<compile_context>
chip_gen: v7x
topology: tpu7x:2x2x1
jax: 0.10.0
libtpu: 0.0.40
codegen_flags: <defaults>
</compile_context>

<pallas_src>
import functools

import jax
import jax.numpy as jnp
from jax import lax
from jax.experimental import pallas as pl
from jax.experimental.pallas import tpu as pltpu


# =============================================================================
# Kernel 1: tiled fused matmul + bias + SiLU   (conv1 || conv2 stem, 1x1)
#            y = silu(X @ W + b)     (BN scale already folded into W)
# =============================================================================
def _matmul_bias_silu_kernel(x_ref, w_ref, b_ref, o_ref, acc_ref):
    @pl.when(pl.program_id(2) == 0)
    def _init():
        acc_ref[...] = jnp.zeros_like(acc_ref)

    acc_ref[...] += jnp.dot(x_ref[...], w_ref[...],
                            preferred_element_type=jnp.float32)

    @pl.when(pl.program_id(2) == pl.num_programs(2) - 1)
    def _epilogue():
        y = acc_ref[...] + b_ref[...]            # bias only; scale folded into W
        o_ref[...] = (y * jax.nn.sigmoid(y)).astype(o_ref.dtype)


def _pick_tile(dim, preferred):
    for t in preferred:
        if t <= dim and dim % t == 0:
            return t
    return dim        # full extent is always a legal block size


def fused_matmul_bias_silu(x2d, wmat, bias, *, out_dtype):
    """x2d (M,K), wmat (K,N) in compute dtype; bias (N,) f32 -> (M,N)."""
    M, K = x2d.shape
    K2, N = wmat.shape
    assert K == K2
    bias2 = bias.reshape(1, N).astype(jnp.float32)

    tm = _pick_tile(M, (256, 512, 128, 64, 32, 16, 8))
    tn = _pick_tile(N, (256, 128))        # multiple of 128 or full extent
    tk = _pick_tile(K, (512, 256, 128))   # multiple of 128 or full extent
    grid = (M // tm, N // tn, K // tk)

    return pl.pallas_call(
        _matmul_bias_silu_kernel,
        out_shape=jax.ShapeDtypeStruct((M, N), out_dtype),
        grid=grid,
        in_specs=[
            pl.BlockSpec((tm, tk), lambda i, j, k: (i, k)),
            pl.BlockSpec((tk, tn), lambda i, j, k: (k, j)),
            pl.BlockSpec((1, tn), lambda i, j, k: (0, j)),   # no re-DMA per k
        ],
        out_specs=pl.BlockSpec((tm, tn), lambda i, j, k: (i, j)),
        scratch_shapes=[pltpu.VMEM((tm, tn), jnp.float32)],
        compiler_params=pltpu.CompilerParams(
            dimension_semantics=("parallel", "parallel", "arbitrary"),
            vmem_limit_bytes=64 * 1024 * 1024),
    )(x2d, wmat, bias2)


# =============================================================================
# Kernel 2: fused conv3->conv6 chain + concat + 1x1 `out` conv (grid over B)
# =============================================================================
def _elan_chain_kernel(x12_ref,
                       w3_ref, b3_ref, w4_ref, b4_ref,
                       w5_ref, b5_ref, w6_ref, b6_ref,
                       wo12_ref, wo3_ref, wo4_ref, wo5_ref, wo6_ref, bo_ref,
                       o_ref, pad2_ref, padc_ref):
    Hp2, Wp2, inter = pad2_ref.shape
    H, W = Hp2 - 2, Wp2 - 2
    i2 = padc_ref.shape[2]
    cdt = pad2_ref.dtype

    # Zero the padded scratch (borders stay zero; interiors are overwritten).
    pad2_ref[...] = jnp.zeros_like(pad2_ref)
    padc_ref[...] = jnp.zeros_like(padc_ref)

    x12 = x12_ref[0]                                   # (H, W, 2*inter), in VMEM

    def conv3x3_bias_silu(pad_ref, w_ref, b_ref):
        cin = pad_ref.shape[2]
        cout = w_ref.shape[2]
        acc = jnp.zeros((H * W, cout), jnp.float32)
        for t in range(9):                             # 9 shifted-tap matmuls
            dy, dx = t // 3, t % 3
            tap = pad_ref[dy:dy + H, dx:dx + W, :].reshape(H * W, cin)
            acc = acc + jnp.dot(tap, w_ref[t],
                                preferred_element_type=jnp.float32)
        y = acc + b_ref[...]
        return y * jax.nn.sigmoid(y)                   # (H*W, cout) f32

    # conv3 consumes x2 (second half of the fused stem output).
    pad2_ref[1:H + 1, 1:W + 1, :] = x12[:, :, inter:].astype(cdt)
    x3 = conv3x3_bias_silu(pad2_ref, w3_ref, b3_ref)

    # Final 1x1 `out` conv accumulated incrementally -> concat never built.
    x12_2d = x12.reshape(H * W, 2 * inter).astype(cdt)
    acc_o = bo_ref[...] + jnp.dot(x12_2d, wo12_ref[...],
                                  preferred_element_type=jnp.float32)
    acc_o = acc_o + jnp.dot(x3.astype(cdt), wo3_ref[...],
                            preferred_element_type=jnp.float32)

    padc_ref[1:H + 1, 1:W + 1, :] = x3.reshape(H, W, i2).astype(cdt)
    x4 = conv3x3_bias_silu(padc_ref, w4_ref, b4_ref)
    acc_o = acc_o + jnp.dot(x4.astype(cdt), wo4_ref[...],
                            preferred_element_type=jnp.float32)

    padc_ref[1:H + 1, 1:W + 1, :] = x4.reshape(H, W, i2).astype(cdt)
    x5 = conv3x3_bias_silu(padc_ref, w5_ref, b5_ref)
    acc_o = acc_o + jnp.dot(x5.astype(cdt), wo5_ref[...],
                            preferred_element_type=jnp.float32)

    padc_ref[1:H + 1, 1:W + 1, :] = x5.reshape(H, W, i2).astype(cdt)
    x6 = conv3x3_bias_silu(padc_ref, w6_ref, b6_ref)
    acc_o = acc_o + jnp.dot(x6.astype(cdt), wo6_ref[...],
                            preferred_element_type=jnp.float32)

    out = acc_o * jax.nn.sigmoid(acc_o)                # SiLU epilogue in f32
    cout = o_ref.shape[-1]
    o_ref[0] = out.reshape(H, W, cout).astype(o_ref.dtype)


def _elan_chain_call(x12, weight_args, *, inter, i2, out_dim, out_dtype):
    B, H, W, C12 = x12.shape
    cdt = x12.dtype

    def rep(a):
        shp = a.shape
        return pl.BlockSpec(shp, lambda b, n=len(shp): (0,) * n)

    return pl.pallas_call(
        _elan_chain_kernel,
        out_shape=jax.ShapeDtypeStruct((B, H, W, out_dim), out_dtype),
        grid=(B,),
        in_specs=[pl.BlockSpec((1, H, W, C12), lambda b: (b, 0, 0, 0))]
                 + [rep(a) for a in weight_args],
        out_specs=pl.BlockSpec((1, H, W, out_dim), lambda b: (b, 0, 0, 0)),
        scratch_shapes=[pltpu.VMEM((H + 2, W + 2, inter), cdt),
                        pltpu.VMEM((H + 2, W + 2, i2), cdt)],
        compiler_params=pltpu.CompilerParams(
            dimension_semantics=("parallel",),
            vmem_limit_bytes=64 * 1024 * 1024),
    )(x12, *weight_args)


# =============================================================================
# Parameter init (deterministic synthetic; BN in eval semantics, folded)
# =============================================================================
def fold_bn(gamma, beta, mean, var, eps=1e-5):
    scale = gamma / jnp.sqrt(var + eps)
    bias = beta - mean * scale
    return scale, bias


def init_conv_params(key, cin, cout, k):
    kw, kg, kb, km, kv = jax.random.split(key, 5)
    w = jax.random.normal(kw, (cout, cin, k, k), jnp.float32) * 0.1   # OIHW
    gamma = jax.random.uniform(kg, (cout,), jnp.float32, 0.5, 1.5)
    beta = jax.random.normal(kb, (cout,), jnp.float32) * 0.05
    mean = jax.random.normal(km, (cout,), jnp.float32) * 0.05
    var = jax.random.uniform(kv, (cout,), jnp.float32, 0.5, 1.5)
    scale, bias = fold_bn(gamma, beta, mean, var)
    return {"w": w, "scale": scale, "bias": bias,
            "gamma": gamma, "beta": beta, "mean": mean, "var": var}


def init_elan_h_block(key, in_dim, out_dim, expand_ratio=0.5):
    inter_dim = int(in_dim * expand_ratio)
    inter_dim2 = int(inter_dim * expand_ratio)
    keys = jax.random.split(key, 7)
    return {
        "conv1": init_conv_params(keys[0], in_dim, inter_dim, 1),
        "conv2": init_conv_params(keys[1], in_dim, inter_dim, 1),
        "conv3": init_conv_params(keys[2], inter_dim, inter_dim2, 3),
        "conv4": init_conv_params(keys[3], inter_dim2, inter_dim2, 3),
        "conv5": init_conv_params(keys[4], inter_dim2, inter_dim2, 3),
        "conv6": init_conv_params(keys[5], inter_dim2, inter_dim2, 3),
        "out": init_conv_params(keys[6], inter_dim * 2 + inter_dim2 * 4,
                                out_dim, 1),
    }


# =============================================================================
# Forward pass (Pallas-backed)
# =============================================================================
def _forward_nhwc(params, x_nhwc, cdt):
    B, H, W, Cin = x_nhwc.shape
    inter = params["conv1"]["w"].shape[0]
    i2 = params["conv3"]["w"].shape[0]
    c12 = 2 * inter
    out_dim = params["out"]["w"].shape[0]
    out_dtype = x_nhwc.dtype

    # --- fold BN scale into weights (wrapper-side, done once, free) ---
    def w1x1(p):
        return (p["w"][:, :, 0, 0].T * p["scale"][None, :]).astype(cdt)

    def w3x3(p):                                        # -> (9, cin, cout)
        w = jnp.transpose(p["w"], (2, 3, 1, 0)) * p["scale"][None, None, None, :]
        return w.reshape(9, w.shape[2], w.shape[3]).astype(cdt)

    def b(p, n):
        return p["bias"].reshape(1, n).astype(jnp.float32)

    w12 = jnp.concatenate([w1x1(params["conv1"]), w1x1(params["conv2"])], axis=1)
    b12 = jnp.concatenate([params["conv1"]["bias"], params["conv2"]["bias"]])

    w_out = w1x1(params["out"])                         # (c12 + 4*i2, out_dim)
    weight_args = (
        w3x3(params["conv3"]), b(params["conv3"], i2),
        w3x3(params["conv4"]), b(params["conv4"], i2),
        w3x3(params["conv5"]), b(params["conv5"], i2),
        w3x3(params["conv6"]), b(params["conv6"], i2),
        w_out[:c12],                                    # x1 || x2 slice of `out`
        w_out[c12:c12 + i2],
        w_out[c12 + i2:c12 + 2 * i2],
        w_out[c12 + 2 * i2:c12 + 3 * i2],
        w_out[c12 + 3 * i2:],
        b(params["out"], out_dim),
    )

    # Kernel 1: fused conv1 || conv2 (single tiled matmul over B*H*W rows).
    x12 = fused_matmul_bias_silu(
        x_nhwc.reshape(B * H * W, Cin).astype(cdt), w12,
        b12.astype(jnp.float32), out_dtype=cdt)
    x12 = x12.reshape(B, H, W, c12)

    # Kernel 2: conv3..conv6 + concat + out conv, all intermediates in VMEM.
    return _elan_chain_call(x12, weight_args, inter=inter, i2=i2,
                            out_dim=out_dim, out_dtype=out_dtype)


@functools.partial(jax.jit, static_argnames=("compute_dtype",))
def elan_h_block_forward(params, x_nchw, compute_dtype=jnp.bfloat16):
    """PyTorch-compatible NCHW in / NCHW out.  (At model scale you would keep
    the whole network NHWC and drop these edge transposes.)"""
    x = jnp.transpose(x_nchw, (0, 2, 3, 1))             # NCHW -> NHWC
    out = _forward_nhwc(params, x, compute_dtype)
    return jnp.transpose(out, (0, 3, 1, 2))             # NHWC -> NCHW


# =============================================================================
# Pure-JAX (XLA conv) reference.  BN(eval) is an exact per-channel affine and
# is folded into the conv weights/bias exactly as the kernels do, so the f32
# comparison is insensitive to the MXU's default f32 matmul precision.
# =============================================================================
def _ref_conv_bn_silu(x_nhwc, p, pad):
    w_hwio = jnp.transpose(p["w"], (2, 3, 1, 0)) * p["scale"][None, None, None, :]
    y = lax.conv_general_dilated(
        x_nhwc, w_hwio, window_strides=(1, 1),
        padding=[(pad, pad), (pad, pad)],
        dimension_numbers=("NHWC", "HWIO", "NHWC"))
    y = y + p["bias"][None, None, None, :]
    return y * jax.nn.sigmoid(y)


def elan_h_block_reference(params, x_nchw):
    x = jnp.transpose(x_nchw, (0, 2, 3, 1))
    x1 = _ref_conv_bn_silu(x, params["conv1"], 0)
    x2 = _ref_conv_bn_silu(x, params["conv2"], 0)
    x3 = _ref_conv_bn_silu(x2, params["conv3"], 1)
    x4 = _ref_conv_bn_silu(x3, params["conv4"], 1)
    x5 = _ref_conv_bn_silu(x4, params["conv5"], 1)
    x6 = _ref_conv_bn_silu(x5, params["conv6"], 1)
    cat = jnp.concatenate([x1, x2, x3, x4, x5, x6], axis=-1)
    out = _ref_conv_bn_silu(cat, params["out"], 0)
    return jnp.transpose(out, (0, 3, 1, 2))


if __name__ == "__main__":
    key = jax.random.PRNGKey(0)
    k_param, k_x = jax.random.split(key)

    B, in_dim, H, W = 2, 16, 16, 16
    out_dim = 16                    # inter_dim=8, inter_dim2=4, cat=32 channels

    params = init_elan_h_block(k_param, in_dim, out_dim)
    x = jax.random.normal(k_x, (B, in_dim, H, W), jnp.float32)

    y_ref = jax.block_until_ready(elan_h_block_reference(params, x))

    # f32 MXU path: tight check against the XLA reference.
    y32 = jax.block_until_ready(
        elan_h_block_forward(params, x, compute_dtype=jnp.float32))
    assert y32.shape == (B, out_dim, H, W), y32.shape
    assert jnp.allclose(y32, y_ref, atol=1e-3, rtol=1e-3), \
        float(jnp.max(jnp.abs(y32 - y_ref)))

    # bf16 MXU path (default, the recommended mode on v5e/v6e/v7x).
    ybf = jax.block_until_ready(
        elan_h_block_forward(params, x, compute_dtype=jnp.bfloat16))
    assert ybf.shape == (B, out_dim, H, W), ybf.shape
    assert jnp.allclose(ybf, y_ref, atol=5e-2, rtol=5e-2), \
        float(jnp.max(jnp.abs(ybf - y_ref)))

    print("KERNEL_OK")
</pallas_src>

<mosaic_0001>
module attributes {stable_mosaic.version = 11 : i64} {
  func.func @_matmul_bias_silu_kernel(%arg0: i32, %arg1: i32, %arg2: i32, %arg3: memref<256x16xf32, #tpu.memory_space<vmem>>, %arg4: memref<16x16xf32, #tpu.memory_space<vmem>>, %arg5: memref<1x16xf32, #tpu.memory_space<vmem>>, %arg6: memref<256x16xf32, #tpu.memory_space<vmem>>, %arg7: memref<256x16xf32, #tpu.memory_space<vmem>>) attributes {dimension_semantics = [#tpu.dimension_semantics<parallel>, #tpu.dimension_semantics<parallel>, #tpu.dimension_semantics<arbitrary>], iteration_bounds = array<i64: 2, 1, 1>, scalar_prefetch = 0 : i64, scratch_operands = 1 : i64, tpu.core_type = #tpu.core_type<tc>, window_params = [{transform_indices = @transform_0, window_bounds = array<i64: 256, 16>}, {transform_indices = @transform_1, window_bounds = array<i64: 16, 16>}, {transform_indices = @transform_2, window_bounds = array<i64: 1, 16>}, {transform_indices = @transform_3, window_bounds = array<i64: 256, 16>}]} {
    %c0_i32 = arith.constant 0 : i32
    %0 = arith.cmpi eq, %arg2, %c0_i32 : i32
    %1 = arith.extui %0 : i1 to i32
    %c0_i32_0 = arith.constant 0 : i32
    %2 = arith.cmpi ne, %1, %c0_i32_0 : i32
    scf.if %2 {
      %cst_10 = arith.constant 0.000000e+00 : f32
      %12 = vector.broadcast %cst_10 : f32 to vector<256x16xf32>
      %c0_11 = arith.constant 0 : index
      %c0_12 = arith.constant 0 : index
      %13 = vector.load %arg7[%c0_11, %c0_12] : memref<256x16xf32, #tpu.memory_space<vmem>>, vector<256x16xf32>
      tpu.vector_store %arg7[%c0_11, %c0_12], %12 {strides = array<i32>} : memref<256x16xf32, #tpu.memory_space<vmem>>, vector<256x16xf32>,
    } else {
    }
    %c0 = arith.constant 0 : index
    %c0_1 = arith.constant 0 : index
    %3 = vector.load %arg7[%c0, %c0_1] : memref<256x16xf32, #tpu.memory_space<vmem>>, vector<256x16xf32>
    %c0_2 = arith.constant 0 : index
    %c0_3 = arith.constant 0 : index
    %4 = vector.load %arg3[%c0_2, %c0_3] : memref<256x16xf32, #tpu.memory_space<vmem>>, vector<256x16xf32>
    %c0_4 = arith.constant 0 : index
    %c0_5 = arith.constant 0 : index
    %5 = vector.load %arg4[%c0_4, %c0_5] : memref<16x16xf32, #tpu.memory_space<vmem>>, vector<16x16xf32>
    %cst = arith.constant dense<0.000000e+00> : vector<256x16xf32>
    %6 = tpu.matmul %4, %5, %cst {dimension_numbers = #tpu.dot_dimension_numbers<[1], [0], [0], [1], [0, 0, 1, 1], [], []>} : vector<256x16xf32>, vector<16x16xf32>, vector<256x16xf32> -> vector<256x16xf32>
    %7 = arith.addf %3, %6 : vector<256x16xf32>
    %c0_6 = arith.constant 0 : index
    %c0_7 = arith.constant 0 : index
    %8 = vector.load %arg7[%c0_6, %c0_7] : memref<256x16xf32, #tpu.memory_space<vmem>>, vector<256x16xf32>
    tpu.vector_store %arg7[%c0_6, %c0_7], %7 {strides = array<i32>} : memref<256x16xf32, #tpu.memory_space<vmem>>, vector<256x16xf32>,
    %c0_i32_8 = arith.constant 0 : i32
    %9 = arith.cmpi eq, %arg2, %c0_i32_8 : i32
    %10 = arith.extui %9 : i1 to i32
    %c0_i32_9 = arith.constant 0 : i32
    %11 = arith.cmpi ne, %10, %c0_i32_9 : i32
    scf.if %11 {
      %c0_10 = arith.constant 0 : index
      %c0_11 = arith.constant 0 : index
      %12 = vector.load %arg7[%c0_10, %c0_11] : memref<256x16xf32, #tpu.memory_space<vmem>>, vector<256x16xf32>
      %c0_12 = arith.constant 0 : index
      %c0_13 = arith.constant 0 : index
      %13 = vector.load %arg5[%c0_12, %c0_13] : memref<1x16xf32, #tpu.memory_space<vmem>>, vector<1x16xf32>
      %14 = vector.broadcast %13 : vector<1x16xf32> to vector<256x16xf32>
      %15 = arith.addf %12, %14 : vector<256x16xf32>
      %16 = arith.negf %15 : vector<256x16xf32>
      %17 = math.exp %16 : vector<256x16xf32>
      %cst_14 = arith.constant 1.000000e+00 : f32
      %18 = vector.broadcast %cst_14 : f32 to vector<256x16xf32>
      %19 = arith.addf %18, %17 : vector<256x16xf32>
      %20 = arith.divf %18, %19 : vector<256x16xf32>
      %21 = arith.mulf %15, %20 : vector<256x16xf32>
      %c0_15 = arith.constant 0 : index
      %c0_16 = arith.constant 0 : index
      %22 = vector.load %arg6[%c0_15, %c0_16] : memref<256x16xf32, #tpu.memory_space<vmem>>, vector<256x16xf32>
      tpu.vector_store %arg6[%c0_15, %c0_16], %21 {strides = array<i32>} : memref<256x16xf32, #tpu.memory_space<vmem>>, vector<256x16xf32>,
    } else {
    }
    return
  }
  func.func @transform_0(%arg0: i32, %arg1: i32, %arg2: i32) -> (i32, i32) {
    %c0_i32 = arith.constant 0 : i32
    return %arg0, %arg2 : i32, i32
  }
  func.func @transform_1(%arg0: i32, %arg1: i32, %arg2: i32) -> (i32, i32) {
    %c0_i32 = arith.constant 0 : i32
    return %arg2, %arg1 : i32, i32
  }
  func.func @transform_2(%arg0: i32, %arg1: i32, %arg2: i32) -> (i32, i32) {
    %c0_i32 = arith.constant 0 : i32
    %c0_i32_0 = arith.constant 0 : i32
    return %c0_i32, %arg1 : i32, i32
  }
  func.func @transform_3(%arg0: i32, %arg1: i32, %arg2: i32) -> (i32, i32) {
    %c0_i32 = arith.constant 0 : i32
    return %arg0, %arg1 : i32, i32
  }
}

module attributes {stable_mosaic.version = 11 : i64} {
  func.func @_elan_chain_kernel(%arg0: i32, %arg1: memref<1x16x16x16xf32, #tpu.memory_space<vmem>>, %arg2: memref<9x8x4xf32, #tpu.memory_space<vmem>>, %arg3: memref<1x4xf32, #tpu.memory_space<vmem>>, %arg4: memref<9x4x4xf32, #tpu.memory_space<vmem>>, %arg5: memref<1x4xf32, #tpu.memory_space<vmem>>, %arg6: memref<9x4x4xf32, #tpu.memory_space<vmem>>, %arg7: memref<1x4xf32, #tpu.memory_space<vmem>>, %arg8: memref<9x4x4xf32, #tpu.memory_space<vmem>>, %arg9: memref<1x4xf32, #tpu.memory_space<vmem>>, %arg10: memref<16x16xf32, #tpu.memory_space<vmem>>, %arg11: memref<4x16xf32, #tpu.memory_space<vmem>>, %arg12: memref<4x16xf32, #tpu.memory_space<vmem>>, %arg13: memref<4x16xf32, #tpu.memory_space<vmem>>, %arg14: memref<4x16xf32, #tpu.memory_space<vmem>>, %arg15: memref<1x16xf32, #tpu.memory_space<vmem>>, %arg16: memref<1x16x16x16xf32, #tpu.memory_space<vmem>>, %arg17: memref<18x18x8xf32, #tpu.memory_space<vmem>>, %arg18: memref<18x18x4xf32, #tpu.memory_space<vmem>>) attributes {dimension_semantics = [#tpu.dimension_semantics<parallel>], iteration_bounds = array<i64: 2>, scalar_prefetch = 0 : i64, scratch_operands = 2 : i64, tpu.core_type = #tpu.core_type<tc>, window_params = [{transform_indices = @transform_0, window_bounds = array<i64: 1, 16, 16, 16>}, {pipeline_mode = #tpu.pipeline_mode<synchronous>, transform_indices = @transform_1, window_bounds = array<i64: 9, 8, 4>}, {pipeline_mode = #tpu.pipeline_mode<synchronous>, transform_indices = @transform_2, window_bounds = array<i64: 1, 4>}, {pipeline_mode = #tpu.pipeline_mode<synchronous>, transform_indices = @transform_3, window_bounds = array<i64: 9, 4, 4>}, {pipeline_mode = #tpu.pipeline_mode<synchronous>, transform_indices = @transform_4, window_bounds = array<i64: 1, 4>}, {pipeline_mode = #tpu.pipeline_mode<synchronous>, transform_indices = @transform_5, window_bounds = array<i64: 9, 4, 4>}, {pipeline_mode = #tpu.pipeline_mode<synchronous>, transform_indices = @transform_6, window_bounds = array<i64: 1, 4>}, {pipeline_mode = #tpu.pipeline_mode<synchronous>, transform_indices = @transform_7, window_bounds = array<i64: 9, 4, 4>}, {pipeline_mode = #tpu.pipeline_mode<synchronous>, transform_indices = @transform_8, window_bounds = array<i64: 1, 4>}, {pipeline_mode = #tpu.pipeline_mode<synchronous>, transform_indices = @transform_9, window_bounds = array<i64: 16, 16>}, {pipeline_mode = #tpu.pipeline_mode<synchronous>, transform_indices = @transform_10, window_bounds = array<i64: 4, 16>}, {pipeline_mode = #tpu.pipeline_mode<synchronous>, transform_indices = @transform_11, window_bounds = array<i64: 4, 16>}, {pipeline_mode = #tpu.pipeline_mode<synchronous>, transform_indices = @transform_12, window_bounds = array<i64: 4, 16>}, {pipeline_mode = #tpu.pipeline_mode<synchronous>, transform_indices = @transform_13, window_bounds = array<i64: 4, 16>}, {pipeline_mode = #tpu.pipeline_mode<synchronous>, transform_indices = @transform_14, window_bounds = array<i64: 1, 16>}, {transform_indices = @transform_15, window_bounds = array<i64: 1, 16, 16, 16>}]} {
    %cst = arith.constant 0.000000e+00 : f32
    %0 = vector.broadcast %cst : f32 to vector<18x18x8xf32>
    %c0 = arith.constant 0 : index
    %c0_0 = arith.constant 0 : index
    %c0_1 = arith.constant 0 : index
    %1 = vector.load %arg17[%c0, %c0_0, %c0_1] : memref<18x18x8xf32, #tpu.memory_space<vmem>>, vector<18x18x8xf32>
    tpu.vector_store %arg17[%c0, %c0_0, %c0_1], %0 {strides = array<i32>} : memref<18x18x8xf32, #tpu.memory_space<vmem>>, vector<18x18x8xf32>,
    %cst_2 = arith.constant 0.000000e+00 : f32
    %2 = vector.broadcast %cst_2 : f32 to vector<18x18x4xf32>
    %c0_3 = arith.constant 0 : index
    %c0_4 = arith.constant 0 : index
    %c0_5 = arith.constant 0 : index
    %3 = vector.load %arg18[%c0_3, %c0_4, %c0_5] : memref<18x18x4xf32, #tpu.memory_space<vmem>>, vector<18x18x4xf32>
    tpu.vector_store %arg18[%c0_3, %c0_4, %c0_5], %2 {strides = array<i32>} : memref<18x18x4xf32, #tpu.memory_space<vmem>>, vector<18x18x4xf32>,
    %c0_6 = arith.constant 0 : index
    %c0_7 = arith.constant 0 : index
    %c0_8 = arith.constant 0 : index
    %c0_9 = arith.constant 0 : index
    %4 = vector.load %arg1[%c0_6, %c0_7, %c0_8, %c0_9] : memref<1x16x16x16xf32, #tpu.memory_space<vmem>>, vector<1x16x16x16xf32>
    %5 = vector.shape_cast %4 : vector<1x16x16x16xf32> to vector<16x16x16xf32>
    %6 = vector.extract_strided_slice %5 {offsets = [0, 0, 8], sizes = [16, 16, 8], strides = [1, 1, 1]} : vector<16x16x16xf32> to vector<16x16x8xf32>
    %c1 = arith.constant 1 : index
    %c1_10 = arith.constant 1 : index
    %c0_11 = arith.constant 0 : index
    %7 = vector.load %arg17[%c1, %c1_10, %c0_11] : memref<18x18x8xf32, #tpu.memory_space<vmem>>, vector<16x16x8xf32>
    tpu.vector_store %arg17[%c1, %c1_10, %c0_11], %6 {strides = array<i32>} : memref<18x18x8xf32, #tpu.memory_space<vmem>>, vector<16x16x8xf32>,
    %cst_12 = arith.constant 0.000000e+00 : f32
    %8 = vector.broadcast %cst_12 : f32 to vector<256x4xf32>
    %c0_13 = arith.constant 0 : index
    %c0_14 = arith.constant 0 : index
    %c0_15 = arith.constant 0 : index
    %9 = vector.load %arg17[%c0_13, %c0_14, %c0_15] : memref<18x18x8xf32, #tpu.memory_space<vmem>>, vector<16x16x8xf32>
    %10 = vector.shape_cast %9 : vector<16x16x8xf32> to vector<256x8xf32>
    %c0_16 = arith.constant 0 : index
    %c0_17 = arith.constant 0 : index
    %c0_18 = arith.constant 0 : index
    %11 = vector.load %arg2[%c0_16, %c0_17, %c0_18] : memref<9x8x4xf32, #tpu.memory_space<vmem>>, vector<1x8x4xf32>
    %12 = vector.shape_cast %11 : vector<1x8x4xf32> to vector<8x4xf32>
    %cst_19 = arith.constant dense<0.000000e+00> : vector<256x4xf32>
    %13 = tpu.matmul %10, %12, %cst_19 {dimension_numbers = #tpu.dot_dimension_numbers<[1], [0], [0], [1], [0, 0, 1, 1], [], []>} : vector<256x8xf32>, vector<8x4xf32>, vector<256x4xf32> -> vector<256x4xf32>
    %14 = arith.addf %8, %13 : vector<256x4xf32>
    %c0_20 = arith.constant 0 : index
    %c1_21 = arith.constant 1 : index
    %c0_22 = arith.constant 0 : index
    %15 = vector.load %arg17[%c0_20, %c1_21, %c0_22] : memref<18x18x8xf32, #tpu.memory_space<vmem>>, vector<16x16x8xf32>
    %16 = vector.shape_cast %15 : vector<16x16x8xf32> to vector<256x8xf32>
    %c1_23 = arith.constant 1 : index
    %c0_24 = arith.constant 0 : index
    %c0_25 = arith.constant 0 : index
    %17 = vector.load %arg2[%c1_23, %c0_24, %c0_25] : memref<9x8x4xf32, #tpu.memory_space<vmem>>, vector<1x8x4xf32>
    %18 = vector.shape_cast %17 : vector<1x8x4xf32> to vector<8x4xf32>
    %cst_26 = arith.constant dense<0.000000e+00> : vector<256x4xf32>
    %19 = tpu.matmul %16, %18, %cst_26 {dimension_numbers = #tpu.dot_dimension_numbers<[1], [0], [0], [1], [0, 0, 1, 1], [], []>} : vector<256x8xf32>, vector<8x4xf32>, vector<256x4xf32> -> vector<256x4xf32>
    %20 = arith.addf %14, %19 : vector<256x4xf32>
    %c0_27 = arith.constant 0 : index
    %c2 = arith.constant 2 : index
    %c0_28 = arith.constant 0 : index
    %21 = vector.load %arg17[%c0_27, %c2, %c0_28] : memref<18x18x8xf32, #tpu.memory_space<vmem>>, vector<16x16x8xf32>
    %22 = vector.shape_cast %21 : vector<16x16x8xf32> to vector<256x8xf32>
    %c2_29 = arith.constant 2 : index
    %c0_30 = arith.constant 0 : index
    %c0_31 = arith.constant 0 : index
    %23 = vector.load %arg2[%c2_29, %c0_30, %c0_31] : memref<9x8x4xf32, #tpu.memory_space<vmem>>, vector<1x8x4xf32>
    %24 = vector.shape_cast %23 : vector<1x8x4xf32> to vector<8x4xf32>
    %cst_32 = arith.constant dense<0.000000e+00> : vector<256x4xf32>
    %25 = tpu.matmul %22, %24, %cst_32 {dimension_numbers = #tpu.dot_dimension_numbers<[1], [0], [0], [1], [0, 0, 1, 1], [], []>} : vector<256x8xf32>, vector<8x4xf32>, vector<256x4xf32> -> vector<256x4xf32>
    %26 = arith.addf %20, %25 : vector<256x4xf32>
    %c1_33 = arith.constant 1 : index
    %c0_34 = arith.constant 0 : index
    %c0_35 = arith.constant 0 : index
    %27 = vector.load %arg17[%c1_33, %c0_34, %c0_35] : memref<18x18x8xf32, #tpu.memory_space<vmem>>, vector<16x16x8xf32>
    %28 = vector.shape_cast %27 : vector<16x16x8xf32> to vector<256x8xf32>
    %c3 = arith.constant 3 : index
    %c0_36 = arith.constant 0 : index
    %c0_37 = arith.constant 0 : index
    %29 = vector.load %arg2[%c3, %c0_36, %c0_37] : memref<9x8x4xf32, #tpu.memory_space<vmem>>, vector<1x8x4xf32>
    %30 = vector.shape_cast %29 : vector<1x8x4xf32> to vector<8x4xf32>
    %cst_38 = arith.constant dense<0.000000e+00> : vector<256x4xf32>
    %31 = tpu.matmul %28, %30, %cst_38 {dimension_numbers = #tpu.dot_dimension_numbers<[1], [0], [0], [1], [0, 0, 1, 1], [], []>} : vector<256x8xf32>, vector<8x4xf32>, vector<256x4xf32> -> vector<256x4xf32>
    %32 = arith.addf %26, %31 : vector<256x4xf32>
    %c1_39 = arith.constant 1 : index
    %c1_40 = arith.constant 1 : index
    %c0_41 = arith.constant 0 : index
    %33 = vector.load %arg17[%c1_39, %c1_40, %c0_41] : memref<18x18x8xf32, #tpu.memory_space<vmem>>, vector<16x16x8xf32>
    %34 = vector.shape_cast %33 : vector<16x16x8xf32> to vector<256x8xf32>
    %c4 = arith.constant 4 : index
    %c0_42 = arith.constant 0 : index
    %c0_43 = arith.constant 0 : index
    %35 = vector.load %arg2[%c4, %c0_42, %c0_43] : memref<9x8x4xf32, #tpu.memory_space<vmem>>, vector<1x8x4xf32>
    %36 = vector.shape_cast %35 : vector<1x8x4xf32> to vector<8x4xf32>
    %cst_44 = arith.constant dense<0.000000e+00> : vector<256x4xf32>
    %37 = tpu.matmul %34, %36, %cst_44 {dimension_numbers = #tpu.dot_dimension_numbers<[1], [0], [0], [1], [0, 0, 1, 1], [], []>} : vector<256x8xf32>, vector<8x4xf32>, vector<256x4xf32> -> vector<256x4xf32>
    %38 = arith.addf %32, %37 : vector<256x4xf32>
    %c1_45 = arith.constant 1 : index
    %c2_46 = arith.constant 2 : index
    %c0_47 = arith.constant 0 : index
    %39 = vector.load %arg17[%c1_45, %c2_46, %c0_47] : memref<18x18x8xf32, #tpu.memory_space<vmem>>, vector<16x16x8xf32>
    %40 = vector.shape_cast %39 : vector<16x16x8xf32> to vector<256x8xf32>
    %c5 = arith.constant 5 : index
    %c0_48 = arith.constant 0 : index
    %c0_49 = arith.constant 0 : index
    %41 = vector.load %arg2[%c5, %c0_48, %c0_49] : memref<9x8x4xf32, #tpu.memory_space<vmem>>, vector<1x8x4xf32>
    %42 = vector.shape_cast %41 : vector<1x8x4xf32> to vector<8x4xf32>
    %cst_50 = arith.constant dense<0.000000e+00> : vector<256x4xf32>
    %43 = tpu.matmul %40, %42, %cst_50 {dimension_numbers = #tpu.dot_dimension_numbers<[1], [0], [0], [1], [0, 0, 1, 1], [], []>} : vector<256x8xf32>, vector<8x4xf32>, vector<256x4xf32> -> vector<256x4xf32>
    %44 = arith.addf %38, %43 : vector<256x4xf32>
    %c2_51 = arith.constant 2 : index
    %c0_52 = arith.constant 0 : index
    %c0_53 = arith.constant 0 : index
    %45 = vector.load %arg17[%c2_51, %c0_52, %c0_53] : memref<18x18x8xf32, #tpu.memory_space<vmem>>, vector<16x16x8xf32>
    %46 = vector.shape_cast %45 : vector<16x16x8xf32> to vector<256x8xf32>
    %c6 = arith.constant 6 : index
    %c0_54 = arith.constant 0 : index
    %c0_55 = arith.constant 0 : index
    %47 = vector.load %arg2[%c6, %c0_54, %c0_55] : memref<9x8x4xf32, #tpu.memory_space<vmem>>, vector<1x8x4xf32>
    %48 = vector.shape_cast %47 : vector<1x8x4xf32> to vector<8x4xf32>
    %cst_56 = arith.constant dense<0.000000e+00> : vector<256x4xf32>
    %49 = tpu.matmul %46, %48, %cst_56 {dimension_numbers = #tpu.dot_dimension_numbers<[1], [0], [0], [1], [0, 0, 1, 1], [], []>} : vector<256x8xf32>, vector<8x4xf32>, vector<256x4xf32> -> vector<256x4xf32>
    %50 = arith.addf %44, %49 : vector<256x4xf32>
    %c2_57 = arith.constant 2 : index
    %c1_58 = arith.constant 1 : index
    %c0_59 = arith.constant 0 : index
    %51 = vector.load %arg17[%c2_57, %c1_58, %c0_59] : memref<18x18x8xf32, #tpu.memory_space<vmem>>, vector<16x16x8xf32>
    %52 = vector.shape_cast %51 : vector<16x16x8xf32> to vector<256x8xf32>
    %c7 = arith.constant 7 : index
    %c0_60 = arith.constant 0 : index
    %c0_61 = arith.constant 0 : index
    %53 = vector.load %arg2[%c7, %c0_60, %c0_61] : memref<9x8x4xf32, #tpu.memory_space<vmem>>, vector<1x8x4xf32>
    %54 = vector.shape_cast %53 : vector<1x8x4xf32> to vector<8x4xf32>
    %cst_62 = arith.constant dense<0.000000e+00> : vector<256x4xf32>
    %55 = tpu.matmul %52, %54, %cst_62 {dimension_numbers = #tpu.dot_dimension_numbers<[1], [0], [0], [1], [0, 0, 1, 1], [], []>} : vector<256x8xf32>, vector<8x4xf32>, vector<256x4xf32> -> vector<256x4xf32>
    %56 = arith.addf %50, %55 : vector<256x4xf32>
    %c2_63 = arith.constant 2 : index
    %c2_64 = arith.constant 2 : index
    %c0_65 = arith.constant 0 : index
    %57 = vector.load %arg17[%c2_63, %c2_64, %c0_65] : memref<18x18x8xf32, #tpu.memory_space<vmem>>, vector<16x16x8xf32>
    %58 = vector.shape_cast %57 : vector<16x16x8xf32> to vector<256x8xf32>
    %c8 = arith.constant 8 : index
    %c0_66 = arith.constant 0 : index
    %c0_67 = arith.constant 0 : index
    %59 = vector.load %arg2[%c8, %c0_66, %c0_67] : memref<9x8x4xf32, #tpu.memory_space<vmem>>, vector<1x8x4xf32>
    %60 = vector.shape_cast %59 : vector<1x8x4xf32> to vector<8x4xf32>
    %cst_68 = arith.constant dense<0.000000e+00> : vector<256x4xf32>
    %61 = tpu.matmul %58, %60, %cst_68 {dimension_numbers = #tpu.dot_dimension_numbers<[1], [0], [0], [1], [0, 0, 1, 1], [], []>} : vector<256x8xf32>, vector<8x4xf32>, vector<256x4xf32> -> vector<256x4xf32>
    %62 = arith.addf %56, %61 : vector<256x4xf32>
    %c0_69 = arith.constant 0 : index
    %c0_70 = arith.constant 0 : index
    %63 = vector.load %arg3[%c0_69, %c0_70] : memref<1x4xf32, #tpu.memory_space<vmem>>, vector<1x4xf32>
    %64 = vector.broadcast %63 : vector<1x4xf32> to vector<256x4xf32>
    %65 = arith.addf %62, %64 : vector<256x4xf32>
    %66 = arith.negf %65 : vector<256x4xf32>
    %67 = math.exp %66 : vector<256x4xf32>
    %cst_71 = arith.constant 1.000000e+00 : f32
    %68 = vector.broadcast %cst_71 : f32 to vector<256x4xf32>
    %69 = arith.addf %68, %67 : vector<256x4xf32>
    %70 = arith.divf %68, %69 : vector<256x4xf32>
    %71 = arith.mulf %65, %70 : vector<256x4xf32>
    %72 = vector.shape_cast %5 : vector<16x16x16xf32> to vector<256x16xf32>
    %c0_72 = arith.constant 0 : index
    %c0_73 = arith.constant 0 : index
    %73 = vector.load %arg15[%c0_72, %c0_73] : memref<1x16xf32, #tpu.memory_space<vmem>>, vector<1x16xf32>
    %c0_74 = arith.constant 0 : index
    %c0_75 = arith.constant 0 : index
    %74 = vector.load %arg10[%c0_74, %c0_75] : memref<16x16xf32, #tpu.memory_space<vmem>>, vector<16x16xf32>
    %cst_76 = arith.constant dense<0.000000e+00> : vector<256x16xf32>
    %75 = tpu.matmul %72, %74, %cst_76 {dimension_numbers = #tpu.dot_dimension_numbers<[1], [0], [0], [1], [0, 0, 1, 1], [], []>} : vector<256x16xf32>, vector<16x16xf32>, vector<256x16xf32> -> vector<256x16xf32>
    %76 = vector.broadcast %73 : vector<1x16xf32> to vector<256x16xf32>
    %77 = arith.addf %76, %75 : vector<256x16xf32>
    %c0_77 = arith.constant 0 : index
    %c0_78 = arith.constant 0 : index
    %78 = vector.load %arg11[%c0_77, %c0_78] : memref<4x16xf32, #tpu.memory_space<vmem>>, vector<4x16xf32>
    %cst_79 = arith.constant dense<0.000000e+00> : vector<256x16xf32>
    %79 = tpu.matmul %71, %78, %cst_79 {dimension_numbers = #tpu.dot_dimension_numbers<[1], [0], [0], [1], [0, 0, 1, 1], [], []>} : vector<256x4xf32>, vector<4x16xf32>, vector<256x16xf32> -> vector<256x16xf32>
    %80 = arith.addf %77, %79 : vector<256x16xf32>
    %81 = vector.shape_cast %71 : vector<256x4xf32> to vector<16x16x4xf32>
    %c1_80 = arith.constant 1 : index
    %c1_81 = arith.constant 1 : index
    %c0_82 = arith.constant 0 : index
    %82 = vector.load %arg18[%c1_80, %c1_81, %c0_82] : memref<18x18x4xf32, #tpu.memory_space<vmem>>, vector<16x16x4xf32>
    tpu.vector_store %arg18[%c1_80, %c1_81, %c0_82], %81 {strides = array<i32>} : memref<18x18x4xf32, #tpu.memory_space<vmem>>, vector<16x16x4xf32>,
    %cst_83 = arith.constant 0.000000e+00 : f32
    %83 = vector.broadcast %cst_83 : f32 to vector<256x4xf32>
    %c0_84 = arith.constant 0 : index
    %c0_85 = arith.constant 0 : index
    %c0_86 = arith.constant 0 : index
    %84 = vector.load %arg18[%c0_84, %c0_85, %c0_86] : memref<18x18x4xf32, #tpu.memory_space<vmem>>, vector<16x16x4xf32>
    %85 = vector.shape_cast %84 : vector<16x16x4xf32> to vector<256x4xf32>
    %c0_87 = arith.constant 0 : index
    %c0_88 = arith.constant 0 : index
    %c0_89 = arith.constant 0 : index
    %86 = vector.load %arg4[%c0_87, %c0_88, %c0_89] : memref<9x4x4xf32, #tpu.memory_space<vmem>>, vector<1x4x4xf32>
    %87 = vector.shape_cast %86 : vector<1x4x4xf32> to vector<4x4xf32>
    %cst_90 = arith.constant dense<0.000000e+00> : vector<256x4xf32>
    %88 = tpu.matmul %85, %87, %cst_90 {dimension_numbers = #tpu.dot_dimension_numbers<[1], [0], [0], [1], [0, 0, 1, 1], [], []>} : vector<256x4xf32>, vector<4x4xf32>, vector<256x4xf32> -> vector<256x4xf32>
    %89 = arith.addf %83, %88 : vector<256x4xf32>
    %c0_91 = arith.constant 0 : index
    %c1_92 = arith.constant 1 : index
    %c0_93 = arith.constant 0 : index
    %90 = vector.load %arg18[%c0_91, %c1_92, %c0_93] : memref<18x18x4xf32, #tpu.memory_space<vmem>>, vector<16x16x4xf32>
    %91 = vector.shape_cast %90 : vector<16x16x4xf32> to vector<256x4xf32>
    %c1_94 = arith.constant 1 : index
    %c0_95 = arith.constant 0 : index
    %c0_96 = arith.constant 0 : index
    %92 = vector.load %arg4[%c1_94, %c0_95, %c0_96] : memref<9x4x4xf32, #tpu.memory_space<vmem>>, vector<1x4x4xf32>
    %93 = vector.shape_cast %92 : vector<1x4x4xf32> to vector<4x4xf32>
    %cst_97 = arith.constant dense<0.000000e+00> : vector<256x4xf32>
    %94 = tpu.matmul %91, %93, %cst_97 {dimension_numbers = #tpu.dot_dimension_numbers<[1], [0], [0], [1], [0, 0, 1, 1], [], []>} : vector<256x4xf32>, vector<4x4xf32>, vector<256x4xf32> -> vector<256x4xf32>
    %95 = arith.addf %89, %94 : vector<256x4xf32>
    %c0_98 = arith.constant 0 : index
    %c2_99 = arith.constant 2 : index
    %c0_100 = arith.constant 0 : index
    %96 = vector.load %arg18[%c0_98, %c2_99, %c0_100] : memref<18x18x4xf32, #tpu.memory_space<vmem>>, vector<16x16x4xf32>
    %97 = vector.shape_cast %96 : vector<16x16x4xf32> to vector<256x4xf32>
    %c2_101 = arith.constant 2 : index
    %c0_102 = arith.constant 0 : index
    %c0_103 = arith.constant 0 : index
    %98 = vector.load %arg4[%c2_101, %c0_102, %c0_103] : memref<9x4x4xf32, #tpu.memory_space<vmem>>, vector<1x4x4xf32>
    %99 = vector.shape_cast %98 : vector<1x4x4xf32> to vector<4x4xf32>
    %cst_104 = arith.constant dense<0.000000e+00> : vector<256x4xf32>
    %100 = tpu.matmul %97, %99, %cst_104 {dimension_numbers = #tpu.dot_dimension_numbers<[1], [0], [0], [1], [0, 0, 1, 1], [], []>} : vector<256x4xf32>, vector<4x4xf32>, vector<256x4xf32> -> vector<256x4xf32>
    %101 = arith.addf %95, %100 : vector<256x4xf32>
    %c1_105 = arith.constant 1 : index
    %c0_106 = arith.constant 0 : index
    %c0_107 = arith.constant 0 : index
    %102 = vector.load %arg18[%c1_105, %c0_106, %c0_107] : memref<18x18x4xf32, #tpu.memory_space<vmem>>, vector<16x16x4xf32>
    %103 = vector.shape_cast %102 : vector<16x16x4xf32> to vector<256x4xf32>
    %c3_108 = arith.constant 3 : index
    %c0_109 = arith.constant 0 : index
    %c0_110 = arith.constant 0 : index
    %104 = vector.load %arg4[%c3_108, %c0_109, %c0_110] : memref<9x4x4xf32, #tpu.memory_space<vmem>>, vector<1x4x4xf32>
    %105 = vector.shape_cast %104 : vector<1x4x4xf32> to vector<4x4xf32>
    %cst_111 = arith.constant dense<0.000000e+00> : vector<256x4xf32>
    %106 = tpu.matmul %103, %105, %cst_111 {dimension_numbers = #tpu.dot_dimension_numbers<[1], [0], [0], [1], [0, 0, 1, 1], [], []>} : vector<256x4xf32>, vector<4x4xf32>, vector<256x4xf32> -> vector<256x4xf32>
    %107 = arith.addf %101, %106 : vector<256x4xf32>
    %c1_112 = arith.constant 1 : index
    %c1_113 = arith.constant 1 : index
    %c0_114 = arith.constant 0 : index
    %108 = vector.load %arg18[%c1_112, %c1_113, %c0_114] : memref<18x18x4xf32, #tpu.memory_space<vmem>>, vector<16x16x4xf32>
    %109 = vector.shape_cast %108 : vector<16x16x4xf32> to vector<256x4xf32>
    %c4_115 = arith.constant 4 : index
    %c0_116 = arith.constant 0 : index
    %c0_117 = arith.constant 0 : index
    %110 = vector.load %arg4[%c4_115, %c0_116, %c0_117] : memref<9x4x4xf32, #tpu.memory_space<vmem>>, vector<1x4x4xf32>
    %111 = vector.shape_cast %110 : vector<1x4x4xf32> to vector<4x4xf32>
    %cst_118 = arith.constant dense<0.000000e+00> : vector<256x4xf32>
    %112 = tpu.matmul %109, %111, %cst_118 {dimension_numbers = #tpu.dot_dimension_numbers<[1], [0], [0], [1], [0, 0, 1, 1], [], []>} : vector<256x4xf32>, vector<4x4xf32>, vector<256x4xf32> -> vector<256x4xf32>
    %113 = arith.addf %107, %112 : vector<256x4xf32>
    %c1_119 = arith.constant 1 : index
    %c2_120 = arith.constant 2 : index
    %c0_121 = arith.constant 0 : index
    %114 = vector.load %arg18[%c1_119, %c2_120, %c0_121] : memref<18x18x4xf32, #tpu.memory_space<vmem>>, vector<16x16x4xf32>
    %115 = vector.shape_cast %114 : vector<16x16x4xf32> to vector<256x4xf32>
    %c5_122 = arith.constant 5 : index
    %c0_123 = arith.constant 0 : index
    %c0_124 = arith.constant 0 : index
    %116 = vector.load %arg4[%c5_122, %c0_123, %c0_124] : memref<9x4x4xf32, #tpu.memory_space<vmem>>, vector<1x4x4xf32>
    %117 = vector.shape_cast %116 : vector<1x4x4xf32> to vector<4x4xf32>
    %cst_125 = arith.constant dense<0.000000e+00> : vector<256x4xf32>
    %118 = tpu.matmul %115, %117, %cst_125 {dimension_numbers = #tpu.dot_dimension_numbers<[1], [0], [0], [1], [0, 0, 1, 1], [], []>} : vector<256x4xf32>, vector<4x4xf32>, vector<256x4xf32> -> vector<256x4xf32>
    %119 = arith.addf %113, %118 : vector<256x4xf32>
    %c2_126 = arith.constant 2 : index
    %c0_127 = arith.constant 0 : index
    %c0_128 = arith.constant 0 : index
    %120 = vector.load %arg18[%c2_126, %c0_127, %c0_128] : memref<18x18x4xf32, #tpu.memory_space<vmem>>, vector<16x16x4xf32>
    %121 = vector.shape_cast %120 : vector<16x16x4xf32> to vector<256x4xf32>
    %c6_129 = arith.constant 6 : index
    %c0_130 = arith.constant 0 : index
    %c0_131 = arith.constant 0 : index
    %122 = vector.load %arg4[%c6_129, %c0_130, %c0_131] : memref<9x4x4xf32, #tpu.memory_space<vmem>>, vector<1x4x4xf32>
    %123 = vector.shape_cast %122 : vector<1x4x4xf32> to vector<4x4xf32>
    %cst_132 = arith.constant dense<0.000000e+00> : vector<256x4xf32>
    %124 = tpu.matmul %121, %123, %cst_132 {dimension_numbers = #tpu.dot_dimension_numbers<[1], [0], [0], [1], [0, 0, 1, 1], [], []>} : vector<256x4xf32>, vector<4x4xf32>, vector<256x4xf32> -> vector<256x4xf32>
    %125 = arith.addf %119, %124 : vector<256x4xf32>
    %c2_133 = arith.constant 2 : index
    %c1_134 = arith.constant 1 : index
    %c0_135 = arith.constant 0 : index
    %126 = vector.load %arg18[%c2_133, %c1_134, %c0_135] : memref<18x18x4xf32, #tpu.memory_space<vmem>>, vector<16x16x4xf32>
    %127 = vector.shape_cast %126 : vector<16x16x4xf32> to vector<256x4xf32>
    %c7_136 = arith.constant 7 : index
    %c0_137 = arith.constant 0 : index
    %c0_138 = arith.constant 0 : index
    %128 = vector.load %arg4[%c7_136, %c0_137, %c0_138] : memref<9x4x4xf32, #tpu.memory_space<vmem>>, vector<1x4x4xf32>
    %129 = vector.shape_cast %128 : vector<1x4x4xf32> to vector<4x4xf32>
    %cst_139 = arith.constant dense<0.000000e+00> : vector<256x4xf32>
    %130 = tpu.matmul %127, %129, %cst_139 {dimension_numbers = #tpu.dot_dimension_numbers<[1], [0], [0], [1], [0, 0, 1, 1], [], []>} : vector<256x4xf32>, vector<4x4xf32>, vector<256x4xf32> -> vector<256x4xf32>
    %131 = arith.addf %125, %130 : vector<256x4xf32>
    %c2_140 = arith.constant 2 : index
    %c2_141 = arith.constant 2 : index
    %c0_142 = arith.constant 0 : index
    %132 = vector.load %arg18[%c2_140, %c2_141, %c0_142] : memref<18x18x4xf32, #tpu.memory_space<vmem>>, vector<16x16x4xf32>
    %133 = vector.shape_cast %132 : vector<16x16x4xf32> to vector<256x4xf32>
    %c8_143 = arith.constant 8 : index
    %c0_144 = arith.constant 0 : index
    %c0_145 = arith.constant 0 : index
    %134 = vector.load %arg4[%c8_143, %c0_144, %c0_145] : memref<9x4x4xf32, #tpu.memory_space<vmem>>, vector<1x4x4xf32>
    %135 = vector.shape_cast %134 : vector<1x4x4xf32> to vector<4x4xf32>
    %cst_146 = arith.constant dense<0.000000e+00> : vector<256x4xf32>
    %136 = tpu.matmul %133, %135, %cst_146 {dimension_numbers = #tpu.dot_dimension_numbers<[1], [0], [0], [1], [0, 0, 1, 1], [], []>} : vector<256x4xf32>, vector<4x4xf32>, vector<256x4xf32> -> vector<256x4xf32>
    %137 = arith.addf %131, %136 : vector<256x4xf32>
    %c0_147 = arith.constant 0 : index
    %c0_148 = arith.constant 0 : index
    %138 = vector.load %arg5[%c0_147, %c0_148] : memref<1x4xf32, #tpu.memory_space<vmem>>, vector<1x4xf32>
    %139 = vector.broadcast %138 : vector<1x4xf32> to vector<256x4xf32>
    %140 = arith.addf %137, %139 : vector<256x4xf32>
    %141 = arith.negf %140 : vector<256x4xf32>
    %142 = math.exp %141 : vector<256x4xf32>
    %cst_149 = arith.constant 1.000000e+00 : f32
    %143 = vector.broadcast %cst_149 : f32 to vector<256x4xf32>
    %144 = arith.addf %143, %142 : vector<256x4xf32>
    %145 = arith.divf %143, %144 : vector<256x4xf32>
    %146 = arith.mulf %140, %145 : vector<256x4xf32>
    %c0_150 = arith.constant 0 : index
    %c0_151 = arith.constant 0 : index
    %147 = vector.load %arg12[%c0_150, %c0_151] : memref<4x16xf32, #tpu.memory_space<vmem>>, vector<4x16xf32>
    %cst_152 = arith.constant dense<0.000000e+00> : vector<256x16xf32>
    %148 = tpu.matmul %146, %147, %cst_152 {dimension_numbers = #tpu.dot_dimension_numbers<[1], [0], [0], [1], [0, 0, 1, 1], [], []>} : vector<256x4xf32>, vector<4x16xf32>, vector<256x16xf32> -> vector<256x16xf32>
    %149 = arith.addf %80, %148 : vector<256x16xf32>
    %150 = vector.shape_cast %146 : vector<256x4xf32> to vector<16x16x4xf32>
    %c1_153 = arith.constant 1 : index
    %c1_154 = arith.constant 1 : index
    %c0_155 = arith.constant 0 : index
    %151 = vector.load %arg18[%c1_153, %c1_154, %c0_155] : memref<18x18x4xf32, #tpu.memory_space<vmem>>, vector<16x16x4xf32>
    tpu.vector_store %arg18[%c1_153, %c1_154, %c0_155], %150 {strides = array<i32>} : memref<18x18x4xf32, #tpu.memory_space<vmem>>, vector<16x16x4xf32>,
    %cst_156 = arith.constant 0.000000e+00 : f32
    %152 = vector.broadcast %cst_156 : f32 to vector<256x4xf32>
    %c0_157 = arith.constant 0 : index
    %c0_158 = arith.constant 0 : index
    %c0_159 = arith.constant 0 : index
    %153 = vector.load %arg18[%c0_157, %c0_158, %c0_159] : memref<18x18x4xf32, #tpu.memory_space<vmem>>, vector<16x16x4xf32>
    %154 = vector.shape_cast %153 : vector<16x16x4xf32> to vector<256x4xf32>
    %c0_160 = arith.constant 0 : index
    %c0_161 = arith.constant 0 : index
    %c0_162 = arith.constant 0 : index
    %155 = vector.load %arg6[%c0_160, %c0_161, %c0_162] : memref<9x4x4xf32, #tpu.memory_space<vmem>>, vector<1x4x4xf32>
    %156 = vector.shape_cast %155 : vector<1x4x4xf32> to vector<4x4xf32>
    %cst_163 = arith.constant dense<0.000000e+00> : vector<256x4xf32>
    %157 = tpu.matmul %154, %156, %cst_163 {dimension_numbers = #tpu.dot_dimension_numbers<[1], [0], [0], [1], [0, 0, 1, 1], [], []>} : vector<256x4xf32>, vector<4x4xf32>, vector<256x4xf32> -> vector<256x4xf32>
    %158 = arith.addf %152, %157 : vector<256x4xf32>
    %c0_164 = arith.constant 0 : index
    %c1_165 = arith.constant 1 : index
    %c0_166 = arith.constant 0 : index
    %159 = vector.load %arg18[%c0_164, %c1_165, %c0_166] : memref<18x18x4xf32, #tpu.memory_space<vmem>>, vector<16x16x4xf32>
    %160 = vector.shape_cast %159 : vector<16x16x4xf32> to vector<256x4xf32>
    %c1_167 = arith.constant 1 : index
    %c0_168 = arith.constant 0 : index
    %c0_169 = arith.constant 0 : index
    %161 = vector.load %arg6[%c1_167, %c0_168, %c0_169] : memref<9x4x4xf32, #tpu.memory_space<vmem>>, vector<1x4x4xf32>
    %162 = vector.shape_cast %161 : vector<1x4x4xf32> to vector<4x4xf32>
    %cst_170 = arith.constant dense<0.000000e+00> : vector<256x4xf32>
    %163 = tpu.matmul %160, %162, %cst_170 {dimension_numbers = #tpu.dot_dimension_numbers<[1], [0], [0], [1], [0, 0, 1, 1], [], []>} : vector<256x4xf32>, vector<4x4xf32>, vector<256x4xf32> -> vector<256x4xf32>
    %164 = arith.addf %158, %163 : vector<256x4xf32>
    %c0_171 = arith.constant 0 : index
    %c2_172 = arith.constant 2 : index
    %c0_173 = arith.constant 0 : index
    %165 = vector.load %arg18[%c0_171, %c2_172, %c0_173] : memref<18x18x4xf32, #tpu.memory_space<vmem>>, vector<16x16x4xf32>
    %166 = vector.shape_cast %165 : vector<16x16x4xf32> to vector<256x4xf32>
    %c2_174 = arith.constant 2 : index
    %c0_175 = arith.constant 0 : index
    %c0_176 = arith.constant 0 : index
    %167 = vector.load %arg6[%c2_174, %c0_175, %c0_176] : memref<9x4x4xf32, #tpu.memory_space<vmem>>, vector<1x4x4xf32>
    %168 = vector.shape_cast %167 : vector<1x4x4xf32> to vector<4x4xf32>
    %cst_177 = arith.constant dense<0.000000e+00> : vector<256x4xf32>
    %169 = tpu.matmul %166, %168, %cst_177 {dimension_numbers = #tpu.dot_dimension_numbers<[1], [0], [0], [1], [0, 0, 1, 1], [], []>} : vector<256x4xf32>, vector<4x4xf32>, vector<256x4xf32> -> vector<256x4xf32>
    %170 = arith.addf %164, %169 : vector<256x4xf32>
    %c1_178 = arith.constant 1 : index
    %c0_179 = arith.constant 0 : index
    %c0_180 = arith.constant 0 : index
    %171 = vector.load %arg18[%c1_178, %c0_179, %c0_180] : memref<18x18x4xf32, #tpu.memory_space<vmem>>, vector<16x16x4xf32>
    %172 = vector.shape_cast %171 : vector<16x16x4xf32> to vector<256x4xf32>
    %c3_181 = arith.constant 3 : index
    %c0_182 = arith.constant 0 : index
    %c0_183 = arith.constant 0 : index
    %173 = vector.load %arg6[%c3_181, %c0_182, %c0_183] : memref<9x4x4xf32, #tpu.memory_space<vmem>>, vector<1x4x4xf32>
    %174 = vector.shape_cast %173 : vector<1x4x4xf32> to vector<4x4xf32>
    %cst_184 = arith.constant dense<0.000000e+00> : vector<256x4xf32>
    %175 = tpu.matmul %172, %174, %cst_184 {dimension_numbers = #tpu.dot_dimension_numbers<[1], [0], [0], [1], [0, 0, 1, 1], [], []>} : vector<256x4xf32>, vector<4x4xf32>, vector<256x4xf32> -> vector<256x4xf32>
    %176 = arith.addf %170, %175 : vector<256x4xf32>
    %c1_185 = arith.constant 1 : index
    %c1_186 = arith.constant 1 : index
    %c0_187 = arith.constant 0 : index
    %177 = vector.load %arg18[%c1_185, %c1_186, %c0_187] : memref<18x18x4xf32, #tpu.memory_space<vmem>>, vector<16x16x4xf32>
    %178 = vector.shape_cast %177 : vector<16x16x4xf32> to vector<256x4xf32>
    %c4_188 = arith.constant 4 : index
    %c0_189 = arith.constant 0 : index
    %c0_190 = arith.constant 0 : index
    %179 = vector.load %arg6[%c4_188, %c0_189, %c0_190] : memref<9x4x4xf32, #tpu.memory_space<vmem>>, vector<1x4x4xf32>
    %180 = vector.shape_cast %179 : vector<1x4x4xf32> to vector<4x4xf32>
    %cst_191 = arith.constant dense<0.000000e+00> : vector<256x4xf32>
    %181 = tpu.matmul %178, %180, %cst_191 {dimension_numbers = #tpu.dot_dimension_numbers<[1], [0], [0], [1], [0, 0, 1, 1], [], []>} : vector<256x4xf32>, vector<4x4xf32>, vector<256x4xf32> -> vector<256x4xf32>
    %182 = arith.addf %176, %181 : vector<256x4xf32>
    %c1_192 = arith.constant 1 : index
    %c2_193 = arith.constant 2 : index
    %c0_194 = arith.constant 0 : index
    %183 = vector.load %arg18[%c1_192, %c2_193, %c0_194] : memref<18x18x4xf32, #tpu.memory_space<vmem>>, vector<16x16x4xf32>
    %184 = vector.shape_cast %183 : vector<16x16x4xf32> to vector<256x4xf32>
    %c5_195 = arith.constant 5 : index
    %c0_196 = arith.constant 0 : index
    %c0_197 = arith.constant 0 : index
    %185 = vector.load %arg6[%c5_195, %c0_196, %c0_197] : memref<9x4x4xf32, #tpu.memory_space<vmem>>, vector<1x4x4xf32>
    %186 = vector.shape_cast %185 : vector<1x4x4xf32> to vector<4x4xf32>
    %cst_198 = arith.constant dense<0.000000e+00> : vector<256x4xf32>
    %187 = tpu.matmul %184, %186, %cst_198 {dimension_numbers = #tpu.dot_dimension_numbers<[1], [0], [0], [1], [0, 0, 1, 1], [], []>} : vector<256x4xf32>, vector<4x4xf32>, vector<256x4xf32> -> vector<256x4xf32>
    %188 = arith.addf %182, %187 : vector<256x4xf32>
    %c2_199 = arith.constant 2 : index
    %c0_200 = arith.constant 0 : index
    %c0_201 = arith.constant 0 : index
    %189 = vector.load %arg18[%c2_199, %c0_200, %c0_201] : memref<18x18x4xf32, #tpu.memory_space<vmem>>, vector<16x16x4xf32>
    %190 = vector.shape_cast %189 : vector<16x16x4xf32> to vector<256x4xf32>
    %c6_202 = arith.constant 6 : index
    %c0_203 = arith.constant 0 : index
    %c0_204 = arith.constant 0 : index
    %191 = vector.load %arg6[%c6_202, %c0_203, %c0_204] : memref<9x4x4xf32, #tpu.memory_space<vmem>>, vector<1x4x4xf32>
    %192 = vector.shape_cast %191 : vector<1x4x4xf32> to vector<4x4xf32>
    %cst_205 = arith.constant dense<0.000000e+00> : vector<256x4xf32>
    %193 = tpu.matmul %190, %192, %cst_205 {dimension_numbers = #tpu.dot_dimension_numbers<[1], [0], [0], [1], [0, 0, 1, 1], [], []>} : vector<256x4xf32>, vector<4x4xf32>, vector<256x4xf32> -> vector<256x4xf32>
    %194 = arith.addf %188, %193 : vector<256x4xf32>
    %c2_206 = arith.constant 2 : index
    %c1_207 = arith.constant 1 : index
    %c0_208 = arith.constant 0 : index
    %195 = vector.load %arg18[%c2_206, %c1_207, %c0_208] : memref<18x18x4xf32, #tpu.memory_space<vmem>>, vector<16x16x4xf32>
    %196 = vector.shape_cast %195 : vector<16x16x4xf32> to vector<256x4xf32>
    %c7_209 = arith.constant 7 : index
    %c0_210 = arith.constant 0 : index
    %c0_211 = arith.constant 0 : index
    %197 = vector.load %arg6[%c7_209, %c0_210, %c0_211] : memref<9x4x4xf32, #tpu.memory_space<vmem>>, vector<1x4x4xf32>
    %198 = vector.shape_cast %197 : vector<1x4x4xf32> to vector<4x4xf32>
    %cst_212 = arith.constant dense<0.000000e+00> : vector<256x4xf32>
    %199 = tpu.matmul %196, %198, %cst_212 {dimension_numbers = #tpu.dot_dimension_numbers<[1], [0], [0], [1], [0, 0, 1, 1], [], []>} : vector<256x4xf32>, vector<4x4xf32>, vector<256x4xf32> -> vector<256x4xf32>
    %200 = arith.addf %194, %199 : vector<256x4xf32>
    %c2_213 = arith.constant 2 : index
    %c2_214 = arith.constant 2 : index
    %c0_215 = arith.constant 0 : index
    %201 = vector.load %arg18[%c2_213, %c2_214, %c0_215] : memref<18x18x4xf32, #tpu.memory_space<vmem>>, vector<16x16x4xf32>
    %202 = vector.shape_cast %201 : vector<16x16x4xf32> to vector<256x4xf32>
    %c8_216 = arith.constant 8 : index
    %c0_217 = arith.constant 0 : index
    %c0_218 = arith.constant 0 : index
    %203 = vector.load %arg6[%c8_216, %c0_217, %c0_218] : memref<9x4x4xf32, #tpu.memory_space<vmem>>, vector<1x4x4xf32>
    %204 = vector.shape_cast %203 : vector<1x4x4xf32> to vector<4x4xf32>
    %cst_219 = arith.constant dense<0.000000e+00> : vector<256x4xf32>
    %205 = tpu.matmul %202, %204, %cst_219 {dimension_numbers = #tpu.dot_dimension_numbers<[1], [0], [0], [1], [0, 0, 1, 1], [], []>} : vector<256x4xf32>, vector<4x4xf32>, vector<256x4xf32> -> vector<256x4xf32>
    %206 = arith.addf %200, %205 : vector<256x4xf32>
    %c0_220 = arith.constant 0 : index
    %c0_221 = arith.constant 0 : index
    %207 = vector.load %arg7[%c0_220, %c0_221] : memref<1x4xf32, #tpu.memory_space<vmem>>, vector<1x4xf32>
    %208 = vector.broadcast %207 : vector<1x4xf32> to vector<256x4xf32>
    %209 = arith.addf %206, %208 : vector<256x4xf32>
    %210 = arith.negf %209 : vector<256x4xf32>
    %211 = math.exp %210 : vector<256x4xf32>
    %cst_222 = arith.constant 1.000000e+00 : f32
    %212 = vector.broadcast %cst_222 : f32 to vector<256x4xf32>
    %213 = arith.addf %212, %211 : vector<256x4xf32>
    %214 = arith.divf %212, %213 : vector<256x4xf32>
    %215 = arith.mulf %209, %214 : vector<256x4xf32>
    %c0_223 = arith.constant 0 : index
    %c0_224 = arith.constant 0 : index
    %216 = vector.load %arg13[%c0_223, %c0_224] : memref<4x16xf32, #tpu.memory_space<vmem>>, vector<4x16xf32>
    %cst_225 = arith.constant dense<0.000000e+00> : vector<256x16xf32>
    %217 = tpu.matmul %215, %216, %cst_225 {dimension_numbers = #tpu.dot_dimension_numbers<[1], [0], [0], [1], [0, 0, 1, 1], [], []>} : vector<256x4xf32>, vector<4x16xf32>, vector<256x16xf32> -> vector<256x16xf32>
    %218 = arith.addf %149, %217 : vector<256x16xf32>
    %219 = vector.shape_cast %215 : vector<256x4xf32> to vector<16x16x4xf32>
    %c1_226 = arith.constant 1 : index
    %c1_227 = arith.constant 1 : index
    %c0_228 = arith.constant 0 : index
    %220 = vector.load %arg18[%c1_226, %c1_227, %c0_228] : memref<18x18x4xf32, #tpu.memory_space<vmem>>, vector<16x16x4xf32>
    tpu.vector_store %arg18[%c1_226, %c1_227, %c0_228], %219 {strides = array<i32>} : memref<18x18x4xf32, #tpu.memory_space<vmem>>, vector<16x16x4xf32>,
    %cst_229 = arith.constant 0.000000e+00 : f32
    %221 = vector.broadcast %cst_229 : f32 to vector<256x4xf32>
    %c0_230 = arith.constant 0 : index
    %c0_231 = arith.constant 0 : index
    %c0_232 = arith.constant 0 : index
    %222 = vector.load %arg18[%c0_230, %c0_231, %c0_232] : memref<18x18x4xf32, #tpu.memory_space<vmem>>, vector<16x16x4xf32>
    %223 = vector.shape_cast %222 : vector<16x16x4xf32> to vector<256x4xf32>
    %c0_233 = arith.constant 0 : index
    %c0_234 = arith.constant 0 : index
    %c0_235 = arith.constant 0 : index
    %224 = vector.load %arg8[%c0_233, %c0_234, %c0_235] : memref<9x4x4xf32, #tpu.memory_space<vmem>>, vector<1x4x4xf32>
    %225 = vector.shape_cast %224 : vector<1x4x4xf32> to vector<4x4xf32>
    %cst_236 = arith.constant dense<0.000000e+00> : vector<256x4xf32>
    %226 = tpu.matmul %223, %225, %cst_236 {dimension_numbers = #tpu.dot_dimension_numbers<[1], [0], [0], [1], [0, 0, 1, 1], [], []>} : vector<256x4xf32>, vector<4x4xf32>, vector<256x4xf32> -> vector<256x4xf32>
    %227 = arith.addf %221, %226 : vector<256x4xf32>
    %c0_237 = arith.constant 0 : index
    %c1_238 = arith.constant 1 : index
    %c0_239 = arith.constant 0 : index
    %228 = vector.load %arg18[%c0_237, %c1_238, %c0_239] : memref<18x18x4xf32, #tpu.memory_space<vmem>>, vector<16x16x4xf32>
    %229 = vector.shape_cast %228 : vector<16x16x4xf32> to vector<256x4xf32>
    %c1_240 = arith.constant 1 : index
    %c0_241 = arith.constant 0 : index
    %c0_242 = arith.constant 0 : index
    %230 = vector.load %arg8[%c1_240, %c0_241, %c0_242] : memref<9x4x4xf32, #tpu.memory_space<vmem>>, vector<1x4x4xf32>
    %231 = vector.shape_cast %230 : vector<1x4x4xf32> to vector<4x4xf32>
    %cst_243 = arith.constant dense<0.000000e+00> : vector<256x4xf32>
    %232 = tpu.matmul %229, %231, %cst_243 {dimension_numbers = #tpu.dot_dimension_numbers<[1], [0], [0], [1], [0, 0, 1, 1], [], []>} : vector<256x4xf32>, vector<4x4xf32>, vector<256x4xf32> -> vector<256x4xf32>
    %233 = arith.addf %227, %232 : vector<256x4xf32>
    %c0_244 = arith.constant 0 : index
    %c2_245 = arith.constant 2 : index
    %c0_246 = arith.constant 0 : index
    %234 = vector.load %arg18[%c0_244, %c2_245, %c0_246] : memref<18x18x4xf32, #tpu.memory_space<vmem>>, vector<16x16x4xf32>
    %235 = vector.shape_cast %234 : vector<16x16x4xf32> to vector<256x4xf32>
    %c2_247 = arith.constant 2 : index
    %c0_248 = arith.constant 0 : index
    %c0_249 = arith.constant 0 : index
    %236 = vector.load %arg8[%c2_247, %c0_248, %c0_249] : memref<9x4x4xf32, #tpu.memory_space<vmem>>, vector<1x4x4xf32>
    %237 = vector.shape_cast %236 : vector<1x4x4xf32> to vector<4x4xf32>
    %cst_250 = arith.constant dense<0.000000e+00> : vector<256x4xf32>
    %238 = tpu.matmul %235, %237, %cst_250 {dimension_numbers = #tpu.dot_dimension_numbers<[1], [0], [0], [1], [0, 0, 1, 1], [], []>} : vector<256x4xf32>, vector<4x4xf32>, vector<256x4xf32> -> vector<256x4xf32>
    %239 = arith.addf %233, %238 : vector<256x4xf32>
    %c1_251 = arith.constant 1 : index
    %c0_252 = arith.constant 0 : index
    %c0_253 = arith.constant 0 : index
    %240 = vector.load %arg18[%c1_251, %c0_252, %c0_253] : memref<18x18x4xf32, #tpu.memory_space<vmem>>, vector<16x16x4xf32>
    %241 = vector.shape_cast %240 : vector<16x16x4xf32> to vector<256x4xf32>
    %c3_254 = arith.constant 3 : index
    %c0_255 = arith.constant 0 : index
    %c0_256 = arith.constant 0 : index
    %242 = vector.load %arg8[%c3_254, %c0_255, %c0_256] : memref<9x4x4xf32, #tpu.memory_space<vmem>>, vector<1x4x4xf32>
    %243 = vector.shape_cast %242 : vector<1x4x4xf32> to vector<4x4xf32>
    %cst_257 = arith.constant dense<0.000000e+00> : vector<256x4xf32>
    %244 = tpu.matmul %241, %243, %cst_257 {dimension_numbers = #tpu.dot_dimension_numbers<[1], [0], [0], [1], [0, 0, 1, 1], [], []>} : vector<256x4xf32>, vector<4x4xf32>, vector<256x4xf32> -> vector<256x4xf32>
    %245 = arith.addf %239, %244 : vector<256x4xf32>
    %c1_258 = arith.constant 1 : index
    %c1_259 = arith.constant 1 : index
    %c0_260 = arith.constant 0 : index
    %246 = vector.load %arg18[%c1_258, %c1_259, %c0_260] : memref<18x18x4xf32, #tpu.memory_space<vmem>>, vector<16x16x4xf32>
    %247 = vector.shape_cast %246 : vector<16x16x4xf32> to vector<256x4xf32>
    %c4_261 = arith.constant 4 : index
    %c0_262 = arith.constant 0 : index
    %c0_263 = arith.constant 0 : index
    %248 = vector.load %arg8[%c4_261, %c0_262, %c0_263] : memref<9x4x4xf32, #tpu.memory_space<vmem>>, vector<1x4x4xf32>
    %249 = vector.shape_cast %248 : vector<1x4x4xf32> to vector<4x4xf32>
    %cst_264 = arith.constant dense<0.000000e+00> : vector<256x4xf32>
    %250 = tpu.matmul %247, %249, %cst_264 {dimension_numbers = #tpu.dot_dimension_numbers<[1], [0], [0], [1], [0, 0, 1, 1], [], []>} : vector<256x4xf32>, vector<4x4xf32>, vector<256x4xf32> -> vector<256x4xf32>
    %251 = arith.addf %245, %250 : vector<256x4xf32>
    %c1_265 = arith.constant 1 : index
    %c2_266 = arith.constant 2 : index
    %c0_267 = arith.constant 0 : index
    %252 = vector.load %arg18[%c1_265, %c2_266, %c0_267] : memref<18x18x4xf32, #tpu.memory_space<vmem>>, vector<16x16x4xf32>
    %253 = vector.shape_cast %252 : vector<16x16x4xf32> to vector<256x4xf32>
    %c5_268 = arith.constant 5 : index
    %c0_269 = arith.constant 0 : index
    %c0_270 = arith.constant 0 : index
    %254 = vector.load %arg8[%c5_268, %c0_269, %c0_270] : memref<9x4x4xf32, #tpu.memory_space<vmem>>, vector<1x4x4xf32>
    %255 = vector.shape_cast %254 : vector<1x4x4xf32> to vector<4x4xf32>
    %cst_271 = arith.constant dense<0.000000e+00> : vector<256x4xf32>
    %256 = tpu.matmul %253, %255, %cst_271 {dimension_numbers = #tpu.dot_dimension_numbers<[1], [0], [0], [1], [0, 0, 1, 1], [], []>} : vector<256x4xf32>, vector<4x4xf32>, vector<256x4xf32> -> vector<256x4xf32>
    %257 = arith.addf %251, %256 : vector<256x4xf32>
    %c2_272 = arith.constant 2 : index
    %c0_273 = arith.constant 0 : index
    %c0_274 = arith.constant 0 : index
    %258 = vector.load %arg18[%c2_272, %c0_273, %c0_274] : memref<18x18x4xf32, #tpu.memory_space<vmem>>, vector<16x16x4xf32>
    %259 = vector.shape_cast %258 : vector<16x16x4xf32> to vector<256x4xf32>
    %c6_275 = arith.constant 6 : index
    %c0_276 = arith.constant 0 : index
    %c0_277 = arith.constant 0 : index
    %260 = vector.load %arg8[%c6_275, %c0_276, %c0_277] : memref<9x4x4xf32, #tpu.memory_space<vmem>>, vector<1x4x4xf32>
    %261 = vector.shape_cast %260 : vector<1x4x4xf32> to vector<4x4xf32>
    %cst_278 = arith.constant dense<0.000000e+00> : vector<256x4xf32>
    %262 = tpu.matmul %259, %261, %cst_278 {dimension_numbers = #tpu.dot_dimension_numbers<[1], [0], [0], [1], [0, 0, 1, 1], [], []>} : vector<256x4xf32>, vector<4x4xf32>, vector<256x4xf32> -> vector<256x4xf32>
    %263 = arith.addf %257, %262 : vector<256x4xf32>
    %c2_279 = arith.constant 2 : index
    %c1_280 = arith.constant 1 : index
    %c0_281 = arith.constant 0 : index
    %264 = vector.load %arg18[%c2_279, %c1_280, %c0_281] : memref<18x18x4xf32, #tpu.memory_space<vmem>>, vector<16x16x4xf32>
    %265 = vector.shape_cast %264 : vector<16x16x4xf32> to vector<256x4xf32>
    %c7_282 = arith.constant 7 : index
    %c0_283 = arith.constant 0 : index
    %c0_284 = arith.constant 0 : index
    %266 = vector.load %arg8[%c7_282, %c0_283, %c0_284] : memref<9x4x4xf32, #tpu.memory_space<vmem>>, vector<1x4x4xf32>
    %267 = vector.shape_cast %266 : vector<1x4x4xf32> to vector<4x4xf32>
    %cst_285 = arith.constant dense<0.000000e+00> : vector<256x4xf32>
    %268 = tpu.matmul %265, %267, %cst_285 {dimension_numbers = #tpu.dot_dimension_numbers<[1], [0], [0], [1], [0, 0, 1, 1], [], []>} : vector<256x4xf32>, vector<4x4xf32>, vector<256x4xf32> -> vector<256x4xf32>
    %269 = arith.addf %263, %268 : vector<256x4xf32>
    %c2_286 = arith.constant 2 : index
    %c2_287 = arith.constant 2 : index
    %c0_288 = arith.constant 0 : index
    %270 = vector.load %arg18[%c2_286, %c2_287, %c0_288] : memref<18x18x4xf32, #tpu.memory_space<vmem>>, vector<16x16x4xf32>
    %271 = vector.shape_cast %270 : vector<16x16x4xf32> to vector<256x4xf32>
    %c8_289 = arith.constant 8 : index
    %c0_290 = arith.constant 0 : index
    %c0_291 = arith.constant 0 : index
    %272 = vector.load %arg8[%c8_289, %c0_290, %c0_291] : memref<9x4x4xf32, #tpu.memory_space<vmem>>, vector<1x4x4xf32>
    %273 = vector.shape_cast %272 : vector<1x4x4xf32> to vector<4x4xf32>
    %cst_292 = arith.constant dense<0.000000e+00> : vector<256x4xf32>
    %274 = tpu.matmul %271, %273, %cst_292 {dimension_numbers = #tpu.dot_dimension_numbers<[1], [0], [0], [1], [0, 0, 1, 1], [], []>} : vector<256x4xf32>, vector<4x4xf32>, vector<256x4xf32> -> vector<256x4xf32>
    %275 = arith.addf %269, %274 : vector<256x4xf32>
    %c0_293 = arith.constant 0 : index
    %c0_294 = arith.constant 0 : index
    %276 = vector.load %arg9[%c0_293, %c0_294] : memref<1x4xf32, #tpu.memory_space<vmem>>, vector<1x4xf32>
    %277 = vector.broadcast %276 : vector<1x4xf32> to vector<256x4xf32>
    %278 = arith.addf %275, %277 : vector<256x4xf32>
    %279 = arith.negf %278 : vector<256x4xf32>
    %280 = math.exp %279 : vector<256x4xf32>
    %cst_295 = arith.constant 1.000000e+00 : f32
    %281 = vector.broadcast %cst_295 : f32 to vector<256x4xf32>
    %282 = arith.addf %281, %280 : vector<256x4xf32>
    %283 = arith.divf %281, %282 : vector<256x4xf32>
    %284 = arith.mulf %278, %283 : vector<256x4xf32>
    %c0_296 = arith.constant 0 : index
    %c0_297 = arith.constant 0 : index
    %285 = vector.load %arg14[%c0_296, %c0_297] : memref<4x16xf32, #tpu.memory_space<vmem>>, vector<4x16xf32>
    %cst_298 = arith.constant dense<0.000000e+00> : vector<256x16xf32>
    %286 = tpu.matmul %284, %285, %cst_298 {dimension_numbers = #tpu.dot_dimension_numbers<[1], [0], [0], [1], [0, 0, 1, 1], [], []>} : vector<256x4xf32>, vector<4x16xf32>, vector<256x16xf32> -> vector<256x16xf32>
    %287 = arith.addf %218, %286 : vector<256x16xf32>
    %288 = arith.negf %287 : vector<256x16xf32>
    %289 = math.exp %288 : vector<256x16xf32>
    %cst_299 = arith.constant 1.000000e+00 : f32
    %290 = vector.broadcast %cst_299 : f32 to vector<256x16xf32>
    %291 = arith.addf %290, %289 : vector<256x16xf32>
    %292 = arith.divf %290, %291 : vector<256x16xf32>
    %293 = arith.mulf %287, %292 : vector<256x16xf32>
    %294 = vector.shape_cast %293 : vector<256x16xf32> to vector<16x16x16xf32>
    %c0_300 = arith.constant 0 : index
    %c0_301 = arith.constant 0 : index
    %c0_302 = arith.constant 0 : index
    %c0_303 = arith.constant 0 : index
    %295 = vector.load %arg16[%c0_300, %c0_301, %c0_302, %c0_303] : memref<1x16x16x16xf32, #tpu.memory_space<vmem>>, vector<1x16x16x16xf32>
    %296 = vector.shape_cast %295 : vector<1x16x16x16xf32> to vector<16x16x16xf32>
    %297 = vector.shape_cast %294 : vector<16x16x16xf32> to vector<1x16x16x16xf32>
    tpu.vector_store %arg16[%c0_300, %c0_301, %c0_302, %c0_303], %297 {strides = array<i32>} : memref<1x16x16x16xf32, #tpu.memory_space<vmem>>, vector<1x16x16x16xf32>,
    return
  }
  func.func @transform_0(%arg0: i32) -> (i32, i32, i32, i32) {
    %c0_i32 = arith.constant 0 : i32
    %c0_i32_0 = arith.constant 0 : i32
    %c0_i32_1 = arith.constant 0 : i32
    %c0_i32_2 = arith.constant 0 : i32
    return %arg0, %c0_i32, %c0_i32_0, %c0_i32_1 : i32, i32, i32, i32
  }
  func.func @transform_1(%arg0: i32) -> (i32, i32, i32) {
    %c0_i32 = arith.constant 0 : i32
    %c0_i32_0 = arith.constant 0 : i32
    %c0_i32_1 = arith.constant 0 : i32
    %c0_i32_2 = arith.constant 0 : i32
    return %c0_i32, %c0_i32_0, %c0_i32_1 : i32, i32, i32
  }
  func.func @transform_2(%arg0: i32) -> (i32, i32) {
    %c0_i32 = arith.constant 0 : i32
    %c0_i32_0 = arith.constant 0 : i32
    %c0_i32_1 = arith.constant 0 : i32
    return %c0_i32, %c0_i32_0 : i32, i32
  }
  func.func @transform_3(%arg0: i32) -> (i32, i32, i32) {
    %c0_i32 = arith.constant 0 : i32
    %c0_i32_0 = arith.constant 0 : i32
    %c0_i32_1 = arith.constant 0 : i32
    %c0_i32_2 = arith.constant 0 : i32
    return %c0_i32, %c0_i32_0, %c0_i32_1 : i32, i32, i32
  }
  func.func @transform_4(%arg0: i32) -> (i32, i32) {
    %c0_i32 = arith.constant 0 : i32
    %c0_i32_0 = arith.constant 0 : i32
    %c0_i32_1 = arith.constant 0 : i32
    return %c0_i32, %c0_i32_0 : i32, i32
  }
  func.func @transform_5(%arg0: i32) -> (i32, i32, i32) {
    %c0_i32 = arith.constant 0 : i32
    %c0_i32_0 = arith.constant 0 : i32
    %c0_i32_1 = arith.constant 0 : i32
    %c0_i32_2 = arith.constant 0 : i32
    return %c0_i32, %c0_i32_0, %c0_i32_1 : i32, i32, i32
  }
  func.func @transform_6(%arg0: i32) -> (i32, i32) {
    %c0_i32 = arith.constant 0 : i32
    %c0_i32_0 = arith.constant 0 : i32
    %c0_i32_1 = arith.constant 0 : i32
    return %c0_i32, %c0_i32_0 : i32, i32
  }
  func.func @transform_7(%arg0: i32) -> (i32, i32, i32) {
    %c0_i32 = arith.constant 0 : i32
    %c0_i32_0 = arith.constant 0 : i32
    %c0_i32_1 = arith.constant 0 : i32
    %c0_i32_2 = arith.constant 0 : i32
    return %c0_i32, %c0_i32_0, %c0_i32_1 : i32, i32, i32
  }
  func.func @transform_8(%arg0: i32) -> (i32, i32) {
    %c0_i32 = arith.constant 0 : i32
    %c0_i32_0 = arith.constant 0 : i32
    %c0_i32_1 = arith.constant 0 : i32
    return %c0_i32, %c0_i32_0 : i32, i32
  }
  func.func @transform_9(%arg0: i32) -> (i32, i32) {
    %c0_i32 = arith.constant 0 : i32
    %c0_i32_0 = arith.constant 0 : i32
    %c0_i32_1 = arith.constant 0 : i32
    return %c0_i32, %c0_i32_0 : i32, i32
  }
  func.func @transform_10(%arg0: i32) -> (i32, i32) {
    %c0_i32 = arith.constant 0 : i32
    %c0_i32_0 = arith.constant 0 : i32
    %c0_i32_1 = arith.constant 0 : i32
    return %c0_i32, %c0_i32_0 : i32, i32
  }
  func.func @transform_11(%arg0: i32) -> (i32, i32) {
    %c0_i32 = arith.constant 0 : i32
    %c0_i32_0 = arith.constant 0 : i32
    %c0_i32_1 = arith.constant 0 : i32
    return %c0_i32, %c0_i32_0 : i32, i32
  }
  func.func @transform_12(%arg0: i32) -> (i32, i32) {
    %c0_i32 = arith.constant 0 : i32
    %c0_i32_0 = arith.constant 0 : i32
    %c0_i32_1 = arith.constant 0 : i32
    return %c0_i32, %c0_i32_0 : i32, i32
  }
  func.func @transform_13(%arg0: i32) -> (i32, i32) {
    %c0_i32 = arith.constant 0 : i32
    %c0_i32_0 = arith.constant 0 : i32
    %c0_i32_1 = arith.constant 0 : i32
    return %c0_i32, %c0_i32_0 : i32, i32
  }
  func.func @transform_14(%arg0: i32) -> (i32, i32) {
    %c0_i32 = arith.constant 0 : i32
    %c0_i32_0 = arith.constant 0 : i32
    %c0_i32_1 = arith.constant 0 : i32
    return %c0_i32, %c0_i32_0 : i32, i32
  }
  func.func @transform_15(%arg0: i32) -> (i32, i32, i32, i32) {
    %c0_i32 = arith.constant 0 : i32
    %c0_i32_0 = arith.constant 0 : i32
    %c0_i32_1 = arith.constant 0 : i32
    %c0_i32_2 = arith.constant 0 : i32
    return %arg0, %c0_i32, %c0_i32_0, %c0_i32_1 : i32, i32, i32, i32
  }
}

</mosaic_0001>

<bundles_post_ra>
// kernel: elan_h_block_forward.2
= control target key start
LH: loop header
LB: loop body
LE: loop exit
PB: predicated region body
PF: predicated region fallthrough
CT: control target
= control target key end

     0   :  { %8 = vsyncpa [#allocation4], 0  ;;  %s2439_s0 = inlined_call_operand.hbm [shape: f32[512,16], index: 0, kind: input, shape index: {}]   ;;  %s2440_s1 = inlined_call_operand.hbm [shape: f32[16,16], index: 1, kind: input, shape index: {}]   ;;  %s2441_s2 = inlined_call_operand.hbm [shape: f32[1,16], index: 2, kind: input, shape index: {}]   ;;  %s2442_s3 = inlined_call_operand.hbm [shape: f32[512,16], index: 3, kind: output, shape index: {}]  }
   0x1   :  { %10 = vsyncpa [#allocation4 + $0x1], 0 }
   0x2   :  { %11 = vsyncpa [#allocation7], 0 }
   0x3   :  { %12 = vsyncpa [#allocation5], 0 }
   0x4   :  { %14 = vsyncpa [#allocation5 + $0x1], 0  ;;  %s1805_s12 = smov 0   ;;  %s1807_s13 = smov 0  }
   0x5   :  { %s1809_s14 = smov 0   ;;  %s1811_s15 = smov 0  }
   0x6   :  { %s1813_s16 = smov 0   ;;  %s1815_s17 = smov 0  }
   0x7 LB: > { %s1208_s18 = sadd.s32 4294967295, %s1774_s17   ;;  %s1209_s19 = sadd.s32 4294967294, %s1774_s17   ;;  %s1774_s17 = sphi %s1815_s17, %s20_s17   ;;  %s1770_s16 = sphi %s1813_s16, %s2464_s16   ;;  %s1766_s15 = sphi %s1811_s15, %s2463_s15   ;;  %s1762_s14 = sphi %s1809_s14, %s2462_s14   ;;  %s1758_s13 = sphi %s1807_s13, %s2461_s13   ;;  %s1754_s12 = sphi %s1805_s12, %s2460_s12  }
   0x8   : > { %p61_p0 = scmp.ne.s32.totalorder %s1758_s13, %s1754_s12  ;;  %p1839_p1 = scmp.eq.s32.totalorder %s1208_s18, 0 }
   0x9   : > { %p1843_p2 = scmp.eq.s32.totalorder %s1208_s18, 1  ;;  %p147_p3 = scmp.eq.s32.totalorder %s1209_s19, 1 }
   0xa   : > { %s2447_s20 = scalar_select %p1839_p1, 1, 0 }
   0xb   : > { %p1849_p4 = por %p1839_p1, %p61_p0  ;;  %p1210_p5 = scmp.ge.s32.totalorder %s1774_s17, 1 }
   0xc   : > { %p1854_p6 = por %p147_p3, %p61_p0  ;;  %p154_p7 = scmp.lt.s32.totalorder %s1774_s17, 3 }
   0xd   : > { %s2449_s22 = scalar_select %p1849_p4, 1, 0 }
   0xe   : > { %s2450_s23 = scalar_select %p1854_p6, 1, 0 }
   0xf   : > { %p1859_p8 = pnand %p1210_p5, %p154_p7  ;;  %s1776_s25 = smov [#allocation6]  }
  0x10   : > { %s170_s26 = sshll.u32 %s1776_s25, 4  ;;  %s1777_s28 = smov [#allocation8]   ;;  %s1863_s26 = int_to_ptr.vmem [resolvable:$true] %s170_s26 }
  0x11   : > { %p1398_p9 = pneg %p1859_p8  ;;  %s186_s29 = sshll.u32 %s1777_s28, 4  ;;  %s1874_s29 = int_to_ptr.vmem [resolvable:$true] %s186_s29 }
  0x12   : > { %s1602_s5 = scalar_lea.hbm %s2440_s1, 256 }
  0x13   : > { %p1870_p11 = pnand %p1398_p9, %p1839_p1  ;;  %p1603_p12 = scmp.ne.s32.totalorder %s2440_s1, %s1602_s5 }
  0x14   : > { %p1609_p5 = scmp.lt.u32.totalorder %s1602_s5, %s2440_s1 }
  0x15   : > { %p1604_p13 = pneg %p1870_p11 }
  0x17   : > { %p1605_p0 = pnand %p1604_p13, %p1603_p12 }
  0x19   : > { %p1606_p3 = pneg %p1605_p0 }
  0x1b   : > { %p1611_p7 = pnand %p1609_p5, %p1606_p3 }
  0x1d   : > { %1614 = shalt.err (!%p1611_p7)
}
  0x1e   : > { %s1615_s10 = scalar_lea.vmem %s1863_s26, 256  ;;  %p1623_p1 = scmp.lt.s32.totalorder %s1863_s26, %s1863_s26 }
  0x1f   : > { %p1616_p9 = scmp.ne.s32.totalorder %s1863_s26, %s1615_s10  ;;  %p1624_p12 = scmp.lt.s32.totalorder %s1615_s10, %s1615_s10 }
  0x21   : > { %p1618_p10 = pnand %p1616_p9, %p1604_p13  ;;  %p1625_p0 = por %p1624_p12, %p1623_p1 }
  0x23   : > { %p1619_p6 = pneg %p1618_p10 }
  0x25   : > { %p1626_p4 = pnand %p1625_p0, %p1619_p6 }
  0x27   : > { %1629 = shalt.err (!%p1626_p4)
}
  0x28   : > { %s1778_s11 = smov 128   ;;  %s1779_s18 = smov 8  }
  0x29   : > { %1401 = dma.hbm_to_vmem [thread:$0]  (!%p1870_p11), %s2440_s1, 256, %s1863_s26, [#allocation7], %s1778_s11, %s1778_s11, %s1779_s18  }
  0x2a   : > { %s1630_s4 = scalar_lea.hbm %s2441_s2, 16 }
  0x2b   : > { %p1631_p1 = scmp.ne.s32.totalorder %s2441_s2, %s1630_s4  ;;  %p1637_p10 = scmp.lt.u32.totalorder %s1630_s4, %s2441_s2 }
  0x2d   : > { %p1633_p4 = pnand %p1631_p1, %p1604_p13 }
  0x2f   : > { %p1634_p6 = pneg %p1633_p4 }
  0x31   : > { %p1639_p3 = pnand %p1637_p10, %p1634_p6 }
  0x33   : > { %1642 = shalt.err (!%p1639_p3)
}
  0x34   : > { %s1643_s26 = scalar_lea.vmem %s1874_s29, 16  ;;  %s1650_s9 = scalar_lea.vmem %s1874_s29, 32 }
  0x35   : > { %p1644_p5 = scmp.ne.s32.totalorder %s1874_s29, %s1643_s26  ;;  %p1651_p12 = scmp.lt.s32.totalorder %s1874_s29, %s1874_s29 }
  0x36   : > { %p1652_p0 = scmp.lt.s32.totalorder %s1650_s9, %s1643_s26 }
  0x37   : > { %p1646_p7 = pnand %p1644_p5, %p1604_p13 }
  0x38   : > { %p1653_p1 = por %p1652_p0, %p1651_p12 }
  0x39   : > { %p1647_p9 = pneg %p1646_p7 }
  0x3b   : > { %p1654_p4 = pnand %p1653_p1, %p1647_p9 }
  0x3d   : > { %1657 = shalt.err (!%p1654_p4)
}
  0x3e   : > { %1404 = dma.hbm_to_vmem [thread:$0]  (!%p1870_p11), %s2441_s2, 16, %s1874_s29, [#allocation7]  }
  0x3f   : > { %s39_s25 = sadd.s32 1, %s1770_s16  ;;  %s48_s28 = sadd.s32 1, %s1762_s14 }
  0x40   : > { %p41_p13 = scmp.ge.s32.totalorder %s39_s25, 2  ;;  %p55_p6 = scmp.ne.s32.totalorder %s1762_s14, %s1758_s13 }
  0x41   : > { %p56_p10 = scmp.eq.s32.totalorder %s1774_s17, 0  ;;  %p1415_p3 = scmp.lt.s32.totalorder %s1774_s17, 2 }
  0x42   : > { %s2466_s25 = smov (%p41_p13, %s39_s25), 0  ;;  %p1942_p7 = por %p1843_p2, %p55_p6 }
  0x43   : > { %p57_p5 = por %p56_p10, %p55_p6  ;;  %s43_s30 = ssub.s32 %s1770_s16, %s2466_s25 }
  0x44   : > { %s2453_s27 = scalar_select %p1942_p7, 1, 0 }
  0x45   : > { %s197_s4 = sand.u32 1, %s1762_s14   ;;  %p46_p9 = scmp.eq.s32.totalorder %s43_s30, 0 }
  0x46   : > { %s1214_s29 = sshll.u32 %s197_s4, 8  ;;  %s1292_s5 = sshll.u32 %s1770_s16, 12 }
  0x47   : > { %s1951_s6 = scalar_select %p46_p9, %s1762_s14, %s48_s28  }
  0x48   : > { %s1956_s26 = scalar_lea.hbm %s2439_s0, %s1292_s5  ;;  %s201_s21 = scalar_lea.vmem [#allocation3], %s1214_s29 }
  0x49   : > { %s209_s9 = sshll.u32 %s201_s21, 4  ;;  %p1960_p2 = pnand %p1415_p3, %p57_p5  ;;  %s1964_s9 = int_to_ptr.vmem [resolvable:$true] %s209_s9 }
  0x4a   : > { %s1966_s19 = scalar_lea.sflag [#allocation4], %s197_s4  ;;  %s1658_s28 = scalar_lea.hbm %s1956_s26, 4096 }
  0x4b   : > { %p1659_p11 = scmp.ne.s32.totalorder %s1956_s26, %s1658_s28  ;;  %p1660_p12 = pneg %p1960_p2 }
  0x4c   : > { %s1663_s5 = scalar_lea.hbm %s2439_s0, 8192  ;;  %p1664_p4 = scmp.lt.u32.totalorder %s1956_s26, %s2439_s0 }
  0x4d   : > { %p1661_p0 = pnand %p1660_p12, %p1659_p11  ;;  %p1665_p13 = scmp.lt.u32.totalorder %s1663_s5, %s1658_s28 }
  0x4e   : > { %p1667_p10 = scmp.lt.u32.totalorder %s1658_s28, %s1956_s26 }
  0x4f   : > { %p1662_p1 = pneg %p1661_p0  ;;  %p1666_p6 = por %p1665_p13, %p1664_p4 }
  0x51   : > { %p1668_p3 = por %p1667_p10, %p1666_p6 }
  0x53   : > { %p1669_p5 = pnand %p1668_p3, %p1662_p1 }
  0x55   : > { %1672 = shalt.err (!%p1669_p5)
}
  0x56   : > { %s1673_s4 = scalar_lea.vmem %s1964_s9, 4096  ;;  %s1780_s21 = smov [#allocation3]  }
  0x57   : > { %p1674_p9 = scmp.ne.s32.totalorder %s1964_s9, %s1673_s4  ;;  %s1678_s30 = sshll.u32 %s1780_s21, 4  ;;  %s1679_s30 = int_to_ptr.vmem [resolvable:$false] %s1678_s30 }
  0x58   : > { %s1680_s29 = scalar_lea.vmem %s1679_s30, 8192  ;;  %p1681_p7 = scmp.lt.s32.totalorder %s1964_s9, %s1679_s30 }
  0x59   : > { %p1676_p11 = pnand %p1674_p9, %p1660_p12  ;;  %p1682_p4 = scmp.lt.s32.totalorder %s1680_s29, %s1673_s4 }
  0x5b   : > { %p1677_p0 = pneg %p1676_p11  ;;  %p1683_p13 = por %p1682_p4, %p1681_p7 }
  0x5d   : > { %p1684_p6 = pnand %p1683_p13, %p1677_p0 }
  0x5f   : > { %1687 = shalt.err (!%p1684_p6)
}
  0x60   : > { %1408 = dma.hbm_to_vmem [thread:$0]  (!%p1960_p2), %s1956_s26, 4096, %s1964_s9, %s1966_s19, %s1778_s11, %s1778_s11, %s1779_s18  }
  0x61   : > { %221 = sbr.rel (%p1859_p8) target bundleno = 440 (0x1b8), region = 32  ;;  %s2000_s28 = sand.u32 (!%p1859_p8), 1, %s1758_s13  }
  0x62   : > { %s1218_s5 = sshll.u32 (!%p1859_p8), %s2000_s28, 8  ;;  %s224_s7 = scalar_lea.sflag (!%p1859_p8), [#allocation4], %s2000_s28 }
  0x63   : > { %s2006_s10 = scalar_lea.vmem (!%p1859_p8), [#allocation3], %s1218_s5  ;;  %p2455_p7 = scmp.ne.s32.totalorder (!%p1859_p8), %s2449_s22, 0 }
  0x68   : > { %1741 = dma.done.wait (%p2455_p7), %s224_s7, 4096  }
  0x69   : > { %1743 = vsyncadd (%p2455_p7), %s224_s7, 4294963200  ;;  %p2456_p2 = scmp.ne.s32.totalorder %s2447_s20, 0 }
  0x6b   : > { %1745 = dma.done.wait (%p2456_p2), [#allocation7], 272  }
  0x6c   : > { %1747 = vsyncadd (%p2456_p2), [#allocation7], 4294967024  ;;  %vm265_vm0 = vcmask 130048   ;;  %v1781_v0 = vmov 0.0   ;;  %v362_v1 = vld [vmem:[#allocation6] sm:$0xff]  ;;  %v363_v2 = vld [vmem:[#allocation6 + $0x8] sm:$0xff] }
  0x6d   : > { %267 = vst.msk [vmem:[#allocation2 + $0x8] sm:$0xff] %vm265_vm0, %v1781_v0  ;;  %266 = vst.msk [vmem:[#allocation2] sm:$0xff] %vm265_vm0, %v1781_v0  ;;  %v330_v3 = vld [vmem:[%s2006_s10] sm:$0xff]  ;;  %v1380_v4 = vpack.c.bf16 %v363_v2, %v362_v1  ;;  %v331_v6 = vld [vmem:[%s2006_s10 + $0x8] sm:$0xff]  ;;  %s2236_s20 = scalar_lea.vmem [#allocation9], %s1218_s5  ;;  %s1293_s22 = sshll.u32 %s1766_s15, 12 }
  0x6e   : > { %268 = vst.msk [vmem:[#allocation2 + $0x10] sm:$0xff] %vm265_vm0, %v1781_v0  ;;  %269 = vst.msk [vmem:[#allocation2 + $0x18] sm:$0xff] %vm265_vm0, %v1781_v0  ;;  %1332 = vmatprep.mubr.msk.f32.mxu0 %vm265_vm0, %v330_v3  ;;  %v346_v5 = vld [vmem:[%s2006_s10 + $0x80] sm:$0xff]  ;;  %v347_v7 = vld [vmem:[%s2006_s10 + $0x88] sm:$0xff]  ;;  %s1095_s24 = sshll.u32 %s2236_s20, 4  ;;  %s2381_s18 = scalar_lea.hbm %s2442_s3, %s1293_s22  ;;  %s2383_s24 = int_to_ptr.vmem [resolvable:$true] %s1095_s24 }
  0x6f   : > { %270 = vst.msk [vmem:[#allocation2 + $0x20] sm:$0xff] %vm265_vm0, %v1781_v0  ;;  %271 = vst.msk [vmem:[#allocation2 + $0x28] sm:$0xff] %vm265_vm0, %v1781_v0  ;;  %1356 = vmatprep.mubr.msk.f32.mxu1 %vm265_vm0, %v346_v5  ;;  %1381 = vmatprep.subr.bf16.mxu0 %v1380_v4  ;;  %v332_v8 = vld [vmem:[%s2006_s10 + $0x10] sm:$0xff]  ;;  %v333_v10 = vld [vmem:[%s2006_s10 + $0x18] sm:$0xff]  ;;  %s1081_s26 = scalar_lea.sflag [#allocation5], %s2000_s28  ;;  %s1688_s9 = scalar_lea.vmem %s2383_s24, 4096 }
  0x70   : > { %272 = vst.msk [vmem:[#allocation2 + $0x30] sm:$0xff] %vm265_vm0, %v1781_v0  ;;  %273 = vst.msk [vmem:[#allocation2 + $0x38] sm:$0xff] %vm265_vm0, %v1781_v0  ;;  %1384 = vmatprep.subr.bf16.mxu1 %v1380_v4  ;;  %1383 = vmatpush3.bf16.msra.mxu0 %v1380_v4  ;;  %v348_v9 = vld [vmem:[%s2006_s10 + $0x90] sm:$0xff]  ;;  %v349_v11 = vld [vmem:[%s2006_s10 + $0x98] sm:$0xff]  ;;  %p1689_p8 = scmp.ne.s32.totalorder %s2383_s24, %s1688_s9  ;;  %p2457_p12 = scmp.ne.s32.totalorder %s2453_s27, 0 }
  0x71   : > { %274 = vst.msk [vmem:[#allocation2 + $0x40] sm:$0xff] %vm265_vm0, %v1781_v0  ;;  %275 = vst.msk [vmem:[#allocation2 + $0x48] sm:$0xff] %vm265_vm0, %v1781_v0  ;;  %1385 = vmatpush3.bf16.msra.mxu1 %v1380_v4  ;;  %v334_v12 = vld [vmem:[%s2006_s10 + $0x20] sm:$0xff]  ;;  %v335_v14 = vld [vmem:[%s2006_s10 + $0x28] sm:$0xff]  ;;  %s1782_s19 = smov [#allocation9]  }
  0x72   : > { %276 = vst.msk [vmem:[#allocation2 + $0x50] sm:$0xff] %vm265_vm0, %v1781_v0  ;;  %277 = vst.msk [vmem:[#allocation2 + $0x58] sm:$0xff] %vm265_vm0, %v1781_v0  ;;  %v350_v13 = vld [vmem:[%s2006_s10 + $0xa0] sm:$0xff]  ;;  %v351_v15 = vld [vmem:[%s2006_s10 + $0xa8] sm:$0xff]  ;;  %p1690_p1 = pnand %p1689_p8, %p2457_p12  ;;  %s1692_s8 = sshll.u32 %s1782_s19, 4  ;;  %s1693_s8 = int_to_ptr.vmem [resolvable:$false] %s1692_s8 }
  0x73   : > { %278 = vst.msk [vmem:[#allocation2 + $0x60] sm:$0xff] %vm265_vm0, %v1781_v0  ;;  %279 = vst.msk [vmem:[#allocation2 + $0x68] sm:$0xff] %vm265_vm0, %v1781_v0  ;;  %1333 = vmatmul.mubr.msk.f32.vlgmr.msra.gmra.mrb[0].mxu0 %vm265_vm0, %v331_v6  ;;  %v336_v16 = vld [vmem:[%s2006_s10 + $0x30] sm:$0xff]  ;;  %v337_v18 = vld [vmem:[%s2006_s10 + $0x38] sm:$0xff]  ;;  %s1694_s4 = scalar_lea.vmem %s1693_s8, 8192  ;;  %p1695_p3 = scmp.lt.s32.totalorder %s2383_s24, %s1693_s8 }
  0x74   : > { %280 = vst.msk [vmem:[#allocation2 + $0x70] sm:$0xff] %vm265_vm0, %v1781_v0  ;;  %281 = vst.msk [vmem:[#allocation2 + $0x78] sm:$0xff] %vm265_vm0, %v1781_v0  ;;  %1357 = vmatmul.mubr.msk.f32.vlgmr.msra.gmra.mrb[0].mxu1 %vm265_vm0, %v347_v7  ;;  %1335 = vmatprep.mubr.msk.f32.mxu0 %vm265_vm0, %v332_v8  ;;  %v352_v17 = vld [vmem:[%s2006_s10 + $0xb0] sm:$0xff]  ;;  %v353_v19 = vld [vmem:[%s2006_s10 + $0xb8] sm:$0xff]  ;;  %p1691_p10 = pneg %p1690_p1  ;;  %p1696_p5 = scmp.lt.s32.totalorder %s1694_s4, %s1688_s9 }
  0x75   : > { %282 = vst.msk [vmem:[#allocation2 + $0x80] sm:$0xff] %vm265_vm0, %v1781_v0  ;;  %283 = vst.msk [vmem:[#allocation2 + $0x88] sm:$0xff] %vm265_vm0, %v1781_v0  ;;  %1359 = vmatprep.mubr.msk.f32.mxu1 %vm265_vm0, %v348_v9  ;;  %v338_v20 = vld [vmem:[%s2006_s10 + $0x40] sm:$0xff]  ;;  %v339_v22 = vld [vmem:[%s2006_s10 + $0x48] sm:$0xff] }
  0x76   : > { %284 = vst.msk [vmem:[#allocation2 + $0x90] sm:$0xff] %vm265_vm0, %v1781_v0  ;;  %285 = vst.msk [vmem:[#allocation2 + $0x98] sm:$0xff] %vm265_vm0, %v1781_v0  ;;  %v354_v21 = vld [vmem:[%s2006_s10 + $0xc0] sm:$0xff]  ;;  %v355_v23 = vld [vmem:[%s2006_s10 + $0xc8] sm:$0xff]  ;;  %p1697_p9 = por %p1696_p5, %p1695_p3 }
  0x77   : > { %286 = vst.msk [vmem:[#allocation2 + $0xa0] sm:$0xff] %vm265_vm0, %v1781_v0  ;;  %287 = vst.msk [vmem:[#allocation2 + $0xa8] sm:$0xff] %vm265_vm0, %v1781_v0  ;;  %1336 = vmatmul.mubr.msk.f32.gmra.mrb[2].mxu0 %vm265_vm0, %v333_v10  ;;  %v340_v24 = vld [vmem:[%s2006_s10 + $0x50] sm:$0xff]  ;;  %v341_v26 = vld [vmem:[%s2006_s10 + $0x58] sm:$0xff] }
  0x78   : > { %288 = vst.msk [vmem:[#allocation2 + $0xb0] sm:$0xff] %vm265_vm0, %v1781_v0  ;;  %289 = vst.msk [vmem:[#allocation2 + $0xb8] sm:$0xff] %vm265_vm0, %v1781_v0  ;;  %1360 = vmatmul.mubr.msk.f32.gmra.mrb[2].mxu1 %vm265_vm0, %v349_v11  ;;  %1338 = vmatprep.mubr.msk.f32.mxu0 %vm265_vm0, %v334_v12  ;;  %v356_v25 = vld [vmem:[%s2006_s10 + $0xd0] sm:$0xff]  ;;  %v357_v27 = vld [vmem:[%s2006_s10 + $0xd8] sm:$0xff]  ;;  %p1698_p11 = pnand %p1697_p9, %p1691_p10 }
  0x79   : > { %290 = vst.msk [vmem:[#allocation2 + $0xc0] sm:$0xff] %vm265_vm0, %v1781_v0  ;;  %291 = vst.msk [vmem:[#allocation2 + $0xc8] sm:$0xff] %vm265_vm0, %v1781_v0  ;;  %1362 = vmatprep.mubr.msk.f32.mxu1 %vm265_vm0, %v350_v13  ;;  %v342_v28 = vld [vmem:[%s2006_s10 + $0x60] sm:$0xff]  ;;  %v343_v30 = vld [vmem:[%s2006_s10 + $0x68] sm:$0xff] }
  0x7a   : > { %292 = vst.msk [vmem:[#allocation2 + $0xd0] sm:$0xff] %vm265_vm0, %v1781_v0  ;;  %293 = vst.msk [vmem:[#allocation2 + $0xd8] sm:$0xff] %vm265_vm0, %v1781_v0  ;;  %v358_v29 = vld [vmem:[%s2006_s10 + $0xe0] sm:$0xff]  ;;  %v359_v31 = vld [vmem:[%s2006_s10 + $0xe8] sm:$0xff] }
  0x7b   : > { %294 = vst.msk [vmem:[#allocation2 + $0xe0] sm:$0xff] %vm265_vm0, %v1781_v0  ;;  %295 = vst.msk [vmem:[#allocation2 + $0xe8] sm:$0xff] %vm265_vm0, %v1781_v0  ;;  %1339 = vmatmul.mubr.msk.f32.gmra.mrb[4].mxu0 %vm265_vm0, %v335_v14  ;;  %v344_v32 = vld [vmem:[%s2006_s10 + $0x70] sm:$0xff]  ;;  %v345_v34 = vld [vmem:[%s2006_s10 + $0x78] sm:$0xff] }
  0x7c   : > { %296 = vst.msk [vmem:[#allocation2 + $0xf0] sm:$0xff] %vm265_vm0, %v1781_v0  ;;  %297 = vst.msk [vmem:[#allocation2 + $0xf8] sm:$0xff] %vm265_vm0, %v1781_v0  ;;  %1363 = vmatmul.mubr.msk.f32.gmra.mrb[4].mxu1 %vm265_vm0, %v351_v15  ;;  %1341 = vmatprep.mubr.msk.f32.mxu0 %vm265_vm0, %v336_v16  ;;  %v360_v33 = vld [vmem:[%s2006_s10 + $0xf0] sm:$0xff]  ;;  %v361_v35 = vld [vmem:[%s2006_s10 + $0xf8] sm:$0xff] }
  0x7d   : > { %1365 = vmatprep.mubr.msk.f32.mxu1 %vm265_vm0, %v352_v17  ;;  %v299_v36 = vld [vmem:[#allocation2 + $0x8] sm:$0xff]  ;;  %v298_v38 = vld [vmem:[#allocation2] sm:$0xff]  ;;  %v301_v48 = vld [vmem:[#allocation2 + $0x18] sm:$0xff] }
  0x7e   : > { %v315_v37 = vld [vmem:[#allocation2 + $0x88] sm:$0xff]  ;;  %v314_v39 = vld [vmem:[#allocation2 + $0x80] sm:$0xff]  ;;  %v317_v49 = vld [vmem:[#allocation2 + $0x98] sm:$0xff] }
  0x7f   : > { %1342 = vmatmul.mubr.msk.f32.gmra.mrb[6].mxu0 %vm265_vm0, %v337_v18  ;;  %v300_v50 = vld [vmem:[#allocation2 + $0x10] sm:$0xff]  ;;  %v303_v60 = vld [vmem:[#allocation2 + $0x28] sm:$0xff]  ;;  %v302_v62 = vld [vmem:[#allocation2 + $0x20] sm:$0xff] }
  0x80   : > { %1366 = vmatmul.mubr.msk.f32.gmra.mrb[6].mxu1 %vm265_vm0, %v353_v19  ;;  %1344 = vmatprep.mubr.msk.f32.mxu0 %vm265_vm0, %v338_v20  ;;  %v316_v51 = vld [vmem:[#allocation2 + $0x90] sm:$0xff]  ;;  %v319_v61 = vld [vmem:[#allocation2 + $0xa8] sm:$0xff]  ;;  %v318_v63 = vld [vmem:[#allocation2 + $0xa0] sm:$0xff] }
  0x81   : > { %1368 = vmatprep.mubr.msk.f32.mxu1 %vm265_vm0, %v354_v21  ;;  %v2118_v0 = vld [vmem:[#allocation8] ss:$0 sm:$0xff]  ;;  %v305_v7 = vld [vmem:[#allocation2 + $0x38] sm:$0xff] }
  0x82   : > { %v321_v8 = vld [vmem:[#allocation2 + $0xb8] sm:$0xff]  ;;  %v304_v13 = vld [vmem:[#allocation2 + $0x30] sm:$0xff] }
  0x83   : > { %1345 = vmatmul.mubr.msk.f32.gmra.mrb[8].mxu0 %vm265_vm0, %v339_v22  ;;  %v320_v18 = vld [vmem:[#allocation2 + $0xb0] sm:$0xff] }
  0x84   : > { %1369 = vmatmul.mubr.msk.f32.gmra.mrb[8].mxu1 %vm265_vm0, %v355_v23  ;;  %1347 = vmatprep.mubr.msk.f32.mxu0 %vm265_vm0, %v340_v24  ;;  %v307_v23 = vld [vmem:[#allocation2 + $0x48] sm:$0xff] }
  0x85   : > { %1371 = vmatprep.mubr.msk.f32.mxu1 %vm265_vm0, %v356_v25 }
  0x87   : > { %1348 = vmatmul.mubr.msk.f32.gmra.mrb[10].mxu0 %vm265_vm0, %v341_v26 }
  0x88   : > { %1372 = vmatmul.mubr.msk.f32.gmra.mrb[10].mxu1 %vm265_vm0, %v357_v27  ;;  %1350 = vmatprep.mubr.msk.f32.mxu0 %vm265_vm0, %v342_v28 }
  0x89   : > { %1374 = vmatprep.mubr.msk.f32.mxu1 %vm265_vm0, %v358_v29 }
  0x8b   : > { %1351 = vmatmul.mubr.msk.f32.gmra.mrb[12].mxu0 %vm265_vm0, %v343_v30 }
  0x8c   : > { %1375 = vmatmul.mubr.msk.f32.gmra.mrb[12].mxu1 %vm265_vm0, %v359_v31  ;;  %1353 = vmatprep.mubr.msk.f32.mxu0 %vm265_vm0, %v344_v32 }
  0x8d   : > { %1377 = vmatprep.mubr.msk.f32.mxu1 %vm265_vm0, %v360_v33 }
  0x8f   : > { %1354 = vmatmul.mubr.msk.f32.gmra.mrb[14].mxu0 %vm265_vm0, %v345_v34 }
  0x90   : > { %1378 = vmatmul.mubr.msk.f32.gmra.mrb[14].mxu1 %vm265_vm0, %v361_v35 }
 0x146   : > { %v1334_v40 = vpop.f32.mrb[0].mxu0 }
 0x147   : > { %v1358_v41 = vpop.f32.mrb[0].mxu1  ;;  %v687_v42 = vadd.f32 %v1334_v40, %v299_v36  ;;  %v527_v44 = vpop.f32.mrb[1].mxu0  ;;  %v323_v40 = vld [vmem:[#allocation2 + $0xc8] sm:$0xff] }
 0x148   : > { %v703_v43 = vadd.f32 %v1358_v41, %v315_v37  ;;  %v607_v45 = vpop.f32.mrb[1].mxu1  ;;  %v686_v46 = vadd.f32 %v527_v44, %v298_v38 }
 0x149   : > { %v702_v47 = vadd.f32 %v607_v45, %v314_v39  ;;  %719 = vst.msk [vmem:[#allocation2 + $0x8] sm:$0xff] %vm265_vm0, %v687_v42  ;;  %v306_v45 = vld [vmem:[#allocation2 + $0x40] sm:$0xff] }
 0x14a   : > { %735 = vst.msk [vmem:[#allocation2 + $0x88] sm:$0xff] %vm265_vm0, %v703_v43  ;;  %718 = vst.msk [vmem:[#allocation2] sm:$0xff] %vm265_vm0, %v686_v46  ;;  %v1337_v52 = vpop.f32.mrb[2].mxu0  ;;  %v322_v46 = vld [vmem:[#allocation2 + $0xc0] sm:$0xff] }
 0x14b   : > { %734 = vst.msk [vmem:[#allocation2 + $0x80] sm:$0xff] %vm265_vm0, %v702_v47  ;;  %v1361_v53 = vpop.f32.mrb[2].mxu1  ;;  %v689_v54 = vadd.f32 %v1337_v52, %v301_v48  ;;  %v537_v56 = vpop.f32.mrb[3].mxu0  ;;  %v309_v47 = vld [vmem:[#allocation2 + $0x58] sm:$0xff] }
 0x14c   : > { %v705_v55 = vadd.f32 %v1361_v53, %v317_v49  ;;  %v617_v57 = vpop.f32.mrb[3].mxu1  ;;  %v688_v58 = vadd.f32 %v537_v56, %v300_v50 }
 0x14d   : > { %v704_v59 = vadd.f32 %v617_v57, %v316_v51  ;;  %721 = vst.msk [vmem:[#allocation2 + $0x18] sm:$0xff] %vm265_vm0, %v689_v54 }
 0x14e   : > { %737 = vst.msk [vmem:[#allocation2 + $0x98] sm:$0xff] %vm265_vm0, %v705_v55  ;;  %720 = vst.msk [vmem:[#allocation2 + $0x10] sm:$0xff] %vm265_vm0, %v688_v58  ;;  %v1340_v1 = vpop.f32.mrb[4].mxu0 }
 0x14f   : > { %736 = vst.msk [vmem:[#allocation2 + $0x90] sm:$0xff] %vm265_vm0, %v704_v59  ;;  %v1364_v2 = vpop.f32.mrb[4].mxu1  ;;  %v691_v3 = vadd.f32 %v1340_v1, %v303_v60  ;;  %v547_v5 = vpop.f32.mrb[5].mxu0 }
 0x150   : > { %v707_v4 = vadd.f32 %v1364_v2, %v319_v61  ;;  %v627_v6 = vpop.f32.mrb[5].mxu1  ;;  %v754_v9 = vld [vmem:[#allocation2 + $0x8] sm:$0xff]  ;;  %v690_v11 = vadd.f32 %v547_v5, %v302_v62 }
 0x151   : > { %v770_v10 = vld [vmem:[#allocation2 + $0x88] sm:$0xff]  ;;  %v706_v12 = vadd.f32 %v627_v6, %v318_v63  ;;  %v2123_v14 = vadd.f32 %v2118_v0, %v754_v9  ;;  %v753_v16 = vld [vmem:[#allocation2] sm:$0xff]  ;;  %723 = vst.msk [vmem:[#allocation2 + $0x28] sm:$0xff] %vm265_vm0, %v691_v3  ;;  %v325_v63 = vld [vmem:[#allocation2 + $0xd8] sm:$0xff] }
 0x152   : > { %v2126_v15 = vadd.f32 %v2118_v0, %v770_v10  ;;  %v769_v17 = vld [vmem:[#allocation2 + $0x80] sm:$0xff]  ;;  %739 = vst.msk [vmem:[#allocation2 + $0xa8] sm:$0xff] %vm265_vm0, %v707_v4  ;;  %v2131_v19 = vadd.f32 %v2118_v0, %v753_v16  ;;  %722 = vst.msk [vmem:[#allocation2 + $0x20] sm:$0xff] %vm265_vm0, %v690_v11  ;;  %v1343_v21 = vpop.f32.mrb[6].mxu0  ;;  %v308_v6 = vld [vmem:[#allocation2 + $0x50] sm:$0xff] }
 0x153   : > { %v2134_v20 = vadd.f32 %v2118_v0, %v769_v17  ;;  %738 = vst.msk [vmem:[#allocation2 + $0xa0] sm:$0xff] %vm265_vm0, %v706_v12  ;;  %v1367_v22 = vpop.f32.mrb[6].mxu1  ;;  %v1256_v24 = vmul.f32 -1.442695, %v2123_v14  ;;  %v693_v26 = vadd.f32 %v1343_v21, %v305_v7  ;;  %v557_v28 = vpop.f32.mrb[7].mxu0  ;;  %v324_v7 = vld [vmem:[#allocation2 + $0xd0] sm:$0xff] }
 0x154   : > { %v1272_v25 = vmul.f32 -1.442695, %v2126_v15  ;;  %v709_v27 = vadd.f32 %v1367_v22, %v321_v8  ;;  %v637_v29 = vpop.f32.mrb[7].mxu1  ;;  %v1255_v30 = vmul.f32 -1.442695, %v2131_v19  ;;  %v756_v32 = vld [vmem:[#allocation2 + $0x18] sm:$0xff]  ;;  %v692_v34 = vadd.f32 %v557_v28, %v304_v13 }
 0x155   : > { %v1271_v31 = vmul.f32 -1.442695, %v2134_v20  ;;  %v772_v33 = vld [vmem:[#allocation2 + $0x98] sm:$0xff]  ;;  %v708_v35 = vadd.f32 %v637_v29, %v320_v18  ;;  %1474 = vpow2.f32 %v1256_v24  ;;  %v2143_v36 = vadd.f32 %v2118_v0, %v756_v32  ;;  %v755_v38 = vld [vmem:[#allocation2 + $0x10] sm:$0xff]  ;;  %725 = vst.msk [vmem:[#allocation2 + $0x38] sm:$0xff] %vm265_vm0, %v693_v26  ;;  %v311_v21 = vld [vmem:[#allocation2 + $0x68] sm:$0xff] }
 0x156   : > { %v2146_v37 = vadd.f32 %v2118_v0, %v772_v33  ;;  %v771_v39 = vld [vmem:[#allocation2 + $0x90] sm:$0xff]  ;;  %741 = vst.msk [vmem:[#allocation2 + $0xb8] sm:$0xff] %vm265_vm0, %v709_v27  ;;  %1476 = vpow2.f32 %v1272_v25  ;;  %v2151_v41 = vadd.f32 %v2118_v0, %v755_v38  ;;  %724 = vst.msk [vmem:[#allocation2 + $0x30] sm:$0xff] %vm265_vm0, %v692_v34  ;;  %v1346_v43 = vpop.f32.mrb[8].mxu0  ;;  %v327_v26 = vld [vmem:[#allocation2 + $0xe8] sm:$0xff] }
 0x157   : > { %v2154_v42 = vadd.f32 %v2118_v0, %v771_v39  ;;  %740 = vst.msk [vmem:[#allocation2 + $0xb0] sm:$0xff] %vm265_vm0, %v708_v35  ;;  %v1370_v44 = vpop.f32.mrb[8].mxu1  ;;  %1478 = vpow2.f32 %v1255_v30  ;;  %v1258_v48 = vmul.f32 -1.442695, %v2143_v36  ;;  %v695_v50 = vadd.f32 %v1346_v43, %v307_v23  ;;  %v567_v51 = vpop.f32.mrb[9].mxu0 }
 0x158   : > { %v1274_v49 = vmul.f32 -1.442695, %v2146_v37  ;;  %v647_v52 = vpop.f32.mrb[9].mxu1  ;;  %1480 = vpow2.f32 %v1271_v31  ;;  %v1257_v53 = vmul.f32 -1.442695, %v2151_v41  ;;  %v758_v55 = vld [vmem:[#allocation2 + $0x28] sm:$0xff]  ;;  %v711_v57 = vadd.f32 %v1370_v44, %v323_v40 }
 0x159   : > { %v1273_v54 = vmul.f32 -1.442695, %v2154_v42  ;;  %v774_v56 = vld [vmem:[#allocation2 + $0xa8] sm:$0xff]  ;;  %1482 = vpow2.f32 %v1258_v48  ;;  %v2163_v58 = vadd.f32 %v2118_v0, %v758_v55  ;;  %v757_v60 = vld [vmem:[#allocation2 + $0x20] sm:$0xff]  ;;  %727 = vst.msk [vmem:[#allocation2 + $0x48] sm:$0xff] %vm265_vm0, %v695_v50  ;;  %v694_v62 = vadd.f32 %v567_v51, %v306_v45 }
 0x15a   : > { %v2166_v59 = vadd.f32 %v2118_v0, %v774_v56  ;;  %v773_v61 = vld [vmem:[#allocation2 + $0xa0] sm:$0xff]  ;;  %1484 = vpow2.f32 %v1274_v49  ;;  %v2170_v1 = vadd.f32 %v2118_v0, %v757_v60  ;;  %743 = vst.msk [vmem:[#allocation2 + $0xc8] sm:$0xff] %vm265_vm0, %v711_v57  ;;  %v710_v3 = vadd.f32 %v647_v52, %v322_v46  ;;  %v1349_v4 = vpop.f32.mrb[10].mxu0 }
 0x15b   : > { %v2173_v2 = vadd.f32 %v2118_v0, %v773_v61  ;;  %v1373_v5 = vpop.f32.mrb[10].mxu1  ;;  %1486 = vpow2.f32 %v1257_v53  ;;  %v1260_v8 = vmul.f32 -1.442695, %v2163_v58  ;;  %726 = vst.msk [vmem:[#allocation2 + $0x40] sm:$0xff] %vm265_vm0, %v694_v62  ;;  %v697_v10 = vadd.f32 %v1349_v4, %v309_v47  ;;  %v577_v11 = vpop.f32.mrb[11].mxu0  ;;  %v310_v31 = vld [vmem:[#allocation2 + $0x60] sm:$0xff] }
 0x15c   : > { %v1276_v9 = vmul.f32 -1.442695, %v2166_v59  ;;  %v657_v12 = vpop.f32.mrb[11].mxu1  ;;  %1488 = vpow2.f32 %v1273_v54  ;;  %v1259_v13 = vmul.f32 -1.442695, %v2170_v1  ;;  %v760_v17 = vld [vmem:[#allocation2 + $0x38] sm:$0xff]  ;;  %v713_v18 = vadd.f32 %v1373_v5, %v325_v63 }
 0x15d   : > { %v1275_v16 = vmul.f32 -1.442695, %v2173_v2  ;;  %742 = vst.msk [vmem:[#allocation2 + $0xc0] sm:$0xff] %vm265_vm0, %v710_v3  ;;  %1490 = vpow2.f32 %v1260_v8  ;;  %v2183_v22 = vadd.f32 %v2118_v0, %v760_v17  ;;  %729 = vst.msk [vmem:[#allocation2 + $0x58] sm:$0xff] %vm265_vm0, %v697_v10  ;;  %v696_v23 = vadd.f32 %v577_v11, %v308_v6  ;;  %v776_v45 = vld [vmem:[#allocation2 + $0xb8] sm:$0xff]  ;;  %v759_v46 = vld [vmem:[#allocation2 + $0x30] sm:$0xff] }
 0x15e   : > { %1492 = vpow2.f32 %v1276_v9  ;;  %745 = vst.msk [vmem:[#allocation2 + $0xd8] sm:$0xff] %vm265_vm0, %v713_v18  ;;  %v712_v24 = vadd.f32 %v657_v12, %v324_v7  ;;  %v1352_v25 = vpop.f32.mrb[12].mxu0  ;;  %v775_v52 = vld [vmem:[#allocation2 + $0xb0] sm:$0xff]  ;;  %v2200_v62 = vadd.f32 %v2118_v0, %v776_v45  ;;  %v2203_v63 = vadd.f32 %v2118_v0, %v759_v46  ;;  %v326_v10 = vld [vmem:[#allocation2 + $0xe0] sm:$0xff] }
 0x15f   : > { %v1376_v27 = vpop.f32.mrb[12].mxu1  ;;  %v1475_v28 = vpop.eup %1474  ;;  %1494 = vpow2.f32 %v1259_v13  ;;  %v1262_v29 = vmul.f32 -1.442695, %v2183_v22  ;;  %728 = vst.msk [vmem:[#allocation2 + $0x50] sm:$0xff] %vm265_vm0, %v696_v23  ;;  %v699_v30 = vadd.f32 %v1352_v25, %v311_v21  ;;  %v2206_v6 = vadd.f32 %v2118_v0, %v775_v52  ;;  %v328_v46 = vld [vmem:[#allocation2 + $0xf0] sm:$0xff] }
 0x160   : > { %v587_v32 = vpop.f32.mrb[13].mxu0  ;;  %v667_v33 = vpop.f32.mrb[13].mxu1  ;;  %v921_v35 = vadd.f32 1.0, %v1475_v28  ;;  %1496 = vpow2.f32 %v1275_v16  ;;  %744 = vst.msk [vmem:[#allocation2 + $0xd0] sm:$0xff] %vm265_vm0, %v712_v24  ;;  %v715_v40 = vadd.f32 %v1376_v27, %v327_v26  ;;  %v762_v57 = vld [vmem:[#allocation2 + $0x48] sm:$0xff]  ;;  %v313_v24 = vld [vmem:[#allocation2 + $0x78] sm:$0xff] }
 0x161   : > { %v1477_v34 = vpop.eup %1476  ;;  %1498 = vpow2.f32 %v1262_v29  ;;  %731 = vst.msk [vmem:[#allocation2 + $0x68] sm:$0xff] %vm265_vm0, %v699_v30  ;;  %v698_v47 = vadd.f32 %v587_v32, %v310_v31  ;;  %v778_v3 = vld [vmem:[#allocation2 + $0xc8] sm:$0xff]  ;;  %v2209_v9 = vadd.f32 %v2118_v0, %v762_v57  ;;  %v1278_v21 = vmul.f32 -1.442695, %v2200_v62  ;;  %v329_v30 = vld [vmem:[#allocation2 + $0xf8] sm:$0xff] }
 0x162   : > { %v1479_v38 = vpop.eup %1478  ;;  %v937_v39 = vadd.f32 1.0, %v1477_v34  ;;  %1500 = vrcp.f32 %v921_v35  ;;  %v1355_v48 = vpop.f32.mrb[14].mxu0  ;;  %747 = vst.msk [vmem:[#allocation2 + $0xe8] sm:$0xff] %vm265_vm0, %v715_v40  ;;  %v2212_v13 = vadd.f32 %v2118_v0, %v778_v3  ;;  %v761_v16 = vld [vmem:[#allocation2 + $0x40] sm:$0xff]  ;;  %v1261_v23 = vmul.f32 -1.442695, %v2203_v63 }
 0x163   : > { %v1481_v43 = vpop.eup %1480  ;;  %v920_v44 = vadd.f32 1.0, %v1479_v38  ;;  %v2191_v49 = vpop.f32.mrb[14].mxu1  ;;  %730 = vst.msk [vmem:[#allocation2 + $0x60] sm:$0xff] %vm265_vm0, %v698_v47  ;;  %v1277_v27 = vmul.f32 -1.442695, %v2206_v6  ;;  %v714_v29 = vadd.f32 %v667_v33, %v326_v10  ;;  %v2219_v35 = vadd.f32 %v2118_v0, %v761_v16 }
 0x164   : > { %v1483_v50 = vpop.eup %1482  ;;  %1502 = vrcp.f32 %v937_v39  ;;  %v936_v51 = vadd.f32 1.0, %v1481_v43  ;;  %v2194_v53 = vpop.f32.mrb[15].mxu0  ;;  %v777_v28 = vld [vmem:[#allocation2 + $0xc0] sm:$0xff]  ;;  %v1264_v34 = vmul.f32 -1.442695, %v2209_v9  ;;  %v764_v38 = vld [vmem:[#allocation2 + $0x58] sm:$0xff]  ;;  %v701_v33 = vadd.f32 %v1355_v48, %v313_v24 }
 0x165   : > { %v2196_v54 = vpop.f32.mrb[15].mxu1  ;;  %v1485_v55 = vpop.eup %1484  ;;  %1504 = vrcp.f32 %v920_v44  ;;  %v923_v56 = vadd.f32 1.0, %v1483_v50  ;;  %v312_v39 = vld [vmem:[#allocation2 + $0x70] sm:$0xff]  ;;  %v1280_v44 = vmul.f32 -1.442695, %v2212_v13  ;;  %v780_v45 = vld [vmem:[#allocation2 + $0xd8] sm:$0xff] }
 0x166   : > { %v1487_v60 = vpop.eup %1486  ;;  %1506 = vrcp.f32 %v936_v51  ;;  %v939_v61 = vadd.f32 1.0, %v1485_v55  ;;  %746 = vst.msk [vmem:[#allocation2 + $0xe0] sm:$0xff] %vm265_vm0, %v714_v29  ;;  %v2225_v51 = vadd.f32 %v2118_v0, %v777_v28  ;;  %v763_v52 = vld [vmem:[#allocation2 + $0x50] sm:$0xff]  ;;  %v717_v55 = vadd.f32 %v2191_v49, %v329_v30  ;;  %733 = vst.msk [vmem:[#allocation2 + $0x78] sm:$0xff] %vm265_vm0, %v701_v33 }
 0x167   : > { %v1489_v4 = vpop.eup %1488  ;;  %1508 = vrcp.f32 %v923_v56  ;;  %v922_v5 = vadd.f32 1.0, %v1487_v60  ;;  %v2230_v60 = vadd.f32 %v2118_v0, %v764_v38  ;;  %v779_v48 = vld [vmem:[#allocation2 + $0xd0] sm:$0xff]  ;;  %v2242_v49 = vadd.f32 %v2118_v0, %v780_v45 }
 0x168   : > { %v1491_v7 = vpop.eup %1490  ;;  %1510 = vrcp.f32 %v939_v61  ;;  %v938_v8 = vadd.f32 1.0, %v1489_v4  ;;  %v700_v61 = vadd.f32 %v2194_v53, %v312_v39  ;;  %v766_v3 = vld [vmem:[#allocation2 + $0x68] sm:$0xff]  ;;  %749 = vst.msk [vmem:[#allocation2 + $0xf8] sm:$0xff] %vm265_vm0, %v717_v55  ;;  %v716_v53 = vadd.f32 %v2196_v54, %v328_v46 }
 0x169   : > { %v1493_v11 = vpop.eup %1492  ;;  %1512 = vrcp.f32 %v922_v5  ;;  %v925_v12 = vadd.f32 1.0, %v1491_v7  ;;  %v1263_v7 = vmul.f32 -1.442695, %v2219_v35 }
 0x16a   : > { %v1495_v17 = vpop.eup %1494  ;;  %1514 = vrcp.f32 %v938_v8  ;;  %v941_v18 = vadd.f32 1.0, %v1493_v11  ;;  %v782_v8 = vld [vmem:[#allocation2 + $0xe8] sm:$0xff]  ;;  %732 = vst.msk [vmem:[#allocation2 + $0x70] sm:$0xff] %vm265_vm0, %v700_v61  ;;  %v1279_v11 = vmul.f32 -1.442695, %v2225_v51  ;;  %748 = vst.msk [vmem:[#allocation2 + $0xf0] sm:$0xff] %vm265_vm0, %v716_v53 }
 0x16b   : > { %v1497_v25 = vpop.eup %1496  ;;  %1516 = vrcp.f32 %v925_v12  ;;  %v924_v26 = vadd.f32 1.0, %v1495_v17  ;;  %v1266_v17 = vmul.f32 -1.442695, %v2230_v60  ;;  %v2274_v24 = vadd.f32 %v2118_v0, %v782_v8 }
 0x16c   : > { %v1499_v31 = vpop.eup %1498  ;;  %1518 = vrcp.f32 %v941_v18  ;;  %v940_v32 = vadd.f32 1.0, %v1497_v25 }
 0x16d   : > { %v1501_v40 = vpop.eup %1500  ;;  %1520 = vrcp.f32 %v924_v26  ;;  %v927_v43 = vadd.f32 1.0, %v1499_v31  ;;  %v768_v61 = vld [vmem:[#allocation2 + $0x78] sm:$0xff] }
 0x16e   : > { %v1503_v47 = vpop.eup %1502  ;;  %v1017_v50 = vmul.f32 %v1501_v40, %v2123_v14  ;;  %1522 = vrcp.f32 %v940_v32 }
 0x16f   : > { %v1505_v56 = vpop.eup %1504  ;;  %v1033_v57 = vmul.f32 %v1503_v47, %v2126_v15  ;;  %1524 = vrcp.f32 %v927_v43  ;;  %v784_v53 = vld [vmem:[#allocation2 + $0xf8] sm:$0xff] }
 0x170   : > { %v1507_v14 = vpop.eup %1506  ;;  %1049 = vst.msk [vmem:[%s2236_s20 + $0x8] sm:$0xff] %vm265_vm0, %v1017_v50  ;;  %v1016_v15 = vmul.f32 %v1505_v56, %v2131_v19  ;;  %1526 = vpow2.f32 %v1278_v21  ;;  %v2251_v19 = vadd.f32 %v2118_v0, %v763_v52  ;;  %v765_v50 = vld [vmem:[#allocation2 + $0x60] sm:$0xff] }
 0x171   : > { %v1509_v4 = vpop.eup %1508  ;;  %1065 = vst.msk [vmem:[%s2236_s20 + $0x88] sm:$0xff] %vm265_vm0, %v1033_v57  ;;  %v1032_v5 = vmul.f32 %v1507_v14, %v2134_v20  ;;  %1528 = vpow2.f32 %v1261_v23  ;;  %v2259_v20 = vadd.f32 %v2118_v0, %v779_v48  ;;  %v1282_v23 = vmul.f32 -1.442695, %v2242_v49  ;;  %v781_v56 = vld [vmem:[#allocation2 + $0xe0] sm:$0xff]  ;;  %v767_v8 = vld [vmem:[#allocation2 + $0x70] sm:$0xff] }
 0x172   : > { %v1511_v10 = vpop.eup %1510  ;;  %1048 = vst.msk [vmem:[%s2236_s20] sm:$0xff] %vm265_vm0, %v1016_v15  ;;  %v1019_v54 = vmul.f32 %v1509_v4, %v2143_v36  ;;  %1530 = vpow2.f32 %v1277_v27  ;;  %v2267_v36 = vadd.f32 %v2118_v0, %v766_v3  ;;  %v1265_v26 = vmul.f32 -1.442695, %v2251_v19 }
 0x173   : > { %v1513_v12 = vpop.eup %1512  ;;  %1064 = vst.msk [vmem:[%s2236_s20 + $0x80] sm:$0xff] %vm265_vm0, %v1032_v5  ;;  %v1035_v16 = vmul.f32 %v1511_v10, %v2146_v37  ;;  %1532 = vpow2.f32 %v1264_v34  ;;  %v1281_v28 = vmul.f32 -1.442695, %v2259_v20  ;;  %v2303_v3 = vadd.f32 %v2118_v0, %v765_v50 }
 0x174   : > { %v1515_v18 = vpop.eup %1514  ;;  %1051 = vst.msk [vmem:[%s2236_s20 + $0x18] sm:$0xff] %vm265_vm0, %v1019_v54  ;;  %v1018_v21 = vmul.f32 %v1513_v12, %v2151_v41  ;;  %1534 = vpow2.f32 %v1280_v44  ;;  %v783_v12 = vld [vmem:[#allocation2 + $0xf0] sm:$0xff] }
 0x175   : > { %v1517_v37 = vpop.eup %1516  ;;  %1067 = vst.msk [vmem:[%s2236_s20 + $0x98] sm:$0xff] %vm265_vm0, %v1035_v16  ;;  %v1034_v25 = vmul.f32 %v1515_v18, %v2154_v42  ;;  %1536 = vpow2.f32 %v1263_v7  ;;  %v1268_v42 = vmul.f32 -1.442695, %v2267_v36  ;;  %v2306_v7 = vadd.f32 %v2118_v0, %v781_v56 }
 0x176   : > { %v1519_v27 = vpop.eup %1518  ;;  %1050 = vst.msk [vmem:[%s2236_s20 + $0x10] sm:$0xff] %vm265_vm0, %v1018_v21  ;;  %v1021_v41 = vmul.f32 %v1517_v37, %v2163_v58  ;;  %1538 = vpow2.f32 %v1279_v11  ;;  %v1284_v58 = vmul.f32 -1.442695, %v2274_v24  ;;  %v2309_v11 = vadd.f32 %v2118_v0, %v768_v61 }
 0x177   : > { %v1521_v29 = vpop.eup %1520  ;;  %1066 = vst.msk [vmem:[%s2236_s20 + $0x90] sm:$0xff] %vm265_vm0, %v1034_v25  ;;  %v1037_v30 = vmul.f32 %v1519_v27, %v2166_v59  ;;  %1540 = vpow2.f32 %v1266_v17  ;;  %v2312_v18 = vadd.f32 %v2118_v0, %v784_v53  ;;  %v1267_v37 = vmul.f32 -1.442695, %v2303_v3 }
 0x178   : > { %v1523_v31 = vpop.eup %1522  ;;  %1053 = vst.msk [vmem:[%s2236_s20 + $0x28] sm:$0xff] %vm265_vm0, %v1021_v41  ;;  %v1020_v32 = vmul.f32 %v1521_v29, %v2170_v1  ;;  %1542 = vpow2.f32 %v1282_v23  ;;  %v2316_v25 = vadd.f32 %v2118_v0, %v767_v8  ;;  %v1283_v41 = vmul.f32 -1.442695, %v2306_v7 }
 0x179   : > { %v1525_v34 = vpop.eup %1524  ;;  %1069 = vst.msk [vmem:[%s2236_s20 + $0xa8] sm:$0xff] %vm265_vm0, %v1037_v30  ;;  %v1036_v38 = vmul.f32 %v1523_v31, %v2173_v2  ;;  %1544 = vpow2.f32 %v1265_v26 }
 0x17a   : > { %v1527_v59 = vpop.eup %1526  ;;  %1052 = vst.msk [vmem:[%s2236_s20 + $0x20] sm:$0xff] %vm265_vm0, %v1020_v32  ;;  %v1023_v39 = vmul.f32 %v1525_v34, %v2183_v22  ;;  %1546 = vpow2.f32 %v1281_v28  ;;  %v2320_v28 = vadd.f32 %v2118_v0, %v783_v12 }
 0x17b   : > { %v1529_v40 = vpop.eup %1528  ;;  %1068 = vst.msk [vmem:[%s2236_s20 + $0xa0] sm:$0xff] %vm265_vm0, %v1036_v38  ;;  %v943_v1 = vadd.f32 1.0, %v1527_v59  ;;  %1548 = vpow2.f32 %v1268_v42  ;;  %v1270_v42 = vmul.f32 -1.442695, %v2309_v11 }
 0x17c   : > { %v1531_v43 = vpop.eup %1530  ;;  %1055 = vst.msk [vmem:[%s2236_s20 + $0x38] sm:$0xff] %vm265_vm0, %v1023_v39  ;;  %v926_v44 = vadd.f32 1.0, %v1529_v40  ;;  %1550 = vpow2.f32 %v1284_v58  ;;  %v1286_v58 = vmul.f32 -1.442695, %v2312_v18 }
 0x17d   : > { %v1533_v45 = vpop.eup %1532  ;;  %1552 = vrcp.f32 %v943_v1  ;;  %v942_v2 = vadd.f32 1.0, %v1531_v43 }
 0x17e   : > { %v1535_v33 = vpop.eup %1534  ;;  %1554 = vrcp.f32 %v926_v44  ;;  %v929_v46 = vadd.f32 1.0, %v1533_v45 }
 0x17f   : > { %v1537_v47 = vpop.eup %1536  ;;  %1556 = vrcp.f32 %v942_v2  ;;  %v945_v22 = vadd.f32 1.0, %v1535_v33 }
 0x180   : > { %v1539_v52 = vpop.eup %1538  ;;  %1558 = vrcp.f32 %v929_v46  ;;  %v928_v55 = vadd.f32 1.0, %v1537_v47 }
 0x181   : > { %v1541_v57 = vpop.eup %1540  ;;  %1560 = vrcp.f32 %v945_v22  ;;  %v944_v48 = vadd.f32 1.0, %v1539_v52 }
 0x182   : > { %v1543_v14 = vpop.eup %1542  ;;  %1562 = vrcp.f32 %v928_v55  ;;  %v931_v15 = vadd.f32 1.0, %v1541_v57 }
 0x183   : > { %v1545_v4 = vpop.eup %1544  ;;  %1564 = vrcp.f32 %v944_v48  ;;  %v947_v5 = vadd.f32 1.0, %v1543_v14 }
 0x184   : > { %v1547_v10 = vpop.eup %1546  ;;  %1566 = vrcp.f32 %v931_v15  ;;  %v930_v54 = vadd.f32 1.0, %v1545_v4 }
 0x185   : > { %v1549_v16 = vpop.eup %1548  ;;  %1568 = vrcp.f32 %v947_v5  ;;  %v946_v17 = vadd.f32 1.0, %v1547_v10 }
 0x186   : > { %v1551_v21 = vpop.eup %1550  ;;  %1570 = vrcp.f32 %v930_v54  ;;  %v933_v23 = vadd.f32 1.0, %v1549_v16 }
 0x187   : > { %v1553_v26 = vpop.eup %1552  ;;  %1572 = vrcp.f32 %v946_v17  ;;  %v949_v27 = vadd.f32 1.0, %v1551_v21 }
 0x188   : > { %v1555_v29 = vpop.eup %1554  ;;  %v1039_v30 = vmul.f32 %v1553_v26, %v2200_v62  ;;  %1574 = vrcp.f32 %v933_v23  ;;  %v1269_v62 = vmul.f32 -1.442695, %v2316_v25 }
 0x189   : > { %v1557_v31 = vpop.eup %1556  ;;  %v1022_v32 = vmul.f32 %v1555_v29, %v2203_v63  ;;  %1576 = vrcp.f32 %v949_v27  ;;  %v1285_v63 = vmul.f32 -1.442695, %v2320_v28 }
 0x18a   : > { %v1559_v34 = vpop.eup %1558  ;;  %1071 = vst.msk [vmem:[%s2236_s20 + $0xb8] sm:$0xff] %vm265_vm0, %v1039_v30  ;;  %v1038_v0 = vmul.f32 %v1557_v31, %v2206_v6  ;;  %1578 = vpow2.f32 %v1267_v37 }
 0x18b   : > { %v1561_v38 = vpop.eup %1560  ;;  %1054 = vst.msk [vmem:[%s2236_s20 + $0x30] sm:$0xff] %vm265_vm0, %v1022_v32  ;;  %v1025_v59 = vmul.f32 %v1559_v34, %v2209_v9  ;;  %1580 = vpow2.f32 %v1283_v41 }
 0x18c   : > { %v1563_v39 = vpop.eup %1562  ;;  %1070 = vst.msk [vmem:[%s2236_s20 + $0xb0] sm:$0xff] %vm265_vm0, %v1038_v0  ;;  %v1041_v40 = vmul.f32 %v1561_v38, %v2212_v13  ;;  %1582 = vpow2.f32 %v1270_v42 }
 0x18d   : > { %v1565_v6 = vpop.eup %1564  ;;  %1057 = vst.msk [vmem:[%s2236_s20 + $0x48] sm:$0xff] %vm265_vm0, %v1025_v59  ;;  %v1024_v1 = vmul.f32 %v1563_v39, %v2219_v35  ;;  %1584 = vpow2.f32 %v1286_v58 }
 0x18e   : > { %v1567_v9 = vpop.eup %1566  ;;  %1073 = vst.msk [vmem:[%s2236_s20 + $0xc8] sm:$0xff] %vm265_vm0, %v1041_v40  ;;  %v1040_v43 = vmul.f32 %v1565_v6, %v2225_v51  ;;  %1586 = vpow2.f32 %v1269_v62 }
 0x18f   : > { %v1569_v44 = vpop.eup %1568  ;;  %1056 = vst.msk [vmem:[%s2236_s20 + $0x40] sm:$0xff] %vm265_vm0, %v1024_v1  ;;  %v1027_v13 = vmul.f32 %v1567_v9, %v2230_v60  ;;  %1588 = vpow2.f32 %v1285_v63 }
 0x190   : > { %v1571_v45 = vpop.eup %1570  ;;  %1072 = vst.msk [vmem:[%s2236_s20 + $0xc0] sm:$0xff] %vm265_vm0, %v1040_v43  ;;  %v1043_v35 = vmul.f32 %v1569_v44, %v2242_v49 }
 0x191   : > { %v1573_v2 = vpop.eup %1572  ;;  %1059 = vst.msk [vmem:[%s2236_s20 + $0x58] sm:$0xff] %vm265_vm0, %v1027_v13  ;;  %v1026_v51 = vmul.f32 %v1571_v45, %v2251_v19 }
 0x192   : > { %v1575_v33 = vpop.eup %1574  ;;  %1075 = vst.msk [vmem:[%s2236_s20 + $0xd8] sm:$0xff] %vm265_vm0, %v1043_v35  ;;  %v1042_v46 = vmul.f32 %v1573_v2, %v2259_v20 }
 0x193   : > { %v1577_v47 = vpop.eup %1576  ;;  %1058 = vst.msk [vmem:[%s2236_s20 + $0x50] sm:$0xff] %vm265_vm0, %v1026_v51  ;;  %v1029_v60 = vmul.f32 %v1575_v33, %v2267_v36 }
 0x194   : > { %v1579_v22 = vpop.eup %1578  ;;  %1074 = vst.msk [vmem:[%s2236_s20 + $0xd0] sm:$0xff] %vm265_vm0, %v1042_v46  ;;  %v1045_v49 = vmul.f32 %v1577_v47, %v2274_v24 }
 0x195   : > { %v1581_v50 = vpop.eup %1580  ;;  %1061 = vst.msk [vmem:[%s2236_s20 + $0x68] sm:$0xff] %vm265_vm0, %v1029_v60  ;;  %v932_v52 = vadd.f32 1.0, %v1579_v22 }
 0x196   : > { %v1583_v19 = vpop.eup %1582  ;;  %1077 = vst.msk [vmem:[%s2236_s20 + $0xe8] sm:$0xff] %vm265_vm0, %v1045_v49  ;;  %v948_v55 = vadd.f32 1.0, %v1581_v50 }
 0x197   : > { %v1585_v56 = vpop.eup %1584  ;;  %1590 = vrcp.f32 %v932_v52  ;;  %v935_v20 = vadd.f32 1.0, %v1583_v19 }
 0x198   : > { %v1587_v57 = vpop.eup %1586  ;;  %1592 = vrcp.f32 %v948_v55  ;;  %v951_v36 = vadd.f32 1.0, %v1585_v56 }
 0x199   : > { %v1589_v48 = vpop.eup %1588  ;;  %1594 = vrcp.f32 %v935_v20  ;;  %v934_v24 = vadd.f32 1.0, %v1587_v57 }
 0x19a   : > { %1596 = vrcp.f32 %v951_v36  ;;  %v950_v61 = vadd.f32 1.0, %v1589_v48 }
 0x19b   : > { %1598 = vrcp.f32 %v934_v24 }
 0x19c   : > { %1600 = vrcp.f32 %v950_v61 }
 0x1a1   : > { %v1591_v14 = vpop.eup %1590 }
 0x1a2   : > { %v1593_v15 = vpop.eup %1592  ;;  %v1028_v53 = vmul.f32 %v1591_v14, %v2303_v3 }
 0x1a3   : > { %v1595_v4 = vpop.eup %1594  ;;  %v1044_v5 = vmul.f32 %v1593_v15, %v2306_v7 }
 0x1a4   : > { %v1597_v8 = vpop.eup %1596  ;;  %1060 = vst.msk [vmem:[%s2236_s20 + $0x60] sm:$0xff] %vm265_vm0, %v1028_v53  ;;  %v1031_v10 = vmul.f32 %v1595_v4, %v2309_v11 }
 0x1a5   : > { %v1599_v54 = vpop.eup %1598  ;;  %1076 = vst.msk [vmem:[%s2236_s20 + $0xe0] sm:$0xff] %vm265_vm0, %v1044_v5  ;;  %v1047_v3 = vmul.f32 %v1597_v8, %v2312_v18 }
 0x1a6   : > { %v1601_v12 = vpop.eup %1600  ;;  %1063 = vst.msk [vmem:[%s2236_s20 + $0x78] sm:$0xff] %vm265_vm0, %v1031_v10  ;;  %v1030_v7 = vmul.f32 %v1599_v54, %v2316_v25 }
 0x1a7   : > { %1079 = vst.msk [vmem:[%s2236_s20 + $0xf8] sm:$0xff] %vm265_vm0, %v1047_v3  ;;  %v1046_v11 = vmul.f32 %v1601_v12, %v2320_v28 }
 0x1a8   : > { %1062 = vst.msk [vmem:[%s2236_s20 + $0x70] sm:$0xff] %vm265_vm0, %v1030_v7 }
 0x1a9   : > { %1078 = vst.msk [vmem:[%s2236_s20 + $0xf0] sm:$0xff] %vm265_vm0, %v1046_v11 }
 0x1aa   : > { %1701 = shalt.err (!%p1698_p11)
}
 0x1ab   : > { %s1702_s21 = scalar_lea.hbm %s2381_s18, 4096  ;;  %s1706_s5 = scalar_lea.hbm %s2442_s3, 8192 }
 0x1ac   : > { %p1703_p0 = scmp.ne.s32.totalorder %s2381_s18, %s1702_s21  ;;  %p1707_p6 = scmp.lt.u32.totalorder %s2381_s18, %s2442_s3 }
 0x1ad   : > { %p1708_p7 = scmp.lt.u32.totalorder %s1706_s5, %s1702_s21  ;;  %p1710_p8 = scmp.lt.u32.totalorder %s1702_s21, %s2381_s18 }
 0x1ae   : > { %p1704_p4 = pnand %p1703_p0, %p2457_p12 }
 0x1af   : > { %p1709_p2 = por %p1708_p7, %p1707_p6 }
 0x1b0   : > { %p1705_p13 = pneg %p1704_p4 }
 0x1b1   : > { %p1711_p1 = por %p1710_p8, %p1709_p2 }
 0x1b3   : > { %p1712_p10 = pnand %p1711_p1, %p1705_p13 }
 0x1b5   : > { %1715 = shalt.err (!%p1712_p10)
}
 0x1b6   : > { %s1783_s20 = smov 128   ;;  %s1784_s22 = smov 8  }
 0x1b7   : > { %1396 = dma.vmem_to_hbm [thread:$0]  (%p2457_p12), %s2383_s24, 4096, %s2381_s18, %s1081_s26, %s1783_s20, %s1783_s20, %s1784_s22  }
 0x1b8 PF: > { %s1110_s15 = sand.u32 1, %s1754_s12   ;;  %p2458_p3 = scmp.ne.s32.totalorder %s2450_s23, 0 }
 0x1b9   : > { %p2459_p5 = scmp.ge.s32.totalorder %s1774_s17, 2  ;;  %s1111_s11 = scalar_lea.sflag [#allocation5], %s1110_s15 }
 0x1bb   : > { %p1410_p9 = pnand %p2459_p5, %p2458_p3 }
 0x1bd   : > { %1749 = dma.done.wait (!%p1410_p9), %s1111_s11, 4096  }
 0x1be   : > { %1751 = vsyncadd (!%p1410_p9), %s1111_s11, 4294963200  ;;  %s20_s17 = sadd.s32 1, %s1774_s17   ;;  %s2460_s12 = smov %s1758_s13 }
 0x1bf   : > { %p17_p11 = scmp.ge.s32.totalorder %s20_s17, 4   ;;  %s2461_s13 = smov %s1762_s14 }
 0x1c0   : > { %s2462_s14 = smov %s1951_s6  ;;  %s2463_s15 = smov %s1770_s16 }
 0x1c1   : > { %s2464_s16 = smov %s2466_s25  ;;  %19 = sbr.rel (!%p17_p11) target bundleno = 7 (0x7), region = 95 }
 0x1c8   :  { %1116 = vsyncpa [#allocation4], 1 }
 0x1c9   :  { %1118 = vsyncpa [#allocation4 + $0x1], 1 }
 0x1ca   :  { %1119 = vsyncpa [#allocation7], 1 }
 0x1cb   :  { %1120 = vsyncpa [#allocation5], 1 }
 0x1cc   :  { %1122 = vsyncpa [#allocation5 + $0x1], 1 }

// kernel: elan_h_block_forward.3
= control target key start
LH: loop header
LB: loop body
LE: loop exit
PB: predicated region body
PF: predicated region fallthrough
CT: control target
= control target key end

     0   :  { %s31048_s0 = inlined_call_operand.hbm [shape: f32[2,16,16,16], index: 0, kind: input, shape index: {}]   ;;  %s31049_s1 = inlined_call_operand.hbm [shape: f32[9,8,4], index: 1, kind: input, shape index: {}]   ;;  %s31050_s2 = inlined_call_operand.hbm [shape: f32[1,4], index: 2, kind: input, shape index: {}]   ;;  %s31051_s3 = inlined_call_operand.hbm [shape: f32[9,4,4], index: 3, kind: input, shape index: {}]   ;;  %s31052_s4 = inlined_call_operand.hbm [shape: f32[1,4], index: 4, kind: input, shape index: {}]   ;;  %s31053_s5 = inlined_call_operand.hbm [shape: f32[9,4,4], index: 5, kind: input, shape index: {}]   ;;  %s31054_s6 = inlined_call_operand.hbm [shape: f32[1,4], index: 6, kind: input, shape index: {}]   ;;  %s31055_s7 = inlined_call_operand.hbm [shape: f32[9,4,4], index: 7, kind: input, shape index: {}]   ;;  %s31056_s8 = inlined_call_operand.hbm [shape: f32[1,4], index: 8, kind: input, shape index: {}]   ;;  %s31057_s9 = inlined_call_operand.hbm [shape: f32[16,16], index: 9, kind: input, shape index: {}]   ;;  %s31058_s10 = inlined_call_operand.hbm [shape: f32[4,16], index: 10, kind: input, shape index: {}]   ;;  %s31059_s11 = inlined_call_operand.hbm [shape: f32[4,16], index: 11, kind: input, shape index: {}]   ;;  %s31060_s12 = inlined_call_operand.hbm [shape: f32[4,16], index: 12, kind: input, shape index: {}]   ;;  %s31061_s13 = inlined_call_operand.hbm [shape: f32[4,16], index: 13, kind: input, shape index: {}]   ;;  %s31062_s14 = inlined_call_operand.hbm [shape: f32[1,16], index: 14, kind: input, shape index: {}]   ;;  %s31063_s15 = inlined_call_operand.hbm [shape: f32[2,16,16,16], index: 15, kind: output, shape index: {}]  }
   0x1   :  { %31320 = sst [smem:[#allocation124_spill]] %s31048_s0 }
   0x2   :  { %31321 = sst [smem:[#allocation125_spill]] %s31049_s1 }
   0x3   :  { %31322 = sst [smem:[#allocation126_spill]] %s31050_s2 }
   0x4   :  { %31323 = sst [smem:[#allocation127_spill]] %s31051_s3 }
   0x5   :  { %31324 = sst [smem:[#allocation128_spill]] %s31063_s15 }
   0x6   :  { %20 = vsyncpa [#allocation5], 0 }
   0x7   :  { %22 = vsyncpa [#allocation5 + $0x1], 0 }
   0x8   :  { %23 = vsyncpa [#allocation8], 0 }
   0x9   :  { %24 = vsyncpa [#allocation11], 0 }
   0xa   :  { %25 = vsyncpa [#allocation14], 0 }
   0xb   :  { %26 = vsyncpa [#allocation17], 0 }
   0xc   :  { %27 = vsyncpa [#allocation20], 0 }
   0xd   :  { %28 = vsyncpa [#allocation23], 0 }
   0xe   :  { %29 = vsyncpa [#allocation26], 0 }
   0xf   :  { %30 = vsyncpa [#allocation6], 0 }
  0x10   :  { %32 = vsyncpa [#allocation6 + $0x1], 0  ;;  %s25781_s18 = smov 0   ;;  %s25783_s19 = smov 0  }
  0x11   :  { %s25785_s20 = smov 0   ;;  %s25787_s21 = smov 0  }
  0x12 LB: > { %31325 = sst [smem:[#allocation38_spill]] %s25663_s18  ;;  %s25677_s22 = smov [#allocation7]   ;;  %s25675_s21 = sphi %s25787_s21, %s31812_s21   ;;  %s25671_s20 = sphi %s25785_s20, %s31811_s20   ;;  %s25667_s19 = sphi %s25783_s19, %s31810_s19   ;;  %s25663_s18 = sphi %s25781_s18, %s31809_s18  }
  0x13   : > { %31326 = sst [smem:[#allocation39_spill]] %s25667_s19  ;;  %s401_s23 = sshll.u32 %s25677_s22, 4  ;;  %s25807_s23 = int_to_ptr.vmem [resolvable:$true] %s401_s23 }
  0x14   : > { %31327 = sst [smem:[#allocation40_spill]] %s25671_s20  ;;  %s25802_s24 = sadd.s32 4294967295, %s25675_s21  }
  0x15   : > { %31328 = sst [smem:[#allocation41_spill]] %s25802_s24  ;;  %p18144_p0 = scmp.ge.s32.totalorder %s25675_s21, 1 }
  0x16   : > { %p31074_p1 = scmp.eq.s32.totalorder %s25802_s24, 0  ;;  %p389_p2 = scmp.lt.s32.totalorder %s25675_s21, 3 }
  0x17   : > { %s25678_s26 = smov [#allocation10]   ;;  %s25679_s29 = smov [#allocation13]  }
  0x18   : > { %p25809_p3 = pnand %p18144_p0, %p389_p2  ;;  %s425_s27 = sshll.u32 %s25678_s26, 4  ;;  %s25822_s27 = int_to_ptr.vmem [resolvable:$true] %s425_s27 }
  0x19   : > { %s25824_s30 = sshll.u32 %s25679_s29, 4  ;;  %s31332_s1 = sld [smem:[#allocation125_spill]]  ;;  %s450_s30 = int_to_ptr.vmem [resolvable:$true] %s25824_s30 }
  0x1a   : > { %s31329_s25 = scalar_select %p25809_p3, 1, 0 }
  0x1b   : > { %p24351_p5 = pneg %p25809_p3 }
  0x1c   : > { %31330 = sst [smem:[#allocation42_spill]] %s31329_s25 }
  0x1d   : > { %p25818_p6 = pnand %p24351_p5, %p31074_p1 }
  0x1f   : > { %s25159_s22 = scalar_lea.hbm %s31332_s1, 1152  ;;  %p25834_p8 = pneg %p25818_p6 }
  0x20   : > { %p25160_p7 = scmp.ne.s32.totalorder %s31332_s1, %s25159_s22  ;;  %p25166_p11 = scmp.lt.u32.totalorder %s25159_s22, %s31332_s1 }
  0x22   : > { %p25162_p9 = pnand %p25834_p8, %p25160_p7 }
  0x24   : > { %p25163_p10 = pneg %p25162_p9 }
  0x26   : > { %p25168_p12 = pnand %p25166_p11, %p25163_p10 }
  0x28   : > { %25171 = shalt.err (!%p25168_p12)
}
  0x29   : > { %s25172_s15 = scalar_lea.vmem %s25807_s23, 1152  ;;  %p25180_p5 = scmp.lt.s32.totalorder %s25807_s23, %s25807_s23 }
  0x2a   : > { %p25173_p13 = scmp.ne.s32.totalorder %s25807_s23, %s25172_s15  ;;  %p25181_p4 = scmp.lt.s32.totalorder %s25172_s15, %s25172_s15 }
  0x2c   : > { %p25175_p0 = pnand %p25173_p13, %p25834_p8  ;;  %p25182_p7 = por %p25181_p4, %p25180_p5 }
  0x2e   : > { %p25176_p2 = pneg %p25175_p0 }
  0x30   : > { %p25183_p9 = pnand %p25182_p7, %p25176_p2 }
  0x32   : > { %25186 = shalt.err (!%p25183_p9)
}
  0x33   : > { %s31072_s25 = smov 128   ;;  %s31076_s0 = smov 8  }
  0x34   : > { %24354 = dma.hbm_to_vmem [thread:$0]  (!%p25818_p6), %s31332_s1, 1152, %s25807_s23, [#allocation8], %s31072_s25, %s31072_s25, %s31076_s0  }
  0x35   : > { %s31334_s3 = sld [smem:[#allocation127_spill]] }
  0x3b   : > { %s25187_s15 = scalar_lea.hbm %s31334_s3, 576 }
  0x3c   : > { %p25188_p4 = scmp.ne.s32.totalorder %s31334_s3, %s25187_s15  ;;  %p25194_p12 = scmp.lt.u32.totalorder %s25187_s15, %s31334_s3 }
  0x3e   : > { %p25190_p10 = pnand %p25188_p4, %p25834_p8 }
  0x40   : > { %p25191_p11 = pneg %p25190_p10 }
  0x42   : > { %p25196_p13 = pnand %p25194_p12, %p25191_p11 }
  0x44   : > { %25199 = shalt.err (!%p25196_p13)
}
  0x45   : > { %s25200_s23 = scalar_lea.vmem %s25822_s27, 576  ;;  %p25208_p7 = scmp.lt.s32.totalorder %s25822_s27, %s25822_s27 }
  0x46   : > { %p25201_p0 = scmp.ne.s32.totalorder %s25822_s27, %s25200_s23  ;;  %p25209_p9 = scmp.lt.s32.totalorder %s25200_s23, %s25200_s23 }
  0x48   : > { %p25203_p2 = pnand %p25201_p0, %p25834_p8  ;;  %p25210_p4 = por %p25209_p9, %p25208_p7 }
  0x4a   : > { %p25204_p5 = pneg %p25203_p2 }
  0x4c   : > { %p25211_p10 = pnand %p25210_p4, %p25204_p5 }
  0x4e   : > { %25214 = shalt.err (!%p25211_p10)
}
  0x4f   : > { %s25682_s18 = smov 64   ;;  %s25683_s19 = smov 4  }
  0x50   : > { %24360 = dma.hbm_to_vmem [thread:$0]  (!%p25818_p6), %s31334_s3, 576, %s25822_s27, [#allocation11], %s25682_s18, %s25682_s18, %s25683_s19  }
  0x51   : > { %s25215_s22 = scalar_lea.hbm %s31053_s5, 576 }
  0x52   : > { %p25216_p11 = scmp.ne.s32.totalorder %s31053_s5, %s25215_s22  ;;  %p25222_p0 = scmp.lt.u32.totalorder %s25215_s22, %s31053_s5 }
  0x54   : > { %p25218_p12 = pnand %p25216_p11, %p25834_p8 }
  0x56   : > { %p25219_p13 = pneg %p25218_p12 }
  0x58   : > { %p25224_p2 = pnand %p25222_p0, %p25219_p13 }
  0x5a   : > { %25227 = shalt.err (!%p25224_p2)
}
  0x5b   : > { %s25228_s20 = scalar_lea.vmem %s450_s30, 576  ;;  %p25236_p4 = scmp.lt.s32.totalorder %s450_s30, %s450_s30 }
  0x5c   : > { %p25229_p5 = scmp.ne.s32.totalorder %s450_s30, %s25228_s20  ;;  %p25237_p10 = scmp.lt.s32.totalorder %s25228_s20, %s25228_s20 }
  0x5e   : > { %p25231_p7 = pnand %p25229_p5, %p25834_p8  ;;  %p25238_p1 = por %p25237_p10, %p25236_p4 }
  0x60   : > { %p25232_p9 = pneg %p25231_p7 }
  0x62   : > { %p25239_p3 = pnand %p25238_p1, %p25232_p9 }
  0x64   : > { %25242 = shalt.err (!%p25239_p3)
}
  0x65   : > { %24366 = dma.hbm_to_vmem [thread:$0]  (!%p25818_p6), %s31053_s5, 576, %s450_s30, [#allocation14], %s25682_s18, %s25682_s18, %s25683_s19  }
  0x66   : > { %s25684_s24 = smov [#allocation16]   ;;  %s25685_s17 = smov [#allocation19]  }
  0x67   : > { %s473_s16 = sshll.u32 %s25684_s24, 4  ;;  %s497_s22 = sshll.u32 %s25685_s17, 4  ;;  %s474_s16 = int_to_ptr.vmem [resolvable:$true] %s473_s16  ;;  %s498_s22 = int_to_ptr.vmem [resolvable:$true] %s497_s22 }
  0x68   : > { %s25243_s23 = scalar_lea.hbm %s31055_s7, 576 }
  0x69   : > { %p25244_p1 = scmp.ne.s32.totalorder %s31055_s7, %s25243_s23  ;;  %p25250_p12 = scmp.lt.u32.totalorder %s25243_s23, %s31055_s7 }
  0x6b   : > { %p25246_p3 = pnand %p25244_p1, %p25834_p8 }
  0x6d   : > { %p25247_p11 = pneg %p25246_p3 }
  0x6f   : > { %p25252_p13 = pnand %p25250_p12, %p25247_p11 }
  0x71   : > { %25255 = shalt.err (!%p25252_p13)
}
  0x72   : > { %s25256_s30 = scalar_lea.vmem %s474_s16, 576  ;;  %p25264_p7 = scmp.lt.s32.totalorder %s474_s16, %s474_s16 }
  0x73   : > { %p25257_p0 = scmp.ne.s32.totalorder %s474_s16, %s25256_s30  ;;  %p25265_p9 = scmp.lt.s32.totalorder %s25256_s30, %s25256_s30 }
  0x75   : > { %p25259_p2 = pnand %p25257_p0, %p25834_p8  ;;  %p25266_p4 = por %p25265_p9, %p25264_p7 }
  0x77   : > { %p25260_p5 = pneg %p25259_p2 }
  0x79   : > { %p25267_p10 = pnand %p25266_p4, %p25260_p5 }
  0x7b   : > { %25270 = shalt.err (!%p25267_p10)
}
  0x7c   : > { %24372 = dma.hbm_to_vmem [thread:$0]  (!%p25818_p6), %s31055_s7, 576, %s474_s16, [#allocation17], %s25682_s18, %s25682_s18, %s25683_s19  }
  0x7d   : > { %s25271_s17 = scalar_lea.hbm %s31057_s9, 256 }
  0x7e   : > { %p25272_p1 = scmp.ne.s32.totalorder %s31057_s9, %s25271_s17  ;;  %p25278_p12 = scmp.lt.u32.totalorder %s25271_s17, %s31057_s9 }
  0x80   : > { %p25274_p3 = pnand %p25272_p1, %p25834_p8 }
  0x82   : > { %p25275_p11 = pneg %p25274_p3 }
  0x84   : > { %p25280_p13 = pnand %p25278_p12, %p25275_p11 }
  0x86   : > { %25283 = shalt.err (!%p25280_p13)
}
  0x87   : > { %s25284_s27 = scalar_lea.vmem %s498_s22, 256  ;;  %p25292_p7 = scmp.lt.s32.totalorder %s498_s22, %s498_s22 }
  0x88   : > { %p25285_p0 = scmp.ne.s32.totalorder %s498_s22, %s25284_s27  ;;  %p25293_p9 = scmp.lt.s32.totalorder %s25284_s27, %s25284_s27 }
  0x8a   : > { %p25287_p2 = pnand %p25285_p0, %p25834_p8  ;;  %p25294_p4 = por %p25293_p9, %p25292_p7 }
  0x8c   : > { %p25288_p5 = pneg %p25287_p2 }
  0x8e   : > { %p25295_p10 = pnand %p25294_p4, %p25288_p5 }
  0x90   : > { %25298 = shalt.err (!%p25295_p10)
}
  0x91   : > { %s31335_s18 = smov 8   ;;  %s31336_s19 = smov 128  }
  0x92   : > { %24378 = dma.hbm_to_vmem [thread:$0]  (!%p25818_p6), %s31057_s9, 256, %s498_s22, [#allocation20], %s31336_s19, %s31336_s19, %s31335_s18  }
  0x93   : > { %s25686_s1 = smov [#allocation22]   ;;  %s25687_s25 = smov [#allocation25]  }
  0x94   : > { %s522_s0 = sshll.u32 %s25686_s1, 4  ;;  %s544_s24 = sshll.u32 %s25687_s25, 4  ;;  %s523_s0 = int_to_ptr.vmem [resolvable:$true] %s522_s0  ;;  %s545_s24 = int_to_ptr.vmem [resolvable:$true] %s544_s24 }
  0x95   : > { %s25299_s15 = scalar_lea.hbm %s31059_s11, 64 }
  0x96   : > { %p25300_p1 = scmp.ne.s32.totalorder %s31059_s11, %s25299_s15  ;;  %p25306_p12 = scmp.lt.u32.totalorder %s25299_s15, %s31059_s11 }
  0x98   : > { %p25302_p3 = pnand %p25300_p1, %p25834_p8 }
  0x9a   : > { %p25303_p11 = pneg %p25302_p3 }
  0x9c   : > { %p25308_p13 = pnand %p25306_p12, %p25303_p11 }
  0x9e   : > { %25311 = shalt.err (!%p25308_p13)
}
  0x9f   : > { %s25312_s22 = scalar_lea.vmem %s523_s0, 64  ;;  %p25320_p7 = scmp.lt.s32.totalorder %s523_s0, %s523_s0 }
  0xa0   : > { %p25313_p0 = scmp.ne.s32.totalorder %s523_s0, %s25312_s22  ;;  %p25321_p9 = scmp.lt.s32.totalorder %s25312_s22, %s25312_s22 }
  0xa2   : > { %p25315_p2 = pnand %p25313_p0, %p25834_p8  ;;  %p25322_p4 = por %p25321_p9, %p25320_p7 }
  0xa4   : > { %p25316_p5 = pneg %p25315_p2 }
  0xa6   : > { %p25323_p10 = pnand %p25322_p4, %p25316_p5 }
  0xa8   : > { %25326 = shalt.err (!%p25323_p10)
}
  0xa9   : > { %24384 = dma.hbm_to_vmem [thread:$0]  (!%p25818_p6), %s31059_s11, 64, %s523_s0, [#allocation23]  }
  0xaa   : > { %s25327_s29 = scalar_lea.hbm %s31061_s13, 64 }
  0xab   : > { %p25328_p1 = scmp.ne.s32.totalorder %s31061_s13, %s25327_s29  ;;  %p25334_p12 = scmp.lt.u32.totalorder %s25327_s29, %s31061_s13 }
  0xad   : > { %p25330_p3 = pnand %p25328_p1, %p25834_p8 }
  0xaf   : > { %p25331_p11 = pneg %p25330_p3 }
  0xb1   : > { %p25336_p13 = pnand %p25334_p12, %p25331_p11 }
  0xb3   : > { %25339 = shalt.err (!%p25336_p13)
}
  0xb4   : > { %s25340_s16 = scalar_lea.vmem %s545_s24, 64  ;;  %p25348_p7 = scmp.lt.s32.totalorder %s545_s24, %s545_s24 }
  0xb5   : > { %p25341_p0 = scmp.ne.s32.totalorder %s545_s24, %s25340_s16  ;;  %p25349_p9 = scmp.lt.s32.totalorder %s25340_s16, %s25340_s16 }
  0xb7   : > { %p25343_p2 = pnand %p25341_p0, %p25834_p8  ;;  %p25350_p4 = por %p25349_p9, %p25348_p7 }
  0xb9   : > { %p25344_p5 = pneg %p25343_p2 }
  0xbb   : > { %p25351_p10 = pnand %p25350_p4, %p25344_p5 }
  0xbd   : > { %25354 = shalt.err (!%p25351_p10)
}
  0xbe   : > { %24390 = dma.hbm_to_vmem [thread:$0]  (!%p25818_p6), %s31061_s13, 64, %s545_s24, [#allocation26]  }
  0xbf   : > { %s25688_s30 = smov [#allocation9]   ;;  %s25689_s25 = smov [#allocation12]  }
  0xc0   : > { %s415_s1 = sshll.u32 %s25688_s30, 4  ;;  %s439_s17 = sshll.u32 %s25689_s25, 4  ;;  %s416_s1 = int_to_ptr.vmem [resolvable:$true] %s415_s1  ;;  %s440_s17 = int_to_ptr.vmem [resolvable:$true] %s439_s17 }
  0xc1   : > { %s31337_s2 = sld [smem:[#allocation126_spill]] }
  0xc7   : > { %s25355_s23 = scalar_lea.hbm %s31337_s2, 16 }
  0xc8   : > { %p25356_p1 = scmp.ne.s32.totalorder %s31337_s2, %s25355_s23  ;;  %p25362_p12 = scmp.lt.u32.totalorder %s25355_s23, %s31337_s2 }
  0xca   : > { %p25358_p3 = pnand %p25356_p1, %p25834_p8 }
  0xcc   : > { %p25359_p11 = pneg %p25358_p3 }
  0xce   : > { %p25364_p13 = pnand %p25362_p12, %p25359_p11 }
  0xd0   : > { %25367 = shalt.err (!%p25364_p13)
}
  0xd1   : > { %s25368_s24 = scalar_lea.vmem %s416_s1, 16  ;;  %s25375_s22 = scalar_lea.vmem %s416_s1, 32 }
  0xd2   : > { %p25369_p0 = scmp.ne.s32.totalorder %s416_s1, %s25368_s24  ;;  %p25376_p7 = scmp.lt.s32.totalorder %s416_s1, %s416_s1 }
  0xd3   : > { %p25377_p9 = scmp.lt.s32.totalorder %s25375_s22, %s25368_s24 }
  0xd4   : > { %p25371_p2 = pnand %p25369_p0, %p25834_p8 }
  0xd5   : > { %p25378_p4 = por %p25377_p9, %p25376_p7 }
  0xd6   : > { %p25372_p5 = pneg %p25371_p2 }
  0xd8   : > { %p25379_p10 = pnand %p25378_p4, %p25372_p5 }
  0xda   : > { %25382 = shalt.err (!%p25379_p10)
}
  0xdb   : > { %24357 = dma.hbm_to_vmem [thread:$0]  (!%p25818_p6), %s31337_s2, 16, %s416_s1, [#allocation8]  }
  0xdc   : > { %s25383_s23 = scalar_lea.hbm %s31052_s4, 16 }
  0xdd   : > { %p25384_p1 = scmp.ne.s32.totalorder %s31052_s4, %s25383_s23  ;;  %p25390_p12 = scmp.lt.u32.totalorder %s25383_s23, %s31052_s4 }
  0xdf   : > { %p25386_p3 = pnand %p25384_p1, %p25834_p8 }
  0xe1   : > { %p25387_p11 = pneg %p25386_p3 }
  0xe3   : > { %p25392_p13 = pnand %p25390_p12, %p25387_p11 }
  0xe5   : > { %25395 = shalt.err (!%p25392_p13)
}
  0xe6   : > { %s25396_s24 = scalar_lea.vmem %s440_s17, 16  ;;  %s25403_s1 = scalar_lea.vmem %s440_s17, 32 }
  0xe7   : > { %p25397_p0 = scmp.ne.s32.totalorder %s440_s17, %s25396_s24  ;;  %p25404_p7 = scmp.lt.s32.totalorder %s440_s17, %s440_s17 }
  0xe8   : > { %p25405_p9 = scmp.lt.s32.totalorder %s25403_s1, %s25396_s24 }
  0xe9   : > { %p25399_p2 = pnand %p25397_p0, %p25834_p8 }
  0xea   : > { %p25406_p4 = por %p25405_p9, %p25404_p7 }
  0xeb   : > { %p25400_p5 = pneg %p25399_p2 }
  0xed   : > { %p25407_p10 = pnand %p25406_p4, %p25400_p5 }
  0xef   : > { %25410 = shalt.err (!%p25407_p10)
}
  0xf0   : > { %24363 = dma.hbm_to_vmem [thread:$0]  (!%p25818_p6), %s31052_s4, 16, %s440_s17, [#allocation11]  }
  0xf1   : > { %s25690_s25 = smov [#allocation15]   ;;  %s25691_s15 = smov [#allocation18]  }
  0xf2   : > { %s463_s29 = sshll.u32 %s25690_s25, 4  ;;  %s487_s23 = sshll.u32 %s25691_s15, 4  ;;  %s464_s29 = int_to_ptr.vmem [resolvable:$true] %s463_s29  ;;  %s488_s23 = int_to_ptr.vmem [resolvable:$true] %s487_s23 }
  0xf3   : > { %s25411_s16 = scalar_lea.hbm %s31054_s6, 16 }
  0xf4   : > { %p25412_p1 = scmp.ne.s32.totalorder %s31054_s6, %s25411_s16  ;;  %p25418_p12 = scmp.lt.u32.totalorder %s25411_s16, %s31054_s6 }
  0xf6   : > { %p25414_p3 = pnand %p25412_p1, %p25834_p8 }
  0xf8   : > { %p25415_p11 = pneg %p25414_p3 }
  0xfa   : > { %p25420_p13 = pnand %p25418_p12, %p25415_p11 }
  0xfc   : > { %25423 = shalt.err (!%p25420_p13)
}
  0xfd   : > { %s25424_s17 = scalar_lea.vmem %s464_s29, 16  ;;  %s25431_s30 = scalar_lea.vmem %s464_s29, 32 }
  0xfe   : > { %p25425_p0 = scmp.ne.s32.totalorder %s464_s29, %s25424_s17  ;;  %p25432_p7 = scmp.lt.s32.totalorder %s464_s29, %s464_s29 }
  0xff   : > { %p25433_p9 = scmp.lt.s32.totalorder %s25431_s30, %s25424_s17 }
 0x100   : > { %p25427_p2 = pnand %p25425_p0, %p25834_p8 }
 0x101   : > { %p25434_p4 = por %p25433_p9, %p25432_p7 }
 0x102   : > { %p25428_p5 = pneg %p25427_p2 }
 0x104   : > { %p25435_p10 = pnand %p25434_p4, %p25428_p5 }
 0x106   : > { %25438 = shalt.err (!%p25435_p10)
}
 0x107   : > { %24369 = dma.hbm_to_vmem [thread:$0]  (!%p25818_p6), %s31054_s6, 16, %s464_s29, [#allocation14]  }
 0x108   : > { %s25439_s16 = scalar_lea.hbm %s31056_s8, 16 }
 0x109   : > { %p25440_p1 = scmp.ne.s32.totalorder %s31056_s8, %s25439_s16  ;;  %p25446_p12 = scmp.lt.u32.totalorder %s25439_s16, %s31056_s8 }
 0x10b   : > { %p25442_p3 = pnand %p25440_p1, %p25834_p8 }
 0x10d   : > { %p25443_p11 = pneg %p25442_p3 }
 0x10f   : > { %p25448_p13 = pnand %p25446_p12, %p25443_p11 }
 0x111   : > { %25451 = shalt.err (!%p25448_p13)
}
 0x112   : > { %s25452_s17 = scalar_lea.vmem %s488_s23, 16  ;;  %s25459_s29 = scalar_lea.vmem %s488_s23, 32 }
 0x113   : > { %p25453_p0 = scmp.ne.s32.totalorder %s488_s23, %s25452_s17  ;;  %p25460_p7 = scmp.lt.s32.totalorder %s488_s23, %s488_s23 }
 0x114   : > { %p25461_p9 = scmp.lt.s32.totalorder %s25459_s29, %s25452_s17 }
 0x115   : > { %p25455_p2 = pnand %p25453_p0, %p25834_p8 }
 0x116   : > { %p25462_p4 = por %p25461_p9, %p25460_p7 }
 0x117   : > { %p25456_p5 = pneg %p25455_p2 }
 0x119   : > { %p25463_p10 = pnand %p25462_p4, %p25456_p5 }
 0x11b   : > { %25466 = shalt.err (!%p25463_p10)
}
 0x11c   : > { %24375 = dma.hbm_to_vmem [thread:$0]  (!%p25818_p6), %s31056_s8, 16, %s488_s23, [#allocation17]  }
 0x11d   : > { %s25692_s15 = smov [#allocation21]   ;;  %s25693_s27 = smov [#allocation24]  }
 0x11e   : > { %s511_s20 = sshll.u32 %s25692_s15, 4  ;;  %s533_s16 = sshll.u32 %s25693_s27, 4  ;;  %s512_s20 = int_to_ptr.vmem [resolvable:$true] %s511_s20  ;;  %s534_s16 = int_to_ptr.vmem [resolvable:$true] %s533_s16 }
 0x11f   : > { %s25467_s1 = scalar_lea.hbm %s31058_s10, 64 }
 0x120   : > { %p25468_p1 = scmp.ne.s32.totalorder %s31058_s10, %s25467_s1  ;;  %p25474_p12 = scmp.lt.u32.totalorder %s25467_s1, %s31058_s10 }
 0x122   : > { %p25470_p3 = pnand %p25468_p1, %p25834_p8 }
 0x124   : > { %p25471_p11 = pneg %p25470_p3 }
 0x126   : > { %p25476_p13 = pnand %p25474_p12, %p25471_p11 }
 0x128   : > { %25479 = shalt.err (!%p25476_p13)
}
 0x129   : > { %s25480_s23 = scalar_lea.vmem %s512_s20, 64  ;;  %p25488_p7 = scmp.lt.s32.totalorder %s512_s20, %s512_s20 }
 0x12a   : > { %p25481_p0 = scmp.ne.s32.totalorder %s512_s20, %s25480_s23  ;;  %p25489_p9 = scmp.lt.s32.totalorder %s25480_s23, %s25480_s23 }
 0x12c   : > { %p25483_p2 = pnand %p25481_p0, %p25834_p8  ;;  %p25490_p4 = por %p25489_p9, %p25488_p7 }
 0x12e   : > { %p25484_p5 = pneg %p25483_p2 }
 0x130   : > { %p25491_p10 = pnand %p25490_p4, %p25484_p5 }
 0x132   : > { %25494 = shalt.err (!%p25491_p10)
}
 0x133   : > { %24381 = dma.hbm_to_vmem [thread:$0]  (!%p25818_p6), %s31058_s10, 64, %s512_s20, [#allocation20]  }
 0x134   : > { %s25495_s24 = scalar_lea.hbm %s31060_s12, 64 }
 0x135   : > { %p25496_p1 = scmp.ne.s32.totalorder %s31060_s12, %s25495_s24  ;;  %p25502_p12 = scmp.lt.u32.totalorder %s25495_s24, %s31060_s12 }
 0x137   : > { %p25498_p3 = pnand %p25496_p1, %p25834_p8 }
 0x139   : > { %p25499_p11 = pneg %p25498_p3 }
 0x13b   : > { %p25504_p13 = pnand %p25502_p12, %p25499_p11 }
 0x13d   : > { %25507 = shalt.err (!%p25504_p13)
}
 0x13e   : > { %s25508_s30 = scalar_lea.vmem %s534_s16, 64  ;;  %p25516_p7 = scmp.lt.s32.totalorder %s534_s16, %s534_s16 }
 0x13f   : > { %p25509_p0 = scmp.ne.s32.totalorder %s534_s16, %s25508_s30  ;;  %p25517_p9 = scmp.lt.s32.totalorder %s25508_s30, %s25508_s30 }
 0x141   : > { %p25511_p2 = pnand %p25509_p0, %p25834_p8  ;;  %p25518_p4 = por %p25517_p9, %p25516_p7 }
 0x143   : > { %p25512_p5 = pneg %p25511_p2 }
 0x145   : > { %p25519_p10 = pnand %p25518_p4, %p25512_p5 }
 0x147   : > { %25522 = shalt.err (!%p25519_p10)
}
 0x148   : > { %24387 = dma.hbm_to_vmem [thread:$0]  (!%p25818_p6), %s31060_s12, 64, %s534_s16, [#allocation23]  }
 0x149   : > { %s25694_s25 = smov [#allocation27]   ;;  %s25523_s24 = scalar_lea.hbm %s31062_s14, 16 }
 0x14a   : > { %s555_s15 = sshll.u32 %s25694_s25, 4  ;;  %p25524_p1 = scmp.ne.s32.totalorder %s31062_s14, %s25523_s24  ;;  %s556_s15 = int_to_ptr.vmem [resolvable:$true] %s555_s15 }
 0x14b   : > { %p25530_p12 = scmp.lt.u32.totalorder %s25523_s24, %s31062_s14 }
 0x14c   : > { %p25526_p3 = pnand %p25524_p1, %p25834_p8 }
 0x14e   : > { %p25527_p11 = pneg %p25526_p3 }
 0x150   : > { %p25532_p13 = pnand %p25530_p12, %p25527_p11 }
 0x152   : > { %25535 = shalt.err (!%p25532_p13)
}
 0x153   : > { %s25536_s16 = scalar_lea.vmem %s556_s15, 16  ;;  %s25543_s30 = scalar_lea.vmem %s556_s15, 32 }
 0x154   : > { %p25537_p0 = scmp.ne.s32.totalorder %s556_s15, %s25536_s16  ;;  %p25544_p7 = scmp.lt.s32.totalorder %s556_s15, %s556_s15 }
 0x155   : > { %p25545_p9 = scmp.lt.s32.totalorder %s25543_s30, %s25536_s16 }
 0x156   : > { %p25539_p2 = pnand %p25537_p0, %p25834_p8 }
 0x157   : > { %p25546_p4 = por %p25545_p9, %p25544_p7 }
 0x158   : > { %p25540_p5 = pneg %p25539_p2 }
 0x15a   : > { %p25547_p10 = pnand %p25546_p4, %p25540_p5 }
 0x15c   : > { %25550 = shalt.err (!%p25547_p10)
}
 0x15d   : > { %s31338_s25 = sld [smem:[#allocation40_spill]]  ;;  %s31339_s27 = sld [smem:[#allocation39_spill]] }
 0x15e   : > { %s31340_s26 = sld [smem:[#allocation38_spill]]  ;;  %s31341_s0 = sld [smem:[#allocation41_spill]] }
 0x15f   : > { %24393 = dma.hbm_to_vmem [thread:$0]  (!%p25818_p6), %s31062_s14, 16, %s556_s15, [#allocation26]  }
 0x160   : > { %s18143_s24 = sadd.s32 4294967294, %s25675_s21   ;;  %s26112_s28 = sadd.s32 1, %s25675_s21  }
 0x161   : > { %s42_s1 = ssub.s32 %s25675_s21, %s26112_s28  ;;  %p53_p3 = scmp.eq.s32.totalorder %s25675_s21, 0 }
 0x162   : > { %p43_p8 = scmp.eq.s32.totalorder %s42_s1, 0  ;;  %p382_p2 = scmp.eq.s32.totalorder %s18143_s24, 1 }
 0x163   : > { %s45_s22 = sadd.s32 1, %s31338_s25  ;;  %p52_p1 = scmp.ne.s32.totalorder %s31338_s25, %s31339_s27 }
 0x164   : > { %p58_p11 = scmp.ne.s32.totalorder %s31339_s27, %s31340_s26  ;;  %p31343_p13 = scmp.eq.s32.totalorder %s31341_s0, 0 }
 0x165   : > { %s26123_s17 = scalar_select %p43_p8, %s31338_s25, %s45_s22  }
 0x166   : > { %p26125_p12 = por %p53_p3, %p52_p1  ;;  %p26131_p6 = por %p31343_p13, %p58_p11 }
 0x167   : > { %p376_p0 = scmp.eq.s32.totalorder %s31341_s0, 1  ;;  %p24416_p5 = scmp.lt.s32.totalorder %s25675_s21, 2 }
 0x168   : > { %s566_s16 = sand.u32 1, %s31338_s25   ;;  %p26142_p9 = por %p382_p2, %p58_p11 }
 0x169   : > { %p26138_p7 = por %p376_p0, %p52_p1  ;;  %s18160_s23 = sshll.u32 %s566_s16, 8 }
 0x16a   : > { %s31346_s20 = scalar_select %p26142_p9, 1, 0 }
 0x16b   : > { %s31345_s30 = scalar_select %p26138_p7, 1, 0 }
 0x16c   : > { %s19693_s27 = sshll.u32 %s25675_s21, 12  ;;  %s31347_s22 = sld [smem:[#allocation124_spill]] }
 0x16d   : > { %s570_s25 = scalar_lea.vmem [#allocation4], %s18160_s23  ;;  %p26156_p4 = pnand %p24416_p5, %p26125_p12 }
 0x16e   : > { %s577_s0 = sshll.u32 %s570_s25, 4  ;;  %s26160_s3 = scalar_lea.sflag [#allocation5], %s566_s16  ;;  %s26152_s0 = int_to_ptr.vmem [resolvable:$true] %s577_s0 }
 0x16f   : > { %p25553_p8 = pneg %p26156_p4 }
 0x172   : > { %s26150_s2 = scalar_lea.hbm %s31347_s22, %s19693_s27  ;;  %s25556_s29 = scalar_lea.hbm %s31347_s22, 8192 }
 0x173   : > { %s25551_s26 = scalar_lea.hbm %s26150_s2, 4096  ;;  %p25557_p11 = scmp.lt.u32.totalorder %s26150_s2, %s31347_s22 }
 0x174   : > { %p25552_p10 = scmp.ne.s32.totalorder %s26150_s2, %s25551_s26  ;;  %p25558_p12 = scmp.lt.u32.totalorder %s25556_s29, %s25551_s26 }
 0x175   : > { %p25560_p0 = scmp.lt.u32.totalorder %s25551_s26, %s26150_s2 }
 0x176   : > { %p25554_p1 = pnand %p25553_p8, %p25552_p10  ;;  %p25559_p13 = por %p25558_p12, %p25557_p11 }
 0x178   : > { %p25555_p3 = pneg %p25554_p1  ;;  %p25561_p2 = por %p25560_p0, %p25559_p13 }
 0x17a   : > { %p25562_p5 = pnand %p25561_p2, %p25555_p3 }
 0x17c   : > { %25565 = shalt.err (!%p25562_p5)
}
 0x17d   : > { %s25566_s16 = scalar_lea.vmem %s26152_s0, 4096  ;;  %s25695_s23 = smov [#allocation4]  }
 0x17e   : > { %p25567_p10 = scmp.ne.s32.totalorder %s26152_s0, %s25566_s16  ;;  %s25571_s27 = sshll.u32 %s25695_s23, 4  ;;  %s25572_s27 = int_to_ptr.vmem [resolvable:$false] %s25571_s27 }
 0x17f   : > { %s25573_s1 = scalar_lea.vmem %s25572_s27, 8192  ;;  %p25574_p7 = scmp.lt.s32.totalorder %s26152_s0, %s25572_s27 }
 0x180   : > { %p25569_p1 = pnand %p25567_p10, %p25553_p8  ;;  %p25575_p11 = scmp.lt.s32.totalorder %s25573_s1, %s25566_s16 }
 0x182   : > { %p25570_p9 = pneg %p25569_p1  ;;  %p25576_p12 = por %p25575_p11, %p25574_p7 }
 0x184   : > { %p25577_p13 = pnand %p25576_p12, %p25570_p9 }
 0x186   : > { %25580 = shalt.err (!%p25577_p13)
}
 0x187   : > { %24397 = dma.hbm_to_vmem [thread:$0]  (!%p26156_p4), %s26150_s2, 4096, %s26152_s0, %s26160_s3, %s31336_s19, %s31336_s19, %s31335_s18  }
 0x188   : > { %s31349_s26 = sld [smem:[#allocation42_spill]] }
 0x18e   : > { %p31350_p8 = scmp.ne.s32.totalorder %s31349_s26, 0 }
 0x190   : > { %589 = sbr.rel (%p31350_p8) target bundleno = 4000 (0xfa0), region = 80 }
 0x197   : > { %s31351_s29 = sld [smem:[#allocation39_spill]] }
 0x19d   : > { %s26194_s25 = sand.u32 1, %s31351_s29  }
 0x19e   : > { %s18164_s16 = sshll.u32 %s26194_s25, 8  ;;  %s592_s23 = scalar_lea.sflag [#allocation5], %s26194_s25 }
 0x19f   : > { %s26200_s24 = scalar_lea.vmem [#allocation4], %s18164_s16 }
 0x1a0   : > { %25626 = dma.done.wait (%p26131_p6), %s592_s23, 4096  }
 0x1a1   : > { %25628 = vsyncadd (%p26131_p6), %s592_s23, 4294963200  ;;  %s31352_s2 = sld [smem:[#allocation41_spill]] }
 0x1a7   : > { %p31353_p7 = scmp.eq.s32.totalorder %s31352_s2, 0 }
 0x1a9   : > { %25630 = dma.done.wait (%p31353_p7), [#allocation8], 1168   ;;  %p31354_p9 = pmov %p31353_p7 }
 0x1aa   : > { %p31355_p4 = pmov %p31353_p7 }
 0x1ab   : > { %25632 = vsyncadd (%p31354_p9), [#allocation8], 4294966128 }
 0x1ac   : > { %25634 = dma.done.wait (%p31355_p4), [#allocation11], 592   ;;  %p31356_p3 = pmov %p31355_p4 }
 0x1ae   : > { %25636 = vsyncadd (%p31356_p3), [#allocation11], 4294966704  ;;  %p31357_p0 = pmov %p31356_p3 }
 0x1b0   : > { %25638 = dma.done.wait (%p31357_p0), [#allocation14], 592   ;;  %p31358_p2 = pmov %p31357_p0 }
 0x1b1   : > { %p31359_p6 = pmov %p31357_p0 }
 0x1b2   : > { %25640 = vsyncadd (%p31358_p2), [#allocation14], 4294966704 }
 0x1b3   : > { %25642 = dma.done.wait (%p31359_p6), [#allocation17], 592   ;;  %p31360_p5 = pmov %p31357_p0 }
 0x1b4   : > { %p31361_p10 = pmov %p31357_p0 }
 0x1b5   : > { %25644 = vsyncadd (%p31360_p5), [#allocation17], 4294966704 }
 0x1b6   : > { %25646 = dma.done.wait (%p31361_p10), [#allocation20], 320   ;;  %p31362_p1 = pmov %p31357_p0 }
 0x1b7   : > { %p31363_p11 = pmov %p31357_p0 }
 0x1b8   : > { %25648 = vsyncadd (%p31362_p1), [#allocation20], 4294966976 }
 0x1b9   : > { %25650 = dma.done.wait (%p31363_p11), [#allocation23], 128   ;;  %p31364_p12 = pmov %p31357_p0 }
 0x1ba   : > { %p31365_p13 = pmov %p31357_p0 }
 0x1bb   : > { %25652 = vsyncadd (%p31364_p12), [#allocation23], 4294967168 }
 0x1bc   : > { %25654 = dma.done.wait (%p31365_p13), [#allocation26], 80   ;;  %p31366_p8 = pmov %p31357_p0 }
 0x1bd   : > { %vm698_vm0 = vcmask 64512   ;;  %vm701_vm1 = vcmask 58368   ;;  %v31079_v0 = vmov 0.0   ;;  %v812_v1 = vld [vmem:[%s26200_s24 + $0x10] sm:$0xff]  ;;  %v810_v2 = vld [vmem:[%s26200_s24] sm:$0xff]  ;;  %s25697_s3 = smov 120  }
 0x1be   : > { %25656 = vsyncadd (%p31366_p8), [#allocation26], 4294967216  ;;  %706 = vst.msk [vmem:[#allocation2 + $0x30] sm:$0xff] %vm698_vm0, %v31079_v0  ;;  %878 = vrot.lane.b32.xlu1 %v812_v1, %s25697_s3  ;;  %874 = vrot.lane.b32.xlu0 %v810_v2, %s25697_s3  ;;  %v1069_v3 = vld [vmem:[#allocation7 + $0x8] sm:$0xff]  ;;  %v813_v4 = vld [vmem:[%s26200_s24 + $0x18] sm:$0xff]  ;;  %vm754_vm2 = vcmask 31744  }
 0x1bf   : > { %707 = vst.msk [vmem:[#allocation2 + $0x38] sm:$0xff] %vm698_vm0, %v31079_v0  ;;  %699 = vst.msk [vmem:[#allocation2] sm:$0xff] %vm698_vm0, %v31079_v0  ;;  %v811_v5 = vld [vmem:[%s26200_s24 + $0x8] sm:$0xff]  ;;  %21049 = vmatprep.subr.mxu0 %v1069_v3  ;;  %v814_v8 = vld [vmem:[%s26200_s24 + $0x20] sm:$0xff]  ;;  %vm757_vm3 = vcmask 25600   ;;  %vm4688_vm4 = vcmask 130048  }
 0x1c0   : > { %700 = vst.msk [vmem:[#allocation2 + $0x8] sm:$0xff] %vm698_vm0, %v31079_v0  ;;  %703 = vst.msk [vmem:[#allocation2 + $0x18] sm:$0xff] %vm698_vm0, %v31079_v0  ;;  %21050 = vmatpush3.msra.mxu0 %v1069_v3  ;;  %v815_v7 = vld [vmem:[%s26200_s24 + $0x28] sm:$0xff]  ;;  %v817_v10 = vld [vmem:[%s26200_s24 + $0x38] sm:$0xff]  ;;  %vm5113_vm5 = vcmask 1043456   ;;  %s30817_s18 = scalar_lea.vmem [#allocation28], %s18164_s16 }
 0x1c1   : > { %704 = vst.msk [vmem:[#allocation2 + $0x20] sm:$0xff] %vm698_vm0, %v31079_v0  ;;  %709 = vst.msk [vmem:[#allocation2 + $0x48] sm:$0xff] %vm698_vm0, %v31079_v0  ;;  %v816_v11 = vld [vmem:[%s26200_s24 + $0x30] sm:$0xff]  ;;  %v1035_v12 = vld [vmem:[#allocation7] sm:$0xff]  ;;  %s19694_s19 = sshll.u32 %s31352_s2, 12  ;;  %s17937_s15 = sshll.u32 %s30817_s18, 4  ;;  %s30999_s15 = int_to_ptr.vmem [resolvable:$true] %s17937_s15 }
 0x1c2   : > { %710 = vst.msk [vmem:[#allocation2 + $0x50] sm:$0xff] %vm698_vm0, %v31079_v0  ;;  %712 = vst.msk [vmem:[#allocation2 + $0x60] sm:$0xff] %vm698_vm0, %v31079_v0  ;;  %880 = vrot.lane.b32.xlu1 %v813_v4, %s25697_s3  ;;  %876 = vrot.lane.b32.xlu0 %v811_v5, %s25697_s3  ;;  %v819_v13 = vld [vmem:[%s26200_s24 + $0x48] sm:$0xff]  ;;  %v818_v14 = vld [vmem:[%s26200_s24 + $0x40] sm:$0xff]  ;;  %s31804_s1 = sld [smem:[#allocation128_spill]]  ;;  %s17924_s29 = scalar_lea.sflag [#allocation6], %s26194_s25 }
 0x1c3   : > { %713 = vst.msk [vmem:[#allocation2 + $0x68] sm:$0xff] %vm698_vm0, %v31079_v0  ;;  %715 = vst.msk [vmem:[#allocation2 + $0x78] sm:$0xff] %vm698_vm0, %v31079_v0  ;;  %21099 = vmatprep.subr.mxu0 %v1035_v12  ;;  %v821_v15 = vld [vmem:[%s26200_s24 + $0x58] sm:$0xff]  ;;  %v820_v16 = vld [vmem:[%s26200_s24 + $0x50] sm:$0xff]  ;;  %s25581_s16 = scalar_lea.vmem %s30999_s15, 4096  ;;  %p31805_p9 = scmp.ne.s32.totalorder %s31345_s30, 0 }
 0x1c4   : > { %716 = vst.msk [vmem:[#allocation2 + $0x80] sm:$0xff] %vm698_vm0, %v31079_v0  ;;  %718 = vst.msk [vmem:[#allocation2 + $0x90] sm:$0xff] %vm698_vm0, %v31079_v0  ;;  %v823_v17 = vld [vmem:[%s26200_s24 + $0x68] sm:$0xff]  ;;  %v822_v18 = vld [vmem:[%s26200_s24 + $0x60] sm:$0xff]  ;;  %p25582_p7 = scmp.ne.s32.totalorder %s30999_s15, %s25581_s16  ;;  %s25698_s23 = smov [#allocation28]  }
 0x1c5   : > { %719 = vst.msk [vmem:[#allocation2 + $0x98] sm:$0xff] %vm698_vm0, %v31079_v0  ;;  %721 = vst.msk [vmem:[#allocation2 + $0xa8] sm:$0xff] %vm698_vm0, %v31079_v0  ;;  %v825_v19 = vld [vmem:[%s26200_s24 + $0x78] sm:$0xff]  ;;  %v824_v20 = vld [vmem:[%s26200_s24 + $0x70] sm:$0xff] }
 0x1c6   : > { %722 = vst.msk [vmem:[#allocation2 + $0xb0] sm:$0xff] %vm698_vm0, %v31079_v0  ;;  %724 = vst.msk [vmem:[#allocation2 + $0xc0] sm:$0xff] %vm698_vm0, %v31079_v0  ;;  %884 = vrot.lane.b32.xlu1 %v815_v7, %s25697_s3  ;;  %882 = vrot.lane.b32.xlu0 %v814_v8, %s25697_s3  ;;  %v827_v21 = vld [vmem:[%s26200_s24 + $0x88] sm:$0xff]  ;;  %v826_v22 = vld [vmem:[%s26200_s24 + $0x80] sm:$0xff]  ;;  %p25583_p4 = pnand %p25582_p7, %p31805_p9 }
 0x1c7   : > { %725 = vst.msk [vmem:[#allocation2 + $0xc8] sm:$0xff] %vm698_vm0, %v31079_v0  ;;  %727 = vst.msk [vmem:[#allocation2 + $0xd8] sm:$0xff] %vm698_vm0, %v31079_v0  ;;  %v1036_v6 = vld [vmem:[#allocation2 + $0x1] sm:$0xff]  ;;  %v829_v23 = vld [vmem:[%s26200_s24 + $0x98] sm:$0xff] }
 0x1c8   : > { %728 = vst.msk [vmem:[#allocation2 + $0xe0] sm:$0xff] %vm698_vm0, %v31079_v0  ;;  %730 = vst.msk [vmem:[#allocation2 + $0xf0] sm:$0xff] %vm698_vm0, %v31079_v0  ;;  %21051 = vmatprep.mubr.msk.f32.mxu0 %vm698_vm0, %v1036_v6  ;;  %v828_v24 = vld [vmem:[%s26200_s24 + $0x90] sm:$0xff]  ;;  %v831_v25 = vld [vmem:[%s26200_s24 + $0xa8] sm:$0xff]  ;;  %s30997_s26 = scalar_lea.hbm %s31804_s1, %s19694_s19  ;;  %p25584_p3 = pneg %p25583_p4 }
 0x1c9   : > { %731 = vst.msk [vmem:[#allocation2 + $0xf8] sm:$0xff] %vm698_vm0, %v31079_v0  ;;  %733 = vst.msk [vmem:[#allocation2 + $0x108] sm:$0xff] %vm698_vm0, %v31079_v0  ;;  %v830_v26 = vld [vmem:[%s26200_s24 + $0xa0] sm:$0xff]  ;;  %v833_v27 = vld [vmem:[%s26200_s24 + $0xb8] sm:$0xff] }
 0x1ca   : > { %734 = vst.msk [vmem:[#allocation2 + $0x110] sm:$0xff] %vm698_vm0, %v31079_v0  ;;  %736 = vst.msk [vmem:[#allocation2 + $0x120] sm:$0xff] %vm698_vm0, %v31079_v0  ;;  %888 = vrot.lane.b32.xlu1 %v817_v10, %s25697_s3  ;;  %886 = vrot.lane.b32.xlu0 %v816_v11, %s25697_s3  ;;  %v832_v28 = vld [vmem:[%s26200_s24 + $0xb0] sm:$0xff]  ;;  %v835_v29 = vld [vmem:[%s26200_s24 + $0xc8] sm:$0xff] }
 0x1cb   : > { %737 = vst.msk [vmem:[#allocation2 + $0x128] sm:$0xff] %vm698_vm0, %v31079_v0  ;;  %739 = vst.msk [vmem:[#allocation2 + $0x138] sm:$0xff] %vm698_vm0, %v31079_v0  ;;  %v834_v30 = vld [vmem:[%s26200_s24 + $0xc0] sm:$0xff]  ;;  %v837_v31 = vld [vmem:[%s26200_s24 + $0xd8] sm:$0xff] }
 0x1cc   : > { %740 = vst.msk [vmem:[#allocation2 + $0x140] sm:$0xff] %vm698_vm0, %v31079_v0  ;;  %742 = vst.msk [vmem:[#allocation2 + $0x150] sm:$0xff] %vm698_vm0, %v31079_v0  ;;  %v836_v32 = vld [vmem:[%s26200_s24 + $0xd0] sm:$0xff]  ;;  %v839_v33 = vld [vmem:[%s26200_s24 + $0xe8] sm:$0xff] }
 0x1cd   : > { %743 = vst.msk [vmem:[#allocation2 + $0x158] sm:$0xff] %vm698_vm0, %v31079_v0  ;;  %745 = vst.msk [vmem:[#allocation2 + $0x168] sm:$0xff] %vm698_vm0, %v31079_v0  ;;  %v838_v34 = vld [vmem:[%s26200_s24 + $0xe0] sm:$0xff]  ;;  %v26404_v35 = vld [vmem:[#allocation7 + $0x10] sm:$0xff] }
 0x1ce   : > { %746 = vst.msk [vmem:[#allocation2 + $0x170] sm:$0xff] %vm698_vm0, %v31079_v0  ;;  %748 = vst.msk [vmem:[#allocation2 + $0x180] sm:$0xff] %vm698_vm0, %v31079_v0  ;;  %892 = vrot.lane.b32.xlu1 %v819_v13, %s25697_s3  ;;  %890 = vrot.lane.b32.xlu0 %v818_v14, %s25697_s3  ;;  %v841_v40 = vld [vmem:[%s26200_s24 + $0xf8] sm:$0xff]  ;;  %v840_v41 = vld [vmem:[%s26200_s24 + $0xf0] sm:$0xff] }
 0x1cf   : > { %749 = vst.msk [vmem:[#allocation2 + $0x188] sm:$0xff] %vm698_vm0, %v31079_v0  ;;  %751 = vst.msk [vmem:[#allocation2 + $0x198] sm:$0xff] %vm698_vm0, %v31079_v0 }
 0x1d0   : > { %752 = vst.msk [vmem:[#allocation2 + $0x1a0] sm:$0xff] %vm698_vm0, %v31079_v0 }
 0x1d1   : > { %708 = vst.msk [vmem:[#allocation2 + $0x40] sm:$0x3] %vm701_vm1, %v31079_v0  ;;  %702 = vst.msk [vmem:[#allocation2 + $0x10] sm:$0x3] %vm701_vm1, %v31079_v0 }
 0x1d2   : > { %705 = vst.msk [vmem:[#allocation2 + $0x28] sm:$0x3] %vm701_vm1, %v31079_v0  ;;  %711 = vst.msk [vmem:[#allocation2 + $0x58] sm:$0x3] %vm701_vm1, %v31079_v0  ;;  %896 = vrot.lane.b32.xlu1 %v821_v15, %s25697_s3  ;;  %894 = vrot.lane.b32.xlu0 %v820_v16, %s25697_s3 }
 0x1d3   : > { %714 = vst.msk [vmem:[#allocation2 + $0x70] sm:$0x3] %vm701_vm1, %v31079_v0  ;;  %717 = vst.msk [vmem:[#allocation2 + $0x88] sm:$0x3] %vm701_vm1, %v31079_v0 }
 0x1d4   : > { %720 = vst.msk [vmem:[#allocation2 + $0xa0] sm:$0x3] %vm701_vm1, %v31079_v0  ;;  %723 = vst.msk [vmem:[#allocation2 + $0xb8] sm:$0x3] %vm701_vm1, %v31079_v0 }
 0x1d5   : > { %726 = vst.msk [vmem:[#allocation2 + $0xd0] sm:$0x3] %vm701_vm1, %v31079_v0  ;;  %729 = vst.msk [vmem:[#allocation2 + $0xe8] sm:$0x3] %vm701_vm1, %v31079_v0 }
 0x1d6   : > { %732 = vst.msk [vmem:[#allocation2 + $0x100] sm:$0x3] %vm701_vm1, %v31079_v0  ;;  %735 = vst.msk [vmem:[#allocation2 + $0x118] sm:$0x3] %vm701_vm1, %v31079_v0  ;;  %900 = vrot.lane.b32.xlu1 %v823_v17, %s25697_s3  ;;  %898 = vrot.lane.b32.xlu0 %v822_v18, %s25697_s3 }
 0x1d7   : > { %738 = vst.msk [vmem:[#allocation2 + $0x130] sm:$0x3] %vm701_vm1, %v31079_v0  ;;  %741 = vst.msk [vmem:[#allocation2 + $0x148] sm:$0x3] %vm701_vm1, %v31079_v0 }
 0x1d8   : > { %744 = vst.msk [vmem:[#allocation2 + $0x160] sm:$0x3] %vm701_vm1, %v31079_v0  ;;  %747 = vst.msk [vmem:[#allocation2 + $0x178] sm:$0x3] %vm701_vm1, %v31079_v0  ;;  %v1037_v9 = vld [vmem:[#allocation2 + $0x9] sm:$0xff] }
 0x1d9   : > { %750 = vst.msk [vmem:[#allocation2 + $0x190] sm:$0x3] %vm701_vm1, %v31079_v0  ;;  %753 = vst.msk [vmem:[#allocation2 + $0x1a8] sm:$0x3] %vm701_vm1, %v31079_v0  ;;  %21052 = vmatmul.mubr.msk.f32.vlgmr.msra.gmra.mrb[0].mxu0 %vm698_vm0, %v1037_v9  ;;  %v26690_v0 = vld [vmem:[#allocation7 + $0x20] sm:$0xff] }
 0x1da   : > { %21100 = vmatpush3.msra.mxu0 %v1035_v12  ;;  %904 = vrot.lane.b32.xlu1 %v825_v19, %s25697_s3 }
 0x1db   : > { %902 = vrot.lane.b32.xlu0 %v824_v20, %s25697_s3  ;;  %21149 = vmatprep.subr.mxu0 %v26404_v35 }
 0x1de   : > { %908 = vrot.lane.b32.xlu1 %v827_v21, %s25697_s3 }
 0x1df   : > { %906 = vrot.lane.b32.xlu0 %v826_v22, %s25697_s3 }
 0x1e2   : > { %912 = vrot.lane.b32.xlu1 %v829_v23, %s25697_s3 }
 0x1e3   : > { %910 = vrot.lane.b32.xlu0 %v828_v24, %s25697_s3 }
 0x1e6   : > { %916 = vrot.lane.b32.xlu1 %v831_v25, %s25697_s3 }
 0x1e7   : > { %914 = vrot.lane.b32.xlu0 %v830_v26, %s25697_s3 }
 0x1ea   : > { %920 = vrot.lane.b32.xlu1 %v833_v27, %s25697_s3 }
 0x1eb   : > { %918 = vrot.lane.b32.xlu0 %v832_v28, %s25697_s3 }
 0x1ee   : > { %924 = vrot.lane.b32.xlu1 %v835_v29, %s25697_s3 }
 0x1ef   : > { %922 = vrot.lane.b32.xlu0 %v834_v30, %s25697_s3 }
 0x1f2   : > { %928 = vrot.lane.b32.xlu1 %v837_v31, %s25697_s3 }
 0x1f3   : > { %926 = vrot.lane.b32.xlu0 %v836_v32, %s25697_s3 }
 0x1f6   : > { %932 = vrot.lane.b32.xlu1 %v839_v33, %s25697_s3 }
 0x1f7   : > { %930 = vrot.lane.b32.xlu0 %v838_v34, %s25697_s3 }
 0x1fa   : > { %936 = vrot.lane.b32.xlu1 %v841_v40, %s25697_s3 }
 0x1fb   : > { %934 = vrot.lane.b32.xlu0 %v840_v41, %s25697_s3 }
 0x230   : > { %v879_v36 = vpop.permute.xlu1 %878  ;;  %v875_v37 = vpop.permute.xlu0 %874 }
 0x231   : > { %973 = vst.msk [vmem:[#allocation2 + $0x31] sm:$0xff] %vm698_vm0, %v879_v36  ;;  %971 = vst.msk [vmem:[#allocation2 + $0x19] sm:$0xff] %vm698_vm0, %v875_v37  ;;  %v1003_v36 = vld [vmem:[#allocation2] sm:$0xff]  ;;  %v1004_v37 = vld [vmem:[#allocation2 + $0x8] sm:$0xff] }
 0x234   : > { %v881_v38 = vpop.permute.xlu1 %880  ;;  %v877_v39 = vpop.permute.xlu0 %876 }
 0x235   : > { %974 = vst.msk [vmem:[#allocation2 + $0x39] sm:$0xff] %vm698_vm0, %v881_v38  ;;  %972 = vst.msk [vmem:[#allocation2 + $0x21] sm:$0xff] %vm698_vm0, %v877_v39  ;;  %v26562_v38 = vld [vmem:[#allocation7 + $0x18] sm:$0xff] }
 0x238   : > { %v26415_v42 = vld [vmem:[#allocation2 + $0x19] sm:$0xff]  ;;  %v885_v43 = vpop.permute.xlu1 %884  ;;  %v883_v44 = vpop.permute.xlu0 %882  ;;  %v26421_v45 = vld [vmem:[#allocation2 + $0x31] sm:$0xff] }
 0x239   : > { %21054 = vmatprep.mubr.msk.f32.mxu0 %vm698_vm0, %v26415_v42  ;;  %976 = vst.msk [vmem:[#allocation2 + $0x51] sm:$0xff] %vm698_vm0, %v885_v43  ;;  %975 = vst.msk [vmem:[#allocation2 + $0x49] sm:$0xff] %vm698_vm0, %v883_v44  ;;  %v26565_v39 = vld [vmem:[#allocation2 + $0x18] sm:$0xff]  ;;  %v26575_v41 = vld [vmem:[#allocation2 + $0x30] sm:$0xff] }
 0x23c   : > { %v26423_v46 = vld [vmem:[#allocation2 + $0x21] sm:$0xff]  ;;  %v889_v47 = vpop.permute.xlu1 %888  ;;  %v887_v48 = vpop.permute.xlu0 %886  ;;  %v26431_v49 = vld [vmem:[#allocation2 + $0x39] sm:$0xff] }
 0x23d   : > { %21055 = vmatmul.mubr.msk.f32.gmra.mrb[2].mxu0 %vm698_vm0, %v26423_v46  ;;  %978 = vst.msk [vmem:[#allocation2 + $0x69] sm:$0xff] %vm698_vm0, %v889_v47  ;;  %977 = vst.msk [vmem:[#allocation2 + $0x61] sm:$0xff] %vm698_vm0, %v887_v48  ;;  %v26571_v40 = vld [vmem:[#allocation2 + $0x20] sm:$0xff]  ;;  %v26579_v43 = vld [vmem:[#allocation2 + $0x38] sm:$0xff] }
 0x23e   : > { %21057 = vmatprep.mubr.msk.f32.mxu0 %vm698_vm0, %v26421_v45 }
 0x240   : > { %v893_v50 = vpop.permute.xlu1 %892  ;;  %v891_v51 = vpop.permute.xlu0 %890  ;;  %v26433_v52 = vld [vmem:[#allocation2 + $0x49] sm:$0xff]  ;;  %v26441_v53 = vld [vmem:[#allocation2 + $0x51] sm:$0xff] }
 0x241   : > { %21058 = vmatmul.mubr.msk.f32.gmra.mrb[4].mxu0 %vm698_vm0, %v26431_v49  ;;  %980 = vst.msk [vmem:[#allocation2 + $0x81] sm:$0xff] %vm698_vm0, %v893_v50  ;;  %979 = vst.msk [vmem:[#allocation2 + $0x79] sm:$0xff] %vm698_vm0, %v891_v51  ;;  %v26587_v44 = vld [vmem:[#allocation2 + $0x50] sm:$0xff] }
 0x242   : > { %21060 = vmatprep.mubr.msk.f32.mxu0 %vm698_vm0, %v26433_v52 }
 0x244   : > { %v897_v54 = vpop.permute.xlu1 %896  ;;  %v895_v55 = vpop.permute.xlu0 %894  ;;  %v26443_v56 = vld [vmem:[#allocation2 + $0x61] sm:$0xff]  ;;  %v26451_v57 = vld [vmem:[#allocation2 + $0x69] sm:$0xff] }
 0x245   : > { %21061 = vmatmul.mubr.msk.f32.gmra.mrb[6].mxu0 %vm698_vm0, %v26441_v53  ;;  %982 = vst.msk [vmem:[#allocation2 + $0x99] sm:$0xff] %vm698_vm0, %v897_v54  ;;  %981 = vst.msk [vmem:[#allocation2 + $0x91] sm:$0xff] %vm698_vm0, %v895_v55  ;;  %v26591_v47 = vld [vmem:[#allocation2 + $0x60] sm:$0xff]  ;;  %v26595_v48 = vld [vmem:[#allocation2 + $0x68] sm:$0xff] }
 0x246   : > { %21063 = vmatprep.mubr.msk.f32.mxu0 %vm698_vm0, %v26443_v56 }
 0x248   : > { %v901_v58 = vpop.permute.xlu1 %900  ;;  %v899_v59 = vpop.permute.xlu0 %898  ;;  %v26453_v60 = vld [vmem:[#allocation2 + $0x79] sm:$0xff]  ;;  %v26461_v61 = vld [vmem:[#allocation2 + $0x81] sm:$0xff] }
 0x249   : > { %21064 = vmatmul.mubr.msk.f32.gmra.mrb[8].mxu0 %vm698_vm0, %v26451_v57  ;;  %984 = vst.msk [vmem:[#allocation2 + $0xb1] sm:$0xff] %vm698_vm0, %v901_v58  ;;  %983 = vst.msk [vmem:[#allocation2 + $0xa9] sm:$0xff] %vm698_vm0, %v899_v59  ;;  %v26599_v50 = vld [vmem:[#allocation2 + $0x78] sm:$0xff]  ;;  %v26603_v51 = vld [vmem:[#allocation2 + $0x80] sm:$0xff] }
 0x24a   : > { %21066 = vmatprep.mubr.msk.f32.mxu0 %vm698_vm0, %v26453_v60 }
 0x24c   : > { %v905_v62 = vpop.permute.xlu1 %904  ;;  %v26463_v1 = vld [vmem:[#allocation2 + $0x91] sm:$0xff]  ;;  %v26471_v2 = vld [vmem:[#allocation2 + $0x99] sm:$0xff] }
 0x24d   : > { %v903_v63 = vpop.permute.xlu0 %902  ;;  %21067 = vmatmul.mubr.msk.f32.gmra.mrb[10].mxu0 %vm698_vm0, %v26461_v61  ;;  %986 = vst.msk [vmem:[#allocation2 + $0xc9] sm:$0xff] %vm698_vm0, %v905_v62  ;;  %v26607_v54 = vld [vmem:[#allocation2 + $0x90] sm:$0xff]  ;;  %v26611_v55 = vld [vmem:[#allocation2 + $0x98] sm:$0xff] }
 0x24e   : > { %985 = vst.msk [vmem:[#allocation2 + $0xc1] sm:$0xff] %vm698_vm0, %v903_v63  ;;  %21069 = vmatprep.mubr.msk.f32.mxu0 %vm698_vm0, %v26463_v1 }
 0x250   : > { %v909_v3 = vpop.permute.xlu1 %908  ;;  %v26473_v5 = vld [vmem:[#allocation2 + $0xa9] sm:$0xff]  ;;  %v26481_v6 = vld [vmem:[#allocation2 + $0xb1] sm:$0xff] }
 0x251   : > { %v907_v4 = vpop.permute.xlu0 %906  ;;  %21070 = vmatmul.mubr.msk.f32.gmra.mrb[12].mxu0 %vm698_vm0, %v26471_v2  ;;  %988 = vst.msk [vmem:[#allocation2 + $0xe1] sm:$0xff] %vm698_vm0, %v909_v3  ;;  %v26615_v58 = vld [vmem:[#allocation2 + $0xa8] sm:$0xff]  ;;  %v26619_v59 = vld [vmem:[#allocation2 + $0xb0] sm:$0xff] }
 0x252   : > { %987 = vst.msk [vmem:[#allocation2 + $0xd9] sm:$0xff] %vm698_vm0, %v907_v4  ;;  %21072 = vmatprep.mubr.msk.f32.mxu0 %vm698_vm0, %v26473_v5 }
 0x254   : > { %v913_v7 = vpop.permute.xlu1 %912  ;;  %v26491_v10 = vld [vmem:[#allocation2 + $0xc9] sm:$0xff] }
 0x255   : > { %v911_v8 = vpop.permute.xlu0 %910  ;;  %v26483_v9 = vld [vmem:[#allocation2 + $0xc1] sm:$0xff]  ;;  %21073 = vmatmul.mubr.msk.f32.gmra.mrb[14].mxu0 %vm698_vm0, %v26481_v6  ;;  %990 = vst.msk [vmem:[#allocation2 + $0xf9] sm:$0xff] %vm698_vm0, %v913_v7 }
 0x256   : > { %989 = vst.msk [vmem:[#allocation2 + $0xf1] sm:$0xff] %vm698_vm0, %v911_v8  ;;  %21075 = vmatprep.mubr.msk.f32.mxu0 %vm698_vm0, %v26483_v9  ;;  %v26623_v62 = vld [vmem:[#allocation2 + $0xc0] sm:$0xff]  ;;  %v26627_v63 = vld [vmem:[#allocation2 + $0xc8] sm:$0xff] }
 0x258   : > { %v917_v11 = vpop.permute.xlu1 %916  ;;  %v26501_v14 = vld [vmem:[#allocation2 + $0xe1] sm:$0xff] }
 0x259   : > { %v915_v12 = vpop.permute.xlu0 %914  ;;  %v26493_v13 = vld [vmem:[#allocation2 + $0xd9] sm:$0xff]  ;;  %21076 = vmatmul.mubr.msk.f32.gmra.mrb[16].mxu0 %vm698_vm0, %v26491_v10  ;;  %992 = vst.msk [vmem:[#allocation2 + $0x111] sm:$0xff] %vm698_vm0, %v917_v11 }
 0x25a   : > { %991 = vst.msk [vmem:[#allocation2 + $0x109] sm:$0xff] %vm698_vm0, %v915_v12  ;;  %21078 = vmatprep.mubr.msk.f32.mxu0 %vm698_vm0, %v26493_v13  ;;  %v26631_v3 = vld [vmem:[#allocation2 + $0xd8] sm:$0xff]  ;;  %v26635_v4 = vld [vmem:[#allocation2 + $0xe0] sm:$0xff] }
 0x25c   : > { %v921_v15 = vpop.permute.xlu1 %920  ;;  %v26511_v18 = vld [vmem:[#allocation2 + $0xf9] sm:$0xff] }
 0x25d   : > { %v919_v16 = vpop.permute.xlu0 %918  ;;  %v26503_v17 = vld [vmem:[#allocation2 + $0xf1] sm:$0xff]  ;;  %21079 = vmatmul.mubr.msk.f32.gmra.mrb[18].mxu0 %vm698_vm0, %v26501_v14  ;;  %994 = vst.msk [vmem:[#allocation2 + $0x129] sm:$0xff] %vm698_vm0, %v921_v15 }
 0x25e   : > { %993 = vst.msk [vmem:[#allocation2 + $0x121] sm:$0xff] %vm698_vm0, %v919_v16  ;;  %21081 = vmatprep.mubr.msk.f32.mxu0 %vm698_vm0, %v26503_v17  ;;  %v26639_v7 = vld [vmem:[#allocation2 + $0xf0] sm:$0xff]  ;;  %v26643_v8 = vld [vmem:[#allocation2 + $0xf8] sm:$0xff] }
 0x260   : > { %v925_v19 = vpop.permute.xlu1 %924  ;;  %v26521_v22 = vld [vmem:[#allocation2 + $0x111] sm:$0xff] }
 0x261   : > { %v923_v20 = vpop.permute.xlu0 %922  ;;  %v26513_v21 = vld [vmem:[#allocation2 + $0x109] sm:$0xff]  ;;  %21082 = vmatmul.mubr.msk.f32.gmra.mrb[20].mxu0 %vm698_vm0, %v26511_v18  ;;  %996 = vst.msk [vmem:[#allocation2 + $0x141] sm:$0xff] %vm698_vm0, %v925_v19 }
 0x262   : > { %995 = vst.msk [vmem:[#allocation2 + $0x139] sm:$0xff] %vm698_vm0, %v923_v20  ;;  %21084 = vmatprep.mubr.msk.f32.mxu0 %vm698_vm0, %v26513_v21  ;;  %v26647_v11 = vld [vmem:[#allocation2 + $0x108] sm:$0xff]  ;;  %v26651_v12 = vld [vmem:[#allocation2 + $0x110] sm:$0xff] }
 0x264   : > { %v929_v23 = vpop.permute.xlu1 %928  ;;  %v26531_v26 = vld [vmem:[#allocation2 + $0x129] sm:$0xff] }
 0x265   : > { %v927_v24 = vpop.permute.xlu0 %926  ;;  %v26523_v25 = vld [vmem:[#allocation2 + $0x121] sm:$0xff]  ;;  %21085 = vmatmul.mubr.msk.f32.gmra.mrb[22].mxu0 %vm698_vm0, %v26521_v22  ;;  %998 = vst.msk [vmem:[#allocation2 + $0x159] sm:$0xff] %vm698_vm0, %v929_v23 }
 0x266   : > { %997 = vst.msk [vmem:[#allocation2 + $0x151] sm:$0xff] %vm698_vm0, %v927_v24  ;;  %21087 = vmatprep.mubr.msk.f32.mxu0 %vm698_vm0, %v26523_v25  ;;  %v26655_v15 = vld [vmem:[#allocation2 + $0x120] sm:$0xff]  ;;  %v26659_v16 = vld [vmem:[#allocation2 + $0x128] sm:$0xff] }
 0x268   : > { %v933_v27 = vpop.permute.xlu1 %932  ;;  %v26541_v30 = vld [vmem:[#allocation2 + $0x141] sm:$0xff] }
 0x269   : > { %v931_v28 = vpop.permute.xlu0 %930  ;;  %v26533_v29 = vld [vmem:[#allocation2 + $0x139] sm:$0xff]  ;;  %21088 = vmatmul.mubr.msk.f32.gmra.mrb[24].mxu0 %vm698_vm0, %v26531_v26  ;;  %1000 = vst.msk [vmem:[#allocation2 + $0x171] sm:$0xff] %vm698_vm0, %v933_v27  ;;  %31368 = vst [vmem:[#allocation44_spill] sm:$0xff] %v26541_v30 }
 0x26a   : > { %31367 = vst [vmem:[#allocation43_spill] sm:$0xff] %v26533_v29  ;;  %999 = vst.msk [vmem:[#allocation2 + $0x169] sm:$0xff] %vm698_vm0, %v931_v28  ;;  %21090 = vmatprep.mubr.msk.f32.mxu0 %vm698_vm0, %v26533_v29  ;;  %v26663_v19 = vld [vmem:[#allocation2 + $0x138] sm:$0xff]  ;;  %v26669_v24 = vld [vmem:[#allocation2 + $0x140] sm:$0xff] }
 0x26c   : > { %v26549_v32 = vld [vmem:[#allocation2 + $0x159] sm:$0xff]  ;;  %v937_v20 = vpop.permute.xlu1 %936 }
 0x26d   : > { %v26543_v31 = vld [vmem:[#allocation2 + $0x151] sm:$0xff]  ;;  %21091 = vmatmul.mubr.msk.f32.gmra.mrb[26].mxu0 %vm698_vm0, %v26541_v30  ;;  %31370 = vst [vmem:[#allocation46_spill] sm:$0xff] %v26549_v32  ;;  %v935_v23 = vpop.permute.xlu0 %934  ;;  %1002 = vst.msk [vmem:[#allocation2 + $0x189] sm:$0xff] %vm698_vm0, %v937_v20 }
 0x26e   : > { %31369 = vst [vmem:[#allocation45_spill] sm:$0xff] %v26543_v31  ;;  %21093 = vmatprep.mubr.msk.f32.mxu0 %vm698_vm0, %v26543_v31  ;;  %1001 = vst.msk [vmem:[#allocation2 + $0x181] sm:$0xff] %vm698_vm0, %v935_v23  ;;  %v26673_v27 = vld [vmem:[#allocation2 + $0x150] sm:$0xff]  ;;  %v26677_v28 = vld [vmem:[#allocation2 + $0x158] sm:$0xff] }
 0x26f   : > { %v1713_v23 = vld [vmem:[#allocation2 + $0xa] sm:$0xff] }
 0x270   : > { %v26557_v34 = vld [vmem:[#allocation2 + $0x171] sm:$0xff] }
 0x271   : > { %v26551_v33 = vld [vmem:[#allocation2 + $0x169] sm:$0xff]  ;;  %21094 = vmatmul.mubr.msk.f32.gmra.mrb[28].mxu0 %vm698_vm0, %v26549_v32  ;;  %31372 = vst [vmem:[#allocation48_spill] sm:$0xff] %v26557_v34 }
 0x272   : > { %31371 = vst [vmem:[#allocation47_spill] sm:$0xff] %v26551_v33  ;;  %21096 = vmatprep.mubr.msk.f32.mxu0 %vm698_vm0, %v26551_v33  ;;  %v26685_v20 = vld [vmem:[#allocation2 + $0x170] sm:$0xff]  ;;  %v26699_v33 = vld [vmem:[#allocation2 + $0x22] sm:$0xff] }
 0x273   : > { %31374 = vst [vmem:[#allocation50_spill] sm:$0xff] %v26699_v33 }
 0x275   : > { %21097 = vmatmul.mubr.msk.f32.gmra.mrb[30].mxu0 %vm698_vm0, %v26557_v34  ;;  %v26693_v34 = vld [vmem:[#allocation2 + $0x1a] sm:$0xff] }
 0x276   : > { %21101 = vmatprep.mubr.msk.f32.mxu0 %vm698_vm0, %v1003_v36  ;;  %v26681_v36 = vld [vmem:[#allocation2 + $0x168] sm:$0xff]  ;;  %31373 = vst [vmem:[#allocation49_spill] sm:$0xff] %v26693_v34 }
 0x279   : > { %21102 = vmatmul.mubr.msk.f32.vlgmr.msra.gmra.mrb[0].mxu0 %vm698_vm0, %v1004_v37  ;;  %v1712_v37 = vld [vmem:[#allocation2 + $0x2] sm:$0xff] }
 0x27a   : > { %21150 = vmatpush3.msra.mxu0 %v26404_v35  ;;  %21104 = vmatprep.mubr.msk.f32.mxu0 %vm698_vm0, %v26565_v39  ;;  %v26583_v35 = vld [vmem:[#allocation2 + $0x48] sm:$0xff] }
 0x27b   : > { %21199 = vmatprep.subr.mxu0 %v26562_v38 }
 0x27d   : > { %21105 = vmatmul.mubr.msk.f32.gmra.mrb[2].mxu0 %vm698_vm0, %v26571_v40 }
 0x27e   : > { %21107 = vmatprep.mubr.msk.f32.mxu0 %vm698_vm0, %v26575_v41 }
 0x281   : > { %21108 = vmatmul.mubr.msk.f32.gmra.mrb[4].mxu0 %vm698_vm0, %v26579_v43 }
 0x282   : > { %21110 = vmatprep.mubr.msk.f32.mxu0 %vm698_vm0, %v26583_v35 }
 0x285   : > { %21111 = vmatmul.mubr.msk.f32.gmra.mrb[6].mxu0 %vm698_vm0, %v26587_v44 }
 0x286   : > { %21113 = vmatprep.mubr.msk.f32.mxu0 %vm698_vm0, %v26591_v47 }
 0x289   : > { %21114 = vmatmul.mubr.msk.f32.gmra.mrb[8].mxu0 %vm698_vm0, %v26595_v48 }
 0x28a   : > { %21116 = vmatprep.mubr.msk.f32.mxu0 %vm698_vm0, %v26599_v50 }
 0x28d   : > { %21117 = vmatmul.mubr.msk.f32.gmra.mrb[10].mxu0 %vm698_vm0, %v26603_v51 }
 0x28e   : > { %21119 = vmatprep.mubr.msk.f32.mxu0 %vm698_vm0, %v26607_v54 }
 0x291   : > { %21120 = vmatmul.mubr.msk.f32.gmra.mrb[12].mxu0 %vm698_vm0, %v26611_v55 }
 0x292   : > { %21122 = vmatprep.mubr.msk.f32.mxu0 %vm698_vm0, %v26615_v58 }
 0x295   : > { %21123 = vmatmul.mubr.msk.f32.gmra.mrb[14].mxu0 %vm698_vm0, %v26619_v59 }
 0x296   : > { %21125 = vmatprep.mubr.msk.f32.mxu0 %vm698_vm0, %v26623_v62 }
 0x299   : > { %21126 = vmatmul.mubr.msk.f32.gmra.mrb[16].mxu0 %vm698_vm0, %v26627_v63 }
 0x29a   : > { %21128 = vmatprep.mubr.msk.f32.mxu0 %vm698_vm0, %v26631_v3 }
 0x29d   : > { %21129 = vmatmul.mubr.msk.f32.gmra.mrb[18].mxu0 %vm698_vm0, %v26635_v4 }
 0x29e   : > { %21131 = vmatprep.mubr.msk.f32.mxu0 %vm698_vm0, %v26639_v7 }
 0x2a1   : > { %21132 = vmatmul.mubr.msk.f32.gmra.mrb[20].mxu0 %vm698_vm0, %v26643_v8 }
 0x2a2   : > { %21134 = vmatprep.mubr.msk.f32.mxu0 %vm698_vm0, %v26647_v11 }
 0x2a5   : > { %21135 = vmatmul.mubr.msk.f32.gmra.mrb[22].mxu0 %vm698_vm0, %v26651_v12 }
 0x2a6   : > { %21137 = vmatprep.mubr.msk.f32.mxu0 %vm698_vm0, %v26655_v15 }
 0x2a9   : > { %21138 = vmatmul.mubr.msk.f32.gmra.mrb[24].mxu0 %vm698_vm0, %v26659_v16 }
 0x2aa   : > { %21140 = vmatprep.mubr.msk.f32.mxu0 %vm698_vm0, %v26663_v19 }
 0x2ad   : > { %21141 = vmatmul.mubr.msk.f32.gmra.mrb[26].mxu0 %vm698_vm0, %v26669_v24 }
 0x2ae   : > { %21143 = vmatprep.mubr.msk.f32.mxu0 %vm698_vm0, %v26673_v27 }
 0x2b1   : > { %21144 = vmatmul.mubr.msk.f32.gmra.mrb[28].mxu0 %vm698_vm0, %v26677_v28 }
 0x2b2   : > { %21146 = vmatprep.mubr.msk.f32.mxu0 %vm698_vm0, %v26681_v36 }
 0x2b5   : > { %21147 = vmatmul.mubr.msk.f32.gmra.mrb[30].mxu0 %vm698_vm0, %v26685_v20 }
 0x2b6   : > { %21151 = vmatprep.mubr.msk.f32.mxu0 %vm698_vm0, %v1712_v37  ;;  %v26703_v37 = vld [vmem:[#allocation2 + $0x32] sm:$0xff] }
 0x2b7   : > { %31375 = vst [vmem:[#allocation51_spill] sm:$0xff] %v26703_v37 }
 0x2b9   : > { %21152 = vmatmul.mubr.msk.f32.vlgmr.msra.gmra.mrb[0].mxu0 %vm698_vm0, %v1713_v23  ;;  %v26707_v23 = vld [vmem:[#allocation2 + $0x3a] sm:$0xff] }
 0x2ba   : > { %21200 = vmatpush3.msra.mxu0 %v26562_v38  ;;  %21154 = vmatprep.mubr.msk.f32.mxu0 %vm698_vm0, %v26693_v34  ;;  %31376 = vst [vmem:[#allocation52_spill] sm:$0xff] %v26707_v23  ;;  %v26711_v38 = vld [vmem:[#allocation2 + $0x4a] sm:$0xff]  ;;  %v26715_v34 = vld [vmem:[#allocation2 + $0x52] sm:$0xff] }
 0x2bb   : > { %21249 = vmatprep.subr.mxu0 %v26690_v0  ;;  %31377 = vst [vmem:[#allocation53_spill] sm:$0xff] %v26711_v38  ;;  %31378 = vst [vmem:[#allocation54_spill] sm:$0xff] %v26715_v34 }
 0x2bd   : > { %21155 = vmatmul.mubr.msk.f32.gmra.mrb[2].mxu0 %vm698_vm0, %v26699_v33  ;;  %v26719_v33 = vld [vmem:[#allocation2 + $0x62] sm:$0xff] }
 0x2be   : > { %21157 = vmatprep.mubr.msk.f32.mxu0 %vm698_vm0, %v26703_v37  ;;  %31379 = vst [vmem:[#allocation55_spill] sm:$0xff] %v26719_v33  ;;  %v26723_v37 = vld [vmem:[#allocation2 + $0x6a] sm:$0xff] }
 0x2bf   : > { %31380 = vst [vmem:[#allocation56_spill] sm:$0xff] %v26723_v37 }
 0x2c1   : > { %21158 = vmatmul.mubr.msk.f32.gmra.mrb[4].mxu0 %vm698_vm0, %v26707_v23  ;;  %v26727_v23 = vld [vmem:[#allocation2 + $0x7a] sm:$0xff] }
 0x2c2   : > { %21160 = vmatprep.mubr.msk.f32.mxu0 %vm698_vm0, %v26711_v38  ;;  %31381 = vst [vmem:[#allocation57_spill] sm:$0xff] %v26727_v23  ;;  %v26731_v38 = vld [vmem:[#allocation2 + $0x82] sm:$0xff] }
 0x2c3   : > { %31382 = vst [vmem:[#allocation58_spill] sm:$0xff] %v26731_v38 }
 0x2c5   : > { %21161 = vmatmul.mubr.msk.f32.gmra.mrb[6].mxu0 %vm698_vm0, %v26715_v34  ;;  %v26735_v34 = vld [vmem:[#allocation2 + $0x92] sm:$0xff] }
 0x2c6   : > { %21163 = vmatprep.mubr.msk.f32.mxu0 %vm698_vm0, %v26719_v33  ;;  %31383 = vst [vmem:[#allocation59_spill] sm:$0xff] %v26735_v34  ;;  %v26739_v33 = vld [vmem:[#allocation2 + $0x9a] sm:$0xff] }
 0x2c7   : > { %31384 = vst [vmem:[#allocation60_spill] sm:$0xff] %v26739_v33 }
 0x2c9   : > { %21164 = vmatmul.mubr.msk.f32.gmra.mrb[8].mxu0 %vm698_vm0, %v26723_v37  ;;  %v26743_v37 = vld [vmem:[#allocation2 + $0xaa] sm:$0xff] }
 0x2ca   : > { %21166 = vmatprep.mubr.msk.f32.mxu0 %vm698_vm0, %v26727_v23  ;;  %31385 = vst [vmem:[#allocation61_spill] sm:$0xff] %v26743_v37  ;;  %v26747_v23 = vld [vmem:[#allocation2 + $0xb2] sm:$0xff] }
 0x2cb   : > { %31386 = vst [vmem:[#allocation62_spill] sm:$0xff] %v26747_v23 }
 0x2cd   : > { %21167 = vmatmul.mubr.msk.f32.gmra.mrb[10].mxu0 %vm698_vm0, %v26731_v38  ;;  %v26751_v38 = vld [vmem:[#allocation2 + $0xc2] sm:$0xff] }
 0x2ce   : > { %21169 = vmatprep.mubr.msk.f32.mxu0 %vm698_vm0, %v26735_v34  ;;  %31387 = vst [vmem:[#allocation63_spill] sm:$0xff] %v26751_v38  ;;  %v26755_v34 = vld [vmem:[#allocation2 + $0xca] sm:$0xff] }
 0x2cf   : > { %31388 = vst [vmem:[#allocation64_spill] sm:$0xff] %v26755_v34 }
 0x2d1   : > { %21170 = vmatmul.mubr.msk.f32.gmra.mrb[12].mxu0 %vm698_vm0, %v26739_v33  ;;  %v26759_v33 = vld [vmem:[#allocation2 + $0xda] sm:$0xff] }
 0x2d2   : > { %21172 = vmatprep.mubr.msk.f32.mxu0 %vm698_vm0, %v26743_v37  ;;  %31389 = vst [vmem:[#allocation65_spill] sm:$0xff] %v26759_v33  ;;  %v26763_v37 = vld [vmem:[#allocation2 + $0xe2] sm:$0xff] }
 0x2d3   : > { %31390 = vst [vmem:[#allocation66_spill] sm:$0xff] %v26763_v37 }
 0x2d5   : > { %21173 = vmatmul.mubr.msk.f32.gmra.mrb[14].mxu0 %vm698_vm0, %v26747_v23  ;;  %v26767_v23 = vld [vmem:[#allocation2 + $0xf2] sm:$0xff] }
 0x2d6   : > { %21175 = vmatprep.mubr.msk.f32.mxu0 %vm698_vm0, %v26751_v38  ;;  %31391 = vst [vmem:[#allocation67_spill] sm:$0xff] %v26767_v23  ;;  %v26771_v38 = vld [vmem:[#allocation2 + $0xfa] sm:$0xff] }
 0x2d7   : > { %31392 = vst [vmem:[#allocation68_spill] sm:$0xff] %v26771_v38 }
 0x2d9   : > { %21176 = vmatmul.mubr.msk.f32.gmra.mrb[16].mxu0 %vm698_vm0, %v26755_v34  ;;  %v26775_v34 = vld [vmem:[#allocation2 + $0x10a] sm:$0xff] }
 0x2da   : > { %21178 = vmatprep.mubr.msk.f32.mxu0 %vm698_vm0, %v26759_v33  ;;  %31393 = vst [vmem:[#allocation69_spill] sm:$0xff] %v26775_v34  ;;  %v26779_v33 = vld [vmem:[#allocation2 + $0x112] sm:$0xff] }
 0x2db   : > { %31394 = vst [vmem:[#allocation70_spill] sm:$0xff] %v26779_v33 }
 0x2dd   : > { %21179 = vmatmul.mubr.msk.f32.gmra.mrb[18].mxu0 %vm698_vm0, %v26763_v37  ;;  %v26783_v37 = vld [vmem:[#allocation2 + $0x122] sm:$0xff] }
 0x2de   : > { %21181 = vmatprep.mubr.msk.f32.mxu0 %vm698_vm0, %v26767_v23  ;;  %31395 = vst [vmem:[#allocation71_spill] sm:$0xff] %v26783_v37  ;;  %v26787_v23 = vld [vmem:[#allocation2 + $0x12a] sm:$0xff] }
 0x2df   : > { %31396 = vst [vmem:[#allocation72_spill] sm:$0xff] %v26787_v23 }
 0x2e1   : > { %21182 = vmatmul.mubr.msk.f32.gmra.mrb[20].mxu0 %vm698_vm0, %v26771_v38  ;;  %v26791_v38 = vld [vmem:[#allocation2 + $0x13a] sm:$0xff] }
 0x2e2   : > { %21184 = vmatprep.mubr.msk.f32.mxu0 %vm698_vm0, %v26775_v34  ;;  %31397 = vst [vmem:[#allocation73_spill] sm:$0xff] %v26791_v38  ;;  %v26795_v34 = vld [vmem:[#allocation2 + $0x142] sm:$0xff] }
 0x2e3   : > { %31398 = vst [vmem:[#allocation74_spill] sm:$0xff] %v26795_v34 }
 0x2e5   : > { %21185 = vmatmul.mubr.msk.f32.gmra.mrb[22].mxu0 %vm698_vm0, %v26779_v33  ;;  %v26799_v33 = vld [vmem:[#allocation2 + $0x152] sm:$0xff] }
 0x2e6   : > { %21187 = vmatprep.mubr.msk.f32.mxu0 %vm698_vm0, %v26783_v37  ;;  %v26803_v37 = vld [vmem:[#allocation2 + $0x15a] sm:$0xff] }
 0x2e7   : > { %31399 = vst [vmem:[#allocation75_spill] sm:$0xff] %v26803_v37 }
 0x2e9   : > { %21188 = vmatmul.mubr.msk.f32.gmra.mrb[24].mxu0 %vm698_vm0, %v26787_v23  ;;  %v26807_v23 = vld [vmem:[#allocation2 + $0x16a] sm:$0xff] }
 0x2ea   : > { %21190 = vmatprep.mubr.msk.f32.mxu0 %vm698_vm0, %v26791_v38  ;;  %v26811_v38 = vld [vmem:[#allocation2 + $0x172] sm:$0xff] }
 0x2ed   : > { %21191 = vmatmul.mubr.msk.f32.gmra.mrb[26].mxu0 %vm698_vm0, %v26795_v34  ;;  %v2906_v34 = vld [vmem:[#allocation7 + $0x28] sm:$0xff] }
 0x2ee   : > { %21193 = vmatprep.mubr.msk.f32.mxu0 %vm698_vm0, %v26799_v33 }
 0x2f1   : > { %21194 = vmatmul.mubr.msk.f32.gmra.mrb[28].mxu0 %vm698_vm0, %v26803_v37 }
 0x2f2   : > { %21196 = vmatprep.mubr.msk.f32.mxu0 %vm698_vm0, %v26807_v23 }
 0x2f5   : > { %21197 = vmatmul.mubr.msk.f32.gmra.mrb[30].mxu0 %vm698_vm0, %v26811_v38 }
 0x2f6   : > { %21201 = vmatprep.mubr.msk.f32.mxu0 %vm698_vm0, %v26565_v39  ;;  %v26880_v39 = vld [vmem:[#allocation2 + $0x188] sm:$0xff] }
 0x2f9   : > { %21202 = vmatmul.mubr.msk.f32.vlgmr.msra.gmra.mrb[0].mxu0 %vm698_vm0, %v26571_v40  ;;  %v3294_v40 = vld [vmem:[#allocation7 + $0x30] sm:$0xff] }
 0x2fa   : > { %21250 = vmatpush3.msra.mxu0 %v26690_v0  ;;  %21204 = vmatprep.mubr.msk.f32.mxu0 %vm698_vm0, %v26575_v41  ;;  %v26874_v0 = vld [vmem:[#allocation2 + $0x180] sm:$0xff] }
 0x2fb   : > { %21299 = vmatprep.subr.mxu0 %v2906_v34 }
 0x2fd   : > { %21205 = vmatmul.mubr.msk.f32.gmra.mrb[2].mxu0 %vm698_vm0, %v26579_v43 }
 0x2fe   : > { %21207 = vmatprep.mubr.msk.f32.mxu0 %vm698_vm0, %v26583_v35 }
 0x301   : > { %21208 = vmatmul.mubr.msk.f32.gmra.mrb[4].mxu0 %vm698_vm0, %v26587_v44 }
 0x302   : > { %21210 = vmatprep.mubr.msk.f32.mxu0 %vm698_vm0, %v26591_v47 }
 0x305   : > { %21211 = vmatmul.mubr.msk.f32.gmra.mrb[6].mxu0 %vm698_vm0, %v26595_v48 }
 0x306   : > { %21213 = vmatprep.mubr.msk.f32.mxu0 %vm698_vm0, %v26599_v50 }
 0x309   : > { %21214 = vmatmul.mubr.msk.f32.gmra.mrb[8].mxu0 %vm698_vm0, %v26603_v51 }
 0x30a   : > { %21216 = vmatprep.mubr.msk.f32.mxu0 %vm698_vm0, %v26607_v54 }
 0x30d   : > { %21217 = vmatmul.mubr.msk.f32.gmra.mrb[10].mxu0 %vm698_vm0, %v26611_v55 }
 0x30e   : > { %21219 = vmatprep.mubr.msk.f32.mxu0 %vm698_vm0, %v26615_v58 }
 0x311   : > { %21220 = vmatmul.mubr.msk.f32.gmra.mrb[12].mxu0 %vm698_vm0, %v26619_v59 }
 0x312   : > { %21222 = vmatprep.mubr.msk.f32.mxu0 %vm698_vm0, %v26623_v62 }
 0x315   : > { %21223 = vmatmul.mubr.msk.f32.gmra.mrb[14].mxu0 %vm698_vm0, %v26627_v63 }
 0x316   : > { %21225 = vmatprep.mubr.msk.f32.mxu0 %vm698_vm0, %v26631_v3 }
 0x319   : > { %21226 = vmatmul.mubr.msk.f32.gmra.mrb[16].mxu0 %vm698_vm0, %v26635_v4 }
 0x31a   : > { %21228 = vmatprep.mubr.msk.f32.mxu0 %vm698_vm0, %v26639_v7 }
 0x31d   : > { %21229 = vmatmul.mubr.msk.f32.gmra.mrb[18].mxu0 %vm698_vm0, %v26643_v8 }
 0x31e   : > { %21231 = vmatprep.mubr.msk.f32.mxu0 %vm698_vm0, %v26647_v11 }
 0x321   : > { %21232 = vmatmul.mubr.msk.f32.gmra.mrb[20].mxu0 %vm698_vm0, %v26651_v12 }
 0x322   : > { %21234 = vmatprep.mubr.msk.f32.mxu0 %vm698_vm0, %v26655_v15 }
 0x325   : > { %21235 = vmatmul.mubr.msk.f32.gmra.mrb[22].mxu0 %vm698_vm0, %v26659_v16 }
 0x326   : > { %21237 = vmatprep.mubr.msk.f32.mxu0 %vm698_vm0, %v26663_v19 }
 0x329   : > { %21238 = vmatmul.mubr.msk.f32.gmra.mrb[24].mxu0 %vm698_vm0, %v26669_v24 }
 0x32a   : > { %21240 = vmatprep.mubr.msk.f32.mxu0 %vm698_vm0, %v26673_v27 }
 0x32d   : > { %21241 = vmatmul.mubr.msk.f32.gmra.mrb[26].mxu0 %vm698_vm0, %v26677_v28 }
 0x32e   : > { %21243 = vmatprep.mubr.msk.f32.mxu0 %vm698_vm0, %v26681_v36 }
 0x331   : > { %21244 = vmatmul.mubr.msk.f32.gmra.mrb[28].mxu0 %vm698_vm0, %v26685_v20 }
 0x332   : > { %21246 = vmatprep.mubr.msk.f32.mxu0 %vm698_vm0, %v26874_v0 }
 0x335   : > { %21247 = vmatmul.mubr.msk.f32.gmra.mrb[30].mxu0 %vm698_vm0, %v26880_v39 }
 0x336   : > { %21251 = vmatprep.mubr.msk.f32.mxu0 %vm698_vm0, %v26415_v42  ;;  %v31400_v42 = vld [vmem:[#allocation47_spill] sm:$0xff] }
 0x339   : > { %21252 = vmatmul.mubr.msk.f32.vlgmr.msra.gmra.mrb[0].mxu0 %vm698_vm0, %v26423_v46  ;;  %v26944_v46 = vld [vmem:[#allocation2 + $0x181] sm:$0xff] }
 0x33a   : > { %21300 = vmatpush3.msra.mxu0 %v2906_v34  ;;  %21254 = vmatprep.mubr.msk.f32.mxu0 %vm698_vm0, %v26421_v45  ;;  %v31401_v45 = vld [vmem:[#allocation48_spill] sm:$0xff]  ;;  %31402 = vst [vmem:[#allocation76_spill] sm:$0xff] %v26944_v46 }
 0x33b   : > { %21349 = vmatprep.subr.mxu0 %v3294_v40  ;;  %v26948_v34 = vld [vmem:[#allocation2 + $0x189] sm:$0xff] }
 0x33c   : > { %31403 = vst [vmem:[#allocation77_spill] sm:$0xff] %v26948_v34 }
 0x33d   : > { %21255 = vmatmul.mubr.msk.f32.gmra.mrb[2].mxu0 %vm698_vm0, %v26431_v49 }
 0x33e   : > { %21257 = vmatprep.mubr.msk.f32.mxu0 %vm698_vm0, %v26433_v52 }
 0x341   : > { %21258 = vmatmul.mubr.msk.f32.gmra.mrb[4].mxu0 %vm698_vm0, %v26441_v53 }
 0x342   : > { %21260 = vmatprep.mubr.msk.f32.mxu0 %vm698_vm0, %v26443_v56 }
 0x345   : > { %21261 = vmatmul.mubr.msk.f32.gmra.mrb[6].mxu0 %vm698_vm0, %v26451_v57 }
 0x346   : > { %21263 = vmatprep.mubr.msk.f32.mxu0 %vm698_vm0, %v26453_v60 }
 0x349   : > { %21264 = vmatmul.mubr.msk.f32.gmra.mrb[8].mxu0 %vm698_vm0, %v26461_v61 }
 0x34a   : > { %21266 = vmatprep.mubr.msk.f32.mxu0 %vm698_vm0, %v26463_v1 }
 0x34d   : > { %21267 = vmatmul.mubr.msk.f32.gmra.mrb[10].mxu0 %vm698_vm0, %v26471_v2 }
 0x34e   : > { %21269 = vmatprep.mubr.msk.f32.mxu0 %vm698_vm0, %v26473_v5 }
 0x351   : > { %21270 = vmatmul.mubr.msk.f32.gmra.mrb[12].mxu0 %vm698_vm0, %v26481_v6 }
 0x352   : > { %21272 = vmatprep.mubr.msk.f32.mxu0 %vm698_vm0, %v26483_v9 }
 0x355   : > { %21273 = vmatmul.mubr.msk.f32.gmra.mrb[14].mxu0 %vm698_vm0, %v26491_v10 }
 0x356   : > { %21275 = vmatprep.mubr.msk.f32.mxu0 %vm698_vm0, %v26493_v13 }
 0x359   : > { %21276 = vmatmul.mubr.msk.f32.gmra.mrb[16].mxu0 %vm698_vm0, %v26501_v14 }
 0x35a   : > { %21278 = vmatprep.mubr.msk.f32.mxu0 %vm698_vm0, %v26503_v17 }
 0x35d   : > { %21279 = vmatmul.mubr.msk.f32.gmra.mrb[18].mxu0 %vm698_vm0, %v26511_v18 }
 0x35e   : > { %21281 = vmatprep.mubr.msk.f32.mxu0 %vm698_vm0, %v26513_v21 }
 0x361   : > { %21282 = vmatmul.mubr.msk.f32.gmra.mrb[20].mxu0 %vm698_vm0, %v26521_v22 }
 0x362   : > { %21284 = vmatprep.mubr.msk.f32.mxu0 %vm698_vm0, %v26523_v25 }
 0x365   : > { %21285 = vmatmul.mubr.msk.f32.gmra.mrb[22].mxu0 %vm698_vm0, %v26531_v26 }
 0x366   : > { %21287 = vmatprep.mubr.msk.f32.mxu0 %vm698_vm0, %v26533_v29  ;;  %v31409_v29 = vld [vmem:[#allocation54_spill] sm:$0xff] }
 0x369   : > { %21288 = vmatmul.mubr.msk.f32.gmra.mrb[24].mxu0 %vm698_vm0, %v26541_v30  ;;  %v31405_v30 = vld [vmem:[#allocation50_spill] sm:$0xff] }
 0x36a   : > { %21290 = vmatprep.mubr.msk.f32.mxu0 %vm698_vm0, %v26543_v31  ;;  %v31404_v31 = vld [vmem:[#allocation49_spill] sm:$0xff] }
 0x36d   : > { %21291 = vmatmul.mubr.msk.f32.gmra.mrb[26].mxu0 %vm698_vm0, %v26549_v32  ;;  %v3681_v32 = vld [vmem:[#allocation7 + $0x38] sm:$0xff] }
 0x36e   : > { %21293 = vmatprep.mubr.msk.f32.mxu0 %vm698_vm0, %v31400_v42  ;;  %v31406_v42 = vld [vmem:[#allocation51_spill] sm:$0xff] }
 0x371   : > { %21294 = vmatmul.mubr.msk.f32.gmra.mrb[28].mxu0 %vm698_vm0, %v31401_v45  ;;  %v31407_v45 = vld [vmem:[#allocation52_spill] sm:$0xff] }
 0x372   : > { %21296 = vmatprep.mubr.msk.f32.mxu0 %vm698_vm0, %v26944_v46  ;;  %v31408_v46 = vld [vmem:[#allocation53_spill] sm:$0xff] }
 0x375   : > { %21297 = vmatmul.mubr.msk.f32.gmra.mrb[30].mxu0 %vm698_vm0, %v26948_v34  ;;  %v31410_v34 = vld [vmem:[#allocation55_spill] sm:$0xff] }
 0x376   : > { %21301 = vmatprep.mubr.msk.f32.mxu0 %vm698_vm0, %v31404_v31  ;;  %v31411_v31 = vld [vmem:[#allocation56_spill] sm:$0xff] }
 0x379   : > { %21302 = vmatmul.mubr.msk.f32.vlgmr.msra.gmra.mrb[0].mxu0 %vm698_vm0, %v31405_v30  ;;  %v31412_v30 = vld [vmem:[#allocation57_spill] sm:$0xff] }
 0x37a   : > { %21350 = vmatpush3.msra.mxu0 %v3294_v40  ;;  %21304 = vmatprep.mubr.msk.f32.mxu0 %vm698_vm0, %v31406_v42  ;;  %v31413_v40 = vld [vmem:[#allocation58_spill] sm:$0xff]  ;;  %v31414_v42 = vld [vmem:[#allocation59_spill] sm:$0xff] }
 0x37b   : > { %21399 = vmatprep.subr.mxu0 %v3681_v32 }
 0x37d   : > { %21305 = vmatmul.mubr.msk.f32.gmra.mrb[2].mxu0 %vm698_vm0, %v31407_v45  ;;  %v31415_v45 = vld [vmem:[#allocation60_spill] sm:$0xff] }
 0x37e   : > { %21307 = vmatprep.mubr.msk.f32.mxu0 %vm698_vm0, %v31408_v46  ;;  %v31416_v46 = vld [vmem:[#allocation61_spill] sm:$0xff] }
 0x381   : > { %21308 = vmatmul.mubr.msk.f32.gmra.mrb[4].mxu0 %vm698_vm0, %v31409_v29  ;;  %v31417_v29 = vld [vmem:[#allocation62_spill] sm:$0xff] }
 0x382   : > { %21310 = vmatprep.mubr.msk.f32.mxu0 %vm698_vm0, %v31410_v34  ;;  %v31418_v34 = vld [vmem:[#allocation63_spill] sm:$0xff] }
 0x385   : > { %21311 = vmatmul.mubr.msk.f32.gmra.mrb[6].mxu0 %vm698_vm0, %v31411_v31  ;;  %v31419_v31 = vld [vmem:[#allocation64_spill] sm:$0xff] }
 0x386   : > { %21313 = vmatprep.mubr.msk.f32.mxu0 %vm698_vm0, %v31412_v30  ;;  %v31420_v30 = vld [vmem:[#allocation65_spill] sm:$0xff] }
 0x389   : > { %21314 = vmatmul.mubr.msk.f32.gmra.mrb[8].mxu0 %vm698_vm0, %v31413_v40  ;;  %v31421_v40 = vld [vmem:[#allocation66_spill] sm:$0xff] }
 0x38a   : > { %21316 = vmatprep.mubr.msk.f32.mxu0 %vm698_vm0, %v31414_v42  ;;  %v31422_v42 = vld [vmem:[#allocation67_spill] sm:$0xff] }
 0x38d   : > { %21317 = vmatmul.mubr.msk.f32.gmra.mrb[10].mxu0 %vm698_vm0, %v31415_v45  ;;  %v31423_v45 = vld [vmem:[#allocation68_spill] sm:$0xff] }
 0x38e   : > { %21319 = vmatprep.mubr.msk.f32.mxu0 %vm698_vm0, %v31416_v46  ;;  %v31424_v46 = vld [vmem:[#allocation69_spill] sm:$0xff] }
 0x391   : > { %21320 = vmatmul.mubr.msk.f32.gmra.mrb[12].mxu0 %vm698_vm0, %v31417_v29  ;;  %v31425_v29 = vld [vmem:[#allocation70_spill] sm:$0xff] }
 0x392   : > { %21322 = vmatprep.mubr.msk.f32.mxu0 %vm698_vm0, %v31418_v34  ;;  %v31426_v34 = vld [vmem:[#allocation71_spill] sm:$0xff] }
 0x395   : > { %21323 = vmatmul.mubr.msk.f32.gmra.mrb[14].mxu0 %vm698_vm0, %v31419_v31  ;;  %v31427_v31 = vld [vmem:[#allocation72_spill] sm:$0xff] }
 0x396   : > { %21325 = vmatprep.mubr.msk.f32.mxu0 %vm698_vm0, %v31420_v30  ;;  %v31428_v30 = vld [vmem:[#allocation73_spill] sm:$0xff] }
 0x399   : > { %21326 = vmatmul.mubr.msk.f32.gmra.mrb[16].mxu0 %vm698_vm0, %v31421_v40  ;;  %v31429_v40 = vld [vmem:[#allocation74_spill] sm:$0xff] }
 0x39a   : > { %21328 = vmatprep.mubr.msk.f32.mxu0 %vm698_vm0, %v31422_v42 }
 0x39d   : > { %21329 = vmatmul.mubr.msk.f32.gmra.mrb[18].mxu0 %vm698_vm0, %v31423_v45 }
 0x39e   : > { %21331 = vmatprep.mubr.msk.f32.mxu0 %vm698_vm0, %v31424_v46 }
 0x3a1   : > { %21332 = vmatmul.mubr.msk.f32.gmra.mrb[20].mxu0 %vm698_vm0, %v31425_v29 }
 0x3a2   : > { %21334 = vmatprep.mubr.msk.f32.mxu0 %vm698_vm0, %v31426_v34  ;;  %v27012_v34 = vld [vmem:[#allocation2 + $0x182] sm:$0xff] }
 0x3a5   : > { %21335 = vmatmul.mubr.msk.f32.gmra.mrb[22].mxu0 %vm698_vm0, %v31427_v31 }
 0x3a6   : > { %21337 = vmatprep.mubr.msk.f32.mxu0 %vm698_vm0, %v31428_v30  ;;  %v27016_v30 = vld [vmem:[#allocation2 + $0x18a] sm:$0xff] }
 0x3a9   : > { %21338 = vmatmul.mubr.msk.f32.gmra.mrb[24].mxu0 %vm698_vm0, %v31429_v40 }
 0x3aa   : > { %21340 = vmatprep.mubr.msk.f32.mxu0 %vm698_vm0, %v26799_v33 }
 0x3ad   : > { %21341 = vmatmul.mubr.msk.f32.gmra.mrb[26].mxu0 %vm698_vm0, %v26803_v37  ;;  %v4068_v37 = vld [vmem:[#allocation7 + $0x40] sm:$0xff] }
 0x3ae   : > { %21343 = vmatprep.mubr.msk.f32.mxu0 %vm698_vm0, %v26807_v23 }
 0x3b1   : > { %21344 = vmatmul.mubr.msk.f32.gmra.mrb[28].mxu0 %vm698_vm0, %v26811_v38 }
 0x3b2   : > { %21346 = vmatprep.mubr.msk.f32.mxu0 %vm698_vm0, %v27012_v34 }
 0x3b5   : > { %21347 = vmatmul.mubr.msk.f32.gmra.mrb[30].mxu0 %vm698_vm0, %v27016_v30 }
 0x3b6   : > { %21351 = vmatprep.mubr.msk.f32.mxu0 %vm698_vm0, %v26575_v41  ;;  %v3292_v41 = vld [vmem:[#allocation2 + $0x1a0] sm:$0xff] }
 0x3b9   : > { %21352 = vmatmul.mubr.msk.f32.vlgmr.msra.gmra.mrb[0].mxu0 %vm698_vm0, %v26579_v43  ;;  %v3648_v43 = vld [vmem:[#allocation2 + $0x31] sm:$0xff] }
 0x3ba   : > { %21400 = vmatpush3.msra.mxu0 %v3681_v32  ;;  %21354 = vmatprep.mubr.msk.f32.mxu0 %vm698_vm0, %v26583_v35  ;;  %v3291_v32 = vld [vmem:[#allocation2 + $0x198] sm:$0xff] }
 0x3bb   : > { %21449 = vmatprep.subr.mxu0 %v4068_v37  ;;  %v4686_v35 = vld [vmem:[#allocation19] sm:$0xff] }
 0x3bd   : > { %21355 = vmatmul.mubr.msk.f32.gmra.mrb[2].mxu0 %vm698_vm0, %v26587_v44  ;;  %v4687_v44 = vld [vmem:[#allocation19 + $0x8] sm:$0xff] }
 0x3be   : > { %21357 = vmatprep.mubr.msk.f32.mxu0 %vm698_vm0, %v26591_v47  ;;  %v27083_v47 = vpack.c.bf16 %v4687_v44, %v4686_v35  ;;  %v25154_v35 = vld [vmem:[%s26200_s24 + $0xe0] sm:$0xff]  ;;  %v25155_v44 = vld [vmem:[%s26200_s24 + $0xe8] sm:$0xff] }
 0x3c1   : > { %21358 = vmatmul.mubr.msk.f32.gmra.mrb[4].mxu0 %vm698_vm0, %v26595_v48  ;;  %v31449_v48 = vld [vmem:[#allocation61_spill] sm:$0xff] }
 0x3c2   : > { %21360 = vmatprep.mubr.msk.f32.mxu0 %vm698_vm0, %v26599_v50  ;;  %v31450_v50 = vld [vmem:[#allocation62_spill] sm:$0xff] }
 0x3c5   : > { %21361 = vmatmul.mubr.msk.f32.gmra.mrb[6].mxu0 %vm698_vm0, %v26603_v51  ;;  %v31451_v51 = vld [vmem:[#allocation63_spill] sm:$0xff] }
 0x3c6   : > { %21363 = vmatprep.mubr.msk.f32.mxu0 %vm698_vm0, %v26607_v54  ;;  %v31452_v54 = vld [vmem:[#allocation64_spill] sm:$0xff] }
 0x3c9   : > { %21364 = vmatmul.mubr.msk.f32.gmra.mrb[8].mxu0 %vm698_vm0, %v26611_v55  ;;  %v31453_v55 = vld [vmem:[#allocation65_spill] sm:$0xff] }
 0x3ca   : > { %21366 = vmatprep.mubr.msk.f32.mxu0 %vm698_vm0, %v26615_v58  ;;  %v31454_v58 = vld [vmem:[#allocation66_spill] sm:$0xff] }
 0x3cd   : > { %21367 = vmatmul.mubr.msk.f32.gmra.mrb[10].mxu0 %vm698_vm0, %v26619_v59  ;;  %v31455_v59 = vld [vmem:[#allocation71_spill] sm:$0xff] }
 0x3ce   : > { %21369 = vmatprep.mubr.msk.f32.mxu0 %vm698_vm0, %v26623_v62  ;;  %v31456_v62 = vld [vmem:[#allocation73_spill] sm:$0xff] }
 0x3d1   : > { %21370 = vmatmul.mubr.msk.f32.gmra.mrb[12].mxu0 %vm698_vm0, %v26627_v63  ;;  %v31457_v63 = vld [vmem:[#allocation75_spill] sm:$0xff] }
 0x3d2   : > { %21372 = vmatprep.mubr.msk.f32.mxu0 %vm698_vm0, %v26631_v3  ;;  %v25126_v3 = vld [vmem:[%s26200_s24] sm:$0xff] }
 0x3d5   : > { %21373 = vmatmul.mubr.msk.f32.gmra.mrb[14].mxu0 %vm698_vm0, %v26635_v4  ;;  %v25127_v4 = vld [vmem:[%s26200_s24 + $0x8] sm:$0xff] }
 0x3d6   : > { %21375 = vmatprep.mubr.msk.f32.mxu0 %vm698_vm0, %v26639_v7  ;;  %v25128_v7 = vld [vmem:[%s26200_s24 + $0x10] sm:$0xff] }
 0x3d9   : > { %21376 = vmatmul.mubr.msk.f32.gmra.mrb[16].mxu0 %vm698_vm0, %v26643_v8  ;;  %v25129_v8 = vld [vmem:[%s26200_s24 + $0x18] sm:$0xff] }
 0x3da   : > { %21378 = vmatprep.mubr.msk.f32.mxu0 %vm698_vm0, %v26647_v11  ;;  %v25130_v11 = vld [vmem:[%s26200_s24 + $0x20] sm:$0xff] }
 0x3dd   : > { %21379 = vmatmul.mubr.msk.f32.gmra.mrb[18].mxu0 %vm698_vm0, %v26651_v12  ;;  %v25131_v12 = vld [vmem:[%s26200_s24 + $0x28] sm:$0xff] }
 0x3de   : > { %21381 = vmatprep.mubr.msk.f32.mxu0 %vm698_vm0, %v26655_v15  ;;  %v25132_v15 = vld [vmem:[%s26200_s24 + $0x30] sm:$0xff] }
 0x3e1   : > { %21382 = vmatmul.mubr.msk.f32.gmra.mrb[20].mxu0 %vm698_vm0, %v26659_v16  ;;  %v25133_v16 = vld [vmem:[%s26200_s24 + $0x38] sm:$0xff] }
 0x3e2   : > { %21384 = vmatprep.mubr.msk.f32.mxu0 %vm698_vm0, %v26663_v19  ;;  %v25134_v19 = vld [vmem:[%s26200_s24 + $0x40] sm:$0xff] }
 0x3e5   : > { %21385 = vmatmul.mubr.msk.f32.gmra.mrb[22].mxu0 %vm698_vm0, %v26669_v24  ;;  %v25135_v24 = vld [vmem:[%s26200_s24 + $0x48] sm:$0xff] }
 0x3e6   : > { %21387 = vmatprep.mubr.msk.f32.mxu0 %vm698_vm0, %v26673_v27  ;;  %v25136_v27 = vld [vmem:[%s26200_s24 + $0x50] sm:$0xff] }
 0x3e9   : > { %21388 = vmatmul.mubr.msk.f32.gmra.mrb[24].mxu0 %vm698_vm0, %v26677_v28  ;;  %v25137_v28 = vld [vmem:[%s26200_s24 + $0x58] sm:$0xff] }
 0x3ea   : > { %21390 = vmatprep.mubr.msk.f32.mxu0 %vm698_vm0, %v26681_v36  ;;  %v25138_v36 = vld [vmem:[%s26200_s24 + $0x60] sm:$0xff] }
 0x3ed   : > { %21391 = vmatmul.mubr.msk.f32.gmra.mrb[26].mxu0 %vm698_vm0, %v26685_v20  ;;  %v25139_v20 = vld [vmem:[%s26200_s24 + $0x68] sm:$0xff] }
 0x3ee   : > { %21393 = vmatprep.mubr.msk.f32.mxu0 %vm698_vm0, %v26874_v0  ;;  %v25143_v0 = vld [vmem:[%s26200_s24 + $0x88] sm:$0xff] }
 0x3f1   : > { %21394 = vmatmul.mubr.msk.f32.gmra.mrb[28].mxu0 %vm698_vm0, %v26880_v39  ;;  %v25144_v39 = vld [vmem:[%s26200_s24 + $0x90] sm:$0xff] }
 0x3f2   : > { %21396 = vmatprep.mubr.msk.f32.mxu0 %vm698_vm0, %v3291_v32  ;;  %v25152_v32 = vld [vmem:[%s26200_s24 + $0xd0] sm:$0xff] }
 0x3f5   : > { %21397 = vmatmul.mubr.msk.f32.gmra.mrb[30].mxu0 %vm698_vm0, %v3292_v41  ;;  %v5016_v41 = vld [vmem:[#allocation21] sm:$0xf] }
 0x3f6   : > { %21401 = vmatprep.mubr.msk.f32.mxu0 %vm698_vm0, %v3648_v43  ;;  %v25153_v43 = vld [vmem:[%s26200_s24 + $0xd8] sm:$0xff] }
 0x3f9   : > { %21402 = vmatmul.mubr.msk.f32.vlgmr.msra.gmra.mrb[0].mxu0 %vm698_vm0, %v26431_v49  ;;  %v31430_v49 = vmov 0.0  }
 0x3fa   : > { %21450 = vmatpush3.msra.mxu0 %v4068_v37  ;;  %21404 = vmatprep.mubr.msk.f32.mxu0 %vm698_vm0, %v26433_v52  ;;  %760 = vst.msk [vmem:[#allocation3 + $0x20] sm:$0xff] %vm754_vm2, %v31430_v49  ;;  %755 = vst.msk [vmem:[#allocation3] sm:$0xff] %vm754_vm2, %v31430_v49  ;;  %v31431_v52 = vld [vmem:[#allocation43_spill] sm:$0xff]  ;;  %v25140_v37 = vld [vmem:[%s26200_s24 + $0x70] sm:$0xff] }
 0x3fb   : > { %23102 = vmatprep.subr.bf16.mxu0 %v27083_v47  ;;  %761 = vst.msk [vmem:[#allocation3 + $0x28] sm:$0x3] %vm757_vm3, %v31430_v49  ;;  %758 = vst.msk [vmem:[#allocation3 + $0x10] sm:$0x3] %vm757_vm3, %v31430_v49 }
 0x3fc   : > { %756 = vst.msk [vmem:[#allocation3 + $0x8] sm:$0xff] %vm754_vm2, %v31430_v49  ;;  %759 = vst.msk [vmem:[#allocation3 + $0x18] sm:$0xff] %vm754_vm2, %v31430_v49 }
 0x3fd   : > { %21405 = vmatmul.mubr.msk.f32.gmra.mrb[2].mxu0 %vm698_vm0, %v26441_v53  ;;  %762 = vst.msk [vmem:[#allocation3 + $0x30] sm:$0xff] %vm754_vm2, %v31430_v49  ;;  %763 = vst.msk [vmem:[#allocation3 + $0x38] sm:$0xff] %vm754_vm2, %v31430_v49  ;;  %v31432_v53 = vld [vmem:[#allocation44_spill] sm:$0xff] }
 0x3fe   : > { %21407 = vmatprep.mubr.msk.f32.mxu0 %vm698_vm0, %v26443_v56  ;;  %764 = vst.msk [vmem:[#allocation3 + $0x40] sm:$0x3] %vm757_vm3, %v31430_v49  ;;  %767 = vst.msk [vmem:[#allocation3 + $0x58] sm:$0x3] %vm757_vm3, %v31430_v49  ;;  %v31433_v56 = vld [vmem:[#allocation45_spill] sm:$0xff] }
 0x3ff   : > { %765 = vst.msk [vmem:[#allocation3 + $0x48] sm:$0xff] %vm754_vm2, %v31430_v49  ;;  %766 = vst.msk [vmem:[#allocation3 + $0x50] sm:$0xff] %vm754_vm2, %v31430_v49 }
 0x400   : > { %768 = vst.msk [vmem:[#allocation3 + $0x60] sm:$0xff] %vm754_vm2, %v31430_v49  ;;  %769 = vst.msk [vmem:[#allocation3 + $0x68] sm:$0xff] %vm754_vm2, %v31430_v49 }
 0x401   : > { %21408 = vmatmul.mubr.msk.f32.gmra.mrb[4].mxu0 %vm698_vm0, %v26451_v57  ;;  %770 = vst.msk [vmem:[#allocation3 + $0x70] sm:$0x3] %vm757_vm3, %v31430_v49  ;;  %773 = vst.msk [vmem:[#allocation3 + $0x88] sm:$0x3] %vm757_vm3, %v31430_v49  ;;  %v31434_v57 = vld [vmem:[#allocation46_spill] sm:$0xff] }
 0x402   : > { %21410 = vmatprep.mubr.msk.f32.mxu0 %vm698_vm0, %v26453_v60  ;;  %771 = vst.msk [vmem:[#allocation3 + $0x78] sm:$0xff] %vm754_vm2, %v31430_v49  ;;  %772 = vst.msk [vmem:[#allocation3 + $0x80] sm:$0xff] %vm754_vm2, %v31430_v49  ;;  %v31435_v60 = vld [vmem:[#allocation47_spill] sm:$0xff] }
 0x403   : > { %774 = vst.msk [vmem:[#allocation3 + $0x90] sm:$0xff] %vm754_vm2, %v31430_v49  ;;  %775 = vst.msk [vmem:[#allocation3 + $0x98] sm:$0xff] %vm754_vm2, %v31430_v49 }
 0x404   : > { %776 = vst.msk [vmem:[#allocation3 + $0xa0] sm:$0x3] %vm757_vm3, %v31430_v49  ;;  %779 = vst.msk [vmem:[#allocation3 + $0xb8] sm:$0x3] %vm757_vm3, %v31430_v49 }
 0x405   : > { %21411 = vmatmul.mubr.msk.f32.gmra.mrb[6].mxu0 %vm698_vm0, %v26461_v61  ;;  %777 = vst.msk [vmem:[#allocation3 + $0xa8] sm:$0xff] %vm754_vm2, %v31430_v49  ;;  %778 = vst.msk [vmem:[#allocation3 + $0xb0] sm:$0xff] %vm754_vm2, %v31430_v49  ;;  %v31436_v61 = vld [vmem:[#allocation48_spill] sm:$0xff] }
 0x406   : > { %21413 = vmatprep.mubr.msk.f32.mxu0 %vm698_vm0, %v26463_v1  ;;  %780 = vst.msk [vmem:[#allocation3 + $0xc0] sm:$0xff] %vm754_vm2, %v31430_v49  ;;  %781 = vst.msk [vmem:[#allocation3 + $0xc8] sm:$0xff] %vm754_vm2, %v31430_v49  ;;  %v31437_v1 = vld [vmem:[#allocation76_spill] sm:$0xff] }
 0x407   : > { %782 = vst.msk [vmem:[#allocation3 + $0xd0] sm:$0x3] %vm757_vm3, %v31430_v49  ;;  %785 = vst.msk [vmem:[#allocation3 + $0xe8] sm:$0x3] %vm757_vm3, %v31430_v49 }
 0x408   : > { %783 = vst.msk [vmem:[#allocation3 + $0xd8] sm:$0xff] %vm754_vm2, %v31430_v49  ;;  %784 = vst.msk [vmem:[#allocation3 + $0xe0] sm:$0xff] %vm754_vm2, %v31430_v49 }
 0x409   : > { %21414 = vmatmul.mubr.msk.f32.gmra.mrb[8].mxu0 %vm698_vm0, %v26471_v2  ;;  %786 = vst.msk [vmem:[#allocation3 + $0xf0] sm:$0xff] %vm754_vm2, %v31430_v49  ;;  %787 = vst.msk [vmem:[#allocation3 + $0xf8] sm:$0xff] %vm754_vm2, %v31430_v49  ;;  %v3678_v2 = vld [vmem:[#allocation2 + $0x199] sm:$0xff] }
 0x40a   : > { %21416 = vmatprep.mubr.msk.f32.mxu0 %vm698_vm0, %v26473_v5  ;;  %788 = vst.msk [vmem:[#allocation3 + $0x100] sm:$0x3] %vm757_vm3, %v31430_v49  ;;  %791 = vst.msk [vmem:[#allocation3 + $0x118] sm:$0x3] %vm757_vm3, %v31430_v49  ;;  %v31438_v5 = vld [vmem:[#allocation77_spill] sm:$0xff] }
 0x40b   : > { %789 = vst.msk [vmem:[#allocation3 + $0x108] sm:$0xff] %vm754_vm2, %v31430_v49  ;;  %790 = vst.msk [vmem:[#allocation3 + $0x110] sm:$0xff] %vm754_vm2, %v31430_v49 }
 0x40c   : > { %792 = vst.msk [vmem:[#allocation3 + $0x120] sm:$0xff] %vm754_vm2, %v31430_v49  ;;  %793 = vst.msk [vmem:[#allocation3 + $0x128] sm:$0xff] %vm754_vm2, %v31430_v49 }
 0x40d   : > { %21417 = vmatmul.mubr.msk.f32.gmra.mrb[10].mxu0 %vm698_vm0, %v26481_v6  ;;  %794 = vst.msk [vmem:[#allocation3 + $0x130] sm:$0x3] %vm757_vm3, %v31430_v49  ;;  %797 = vst.msk [vmem:[#allocation3 + $0x148] sm:$0x3] %vm757_vm3, %v31430_v49  ;;  %v3679_v6 = vld [vmem:[#allocation2 + $0x1a1] sm:$0xff] }
 0x40e   : > { %21419 = vmatprep.mubr.msk.f32.mxu0 %vm698_vm0, %v26483_v9  ;;  %795 = vst.msk [vmem:[#allocation3 + $0x138] sm:$0xff] %vm754_vm2, %v31430_v49  ;;  %796 = vst.msk [vmem:[#allocation3 + $0x140] sm:$0xff] %vm754_vm2, %v31430_v49  ;;  %v31439_v9 = vld [vmem:[#allocation51_spill] sm:$0xff] }
 0x40f   : > { %798 = vst.msk [vmem:[#allocation3 + $0x150] sm:$0xff] %vm754_vm2, %v31430_v49  ;;  %799 = vst.msk [vmem:[#allocation3 + $0x158] sm:$0xff] %vm754_vm2, %v31430_v49 }
 0x410   : > { %800 = vst.msk [vmem:[#allocation3 + $0x160] sm:$0x3] %vm757_vm3, %v31430_v49  ;;  %803 = vst.msk [vmem:[#allocation3 + $0x178] sm:$0x3] %vm757_vm3, %v31430_v49 }
 0x411   : > { %21420 = vmatmul.mubr.msk.f32.gmra.mrb[12].mxu0 %vm698_vm0, %v26491_v10  ;;  %801 = vst.msk [vmem:[#allocation3 + $0x168] sm:$0xff] %vm754_vm2, %v31430_v49  ;;  %802 = vst.msk [vmem:[#allocation3 + $0x170] sm:$0xff] %vm754_vm2, %v31430_v49  ;;  %v31440_v10 = vld [vmem:[#allocation52_spill] sm:$0xff] }
 0x412   : > { %21422 = vmatprep.mubr.msk.f32.mxu0 %vm698_vm0, %v26493_v13  ;;  %804 = vst.msk [vmem:[#allocation3 + $0x180] sm:$0xff] %vm754_vm2, %v31430_v49  ;;  %805 = vst.msk [vmem:[#allocation3 + $0x188] sm:$0xff] %vm754_vm2, %v31430_v49  ;;  %v31441_v13 = vld [vmem:[#allocation53_spill] sm:$0xff] }
 0x413   : > { %806 = vst.msk [vmem:[#allocation3 + $0x190] sm:$0x3] %vm757_vm3, %v31430_v49  ;;  %809 = vst.msk [vmem:[#allocation3 + $0x1a8] sm:$0x3] %vm757_vm3, %v31430_v49 }
 0x414   : > { %807 = vst.msk [vmem:[#allocation3 + $0x198] sm:$0xff] %vm754_vm2, %v31430_v49  ;;  %808 = vst.msk [vmem:[#allocation3 + $0x1a0] sm:$0xff] %vm754_vm2, %v31430_v49  ;;  %v25157_v49 = vld [vmem:[%s26200_s24 + $0xf8] sm:$0xff] }
 0x415   : > { %21423 = vmatmul.mubr.msk.f32.gmra.mrb[14].mxu0 %vm698_vm0, %v26501_v14  ;;  %v31442_v14 = vld [vmem:[#allocation54_spill] sm:$0xff] }
 0x416   : > { %21425 = vmatprep.mubr.msk.f32.mxu0 %vm698_vm0, %v26503_v17  ;;  %v31443_v17 = vld [vmem:[#allocation55_spill] sm:$0xff] }
 0x419   : > { %21426 = vmatmul.mubr.msk.f32.gmra.mrb[16].mxu0 %vm698_vm0, %v26511_v18  ;;  %v31444_v18 = vld [vmem:[#allocation56_spill] sm:$0xff] }
 0x41a   : > { %21428 = vmatprep.mubr.msk.f32.mxu0 %vm698_vm0, %v26513_v21  ;;  %v31445_v21 = vld [vmem:[#allocation57_spill] sm:$0xff] }
 0x41d   : > { %21429 = vmatmul.mubr.msk.f32.gmra.mrb[18].mxu0 %vm698_vm0, %v26521_v22  ;;  %v31446_v22 = vld [vmem:[#allocation58_spill] sm:$0xff] }
 0x41e   : > { %21431 = vmatprep.mubr.msk.f32.mxu0 %vm698_vm0, %v26523_v25  ;;  %v31447_v25 = vld [vmem:[#allocation59_spill] sm:$0xff] }
 0x421   : > { %21432 = vmatmul.mubr.msk.f32.gmra.mrb[20].mxu0 %vm698_vm0, %v26531_v26  ;;  %v31448_v26 = vld [vmem:[#allocation60_spill] sm:$0xff] }
 0x422   : > { %21434 = vmatprep.mubr.msk.f32.mxu0 %vm698_vm0, %v31431_v52  ;;  %v27383_v52 = vld [vmem:[#allocation10 + $0x4] sm:$0xf] }
 0x423   : > { %23105 = vmatprep.subr.msk.mxu1 %vm5113_vm5, %v27383_v52 }
 0x424   : > { %23106 = vmatpush3.msk.msra.mxu1 %vm5113_vm5, %v27383_v52 }
 0x425   : > { %21435 = vmatmul.mubr.msk.f32.gmra.mrb[22].mxu0 %vm698_vm0, %v31432_v53  ;;  %v27391_v53 = vld [vmem:[#allocation10] sm:$0xf] }
 0x426   : > { %21437 = vmatprep.mubr.msk.f32.mxu0 %vm698_vm0, %v31433_v56  ;;  %21651 = vmatprep.subr.msk.mxu1 %vm5113_vm5, %v27391_v53  ;;  %v27395_v56 = vld [vmem:[#allocation9] ss:$0 sm:$0xff] }
 0x429   : > { %21438 = vmatmul.mubr.msk.f32.gmra.mrb[24].mxu0 %vm698_vm0, %v31434_v57 }
 0x42a   : > { %21440 = vmatprep.mubr.msk.f32.mxu0 %vm698_vm0, %v31435_v60 }
 0x42d   : > { %21441 = vmatmul.mubr.msk.f32.gmra.mrb[26].mxu0 %vm698_vm0, %v31436_v61 }
 0x42e   : > { %21443 = vmatprep.mubr.msk.f32.mxu0 %vm698_vm0, %v31437_v1 }
 0x431   : > { %21444 = vmatmul.mubr.msk.f32.gmra.mrb[28].mxu0 %vm698_vm0, %v31438_v5 }
 0x432   : > { %21446 = vmatprep.mubr.msk.f32.mxu0 %vm698_vm0, %v3678_v2 }
 0x435   : > { %21447 = vmatmul.mubr.msk.f32.gmra.mrb[30].mxu0 %vm698_vm0, %v3679_v6 }
 0x436   : > { %21451 = vmatprep.mubr.msk.f32.mxu0 %vm698_vm0, %v31439_v9 }
 0x439   : > { %21452 = vmatmul.mubr.msk.f32.vlgmr.msra.gmra.mrb[0].mxu0 %vm698_vm0, %v31440_v10 }
 0x43a   : > { %21454 = vmatprep.mubr.msk.f32.mxu0 %vm698_vm0, %v31441_v13  ;;  %23104 = vmatpush3.bf16.msra.mxu0 %v27083_v47  ;;  %v25156_v47 = vld [vmem:[%s26200_s24 + $0xf0] sm:$0xff] }
 0x43b   : > { %21551 = vmatprep.subr.msk.mxu0 %vm5113_vm5, %v5016_v41 }
 0x43d   : > { %21455 = vmatmul.mubr.msk.f32.gmra.mrb[2].mxu0 %vm698_vm0, %v31442_v14 }
 0x43e   : > { %21457 = vmatprep.mubr.msk.f32.mxu0 %vm698_vm0, %v31443_v17 }
 0x441   : > { %21458 = vmatmul.mubr.msk.f32.gmra.mrb[4].mxu0 %vm698_vm0, %v31444_v18 }
 0x442   : > { %21460 = vmatprep.mubr.msk.f32.mxu0 %vm698_vm0, %v31445_v21 }
 0x445   : > { %21461 = vmatmul.mubr.msk.f32.gmra.mrb[6].mxu0 %vm698_vm0, %v31446_v22 }
 0x446   : > { %21463 = vmatprep.mubr.msk.f32.mxu0 %vm698_vm0, %v31447_v25 }
 0x449   : > { %21464 = vmatmul.mubr.msk.f32.gmra.mrb[8].mxu0 %vm698_vm0, %v31448_v26 }
 0x44a   : > { %21466 = vmatprep.mubr.msk.f32.mxu0 %vm698_vm0, %v31449_v48 }
 0x44d   : > { %21467 = vmatmul.mubr.msk.f32.gmra.mrb[10].mxu0 %vm698_vm0, %v31450_v50 }
 0x44e   : > { %21469 = vmatprep.mubr.msk.f32.mxu0 %vm698_vm0, %v31451_v51 }
 0x451   : > { %21470 = vmatmul.mubr.msk.f32.gmra.mrb[12].mxu0 %vm698_vm0, %v31452_v54 }
 0x452   : > { %21472 = vmatprep.mubr.msk.f32.mxu0 %vm698_vm0, %v31453_v55 }
 0x455   : > { %21473 = vmatmul.mubr.msk.f32.gmra.mrb[14].mxu0 %vm698_vm0, %v31454_v58 }
 0x456   : > { %21475 = vmatprep.mubr.msk.f32.mxu0 %vm698_vm0, %v31422_v42  ;;  %v25145_v42 = vld [vmem:[%s26200_s24 + $0x98] sm:$0xff] }
 0x459   : > { %21476 = vmatmul.mubr.msk.f32.gmra.mrb[16].mxu0 %vm698_vm0, %v31423_v45  ;;  %v25146_v45 = vld [vmem:[%s26200_s24 + $0xa0] sm:$0xff] }
 0x45a   : > { %21478 = vmatprep.mubr.msk.f32.mxu0 %vm698_vm0, %v31424_v46  ;;  %v25147_v46 = vld [vmem:[%s26200_s24 + $0xa8] sm:$0xff] }
 0x45d   : > { %21479 = vmatmul.mubr.msk.f32.gmra.mrb[18].mxu0 %vm698_vm0, %v31425_v29  ;;  %v4065_v29 = vld [vmem:[#allocation2 + $0x19a] sm:$0xff] }
 0x45e   : > { %21481 = vmatprep.mubr.msk.f32.mxu0 %vm698_vm0, %v31455_v59 }
 0x461   : > { %21482 = vmatmul.mubr.msk.f32.gmra.mrb[20].mxu0 %vm698_vm0, %v31427_v31  ;;  %v25149_v31 = vld [vmem:[%s26200_s24 + $0xb8] sm:$0xff] }
 0x462   : > { %21484 = vmatprep.mubr.msk.f32.mxu0 %vm698_vm0, %v31456_v62 }
 0x465   : > { %21485 = vmatmul.mubr.msk.f32.gmra.mrb[22].mxu0 %vm698_vm0, %v31429_v40  ;;  %v25151_v40 = vld [vmem:[%s26200_s24 + $0xc8] sm:$0xff] }
 0x466   : > { %21487 = vmatprep.mubr.msk.f32.mxu0 %vm698_vm0, %v26799_v33  ;;  %v4066_v33 = vld [vmem:[#allocation2 + $0x1a2] sm:$0xff] }
 0x469   : > { %21488 = vmatmul.mubr.msk.f32.gmra.mrb[24].mxu0 %vm698_vm0, %v31457_v63 }
 0x46a   : > { %21490 = vmatprep.mubr.msk.f32.mxu0 %vm698_vm0, %v26807_v23  ;;  %v25141_v23 = vld [vmem:[%s26200_s24 + $0x78] sm:$0xff] }
 0x46d   : > { %21491 = vmatmul.mubr.msk.f32.gmra.mrb[26].mxu0 %vm698_vm0, %v26811_v38  ;;  %v25142_v38 = vld [vmem:[%s26200_s24 + $0x80] sm:$0xff] }
 0x46e   : > { %21493 = vmatprep.mubr.msk.f32.mxu0 %vm698_vm0, %v27012_v34  ;;  %v25148_v34 = vld [vmem:[%s26200_s24 + $0xb0] sm:$0xff] }
 0x471   : > { %21494 = vmatmul.mubr.msk.f32.gmra.mrb[28].mxu0 %vm698_vm0, %v27016_v30  ;;  %v25150_v30 = vld [vmem:[%s26200_s24 + $0xc0] sm:$0xff]  ;;  %s25585_s24 = sshll.u32 %s25698_s23, 4  ;;  %s25586_s24 = int_to_ptr.vmem [resolvable:$false] %s25585_s24 }
 0x472   : > { %21496 = vmatprep.mubr.msk.f32.mxu0 %vm698_vm0, %v4065_v29  ;;  %s25587_s2 = scalar_lea.vmem %s25586_s24, 8192  ;;  %p25588_p0 = scmp.lt.s32.totalorder %s30999_s15, %s25586_s24 }
 0x473   : > { %p25589_p2 = scmp.lt.s32.totalorder %s25587_s2, %s25581_s16 }
 0x475   : > { %21497 = vmatmul.mubr.msk.f32.gmra.mrb[30].mxu0 %vm698_vm0, %v4066_v33  ;;  %p25590_p6 = por %p25589_p2, %p25588_p0 }
 0x476   : > { %21503 = vmatprep.mubr.msk.f32.mxu0 %vm4688_vm4, %v25126_v3 }
 0x477   : > { %p25591_p5 = pnand %p25590_p6, %p25584_p3 }
 0x479   : > { %21504 = vmatmul.mubr.msk.f32.vlgmr.msra.gmra.mrb[32].mxu0 %vm4688_vm4, %v25127_v4 }
 0x47a   : > { %21506 = vmatprep.mubr.msk.f32.mxu0 %vm4688_vm4, %v25128_v7  ;;  %21552 = vmatpush3.msk.msra.mxu0 %vm5113_vm5, %v5016_v41 }
 0x47b   : > { %21601 = vmatprep.subr.msk.mxu0 %vm5113_vm5, %v27383_v52 }
 0x47d   : > { %21507 = vmatmul.mubr.msk.f32.gmra.mrb[34].mxu0 %vm4688_vm4, %v25129_v8 }
 0x47e   : > { %21509 = vmatprep.mubr.msk.f32.mxu0 %vm4688_vm4, %v25130_v11 }
 0x481   : > { %21510 = vmatmul.mubr.msk.f32.gmra.mrb[36].mxu0 %vm4688_vm4, %v25131_v12 }
 0x482   : > { %21512 = vmatprep.mubr.msk.f32.mxu0 %vm4688_vm4, %v25132_v15 }
 0x485   : > { %21513 = vmatmul.mubr.msk.f32.gmra.mrb[38].mxu0 %vm4688_vm4, %v25133_v16 }
 0x486   : > { %21515 = vmatprep.mubr.msk.f32.mxu0 %vm4688_vm4, %v25134_v19 }
 0x489   : > { %21516 = vmatmul.mubr.msk.f32.gmra.mrb[40].mxu0 %vm4688_vm4, %v25135_v24 }
 0x48a   : > { %21518 = vmatprep.mubr.msk.f32.mxu0 %vm4688_vm4, %v25136_v27 }
 0x48d   : > { %21519 = vmatmul.mubr.msk.f32.gmra.mrb[42].mxu0 %vm4688_vm4, %v25137_v28 }
 0x48e   : > { %21521 = vmatprep.mubr.msk.f32.mxu0 %vm4688_vm4, %v25138_v36 }
 0x491   : > { %21522 = vmatmul.mubr.msk.f32.gmra.mrb[44].mxu0 %vm4688_vm4, %v25139_v20 }
 0x492   : > { %21524 = vmatprep.mubr.msk.f32.mxu0 %vm4688_vm4, %v25140_v37 }
 0x495   : > { %21525 = vmatmul.mubr.msk.f32.gmra.mrb[46].mxu0 %vm4688_vm4, %v25141_v23 }
 0x496   : > { %21527 = vmatprep.mubr.msk.f32.mxu0 %vm4688_vm4, %v25142_v38 }
 0x499   : > { %21528 = vmatmul.mubr.msk.f32.gmra.mrb[48].mxu0 %vm4688_vm4, %v25143_v0 }
 0x49a   : > { %21530 = vmatprep.mubr.msk.f32.mxu0 %vm4688_vm4, %v25144_v39 }
 0x49d   : > { %21531 = vmatmul.mubr.msk.f32.gmra.mrb[50].mxu0 %vm4688_vm4, %v25145_v42 }
 0x49e   : > { %21533 = vmatprep.mubr.msk.f32.mxu0 %vm4688_vm4, %v25146_v45 }
 0x4a1   : > { %21534 = vmatmul.mubr.msk.f32.gmra.mrb[52].mxu0 %vm4688_vm4, %v25147_v46 }
 0x4a2   : > { %21536 = vmatprep.mubr.msk.f32.mxu0 %vm4688_vm4, %v25148_v34 }
 0x4a5   : > { %21537 = vmatmul.mubr.msk.f32.gmra.mrb[54].mxu0 %vm4688_vm4, %v25149_v31 }
 0x4a6   : > { %21539 = vmatprep.mubr.msk.f32.mxu0 %vm4688_vm4, %v25150_v30 }
 0x4a9   : > { %21540 = vmatmul.mubr.msk.f32.gmra.mrb[56].mxu0 %vm4688_vm4, %v25151_v40 }
 0x4aa   : > { %21542 = vmatprep.mubr.msk.f32.mxu0 %vm4688_vm4, %v25152_v32 }
 0x4ad   : > { %21543 = vmatmul.mubr.msk.f32.gmra.mrb[58].mxu0 %vm4688_vm4, %v25153_v43 }
 0x4ae   : > { %21545 = vmatprep.mubr.msk.f32.mxu0 %vm4688_vm4, %v25154_v35 }
 0x4b1   : > { %21546 = vmatmul.mubr.msk.f32.gmra.mrb[60].mxu0 %vm4688_vm4, %v25155_v44 }
 0x4b2   : > { %21548 = vmatprep.mubr.msk.f32.mxu0 %vm4688_vm4, %v25156_v47 }
 0x4b5   : > { %21549 = vmatmul.mubr.msk.f32.gmra.mrb[62].mxu0 %vm4688_vm4, %v25157_v49 }
 0x50c   : > { %v21453_v57 = vpop.f32.mrb[0].mxu0 }
 0x50d   : > { %v27398_v60 = vadd.f32 %v21453_v57, %v27395_v56  ;;  %v4231_v61 = vpop.f32.mrb[1].mxu0 }
 0x50e   : > { %v27401_v1 = vadd.f32 %v27395_v56, %v4231_v61 }
 0x50f   : > { %v18470_v2 = vmul.f32 -1.442695, %v27398_v60 }
 0x510   : > { %v18469_v5 = vmul.f32 -1.442695, %v27401_v1  ;;  %v21456_v6 = vpop.f32.mrb[2].mxu0 }
 0x511   : > { %24486 = vpow2.f32 %v18470_v2  ;;  %v27406_v9 = vadd.f32 %v21456_v6, %v27395_v56  ;;  %v4241_v10 = vpop.f32.mrb[3].mxu0 }
 0x512   : > { %24488 = vpow2.f32 %v18469_v5  ;;  %v27409_v13 = vadd.f32 %v27395_v56, %v4241_v10 }
 0x513   : > { %v18472_v14 = vmul.f32 -1.442695, %v27406_v9 }
 0x514   : > { %v18471_v17 = vmul.f32 -1.442695, %v27409_v13  ;;  %v21459_v18 = vpop.f32.mrb[4].mxu0 }
 0x515   : > { %24490 = vpow2.f32 %v18472_v14  ;;  %v27414_v21 = vadd.f32 %v21459_v18, %v27395_v56  ;;  %v4251_v22 = vpop.f32.mrb[5].mxu0 }
 0x516   : > { %24492 = vpow2.f32 %v18471_v17  ;;  %v27417_v25 = vadd.f32 %v27395_v56, %v4251_v22 }
 0x517   : > { %v18474_v26 = vmul.f32 -1.442695, %v27414_v21 }
 0x518   : > { %v18473_v48 = vmul.f32 -1.442695, %v27417_v25  ;;  %v21462_v50 = vpop.f32.mrb[6].mxu0 }
 0x519   : > { %24494 = vpow2.f32 %v18474_v26  ;;  %v27422_v51 = vadd.f32 %v21462_v50, %v27395_v56  ;;  %v4261_v54 = vpop.f32.mrb[7].mxu0 }
 0x51a   : > { %24496 = vpow2.f32 %v18473_v48  ;;  %v27425_v55 = vadd.f32 %v27395_v56, %v4261_v54 }
 0x51b   : > { %v24487_v58 = vpop.eup %24486  ;;  %v18476_v59 = vmul.f32 -1.442695, %v27422_v51 }
 0x51c   : > { %v24489_v62 = vpop.eup %24488  ;;  %v4558_v63 = vadd.f32 1.0, %v24487_v58  ;;  %v18475_v29 = vmul.f32 -1.442695, %v27425_v55  ;;  %v21465_v33 = vpop.f32.mrb[8].mxu0 }
 0x51d   : > { %v4557_v3 = vadd.f32 1.0, %v24489_v62  ;;  %24498 = vpow2.f32 %v18476_v59  ;;  %v27430_v4 = vadd.f32 %v21465_v33, %v27395_v56  ;;  %v4271_v7 = vpop.f32.mrb[9].mxu0 }
 0x51e   : > { %24500 = vrcp.f32 %v4558_v63  ;;  %v27433_v8 = vadd.f32 %v27395_v56, %v4271_v7 }
 0x51f   : > { %v24491_v11 = vpop.eup %24490  ;;  %24502 = vrcp.f32 %v4557_v3  ;;  %v18478_v12 = vmul.f32 -1.442695, %v27430_v4 }
 0x520   : > { %v24493_v15 = vpop.eup %24492  ;;  %v4560_v16 = vadd.f32 1.0, %v24491_v11  ;;  %24504 = vpow2.f32 %v18475_v29  ;;  %v18477_v19 = vmul.f32 -1.442695, %v27433_v8  ;;  %v21468_v24 = vpop.f32.mrb[10].mxu0 }
 0x521   : > { %v4559_v27 = vadd.f32 1.0, %v24493_v15  ;;  %24506 = vpow2.f32 %v18478_v12  ;;  %v27438_v28 = vadd.f32 %v21468_v24, %v27395_v56  ;;  %v4281_v36 = vpop.f32.mrb[11].mxu0 }
 0x522   : > { %24508 = vrcp.f32 %v4560_v16  ;;  %v27441_v20 = vadd.f32 %v27395_v56, %v4281_v36 }
 0x523   : > { %v24495_v37 = vpop.eup %24494  ;;  %24510 = vrcp.f32 %v4559_v27  ;;  %v18480_v23 = vmul.f32 -1.442695, %v27438_v28 }
 0x524   : > { %v24497_v38 = vpop.eup %24496  ;;  %v4562_v0 = vadd.f32 1.0, %v24495_v37  ;;  %24512 = vpow2.f32 %v18477_v19  ;;  %v18479_v39 = vmul.f32 -1.442695, %v27441_v20  ;;  %v21471_v42 = vpop.f32.mrb[12].mxu0 }
 0x525   : > { %v4561_v45 = vadd.f32 1.0, %v24497_v38  ;;  %24514 = vpow2.f32 %v18480_v23  ;;  %v27446_v46 = vadd.f32 %v21471_v42, %v27395_v56  ;;  %v4291_v34 = vpop.f32.mrb[13].mxu0 }
 0x526   : > { %24516 = vrcp.f32 %v4562_v0  ;;  %v27449_v31 = vadd.f32 %v27395_v56, %v4291_v34 }
 0x527   : > { %v24499_v30 = vpop.eup %24498  ;;  %24518 = vrcp.f32 %v4561_v45  ;;  %v18482_v40 = vmul.f32 -1.442695, %v27446_v46 }
 0x528   : > { %v24501_v32 = vpop.eup %24500  ;;  %v4564_v41 = vadd.f32 1.0, %v24499_v30  ;;  %24520 = vpow2.f32 %v18479_v39  ;;  %v18481_v43 = vmul.f32 -1.442695, %v27449_v31  ;;  %v21474_v35 = vpop.f32.mrb[14].mxu0 }
 0x529   : > { %v24503_v44 = vpop.eup %24502  ;;  %v4654_v47 = vmul.f32 %v24501_v32, %v27398_v60  ;;  %24522 = vpow2.f32 %v18482_v40  ;;  %v27455_v49 = vadd.f32 %v21474_v35, %v27395_v56  ;;  %v4301_v57 = vpop.f32.mrb[15].mxu0 }
 0x52a   : > { %v24505_v61 = vpop.eup %24504  ;;  %v4653_v2 = vmul.f32 %v24503_v44, %v27401_v1  ;;  %24524 = vrcp.f32 %v4564_v41  ;;  %v27459_v5 = vadd.f32 %v27395_v56, %v4301_v57 }
 0x52b   : > { %v24507_v6 = vpop.eup %24506  ;;  %5376 = vst.msk [vmem:[#allocation3 + $0x21] sm:$0xff] %vm754_vm2, %v4654_v47  ;;  %v4563_v10 = vadd.f32 1.0, %v24505_v61  ;;  %24526 = vpow2.f32 %v18481_v43  ;;  %v18484_v14 = vmul.f32 -1.442695, %v27455_v49 }
 0x52c   : > { %v24509_v60 = vpop.eup %24508  ;;  %5375 = vst.msk [vmem:[#allocation3 + $0x19] sm:$0xff] %vm754_vm2, %v4653_v2  ;;  %v4566_v17 = vadd.f32 1.0, %v24507_v6  ;;  %v18483_v18 = vmul.f32 -1.442695, %v27459_v5  ;;  %v21477_v22 = vpop.f32.mrb[16].mxu0  ;;  %21553 = vmatprep.mubr.msk.f32.mxu0 %vm754_vm2, %v4653_v2 }
 0x52d   : > { %v24511_v1 = vpop.eup %24510  ;;  %v4656_v26 = vmul.f32 %v24509_v60, %v27406_v9  ;;  %24528 = vrcp.f32 %v4563_v10  ;;  %v27468_v48 = vadd.f32 %v21477_v22, %v27395_v56  ;;  %v4311_v50 = vpop.f32.mrb[17].mxu0  ;;  %21554 = vmatmul.mubr.msk.f32.vlgmr.msra.gmra.mrb[32].mxu0 %vm754_vm2, %v4654_v47 }
 0x52e   : > { %v24513_v54 = vpop.eup %24512  ;;  %v4655_v58 = vmul.f32 %v24511_v1, %v27409_v13  ;;  %24530 = vrcp.f32 %v4566_v17  ;;  %v27473_v59 = vadd.f32 %v27395_v56, %v4311_v50  ;;  %21602 = vmatpush3.msk.msra.mxu0 %vm5113_vm5, %v27383_v52 }
 0x52f   : > { %v24515_v62 = vpop.eup %24514  ;;  %5378 = vst.msk [vmem:[#allocation3 + $0x39] sm:$0xff] %vm754_vm2, %v4656_v26  ;;  %v4565_v9 = vadd.f32 1.0, %v24513_v54  ;;  %24532 = vpow2.f32 %v18484_v14  ;;  %v18486_v63 = vmul.f32 -1.442695, %v27468_v48 }
 0x530   : > { %v24517_v29 = vpop.eup %24516  ;;  %5377 = vst.msk [vmem:[#allocation3 + $0x31] sm:$0xff] %vm754_vm2, %v4655_v58  ;;  %v4568_v33 = vadd.f32 1.0, %v24515_v62  ;;  %24534 = vpow2.f32 %v18483_v18  ;;  %v18485_v13 = vmul.f32 -1.442695, %v27473_v59  ;;  %v21480_v3 = vpop.f32.mrb[18].mxu0  ;;  %21556 = vmatprep.mubr.msk.f32.mxu0 %vm754_vm2, %v4655_v58 }
 0x531   : > { %v24519_v7 = vpop.eup %24518  ;;  %v4658_v52 = vmul.f32 %v24517_v29, %v27414_v21  ;;  %24536 = vrcp.f32 %v4565_v9  ;;  %v27484_v11 = vadd.f32 %v21480_v3, %v27395_v56  ;;  %v4321_v12 = vpop.f32.mrb[19].mxu0  ;;  %21557 = vmatmul.mubr.msk.f32.gmra.mrb[34].mxu0 %vm754_vm2, %v4656_v26 }
 0x532   : > { %v24521_v15 = vpop.eup %24520  ;;  %v4657_v16 = vmul.f32 %v24519_v7, %v27417_v25  ;;  %24538 = vrcp.f32 %v4568_v33  ;;  %v27489_v19 = vadd.f32 %v27395_v56, %v4321_v12 }
 0x533   : > { %v24523_v24 = vpop.eup %24522  ;;  %5380 = vst.msk [vmem:[#allocation3 + $0x51] sm:$0xff] %vm754_vm2, %v4658_v52  ;;  %v4567_v27 = vadd.f32 1.0, %v24521_v15  ;;  %24540 = vpow2.f32 %v18486_v63  ;;  %v18488_v21 = vmul.f32 -1.442695, %v27484_v11 }
 0x534   : > { %v24525_v36 = vpop.eup %24524  ;;  %5379 = vst.msk [vmem:[#allocation3 + $0x49] sm:$0xff] %vm754_vm2, %v4657_v16  ;;  %v4570_v37 = vadd.f32 1.0, %v24523_v24  ;;  %24542 = vpow2.f32 %v18485_v13  ;;  %v21483_v23 = vpop.f32.mrb[20].mxu0  ;;  %21559 = vmatprep.mubr.msk.f32.mxu0 %vm754_vm2, %v4657_v16  ;;  %v18487_v0 = vmul.f32 -1.442695, %v27489_v19 }
 0x535   : > { %v24527_v25 = vpop.eup %24526  ;;  %v4660_v38 = vmul.f32 %v24525_v36, %v27422_v51  ;;  %24544 = vrcp.f32 %v4567_v27  ;;  %v27498_v39 = vadd.f32 %v21483_v23, %v27395_v56  ;;  %v4331_v42 = vpop.f32.mrb[21].mxu0  ;;  %21560 = vmatmul.mubr.msk.f32.gmra.mrb[36].mxu0 %vm754_vm2, %v4658_v52 }
 0x536   : > { %24546 = vrcp.f32 %v4570_v37  ;;  %v4569_v45 = vadd.f32 1.0, %v24527_v25  ;;  %v27502_v34 = vadd.f32 %v27395_v56, %v4331_v42 }
 0x537   : > { %v24529_v30 = vpop.eup %24528  ;;  %5382 = vst.msk [vmem:[#allocation3 + $0x69] sm:$0xff] %vm754_vm2, %v4660_v38  ;;  %24548 = vpow2.f32 %v18488_v21  ;;  %v18490_v51 = vmul.f32 -1.442695, %v27498_v39 }
 0x538   : > { %v24531_v40 = vpop.eup %24530  ;;  %v4659_v32 = vmul.f32 %v24529_v30, %v27425_v55  ;;  %24550 = vrcp.f32 %v4569_v45  ;;  %v18489_v41 = vmul.f32 -1.442695, %v27502_v34  ;;  %v21486_v43 = vpop.f32.mrb[22].mxu0 }
 0x539   : > { %v24533_v35 = vpop.eup %24532  ;;  %v4662_v44 = vmul.f32 %v24531_v40, %v27430_v4  ;;  %24552 = vpow2.f32 %v18487_v0  ;;  %v27510_v47 = vadd.f32 %v21486_v43, %v27395_v56  ;;  %v4341_v57 = vpop.f32.mrb[23].mxu0 }
 0x53a   : > { %v24535_v61 = vpop.eup %24534  ;;  %5381 = vst.msk [vmem:[#allocation3 + $0x61] sm:$0xff] %vm754_vm2, %v4659_v32  ;;  %v4572_v2 = vadd.f32 1.0, %v24533_v35  ;;  %24554 = vpow2.f32 %v18490_v51  ;;  %21562 = vmatprep.mubr.msk.f32.mxu0 %vm754_vm2, %v4659_v32  ;;  %v27515_v55 = vadd.f32 %v27395_v56, %v4341_v57 }
 0x53b   : > { %v24537_v6 = vpop.eup %24536  ;;  %5384 = vst.msk [vmem:[#allocation3 + $0x81] sm:$0xff] %vm754_vm2, %v4662_v44  ;;  %v4571_v10 = vadd.f32 1.0, %v24535_v61  ;;  %24556 = vpow2.f32 %v18489_v41  ;;  %v18492_v4 = vmul.f32 -1.442695, %v27510_v47  ;;  %21563 = vmatmul.mubr.msk.f32.gmra.mrb[38].mxu0 %vm754_vm2, %v4660_v38 }
 0x53c   : > { %v24539_v14 = vpop.eup %24538  ;;  %v4661_v60 = vmul.f32 %v24537_v6, %v27433_v8  ;;  %24558 = vrcp.f32 %v4572_v2  ;;  %v18491_v17 = vmul.f32 -1.442695, %v27515_v55  ;;  %v21489_v18 = vpop.f32.mrb[24].mxu0 }
 0x53d   : > { %v24541_v22 = vpop.eup %24540  ;;  %v4664_v1 = vmul.f32 %v24539_v14, %v27438_v28  ;;  %24560 = vrcp.f32 %v4571_v10  ;;  %v27524_v26 = vadd.f32 %v21489_v18, %v27395_v56  ;;  %v4351_v50 = vpop.f32.mrb[25].mxu0 }
 0x53e   : > { %v24543_v54 = vpop.eup %24542  ;;  %5383 = vst.msk [vmem:[#allocation3 + $0x79] sm:$0xff] %vm754_vm2, %v4661_v60  ;;  %v4574_v58 = vadd.f32 1.0, %v24541_v22  ;;  %24562 = vpow2.f32 %v18492_v4  ;;  %21565 = vmatprep.mubr.msk.f32.mxu0 %vm754_vm2, %v4661_v60  ;;  %v27529_v8 = vadd.f32 %v27395_v56, %v4351_v50 }
 0x53f   : > { %v24545_v62 = vpop.eup %24544  ;;  %5386 = vst.msk [vmem:[#allocation3 + $0x99] sm:$0xff] %vm754_vm2, %v4664_v1  ;;  %v4573_v9 = vadd.f32 1.0, %v24543_v54  ;;  %24564 = vpow2.f32 %v18491_v17  ;;  %v18494_v28 = vmul.f32 -1.442695, %v27524_v26  ;;  %21566 = vmatmul.mubr.msk.f32.gmra.mrb[40].mxu0 %vm754_vm2, %v4662_v44 }
 0x540   : > { %v24547_v63 = vpop.eup %24546  ;;  %v4663_v29 = vmul.f32 %v24545_v62, %v27441_v20  ;;  %24566 = vrcp.f32 %v4574_v58  ;;  %v18493_v33 = vmul.f32 -1.442695, %v27529_v8  ;;  %v21492_v13 = vpop.f32.mrb[26].mxu0 }
 0x541   : > { %v24549_v3 = vpop.eup %24548  ;;  %v4666_v7 = vmul.f32 %v24547_v63, %v27446_v46  ;;  %24568 = vrcp.f32 %v4573_v9  ;;  %v27538_v52 = vadd.f32 %v21492_v13, %v27395_v56  ;;  %v4361_v12 = vpop.f32.mrb[27].mxu0  ;;  %v27591_v13 = vld [vmem:[#allocation10 + $0x8] sm:$0xf] }
 0x542   : > { %v24551_v15 = vpop.eup %24550  ;;  %5385 = vst.msk [vmem:[#allocation3 + $0x91] sm:$0xff] %vm754_vm2, %v4663_v29  ;;  %v4576_v16 = vadd.f32 1.0, %v24549_v3  ;;  %24570 = vpow2.f32 %v18494_v28  ;;  %21568 = vmatprep.mubr.msk.f32.mxu0 %vm754_vm2, %v4663_v29  ;;  %v27543_v20 = vadd.f32 %v27395_v56, %v4361_v12 }
 0x543   : > { %v24553_v24 = vpop.eup %24552  ;;  %5388 = vst.msk [vmem:[#allocation3 + $0xb1] sm:$0xff] %vm754_vm2, %v4666_v7  ;;  %v4665_v46 = vmul.f32 %v24551_v15, %v27449_v31  ;;  %24572 = vpow2.f32 %v18493_v33  ;;  %v18496_v27 = vmul.f32 -1.442695, %v27538_v52  ;;  %21569 = vmatmul.mubr.msk.f32.gmra.mrb[42].mxu0 %vm754_vm2, %v4664_v1 }
 0x544   : > { %v24555_v21 = vpop.eup %24554  ;;  %24574 = vrcp.f32 %v4576_v16  ;;  %v4575_v36 = vadd.f32 1.0, %v24553_v24  ;;  %v21495_v37 = vpop.f32.mrb[28].mxu0  ;;  %v18495_v38 = vmul.f32 -1.442695, %v27543_v20 }
 0x545   : > { %v24557_v23 = vpop.eup %24556  ;;  %5387 = vst.msk [vmem:[#allocation3 + $0xa9] sm:$0xff] %vm754_vm2, %v4665_v46  ;;  %v4578_v25 = vadd.f32 1.0, %v24555_v21  ;;  %24576 = vpow2.f32 %v18496_v27  ;;  %v27552_v0 = vadd.f32 %v21495_v37, %v27395_v56  ;;  %21571 = vmatprep.mubr.msk.f32.mxu0 %vm754_vm2, %v4665_v46  ;;  %v4371_v31 = vpop.f32.mrb[29].mxu0 }
 0x546   : > { %v24559_v42 = vpop.eup %24558  ;;  %24578 = vrcp.f32 %v4575_v36  ;;  %v4577_v45 = vadd.f32 1.0, %v24557_v23  ;;  %v27556_v30 = vadd.f32 %v27395_v56, %v4371_v31 }
 0x547   : > { %v24561_v51 = vpop.eup %24560  ;;  %v4668_v40 = vmul.f32 %v24559_v42, %v27455_v49  ;;  %24580 = vrcp.f32 %v4578_v25  ;;  %v18498_v32 = vmul.f32 -1.442695, %v27552_v0  ;;  %21572 = vmatmul.mubr.msk.f32.gmra.mrb[44].mxu0 %vm754_vm2, %v4666_v7 }
 0x548   : > { %v24563_v41 = vpop.eup %24562  ;;  %v4667_v43 = vmul.f32 %v24561_v51, %v27459_v5  ;;  %24582 = vrcp.f32 %v4577_v45  ;;  %v21498_v35 = vpop.f32.mrb[30].mxu0  ;;  %v18497_v61 = vmul.f32 -1.442695, %v27556_v30 }
 0x549   : > { %v24565_v44 = vpop.eup %24564  ;;  %5390 = vst.msk [vmem:[#allocation3 + $0xc9] sm:$0xff] %vm754_vm2, %v4668_v40  ;;  %v4580_v57 = vadd.f32 1.0, %v24563_v41  ;;  %24584 = vpow2.f32 %v18495_v38  ;;  %v27565_v2 = vadd.f32 %v21498_v35, %v27395_v56  ;;  %v4381_v49 = vpop.f32.mrb[31].mxu0 }
 0x54a   : > { %v24567_v6 = vpop.eup %24566  ;;  %5389 = vst.msk [vmem:[#allocation3 + $0xc1] sm:$0xff] %vm754_vm2, %v4667_v43  ;;  %v4579_v10 = vadd.f32 1.0, %v24565_v44  ;;  %24586 = vpow2.f32 %v18498_v32  ;;  %21574 = vmatprep.mubr.msk.f32.mxu0 %vm754_vm2, %v4667_v43  ;;  %v27570_v5 = vadd.f32 %v27395_v56, %v4381_v49 }
 0x54b   : > { %v24569_v4 = vpop.eup %24568  ;;  %v4670_v14 = vmul.f32 %v24567_v6, %v27468_v48  ;;  %24588 = vrcp.f32 %v4580_v57  ;;  %v18500_v60 = vmul.f32 -1.442695, %v27565_v2  ;;  %21575 = vmatmul.mubr.msk.f32.gmra.mrb[46].mxu0 %vm754_vm2, %v4668_v40 }
 0x54c   : > { %v24571_v17 = vpop.eup %24570  ;;  %v4669_v18 = vmul.f32 %v24569_v4, %v27473_v59  ;;  %24590 = vrcp.f32 %v4579_v10  ;;  %v18499_v56 = vmul.f32 -1.442695, %v27570_v5 }
 0x54d   : > { %v24573_v22 = vpop.eup %24572  ;;  %5392 = vst.msk [vmem:[#allocation3 + $0xe1] sm:$0xff] %vm754_vm2, %v4670_v14  ;;  %v4582_v1 = vadd.f32 1.0, %v24571_v17  ;;  %24592 = vpow2.f32 %v18497_v61  ;;  %v5407_v17 = vld [vmem:[#allocation3] sm:$0xff] }
 0x54e   : > { %v24575_v50 = vpop.eup %24574  ;;  %5391 = vst.msk [vmem:[#allocation3 + $0xd9] sm:$0xff] %vm754_vm2, %v4669_v18  ;;  %v4581_v48 = vadd.f32 1.0, %v24573_v22  ;;  %24594 = vpow2.f32 %v18500_v60  ;;  %21577 = vmatprep.mubr.msk.f32.mxu0 %vm754_vm2, %v4669_v18  ;;  %v27695_v22 = vld [vmem:[#allocation3 + $0x19] sm:$0xff] }
 0x54f   : > { %v24577_v54 = vpop.eup %24576  ;;  %v4672_v58 = vmul.f32 %v24575_v50, %v27484_v11  ;;  %24596 = vrcp.f32 %v4582_v1  ;;  %21578 = vmatmul.mubr.msk.f32.gmra.mrb[48].mxu0 %vm754_vm2, %v4670_v14  ;;  %v5440_v14 = vld [vmem:[#allocation3 + $0x1] sm:$0xff] }
 0x550   : > { %v24579_v59 = vpop.eup %24578  ;;  %24598 = vrcp.f32 %v4581_v48  ;;  %v4584_v62 = vadd.f32 1.0, %v24577_v54  ;;  %v27589_v11 = vld [vmem:[#allocation3 + $0xc9] sm:$0xff]  ;;  %v27707_v48 = vld [vmem:[#allocation3 + $0x31] sm:$0xff] }
 0x551   : > { %v24581_v9 = vpop.eup %24580  ;;  %5394 = vst.msk [vmem:[#allocation3 + $0xf9] sm:$0xff] %vm754_vm2, %v4672_v58  ;;  %v4671_v28 = vmul.f32 %v24579_v59, %v27489_v19  ;;  %24600 = vpow2.f32 %v18499_v56  ;;  %v27584_v63 = vld [vmem:[#allocation3 + $0xc1] sm:$0xff]  ;;  %v27713_v54 = vld [vmem:[#allocation3 + $0x18] sm:$0xff] }
 0x552   : > { %v24583_v29 = vpop.eup %24582  ;;  %v4674_v33 = vmul.f32 %v24581_v9, %v27498_v39  ;;  %24602 = vrcp.f32 %v4584_v62  ;;  %21627 = vmatprep.mubr.msk.f32.mxu1 %vm754_vm2, %v27584_v63  ;;  %v5408_v1 = vld [vmem:[#allocation3 + $0x8] sm:$0xff]  ;;  %v27721_v59 = vld [vmem:[#allocation3 + $0x20] sm:$0xff]  ;;  %v27729_v9 = vld [vmem:[#allocation3 + $0x30] sm:$0xff] }
 0x553   : > { %v24585_v3 = vpop.eup %24584  ;;  %5393 = vst.msk [vmem:[#allocation3 + $0xf1] sm:$0xff] %vm754_vm2, %v4671_v28  ;;  %v4673_v7 = vmul.f32 %v24583_v29, %v27502_v34  ;;  %21580 = vmatprep.mubr.msk.f32.mxu0 %vm754_vm2, %v4671_v28  ;;  %21628 = vmatmul.mubr.msk.f32.vlgmr.msra.gmra.mrb[0].mxu1 %vm754_vm2, %v27589_v11  ;;  %v27700_v56 = vld [vmem:[#allocation3 + $0x21] sm:$0xff]  ;;  %v27727_v62 = vld [vmem:[#allocation3 + $0x49] sm:$0xff]  ;;  %v27735_v28 = vld [vmem:[#allocation3 + $0x51] sm:$0xff] }
 0x554   : > { %v24587_v19 = vpop.eup %24586  ;;  %5396 = vst.msk [vmem:[#allocation3 + $0x111] sm:$0xff] %vm754_vm2, %v4674_v33  ;;  %v4583_v39 = vadd.f32 1.0, %v24585_v3  ;;  %21581 = vmatmul.mubr.msk.f32.gmra.mrb[50].mxu0 %vm754_vm2, %v4672_v58  ;;  %21652 = vmatpush3.msk.msra.mxu1 %vm5113_vm5, %v27391_v53  ;;  %v27611_v46 = vld [vmem:[#allocation3 + $0xe1] sm:$0xff]  ;;  %v27719_v58 = vld [vmem:[#allocation3 + $0x39] sm:$0xff]  ;;  %v27751_v3 = vld [vmem:[#allocation3 + $0x69] sm:$0xff] }
 0x555   : > { %v24589_v12 = vpop.eup %24588  ;;  %5395 = vst.msk [vmem:[#allocation3 + $0x109] sm:$0xff] %vm754_vm2, %v4673_v7  ;;  %v4586_v15 = vadd.f32 1.0, %v24587_v19  ;;  %21583 = vmatprep.mubr.msk.f32.mxu0 %vm754_vm2, %v4673_v7  ;;  %v27604_v34 = vld [vmem:[#allocation3 + $0xd9] sm:$0xff]  ;;  %21701 = vmatprep.subr.msk.mxu1 %vm5113_vm5, %v27591_v13  ;;  %v27702_v50 = vld [vmem:[#allocation10 + $0xc] sm:$0xf]  ;;  %v27753_v7 = vld [vmem:[#allocation3 + $0x50] sm:$0xff] }
 0x556   : > { %v24591_v16 = vpop.eup %24590  ;;  %v4676_v24 = vmul.f32 %v24589_v12, %v27510_v47  ;;  %24604 = vrcp.f32 %v4583_v39  ;;  %21630 = vmatprep.mubr.msk.f32.mxu1 %vm754_vm2, %v27604_v34  ;;  %v27737_v29 = vld [vmem:[#allocation3 + $0x38] sm:$0xff]  ;;  %31460 = vst [vmem:[#allocation67_spill] sm:$0xff] %v27753_v7  ;;  %v27761_v39 = vld [vmem:[#allocation3 + $0x60] sm:$0xff] }
 0x557   : > { %v24593_v53 = vpop.eup %24592  ;;  %v4675_v27 = vmul.f32 %v24591_v16, %v27515_v55  ;;  %24606 = vrcp.f32 %v4586_v15  ;;  %21631 = vmatmul.mubr.msk.f32.gmra.mrb[2].mxu1 %vm754_vm2, %v27611_v46  ;;  %v27759_v19 = vld [vmem:[#allocation3 + $0x79] sm:$0xff]  ;;  %v27767_v12 = vld [vmem:[#allocation3 + $0x81] sm:$0xff]  ;;  %v27775_v16 = vld [vmem:[#allocation3 + $0x91] sm:$0xff] }
 0x558   : > { %v24595_v21 = vpop.eup %24594  ;;  %5398 = vst.msk [vmem:[#allocation3 + $0x129] sm:$0xff] %vm754_vm2, %v4676_v24  ;;  %v4585_v36 = vadd.f32 1.0, %v24593_v53  ;;  %21584 = vmatmul.mubr.msk.f32.gmra.mrb[52].mxu0 %vm754_vm2, %v4674_v33  ;;  %v27626_v42 = vld [vmem:[#allocation3 + $0xf9] sm:$0xff]  ;;  %v27743_v33 = vld [vmem:[#allocation3 + $0x61] sm:$0xff] }
 0x559   : > { %v24597_v47 = vpop.eup %24596  ;;  %5397 = vst.msk [vmem:[#allocation3 + $0x121] sm:$0xff] %vm754_vm2, %v4675_v27  ;;  %v4588_v37 = vadd.f32 1.0, %v24595_v21  ;;  %21586 = vmatprep.mubr.msk.f32.mxu0 %vm754_vm2, %v4675_v27  ;;  %v27769_v15 = vld [vmem:[#allocation3 + $0x68] sm:$0xff]  ;;  %v27783_v53 = vld [vmem:[#allocation3 + $0x99] sm:$0xff] }
 0x55a   : > { %v24599_v23 = vpop.eup %24598  ;;  %v4678_v25 = vmul.f32 %v24597_v47, %v27524_v26  ;;  %24608 = vrcp.f32 %v4585_v36  ;;  %v27621_v55 = vld [vmem:[#allocation3 + $0xf1] sm:$0xff]  ;;  %31461 = vst [vmem:[#allocation68_spill] sm:$0xff] %v27769_v15  ;;  %v27785_v27 = vld [vmem:[#allocation3 + $0x80] sm:$0xff]  ;;  %v27791_v21 = vld [vmem:[#allocation3 + $0xa9] sm:$0xff] }
 0x55b   : > { %v24601_v38 = vpop.eup %24600  ;;  %v4677_v31 = vmul.f32 %v24599_v23, %v27529_v8  ;;  %24610 = vrcp.f32 %v4588_v37  ;;  %21633 = vmatprep.mubr.msk.f32.mxu1 %vm754_vm2, %v27621_v55  ;;  %v27640_v40 = vld [vmem:[#allocation3 + $0x111] sm:$0xff]  ;;  %v27807_v23 = vld [vmem:[#allocation3 + $0xa8] sm:$0xff] }
 0x55c   : > { %v24603_v45 = vpop.eup %24602  ;;  %5400 = vst.msk [vmem:[#allocation3 + $0x141] sm:$0xff] %vm754_vm2, %v4678_v25  ;;  %v4587_v51 = vadd.f32 1.0, %v24601_v38  ;;  %21587 = vmatmul.mubr.msk.f32.gmra.mrb[54].mxu0 %vm754_vm2, %v4676_v24  ;;  %21634 = vmatmul.mubr.msk.f32.gmra.mrb[4].mxu1 %vm754_vm2, %v27626_v42  ;;  %v27632_v26 = vld [vmem:[#allocation3 + $0x109] sm:$0xff]  ;;  %v27777_v24 = vld [vmem:[#allocation3 + $0x78] sm:$0xff]  ;;  %v27815_v38 = vld [vmem:[#allocation3 + $0xc0] sm:$0xff] }
 0x55d   : > { %5399 = vst.msk [vmem:[#allocation3 + $0x139] sm:$0xff] %vm754_vm2, %v4677_v31  ;;  %v4680_v8 = vmul.f32 %v24603_v45, %v27538_v52  ;;  %21589 = vmatprep.mubr.msk.f32.mxu0 %vm754_vm2, %v4677_v31  ;;  %21636 = vmatprep.mubr.msk.f32.mxu1 %vm754_vm2, %v27632_v26  ;;  %v27793_v36 = vld [vmem:[#allocation3 + $0x90] sm:$0xff]  ;;  %v27801_v37 = vld [vmem:[#allocation3 + $0x98] sm:$0xff]  ;;  %v27819_v31 = vld [vmem:[#allocation3 + $0xc8] sm:$0xff] }
 0x55e   : > { %24612 = vrcp.f32 %v4587_v51  ;;  %v27799_v47 = vld [vmem:[#allocation3 + $0xb1] sm:$0xff]  ;;  %v27827_v51 = vld [vmem:[#allocation3 + $0xe0] sm:$0xff] }
 0x55f   : > { %5402 = vst.msk [vmem:[#allocation3 + $0x159] sm:$0xff] %vm754_vm2, %v4680_v8  ;;  %v27653_v44 = vld [vmem:[#allocation3 + $0x129] sm:$0xff]  ;;  %v27823_v45 = vld [vmem:[#allocation3 + $0xd8] sm:$0xff] }
 0x560   : > { %v24605_v32 = vpop.eup %24604  ;;  %21590 = vmatmul.mubr.msk.f32.gmra.mrb[56].mxu0 %vm754_vm2, %v4678_v25  ;;  %21637 = vmatmul.mubr.msk.f32.gmra.mrb[6].mxu1 %vm754_vm2, %v27640_v40  ;;  %v27645_v41 = vld [vmem:[#allocation3 + $0x121] sm:$0xff]  ;;  %v27811_v25 = vld [vmem:[#allocation3 + $0xb0] sm:$0xff] }
 0x561   : > { %v24607_v43 = vpop.eup %24606  ;;  %v4679_v52 = vmul.f32 %v24605_v32, %v27543_v20  ;;  %21639 = vmatprep.mubr.msk.f32.mxu1 %vm754_vm2, %v27645_v41  ;;  %v27835_v32 = vld [vmem:[#allocation3 + $0xf8] sm:$0xff] }
 0x562   : > { %v4682_v35 = vmul.f32 %v24607_v43, %v27552_v0  ;;  %v27839_v43 = vld [vmem:[#allocation3 + $0x108] sm:$0xff] }
 0x563   : > { %5401 = vst.msk [vmem:[#allocation3 + $0x151] sm:$0xff] %vm754_vm2, %v4679_v52  ;;  %21592 = vmatprep.mubr.msk.f32.mxu0 %vm754_vm2, %v4679_v52  ;;  %v27667_v6 = vld [vmem:[#allocation3 + $0x141] sm:$0xff]  ;;  %v27843_v52 = vld [vmem:[#allocation3 + $0x110] sm:$0xff] }
 0x564   : > { %v24609_v57 = vpop.eup %24608  ;;  %5404 = vst.msk [vmem:[#allocation3 + $0x171] sm:$0xff] %vm754_vm2, %v4682_v35  ;;  %21593 = vmatmul.mubr.msk.f32.gmra.mrb[58].mxu0 %vm754_vm2, %v4680_v8  ;;  %21640 = vmatmul.mubr.msk.f32.gmra.mrb[8].mxu1 %vm754_vm2, %v27653_v44  ;;  %v27659_v20 = vld [vmem:[#allocation3 + $0x139] sm:$0xff]  ;;  %v27831_v8 = vld [vmem:[#allocation3 + $0xf0] sm:$0xff] }
 0x565   : > { %v24611_v61 = vpop.eup %24610  ;;  %v4681_v49 = vmul.f32 %v24609_v57, %v27556_v30  ;;  %21642 = vmatprep.mubr.msk.f32.mxu1 %vm754_vm2, %v27659_v20  ;;  %v27851_v57 = vld [vmem:[#allocation3 + $0x128] sm:$0xff] }
 0x566   : > { %v4684_v0 = vmul.f32 %v24611_v61, %v27565_v2  ;;  %v27680_v2 = vld [vmem:[#allocation3 + $0x159] sm:$0xff] }
 0x567   : > { %5403 = vst.msk [vmem:[#allocation3 + $0x169] sm:$0xff] %vm754_vm2, %v4681_v49  ;;  %21595 = vmatprep.mubr.msk.f32.mxu0 %vm754_vm2, %v4681_v49  ;;  %v27855_v61 = vld [vmem:[#allocation3 + $0x138] sm:$0xff]  ;;  %v27859_v49 = vld [vmem:[#allocation3 + $0x140] sm:$0xff] }
 0x568   : > { %v24613_v10 = vpop.eup %24612  ;;  %5406 = vst.msk [vmem:[#allocation3 + $0x189] sm:$0xff] %vm754_vm2, %v4684_v0  ;;  %21596 = vmatmul.mubr.msk.f32.gmra.mrb[60].mxu0 %vm754_vm2, %v4682_v35  ;;  %21643 = vmatmul.mubr.msk.f32.gmra.mrb[10].mxu1 %vm754_vm2, %v27667_v6  ;;  %v27847_v35 = vld [vmem:[#allocation3 + $0x120] sm:$0xff] }
 0x569   : > { %v4683_v30 = vmul.f32 %v24613_v10, %v27570_v5  ;;  %v5441_v5 = vld [vmem:[#allocation3 + $0x9] sm:$0xff] }
 0x56a   : > { %v27674_v4 = vld [vmem:[#allocation3 + $0x151] sm:$0xff] }
 0x56b   : > { %5405 = vst.msk [vmem:[#allocation3 + $0x181] sm:$0xff] %vm754_vm2, %v4683_v30  ;;  %21598 = vmatprep.mubr.msk.f32.mxu0 %vm754_vm2, %v4683_v30  ;;  %21645 = vmatprep.mubr.msk.f32.mxu1 %vm754_vm2, %v27674_v4  ;;  %v27690_v18 = vld [vmem:[#allocation3 + $0x171] sm:$0xff] }
 0x56c   : > { %21599 = vmatmul.mubr.msk.f32.gmra.mrb[62].mxu0 %vm754_vm2, %v4684_v0  ;;  %21646 = vmatmul.mubr.msk.f32.gmra.mrb[12].mxu1 %vm754_vm2, %v27680_v2  ;;  %31459 = vst [vmem:[#allocation50_spill] sm:$0xff] %v27690_v18  ;;  %v27863_v0 = vld [vmem:[#allocation3 + $0x150] sm:$0xff]  ;;  %v27867_v10 = vld [vmem:[#allocation3 + $0x158] sm:$0xff] }
 0x56d   : > { %21603 = vmatprep.mubr.msk.f32.mxu0 %vm754_vm2, %v5440_v14  ;;  %31462 = vst [vmem:[#allocation69_spill] sm:$0xff] %v27867_v10  ;;  %v6122_v14 = vld [vmem:[#allocation3 + $0x2] sm:$0xff] }
 0x56e   : > { %v27686_v60 = vld [vmem:[#allocation3 + $0x169] sm:$0xff] }
 0x56f   : > { %31458 = vst [vmem:[#allocation49_spill] sm:$0xff] %v27686_v60  ;;  %21648 = vmatprep.mubr.msk.f32.mxu1 %vm754_vm2, %v27686_v60  ;;  %v27871_v30 = vld [vmem:[#allocation3 + $0x168] sm:$0xff] }
 0x570   : > { %21604 = vmatmul.mubr.msk.f32.vlgmr.msra.gmra.mrb[64].mxu0 %vm754_vm2, %v5441_v5  ;;  %21649 = vmatmul.mubr.msk.f32.gmra.mrb[14].mxu1 %vm754_vm2, %v27690_v18  ;;  %v27875_v5 = vld [vmem:[#allocation3 + $0x170] sm:$0xff]  ;;  %v27883_v18 = vld [vmem:[#allocation3 + $0x1a] sm:$0xff]  ;;  %v27891_v60 = vld [vmem:[#allocation3 + $0x22] sm:$0xff] }
 0x571   : > { %21606 = vmatprep.mubr.msk.f32.mxu0 %vm754_vm2, %v27695_v22  ;;  %21653 = vmatprep.mubr.msk.f32.mxu1 %vm754_vm2, %v5407_v17  ;;  %31463 = vst [vmem:[#allocation70_spill] sm:$0xff] %v27875_v5  ;;  %v6123_v17 = vld [vmem:[#allocation3 + $0xa] sm:$0xff]  ;;  %31464 = vst [vmem:[#allocation72_spill] sm:$0xff] %v27883_v18 }
 0x572   : > { %31465 = vst [vmem:[#allocation74_spill] sm:$0xff] %v27891_v60 }
 0x574   : > { %21607 = vmatmul.mubr.msk.f32.gmra.mrb[66].mxu0 %vm754_vm2, %v27700_v56  ;;  %21654 = vmatmul.mubr.msk.f32.vlgmr.msra.gmra.mrb[16].mxu1 %vm754_vm2, %v5408_v1  ;;  %v27880_v1 = vld [vmem:[#allocation10 + $0x10] sm:$0xf] }
 0x575   : > { %21702 = vmatpush3.msk.msra.mxu1 %vm5113_vm5, %v27591_v13  ;;  %21609 = vmatprep.mubr.msk.f32.mxu0 %vm754_vm2, %v27707_v48  ;;  %v27745_v13 = vld [vmem:[#allocation3 + $0x48] sm:$0xff] }
 0x576   : > { %21656 = vmatprep.mubr.msk.f32.mxu1 %vm754_vm2, %v27713_v54  ;;  %21751 = vmatprep.subr.msk.mxu1 %vm5113_vm5, %v27702_v50 }
 0x578   : > { %21610 = vmatmul.mubr.msk.f32.gmra.mrb[68].mxu0 %vm754_vm2, %v27719_v58  ;;  %21657 = vmatmul.mubr.msk.f32.gmra.mrb[18].mxu1 %vm754_vm2, %v27721_v59 }
 0x579   : > { %21612 = vmatprep.mubr.msk.f32.mxu0 %vm754_vm2, %v27727_v62  ;;  %21659 = vmatprep.mubr.msk.f32.mxu1 %vm754_vm2, %v27729_v9 }
 0x57c   : > { %21613 = vmatmul.mubr.msk.f32.gmra.mrb[70].mxu0 %vm754_vm2, %v27735_v28  ;;  %21660 = vmatmul.mubr.msk.f32.gmra.mrb[20].mxu1 %vm754_vm2, %v27737_v29 }
 0x57d   : > { %21615 = vmatprep.mubr.msk.f32.mxu0 %vm754_vm2, %v27743_v33  ;;  %21662 = vmatprep.mubr.msk.f32.mxu1 %vm754_vm2, %v27745_v13 }
 0x580   : > { %21616 = vmatmul.mubr.msk.f32.gmra.mrb[72].mxu0 %vm754_vm2, %v27751_v3  ;;  %21663 = vmatmul.mubr.msk.f32.gmra.mrb[22].mxu1 %vm754_vm2, %v27753_v7 }
 0x581   : > { %21618 = vmatprep.mubr.msk.f32.mxu0 %vm754_vm2, %v27759_v19  ;;  %21665 = vmatprep.mubr.msk.f32.mxu1 %vm754_vm2, %v27761_v39 }
 0x584   : > { %21619 = vmatmul.mubr.msk.f32.gmra.mrb[74].mxu0 %vm754_vm2, %v27767_v12  ;;  %21666 = vmatmul.mubr.msk.f32.gmra.mrb[24].mxu1 %vm754_vm2, %v27769_v15 }
 0x585   : > { %21621 = vmatprep.mubr.msk.f32.mxu0 %vm754_vm2, %v27775_v16  ;;  %21668 = vmatprep.mubr.msk.f32.mxu1 %vm754_vm2, %v27777_v24 }
 0x588   : > { %21622 = vmatmul.mubr.msk.f32.gmra.mrb[76].mxu0 %vm754_vm2, %v27783_v53  ;;  %21669 = vmatmul.mubr.msk.f32.gmra.mrb[26].mxu1 %vm754_vm2, %v27785_v27 }
 0x589   : > { %21624 = vmatprep.mubr.msk.f32.mxu0 %vm754_vm2, %v27791_v21  ;;  %21671 = vmatprep.mubr.msk.f32.mxu1 %vm754_vm2, %v27793_v36 }
 0x58c   : > { %21625 = vmatmul.mubr.msk.f32.gmra.mrb[78].mxu0 %vm754_vm2, %v27799_v47  ;;  %21672 = vmatmul.mubr.msk.f32.gmra.mrb[28].mxu1 %vm754_vm2, %v27801_v37 }
 0x58d   : > { %21674 = vmatprep.mubr.msk.f32.mxu1 %vm754_vm2, %v27807_v23 }
 0x590   : > { %21675 = vmatmul.mubr.msk.f32.gmra.mrb[30].mxu1 %vm754_vm2, %v27811_v25 }
 0x591   : > { %21677 = vmatprep.mubr.msk.f32.mxu1 %vm754_vm2, %v27815_v38 }
 0x594   : > { %21678 = vmatmul.mubr.msk.f32.gmra.mrb[0].mxu1 %vm754_vm2, %v27819_v31 }
 0x595   : > { %21680 = vmatprep.mubr.msk.f32.mxu1 %vm754_vm2, %v27823_v45 }
 0x598   : > { %21681 = vmatmul.mubr.msk.f32.gmra.mrb[2].mxu1 %vm754_vm2, %v27827_v51 }
 0x599   : > { %21683 = vmatprep.mubr.msk.f32.mxu1 %vm754_vm2, %v27831_v8 }
 0x59c   : > { %21684 = vmatmul.mubr.msk.f32.gmra.mrb[4].mxu1 %vm754_vm2, %v27835_v32 }
 0x59d   : > { %21686 = vmatprep.mubr.msk.f32.mxu1 %vm754_vm2, %v27839_v43 }
 0x5a0   : > { %21687 = vmatmul.mubr.msk.f32.gmra.mrb[6].mxu1 %vm754_vm2, %v27843_v52 }
 0x5a1   : > { %21689 = vmatprep.mubr.msk.f32.mxu1 %vm754_vm2, %v27847_v35 }
 0x5a4   : > { %21690 = vmatmul.mubr.msk.f32.gmra.mrb[8].mxu1 %vm754_vm2, %v27851_v57 }
 0x5a5   : > { %21692 = vmatprep.mubr.msk.f32.mxu1 %vm754_vm2, %v27855_v61 }
 0x5a8   : > { %21693 = vmatmul.mubr.msk.f32.gmra.mrb[10].mxu1 %vm754_vm2, %v27859_v49 }
 0x5a9   : > { %21695 = vmatprep.mubr.msk.f32.mxu1 %vm754_vm2, %v27863_v0 }
 0x5ac   : > { %21696 = vmatmul.mubr.msk.f32.gmra.mrb[12].mxu1 %vm754_vm2, %v27867_v10 }
 0x5ad   : > { %21698 = vmatprep.mubr.msk.f32.mxu1 %vm754_vm2, %v27871_v30 }
 0x5b0   : > { %21699 = vmatmul.mubr.msk.f32.gmra.mrb[14].mxu1 %vm754_vm2, %v27875_v5 }
 0x5b1   : > { %21703 = vmatprep.mubr.msk.f32.mxu1 %vm754_vm2, %v6122_v14  ;;  %v27895_v14 = vld [vmem:[#allocation3 + $0x32] sm:$0xff] }
 0x5b2   : > { %31466 = vst [vmem:[#allocation43_spill] sm:$0xff] %v27895_v14 }
 0x5b4   : > { %21704 = vmatmul.mubr.msk.f32.vlgmr.msra.gmra.mrb[16].mxu1 %vm754_vm2, %v6123_v17  ;;  %v27899_v17 = vld [vmem:[#allocation3 + $0x3a] sm:$0xff] }
 0x5b5   : > { %21752 = vmatpush3.msk.msra.mxu1 %vm5113_vm5, %v27702_v50  ;;  %21706 = vmatprep.mubr.msk.f32.mxu1 %vm754_vm2, %v27883_v18  ;;  %31467 = vst [vmem:[#allocation44_spill] sm:$0xff] %v27899_v17  ;;  %v27903_v50 = vld [vmem:[#allocation3 + $0x4a] sm:$0xff]  ;;  %v27907_v18 = vld [vmem:[#allocation3 + $0x52] sm:$0xff] }
 0x5b6   : > { %21801 = vmatprep.subr.msk.mxu1 %vm5113_vm5, %v27880_v1  ;;  %31468 = vst [vmem:[#allocation45_spill] sm:$0xff] %v27903_v50  ;;  %31469 = vst [vmem:[#allocation46_spill] sm:$0xff] %v27907_v18 }
 0x5b8   : > { %21707 = vmatmul.mubr.msk.f32.gmra.mrb[18].mxu1 %vm754_vm2, %v27891_v60  ;;  %v27911_v60 = vld [vmem:[#allocation3 + $0x62] sm:$0xff] }
 0x5b9   : > { %21709 = vmatprep.mubr.msk.f32.mxu1 %vm754_vm2, %v27895_v14  ;;  %31470 = vst [vmem:[#allocation47_spill] sm:$0xff] %v27911_v60  ;;  %v27915_v14 = vld [vmem:[#allocation3 + $0x6a] sm:$0xff] }
 0x5ba   : > { %31471 = vst [vmem:[#allocation48_spill] sm:$0xff] %v27915_v14 }
 0x5bc   : > { %21710 = vmatmul.mubr.msk.f32.gmra.mrb[20].mxu1 %vm754_vm2, %v27899_v17  ;;  %v27919_v17 = vld [vmem:[#allocation3 + $0x7a] sm:$0xff] }
 0x5bd   : > { %21712 = vmatprep.mubr.msk.f32.mxu1 %vm754_vm2, %v27903_v50  ;;  %31472 = vst [vmem:[#allocation76_spill] sm:$0xff] %v27919_v17  ;;  %v27923_v50 = vld [vmem:[#allocation3 + $0x82] sm:$0xff] }
 0x5be   : > { %31473 = vst [vmem:[#allocation77_spill] sm:$0xff] %v27923_v50 }
 0x5c0   : > { %21713 = vmatmul.mubr.msk.f32.gmra.mrb[22].mxu1 %vm754_vm2, %v27907_v18  ;;  %v27927_v18 = vld [vmem:[#allocation3 + $0x92] sm:$0xff] }
 0x5c1   : > { %21715 = vmatprep.mubr.msk.f32.mxu1 %vm754_vm2, %v27911_v60  ;;  %31474 = vst [vmem:[#allocation51_spill] sm:$0xff] %v27927_v18  ;;  %v27931_v60 = vld [vmem:[#allocation3 + $0x9a] sm:$0xff] }
 0x5c2   : > { %31475 = vst [vmem:[#allocation52_spill] sm:$0xff] %v27931_v60 }
 0x5c4   : > { %21716 = vmatmul.mubr.msk.f32.gmra.mrb[24].mxu1 %vm754_vm2, %v27915_v14  ;;  %v27935_v14 = vld [vmem:[#allocation3 + $0xaa] sm:$0xff] }
 0x5c5   : > { %21718 = vmatprep.mubr.msk.f32.mxu1 %vm754_vm2, %v27919_v17  ;;  %31476 = vst [vmem:[#allocation53_spill] sm:$0xff] %v27935_v14  ;;  %v27939_v17 = vld [vmem:[#allocation3 + $0xb2] sm:$0xff] }
 0x5c6   : > { %31477 = vst [vmem:[#allocation54_spill] sm:$0xff] %v27939_v17 }
 0x5c8   : > { %21719 = vmatmul.mubr.msk.f32.gmra.mrb[26].mxu1 %vm754_vm2, %v27923_v50  ;;  %v27943_v50 = vld [vmem:[#allocation3 + $0xc2] sm:$0xff] }
 0x5c9   : > { %21721 = vmatprep.mubr.msk.f32.mxu1 %vm754_vm2, %v27927_v18  ;;  %31478 = vst [vmem:[#allocation55_spill] sm:$0xff] %v27943_v50  ;;  %v27947_v18 = vld [vmem:[#allocation3 + $0xca] sm:$0xff] }
 0x5ca   : > { %31479 = vst [vmem:[#allocation56_spill] sm:$0xff] %v27947_v18 }
 0x5cc   : > { %21722 = vmatmul.mubr.msk.f32.gmra.mrb[28].mxu1 %vm754_vm2, %v27931_v60  ;;  %v27951_v60 = vld [vmem:[#allocation3 + $0xda] sm:$0xff] }
 0x5cd   : > { %21724 = vmatprep.mubr.msk.f32.mxu1 %vm754_vm2, %v27935_v14  ;;  %31480 = vst [vmem:[#allocation57_spill] sm:$0xff] %v27951_v60  ;;  %v27955_v14 = vld [vmem:[#allocation3 + $0xe2] sm:$0xff] }
 0x5ce   : > { %31481 = vst [vmem:[#allocation58_spill] sm:$0xff] %v27955_v14 }
 0x5d0   : > { %21725 = vmatmul.mubr.msk.f32.gmra.mrb[30].mxu1 %vm754_vm2, %v27939_v17  ;;  %v27959_v17 = vld [vmem:[#allocation3 + $0xf2] sm:$0xff] }
 0x5d1   : > { %21727 = vmatprep.mubr.msk.f32.mxu1 %vm754_vm2, %v27943_v50  ;;  %31482 = vst [vmem:[#allocation59_spill] sm:$0xff] %v27959_v17  ;;  %v27963_v50 = vld [vmem:[#allocation3 + $0xfa] sm:$0xff] }
 0x5d2   : > { %31483 = vst [vmem:[#allocation60_spill] sm:$0xff] %v27963_v50 }
 0x5d4   : > { %21728 = vmatmul.mubr.msk.f32.gmra.mrb[0].mxu1 %vm754_vm2, %v27947_v18  ;;  %v27967_v18 = vld [vmem:[#allocation3 + $0x10a] sm:$0xff] }
 0x5d5   : > { %21730 = vmatprep.mubr.msk.f32.mxu1 %vm754_vm2, %v27951_v60  ;;  %31484 = vst [vmem:[#allocation61_spill] sm:$0xff] %v27967_v18  ;;  %v27971_v60 = vld [vmem:[#allocation3 + $0x112] sm:$0xff] }
 0x5d6   : > { %31485 = vst [vmem:[#allocation62_spill] sm:$0xff] %v27971_v60 }
 0x5d8   : > { %21731 = vmatmul.mubr.msk.f32.gmra.mrb[2].mxu1 %vm754_vm2, %v27955_v14  ;;  %v27975_v14 = vld [vmem:[#allocation3 + $0x122] sm:$0xff] }
 0x5d9   : > { %21733 = vmatprep.mubr.msk.f32.mxu1 %vm754_vm2, %v27959_v17  ;;  %31486 = vst [vmem:[#allocation63_spill] sm:$0xff] %v27975_v14  ;;  %v27979_v17 = vld [vmem:[#allocation3 + $0x12a] sm:$0xff] }
 0x5da   : > { %31487 = vst [vmem:[#allocation64_spill] sm:$0xff] %v27979_v17 }
 0x5dc   : > { %21734 = vmatmul.mubr.msk.f32.gmra.mrb[4].mxu1 %vm754_vm2, %v27963_v50  ;;  %v27983_v50 = vld [vmem:[#allocation3 + $0x13a] sm:$0xff] }
 0x5dd   : > { %21736 = vmatprep.mubr.msk.f32.mxu1 %vm754_vm2, %v27967_v18  ;;  %31488 = vst [vmem:[#allocation65_spill] sm:$0xff] %v27983_v50  ;;  %v27987_v18 = vld [vmem:[#allocation3 + $0x142] sm:$0xff] }
 0x5de   : > { %31489 = vst [vmem:[#allocation66_spill] sm:$0xff] %v27987_v18 }
 0x5e0   : > { %21737 = vmatmul.mubr.msk.f32.gmra.mrb[6].mxu1 %vm754_vm2, %v27971_v60  ;;  %v27991_v60 = vld [vmem:[#allocation3 + $0x152] sm:$0xff] }
 0x5e1   : > { %21739 = vmatprep.mubr.msk.f32.mxu1 %vm754_vm2, %v27975_v14  ;;  %v27995_v14 = vld [vmem:[#allocation3 + $0x15a] sm:$0xff] }
 0x5e2   : > { %31490 = vst [vmem:[#allocation71_spill] sm:$0xff] %v27995_v14 }
 0x5e4   : > { %21740 = vmatmul.mubr.msk.f32.gmra.mrb[8].mxu1 %vm754_vm2, %v27979_v17  ;;  %v27999_v17 = vld [vmem:[#allocation3 + $0x16a] sm:$0xff] }
 0x5e5   : > { %21742 = vmatprep.mubr.msk.f32.mxu1 %vm754_vm2, %v27983_v50  ;;  %v28003_v50 = vld [vmem:[#allocation3 + $0x172] sm:$0xff] }
 0x5e8   : > { %21743 = vmatmul.mubr.msk.f32.gmra.mrb[10].mxu1 %vm754_vm2, %v27987_v18  ;;  %v28009_v18 = vld [vmem:[#allocation10 + $0x14] sm:$0xf] }
 0x5e9   : > { %21745 = vmatprep.mubr.msk.f32.mxu1 %vm754_vm2, %v27991_v60 }
 0x5ec   : > { %21746 = vmatmul.mubr.msk.f32.gmra.mrb[12].mxu1 %vm754_vm2, %v27995_v14 }
 0x5ed   : > { %21748 = vmatprep.mubr.msk.f32.mxu1 %vm754_vm2, %v27999_v17 }
 0x5f0   : > { %21749 = vmatmul.mubr.msk.f32.gmra.mrb[14].mxu1 %vm754_vm2, %v28003_v50 }
 0x5f1   : > { %21753 = vmatprep.mubr.msk.f32.mxu1 %vm754_vm2, %v27713_v54 }
 0x5f4   : > { %21754 = vmatmul.mubr.msk.f32.vlgmr.msra.gmra.mrb[16].mxu1 %vm754_vm2, %v27721_v59 }
 0x5f5   : > { %21802 = vmatpush3.msk.msra.mxu1 %vm5113_vm5, %v27880_v1  ;;  %21756 = vmatprep.mubr.msk.f32.mxu1 %vm754_vm2, %v27729_v9 }
 0x5f6   : > { %21851 = vmatprep.subr.msk.mxu1 %vm5113_vm5, %v28009_v18 }
 0x5f8   : > { %21757 = vmatmul.mubr.msk.f32.gmra.mrb[18].mxu1 %vm754_vm2, %v27737_v29 }
 0x5f9   : > { %21759 = vmatprep.mubr.msk.f32.mxu1 %vm754_vm2, %v27745_v13 }
 0x5fc   : > { %21760 = vmatmul.mubr.msk.f32.gmra.mrb[20].mxu1 %vm754_vm2, %v27753_v7 }
 0x5fd   : > { %21762 = vmatprep.mubr.msk.f32.mxu1 %vm754_vm2, %v27761_v39 }
 0x600   : > { %21763 = vmatmul.mubr.msk.f32.gmra.mrb[22].mxu1 %vm754_vm2, %v27769_v15  ;;  %v28029_v54 = vpop.f32.mrb[32].mxu0 }
 0x601   : > { %31491 = vst [vmem:[#allocation73_spill] sm:$0xff] %v28029_v54  ;;  %21765 = vmatprep.mubr.msk.f32.mxu1 %vm754_vm2, %v27777_v24  ;;  %v28033_v59 = vpop.f32.mrb[33].mxu0 }
 0x602   : > { %31492 = vst [vmem:[#allocation75_spill] sm:$0xff] %v28033_v59 }
 0x604   : > { %21766 = vmatmul.mubr.msk.f32.gmra.mrb[24].mxu1 %vm754_vm2, %v27785_v27  ;;  %v28037_v1 = vpop.f32.mrb[34].mxu0 }
 0x605   : > { %31493 = vst [vmem:[#allocation78_spill] sm:$0xff] %v28037_v1  ;;  %21768 = vmatprep.mubr.msk.f32.mxu1 %vm754_vm2, %v27793_v36  ;;  %v28041_v7 = vpop.f32.mrb[35].mxu0 }
 0x606   : > { %31494 = vst [vmem:[#allocation79_spill] sm:$0xff] %v28041_v7 }
 0x608   : > { %21769 = vmatmul.mubr.msk.f32.gmra.mrb[26].mxu1 %vm754_vm2, %v27801_v37  ;;  %v28045_v15 = vpop.f32.mrb[36].mxu0 }
 0x609   : > { %31495 = vst [vmem:[#allocation80_spill] sm:$0xff] %v28045_v15  ;;  %21771 = vmatprep.mubr.msk.f32.mxu1 %vm754_vm2, %v27807_v23  ;;  %v28049_v54 = vpop.f32.mrb[37].mxu0 }
 0x60a   : > { %31496 = vst [vmem:[#allocation81_spill] sm:$0xff] %v28049_v54 }
 0x60c   : > { %21772 = vmatmul.mubr.msk.f32.gmra.mrb[28].mxu1 %vm754_vm2, %v27811_v25 }
 0x60d   : > { %21774 = vmatprep.mubr.msk.f32.mxu1 %vm754_vm2, %v27815_v38 }
 0x60e   : > { %v28055_v1 = vpop.f32.mrb[38].mxu0 }
 0x60f   : > { %31497 = vst [vmem:[#allocation82_spill] sm:$0xff] %v28055_v1  ;;  %v28057_v59 = vpop.f32.mrb[39].mxu0 }
 0x610   : > { %31498 = vst [vmem:[#allocation83_spill] sm:$0xff] %v28057_v59  ;;  %21775 = vmatmul.mubr.msk.f32.gmra.mrb[30].mxu1 %vm754_vm2, %v27819_v31 }
 0x611   : > { %21777 = vmatprep.mubr.msk.f32.mxu1 %vm754_vm2, %v27823_v45 }
 0x612   : > { %v28063_v15 = vpop.f32.mrb[40].mxu0 }
 0x613   : > { %31499 = vst [vmem:[#allocation84_spill] sm:$0xff] %v28063_v15  ;;  %v28065_v7 = vpop.f32.mrb[41].mxu0 }
 0x614   : > { %31500 = vst [vmem:[#allocation85_spill] sm:$0xff] %v28065_v7  ;;  %21778 = vmatmul.mubr.msk.f32.gmra.mrb[0].mxu1 %vm754_vm2, %v27827_v51 }
 0x615   : > { %21780 = vmatprep.mubr.msk.f32.mxu1 %vm754_vm2, %v27831_v8 }
 0x616   : > { %v28071_v54 = vpop.f32.mrb[42].mxu0 }
 0x617   : > { %31501 = vst [vmem:[#allocation86_spill] sm:$0xff] %v28071_v54  ;;  %v28073_v1 = vpop.f32.mrb[43].mxu0 }
 0x618   : > { %31502 = vst [vmem:[#allocation87_spill] sm:$0xff] %v28073_v1  ;;  %21781 = vmatmul.mubr.msk.f32.gmra.mrb[2].mxu1 %vm754_vm2, %v27835_v32 }
 0x619   : > { %21783 = vmatprep.mubr.msk.f32.mxu1 %vm754_vm2, %v27839_v43 }
 0x61a   : > { %v28079_v59 = vpop.f32.mrb[44].mxu0 }
 0x61b   : > { %31503 = vst [vmem:[#allocation88_spill] sm:$0xff] %v28079_v59  ;;  %v28081_v15 = vpop.f32.mrb[45].mxu0 }
 0x61c   : > { %31504 = vst [vmem:[#allocation89_spill] sm:$0xff] %v28081_v15  ;;  %21784 = vmatmul.mubr.msk.f32.gmra.mrb[4].mxu1 %vm754_vm2, %v27843_v52 }
 0x61d   : > { %21786 = vmatprep.mubr.msk.f32.mxu1 %vm754_vm2, %v27847_v35 }
 0x61e   : > { %v28087_v7 = vpop.f32.mrb[46].mxu0 }
 0x61f   : > { %31505 = vst [vmem:[#allocation90_spill] sm:$0xff] %v28087_v7  ;;  %v28089_v54 = vpop.f32.mrb[47].mxu0 }
 0x620   : > { %31506 = vst [vmem:[#allocation91_spill] sm:$0xff] %v28089_v54  ;;  %21787 = vmatmul.mubr.msk.f32.gmra.mrb[6].mxu1 %vm754_vm2, %v27851_v57 }
 0x621   : > { %21789 = vmatprep.mubr.msk.f32.mxu1 %vm754_vm2, %v27855_v61 }
 0x622   : > { %v28095_v1 = vpop.f32.mrb[48].mxu0 }
 0x623   : > { %31507 = vst [vmem:[#allocation92_spill] sm:$0xff] %v28095_v1  ;;  %v28097_v59 = vpop.f32.mrb[49].mxu0 }
 0x624   : > { %31508 = vst [vmem:[#allocation93_spill] sm:$0xff] %v28097_v59  ;;  %21790 = vmatmul.mubr.msk.f32.gmra.mrb[8].mxu1 %vm754_vm2, %v27859_v49  ;;  %v28117_v59 = vld [vmem:[#allocation3 + $0x180] sm:$0xff] }
 0x625   : > { %21792 = vmatprep.mubr.msk.f32.mxu1 %vm754_vm2, %v27863_v0 }
 0x627   : > { %v28103_v15 = vpop.f32.mrb[50].mxu0 }
 0x628   : > { %31509 = vst [vmem:[#allocation94_spill] sm:$0xff] %v28103_v15  ;;  %v28105_v7 = vpop.f32.mrb[51].mxu0  ;;  %21793 = vmatmul.mubr.msk.f32.gmra.mrb[10].mxu1 %vm754_vm2, %v27867_v10 }
 0x629   : > { %31510 = vst [vmem:[#allocation95_spill] sm:$0xff] %v28105_v7  ;;  %21795 = vmatprep.mubr.msk.f32.mxu1 %vm754_vm2, %v27871_v30  ;;  %v28123_v7 = vld [vmem:[#allocation3 + $0x188] sm:$0xff] }
 0x62b   : > { %v28111_v54 = vpop.f32.mrb[52].mxu0 }
 0x62c   : > { %31511 = vst [vmem:[#allocation96_spill] sm:$0xff] %v28111_v54  ;;  %v28113_v1 = vpop.f32.mrb[53].mxu0  ;;  %21796 = vmatmul.mubr.msk.f32.gmra.mrb[12].mxu1 %vm754_vm2, %v27875_v5  ;;  %v28133_v54 = vld [vmem:[#allocation10 + $0x18] sm:$0xf] }
 0x62d   : > { %31512 = vst [vmem:[#allocation97_spill] sm:$0xff] %v28113_v1  ;;  %21798 = vmatprep.mubr.msk.f32.mxu1 %vm754_vm2, %v28117_v59 }
 0x62f   : > { %v28121_v15 = vpop.f32.mrb[54].mxu0 }
 0x630   : > { %31513 = vst [vmem:[#allocation98_spill] sm:$0xff] %v28121_v15  ;;  %v28125_v10 = vpop.f32.mrb[55].mxu0  ;;  %21799 = vmatmul.mubr.msk.f32.gmra.mrb[14].mxu1 %vm754_vm2, %v28123_v7 }
 0x631   : > { %31514 = vst [vmem:[#allocation99_spill] sm:$0xff] %v28125_v10  ;;  %21803 = vmatprep.mubr.msk.f32.mxu1 %vm754_vm2, %v27695_v22 }
 0x633   : > { %v28131_v1 = vpop.f32.mrb[56].mxu0 }
 0x634   : > { %31515 = vst [vmem:[#allocation100_spill] sm:$0xff] %v28131_v1  ;;  %v28135_v5 = vpop.f32.mrb[57].mxu0  ;;  %21804 = vmatmul.mubr.msk.f32.vlgmr.msra.gmra.mrb[16].mxu1 %vm754_vm2, %v27700_v56 }
 0x635   : > { %31516 = vst [vmem:[#allocation101_spill] sm:$0xff] %v28135_v5  ;;  %21852 = vmatpush3.msk.msra.mxu1 %vm5113_vm5, %v28009_v18  ;;  %21806 = vmatprep.mubr.msk.f32.mxu1 %vm754_vm2, %v27707_v48  ;;  %v18533_v18 = vld [vmem:[#allocation27] ss:$0 sm:$0xff] }
 0x636   : > { %21901 = vmatprep.subr.msk.mxu1 %vm5113_vm5, %v28133_v54 }
 0x637   : > { %v28145_v10 = vpop.f32.mrb[58].mxu0 }
 0x638   : > { %31517 = vst [vmem:[#allocation102_spill] sm:$0xff] %v28145_v10  ;;  %v28147_v22 = vpop.f32.mrb[59].mxu0  ;;  %21807 = vmatmul.mubr.msk.f32.gmra.mrb[18].mxu1 %vm754_vm2, %v27719_v58 }
 0x639   : > { %31518 = vst [vmem:[#allocation103_spill] sm:$0xff] %v28147_v22  ;;  %21809 = vmatprep.mubr.msk.f32.mxu1 %vm754_vm2, %v27727_v62 }
 0x63b   : > { %v28153_v56 = vpop.f32.mrb[60].mxu0 }
 0x63c   : > { %31519 = vst [vmem:[#allocation104_spill] sm:$0xff] %v28153_v56  ;;  %v28155_v5 = vpop.f32.mrb[61].mxu0  ;;  %21810 = vmatmul.mubr.msk.f32.gmra.mrb[20].mxu1 %vm754_vm2, %v27735_v28 }
 0x63d   : > { %31520 = vst [vmem:[#allocation105_spill] sm:$0xff] %v28155_v5  ;;  %21812 = vmatprep.mubr.msk.f32.mxu1 %vm754_vm2, %v27743_v33 }
 0x63f   : > { %v21600_v10 = vpop.f32.mrb[62].mxu0 }
 0x640   : > { %v28161_v1 = vadd.f32 %v21600_v10, %v18533_v18  ;;  %v5333_v22 = vpop.f32.mrb[63].mxu0  ;;  %21813 = vmatmul.mubr.msk.f32.gmra.mrb[22].mxu1 %vm754_vm2, %v27751_v3 }
 0x641   : > { %v28165_v15 = vadd.f32 %v18533_v18, %v5333_v22  ;;  %21815 = vmatprep.mubr.msk.f32.mxu1 %vm754_vm2, %v27759_v19 }
 0x642   : > { %31521 = vst [vmem:[#allocation106_spill] sm:$0xff] %v28161_v1 }
 0x643   : > { %31522 = vst [vmem:[#allocation107_spill] sm:$0xff] %v28165_v15  ;;  %v28169_v5 = vpop.f32.mrb[64].mxu0 }
 0x644   : > { %31523 = vst [vmem:[#allocation108_spill] sm:$0xff] %v28169_v5  ;;  %21816 = vmatmul.mubr.msk.f32.gmra.mrb[24].mxu1 %vm754_vm2, %v27767_v12  ;;  %v28173_v56 = vpop.f32.mrb[65].mxu0  ;;  %v31561_v5 = vld [vmem:[#allocation61_spill] sm:$0xff] }
 0x645   : > { %31524 = vst [vmem:[#allocation109_spill] sm:$0xff] %v28173_v56  ;;  %21818 = vmatprep.mubr.msk.f32.mxu1 %vm754_vm2, %v27775_v16  ;;  %v31560_v56 = vld [vmem:[#allocation60_spill] sm:$0xff] }
 0x647   : > { %v28177_v10 = vpop.f32.mrb[66].mxu0 }
 0x648   : > { %31525 = vst [vmem:[#allocation110_spill] sm:$0xff] %v28177_v10  ;;  %v28179_v1 = vpop.f32.mrb[67].mxu0  ;;  %21819 = vmatmul.mubr.msk.f32.gmra.mrb[26].mxu1 %vm754_vm2, %v27783_v53 }
 0x649   : > { %31526 = vst [vmem:[#allocation111_spill] sm:$0xff] %v28179_v1  ;;  %21821 = vmatprep.mubr.msk.f32.mxu1 %vm754_vm2, %v27791_v21 }
 0x64b   : > { %v28185_v22 = vpop.f32.mrb[68].mxu0 }
 0x64c   : > { %31527 = vst [vmem:[#allocation112_spill] sm:$0xff] %v28185_v22  ;;  %v28187_v18 = vpop.f32.mrb[69].mxu0  ;;  %21822 = vmatmul.mubr.msk.f32.gmra.mrb[28].mxu1 %vm754_vm2, %v27799_v47 }
 0x64d   : > { %31528 = vst [vmem:[#allocation113_spill] sm:$0xff] %v28187_v18  ;;  %21824 = vmatprep.mubr.msk.f32.mxu1 %vm754_vm2, %v27584_v63  ;;  %v31559_v18 = vld [vmem:[#allocation59_spill] sm:$0xff] }
 0x64f   : > { %v28193_v15 = vpop.f32.mrb[70].mxu0 }
 0x650   : > { %31529 = vst [vmem:[#allocation114_spill] sm:$0xff] %v28193_v15  ;;  %v28195_v10 = vpop.f32.mrb[71].mxu0  ;;  %21825 = vmatmul.mubr.msk.f32.gmra.mrb[30].mxu1 %vm754_vm2, %v27589_v11 }
 0x651   : > { %31530 = vst [vmem:[#allocation115_spill] sm:$0xff] %v28195_v10  ;;  %21827 = vmatprep.mubr.msk.f32.mxu1 %vm754_vm2, %v27604_v34  ;;  %v31558_v10 = vld [vmem:[#allocation58_spill] sm:$0xff] }
 0x653   : > { %v28201_v1 = vpop.f32.mrb[72].mxu0 }
 0x654   : > { %31531 = vst [vmem:[#allocation116_spill] sm:$0xff] %v28201_v1  ;;  %v28203_v22 = vpop.f32.mrb[73].mxu0  ;;  %21828 = vmatmul.mubr.msk.f32.gmra.mrb[0].mxu1 %vm754_vm2, %v27611_v46  ;;  %v31557_v1 = vld [vmem:[#allocation57_spill] sm:$0xff] }
 0x655   : > { %31532 = vst [vmem:[#allocation117_spill] sm:$0xff] %v28203_v22  ;;  %21830 = vmatprep.mubr.msk.f32.mxu1 %vm754_vm2, %v27621_v55  ;;  %v31556_v22 = vld [vmem:[#allocation56_spill] sm:$0xff] }
 0x657   : > { %v28209_v63 = vpop.f32.mrb[74].mxu0 }
 0x658   : > { %31533 = vst [vmem:[#allocation118_spill] sm:$0xff] %v28209_v63  ;;  %v28211_v15 = vpop.f32.mrb[75].mxu0  ;;  %21831 = vmatmul.mubr.msk.f32.gmra.mrb[2].mxu1 %vm754_vm2, %v27626_v42  ;;  %v31539_v42 = vld [vmem:[#allocation49_spill] sm:$0xff]  ;;  %v31555_v63 = vld [vmem:[#allocation55_spill] sm:$0xff] }
 0x659   : > { %31534 = vst [vmem:[#allocation119_spill] sm:$0xff] %v28211_v15  ;;  %21833 = vmatprep.mubr.msk.f32.mxu1 %vm754_vm2, %v27632_v26  ;;  %v31540_v26 = vld [vmem:[#allocation50_spill] sm:$0xff] }
 0x65a   : > { %v31554_v15 = vld [vmem:[#allocation54_spill] sm:$0xff] }
 0x65b   : > { %v28217_v11 = vpop.f32.mrb[76].mxu0 }
 0x65c   : > { %31535 = vst [vmem:[#allocation120_spill] sm:$0xff] %v28217_v11  ;;  %v28219_v34 = vpop.f32.mrb[77].mxu0  ;;  %21834 = vmatmul.mubr.msk.f32.gmra.mrb[4].mxu1 %vm754_vm2, %v27640_v40  ;;  %v28243_v40 = vld [vmem:[#allocation3 + $0x181] sm:$0xff] }
 0x65d   : > { %31536 = vst [vmem:[#allocation121_spill] sm:$0xff] %v28219_v34  ;;  %21836 = vmatprep.mubr.msk.f32.mxu1 %vm754_vm2, %v27645_v41  ;;  %v28247_v41 = vld [vmem:[#allocation3 + $0x189] sm:$0xff]  ;;  %v31552_v34 = vld [vmem:[#allocation52_spill] sm:$0xff]  ;;  %v31553_v11 = vld [vmem:[#allocation53_spill] sm:$0xff] }
 0x65f   : > { %v28225_v46 = vpop.f32.mrb[78].mxu0 }
 0x660   : > { %31537 = vst [vmem:[#allocation122_spill] sm:$0xff] %v28225_v46  ;;  %v28227_v55 = vpop.f32.mrb[79].mxu0  ;;  %21837 = vmatmul.mubr.msk.f32.gmra.mrb[6].mxu1 %vm754_vm2, %v27653_v44  ;;  %v31541_v44 = vld [vmem:[#allocation72_spill] sm:$0xff]  ;;  %v31551_v46 = vld [vmem:[#allocation51_spill] sm:$0xff] }
 0x661   : > { %31538 = vst [vmem:[#allocation123_spill] sm:$0xff] %v28227_v55  ;;  %21839 = vmatprep.mubr.msk.f32.mxu1 %vm754_vm2, %v27659_v20  ;;  %v8106_v20 = vld [vmem:[#allocation10 + $0x1c] sm:$0xf]  ;;  %v31550_v55 = vld [vmem:[#allocation77_spill] sm:$0xff] }
 0x664   : > { %21840 = vmatmul.mubr.msk.f32.gmra.mrb[8].mxu1 %vm754_vm2, %v27667_v6  ;;  %v31542_v6 = vld [vmem:[#allocation74_spill] sm:$0xff] }
 0x665   : > { %21842 = vmatprep.mubr.msk.f32.mxu1 %vm754_vm2, %v27674_v4  ;;  %v31543_v4 = vld [vmem:[#allocation43_spill] sm:$0xff] }
 0x668   : > { %21843 = vmatmul.mubr.msk.f32.gmra.mrb[10].mxu1 %vm754_vm2, %v27680_v2  ;;  %v31544_v2 = vld [vmem:[#allocation44_spill] sm:$0xff] }
 0x669   : > { %21845 = vmatprep.mubr.msk.f32.mxu1 %vm754_vm2, %v31539_v42  ;;  %v31545_v42 = vld [vmem:[#allocation45_spill] sm:$0xff] }
 0x66c   : > { %21846 = vmatmul.mubr.msk.f32.gmra.mrb[12].mxu1 %vm754_vm2, %v31540_v26  ;;  %v31546_v26 = vld [vmem:[#allocation46_spill] sm:$0xff] }
 0x66d   : > { %21848 = vmatprep.mubr.msk.f32.mxu1 %vm754_vm2, %v28243_v40 }
 0x670   : > { %21849 = vmatmul.mubr.msk.f32.gmra.mrb[14].mxu1 %vm754_vm2, %v28247_v41 }
 0x671   : > { %21853 = vmatprep.mubr.msk.f32.mxu1 %vm754_vm2, %v31541_v44  ;;  %v31547_v44 = vld [vmem:[#allocation47_spill] sm:$0xff] }
 0x674   : > { %21854 = vmatmul.mubr.msk.f32.vlgmr.msra.gmra.mrb[16].mxu1 %vm754_vm2, %v31542_v6  ;;  %v31548_v6 = vld [vmem:[#allocation48_spill] sm:$0xff] }
 0x675   : > { %21902 = vmatpush3.msk.msra.mxu1 %vm5113_vm5, %v28133_v54  ;;  %21856 = vmatprep.mubr.msk.f32.mxu1 %vm754_vm2, %v31543_v4  ;;  %v31549_v54 = vld [vmem:[#allocation76_spill] sm:$0xff] }
 0x676   : > { %21951 = vmatprep.subr.msk.mxu1 %vm5113_vm5, %v8106_v20 }
 0x678   : > { %21857 = vmatmul.mubr.msk.f32.gmra.mrb[18].mxu1 %vm754_vm2, %v31544_v2 }
 0x679   : > { %21859 = vmatprep.mubr.msk.f32.mxu1 %vm754_vm2, %v31545_v42 }
 0x67c   : > { %21860 = vmatmul.mubr.msk.f32.gmra.mrb[20].mxu1 %vm754_vm2, %v31546_v26 }
 0x67d   : > { %21862 = vmatprep.mubr.msk.f32.mxu1 %vm754_vm2, %v31547_v44 }
 0x680   : > { %21863 = vmatmul.mubr.msk.f32.gmra.mrb[22].mxu1 %vm754_vm2, %v31548_v6 }
 0x681   : > { %21865 = vmatprep.mubr.msk.f32.mxu1 %vm754_vm2, %v31549_v54 }
 0x684   : > { %21866 = vmatmul.mubr.msk.f32.gmra.mrb[24].mxu1 %vm754_vm2, %v31550_v55 }
 0x685   : > { %21868 = vmatprep.mubr.msk.f32.mxu1 %vm754_vm2, %v31551_v46 }
 0x688   : > { %21869 = vmatmul.mubr.msk.f32.gmra.mrb[26].mxu1 %vm754_vm2, %v31552_v34 }
 0x689   : > { %21871 = vmatprep.mubr.msk.f32.mxu1 %vm754_vm2, %v31553_v11 }
 0x68c   : > { %21872 = vmatmul.mubr.msk.f32.gmra.mrb[28].mxu1 %vm754_vm2, %v31554_v15  ;;  %v31562_v15 = vld [vmem:[#allocation62_spill] sm:$0xff] }
 0x68d   : > { %21874 = vmatprep.mubr.msk.f32.mxu1 %vm754_vm2, %v31555_v63  ;;  %v31563_v63 = vld [vmem:[#allocation63_spill] sm:$0xff] }
 0x690   : > { %21875 = vmatmul.mubr.msk.f32.gmra.mrb[30].mxu1 %vm754_vm2, %v31556_v22  ;;  %v31564_v22 = vld [vmem:[#allocation64_spill] sm:$0xff] }
 0x691   : > { %21877 = vmatprep.mubr.msk.f32.mxu1 %vm754_vm2, %v31557_v1  ;;  %v31565_v1 = vld [vmem:[#allocation65_spill] sm:$0xff] }
 0x694   : > { %21878 = vmatmul.mubr.msk.f32.gmra.mrb[0].mxu1 %vm754_vm2, %v31558_v10  ;;  %v31566_v10 = vld [vmem:[#allocation66_spill] sm:$0xff] }
 0x695   : > { %21880 = vmatprep.mubr.msk.f32.mxu1 %vm754_vm2, %v31559_v18 }
 0x698   : > { %21881 = vmatmul.mubr.msk.f32.gmra.mrb[2].mxu1 %vm754_vm2, %v31560_v56 }
 0x699   : > { %21883 = vmatprep.mubr.msk.f32.mxu1 %vm754_vm2, %v31561_v5 }
 0x69c   : > { %21884 = vmatmul.mubr.msk.f32.gmra.mrb[4].mxu1 %vm754_vm2, %v31562_v15 }
 0x69d   : > { %21886 = vmatprep.mubr.msk.f32.mxu1 %vm754_vm2, %v31563_v63  ;;  %v28314_v63 = vld [vmem:[#allocation3 + $0x182] sm:$0xff] }
 0x69e   : > { %31567 = vst [vmem:[#allocation49_spill] sm:$0xff] %v28314_v63 }
 0x6a0   : > { %21887 = vmatmul.mubr.msk.f32.gmra.mrb[6].mxu1 %vm754_vm2, %v31564_v22 }
 0x6a1   : > { %21889 = vmatprep.mubr.msk.f32.mxu1 %vm754_vm2, %v31565_v1  ;;  %v28318_v1 = vld [vmem:[#allocation3 + $0x18a] sm:$0xff] }
 0x6a2   : > { %31568 = vst [vmem:[#allocation50_spill] sm:$0xff] %v28318_v1 }
 0x6a4   : > { %21890 = vmatmul.mubr.msk.f32.gmra.mrb[8].mxu1 %vm754_vm2, %v31566_v10 }
 0x6a5   : > { %21892 = vmatprep.mubr.msk.f32.mxu1 %vm754_vm2, %v27991_v60 }
 0x6a8   : > { %21893 = vmatmul.mubr.msk.f32.gmra.mrb[10].mxu1 %vm754_vm2, %v27995_v14  ;;  %v8496_v14 = vld [vmem:[#allocation10 + $0x20] sm:$0xf] }
 0x6a9   : > { %21895 = vmatprep.mubr.msk.f32.mxu1 %vm754_vm2, %v27999_v17 }
 0x6ac   : > { %21896 = vmatmul.mubr.msk.f32.gmra.mrb[12].mxu1 %vm754_vm2, %v28003_v50 }
 0x6ad   : > { %21898 = vmatprep.mubr.msk.f32.mxu1 %vm754_vm2, %v28314_v63  ;;  %v31569_v63 = vld [vmem:[#allocation67_spill] sm:$0xff] }
 0x6b0   : > { %21899 = vmatmul.mubr.msk.f32.gmra.mrb[14].mxu1 %vm754_vm2, %v28318_v1  ;;  %v31570_v1 = vld [vmem:[#allocation68_spill] sm:$0xff] }
 0x6b1   : > { %21903 = vmatprep.mubr.msk.f32.mxu1 %vm754_vm2, %v27729_v9  ;;  %v31571_v9 = vld [vmem:[#allocation69_spill] sm:$0xff] }
 0x6b4   : > { %21904 = vmatmul.mubr.msk.f32.vlgmr.msra.gmra.mrb[16].mxu1 %vm754_vm2, %v27737_v29  ;;  %v31572_v29 = vld [vmem:[#allocation70_spill] sm:$0xff] }
 0x6b5   : > { %21952 = vmatpush3.msk.msra.mxu1 %vm5113_vm5, %v8106_v20  ;;  %21906 = vmatprep.mubr.msk.f32.mxu1 %vm754_vm2, %v27745_v13  ;;  %v7713_v13 = vld [vmem:[#allocation3 + $0x198] sm:$0xff] }
 0x6b6   : > { %22001 = vmatprep.subr.msk.mxu1 %vm5113_vm5, %v8496_v14 }
 0x6b8   : > { %21907 = vmatmul.mubr.msk.f32.gmra.mrb[18].mxu1 %vm754_vm2, %v31569_v63 }
 0x6b9   : > { %21909 = vmatprep.mubr.msk.f32.mxu1 %vm754_vm2, %v27761_v39  ;;  %v7714_v39 = vld [vmem:[#allocation3 + $0x1a0] sm:$0xff] }
 0x6bc   : > { %21910 = vmatmul.mubr.msk.f32.gmra.mrb[20].mxu1 %vm754_vm2, %v31570_v1 }
 0x6bd   : > { %21912 = vmatprep.mubr.msk.f32.mxu1 %vm754_vm2, %v27777_v24  ;;  %v8095_v24 = vld [vmem:[#allocation3 + $0x139] sm:$0xff] }
 0x6c0   : > { %21913 = vmatmul.mubr.msk.f32.gmra.mrb[22].mxu1 %vm754_vm2, %v27785_v27  ;;  %v8097_v27 = vld [vmem:[#allocation3 + $0x151] sm:$0xff] }
 0x6c1   : > { %21915 = vmatprep.mubr.msk.f32.mxu1 %vm754_vm2, %v27793_v36  ;;  %v8099_v36 = vld [vmem:[#allocation3 + $0x169] sm:$0xff] }
 0x6c4   : > { %21916 = vmatmul.mubr.msk.f32.gmra.mrb[24].mxu1 %vm754_vm2, %v27801_v37  ;;  %v8103_v37 = vld [vmem:[#allocation3 + $0x199] sm:$0xff] }
 0x6c5   : > { %21918 = vmatprep.mubr.msk.f32.mxu1 %vm754_vm2, %v27807_v23  ;;  %v8104_v23 = vld [vmem:[#allocation3 + $0x1a1] sm:$0xff] }
 0x6c8   : > { %21919 = vmatmul.mubr.msk.f32.gmra.mrb[26].mxu1 %vm754_vm2, %v27811_v25  ;;  %v31573_v25 = vld [vmem:[#allocation54_spill] sm:$0xff] }
 0x6c9   : > { %21921 = vmatprep.mubr.msk.f32.mxu1 %vm754_vm2, %v27815_v38  ;;  %v31574_v38 = vld [vmem:[#allocation55_spill] sm:$0xff] }
 0x6cc   : > { %21922 = vmatmul.mubr.msk.f32.gmra.mrb[28].mxu1 %vm754_vm2, %v27819_v31  ;;  %v31575_v31 = vld [vmem:[#allocation56_spill] sm:$0xff] }
 0x6cd   : > { %21924 = vmatprep.mubr.msk.f32.mxu1 %vm754_vm2, %v27823_v45  ;;  %v31576_v45 = vld [vmem:[#allocation57_spill] sm:$0xff] }
 0x6d0   : > { %21925 = vmatmul.mubr.msk.f32.gmra.mrb[30].mxu1 %vm754_vm2, %v27827_v51  ;;  %v31577_v51 = vld [vmem:[#allocation58_spill] sm:$0xff] }
 0x6d1   : > { %21927 = vmatprep.mubr.msk.f32.mxu1 %vm754_vm2, %v27831_v8  ;;  %v31578_v8 = vld [vmem:[#allocation63_spill] sm:$0xff] }
 0x6d4   : > { %21928 = vmatmul.mubr.msk.f32.gmra.mrb[0].mxu1 %vm754_vm2, %v27835_v32  ;;  %v31579_v32 = vld [vmem:[#allocation65_spill] sm:$0xff] }
 0x6d5   : > { %21930 = vmatprep.mubr.msk.f32.mxu1 %vm754_vm2, %v27839_v43  ;;  %v31580_v43 = vld [vmem:[#allocation71_spill] sm:$0xff] }
 0x6d8   : > { %21931 = vmatmul.mubr.msk.f32.gmra.mrb[2].mxu1 %vm754_vm2, %v27843_v52  ;;  %v8493_v52 = vld [vmem:[#allocation3 + $0x19a] sm:$0xff] }
 0x6d9   : > { %21933 = vmatprep.mubr.msk.f32.mxu1 %vm754_vm2, %v27847_v35  ;;  %v31582_v35 = vld [vmem:[#allocation50_spill] sm:$0xff] }
 0x6dc   : > { %21934 = vmatmul.mubr.msk.f32.gmra.mrb[4].mxu1 %vm754_vm2, %v27851_v57  ;;  %v8494_v57 = vld [vmem:[#allocation3 + $0x1a2] sm:$0xff] }
 0x6dd   : > { %21936 = vmatprep.mubr.msk.f32.mxu1 %vm754_vm2, %v27855_v61  ;;  %v9571_v61 = vld [vmem:[#allocation13 + $0x4] sm:$0xf] }
 0x6de   : > { %22101 = vmatprep.subr.msk.mxu0 %vm5113_vm5, %v9571_v61 }
 0x6df   : > { %22102 = vmatpush3.msk.msra.mxu0 %vm5113_vm5, %v9571_v61 }
 0x6e0   : > { %21937 = vmatmul.mubr.msk.f32.gmra.mrb[6].mxu1 %vm754_vm2, %v27859_v49  ;;  %v9538_v49 = vld [vmem:[#allocation3 + $0x1] sm:$0xff] }
 0x6e1   : > { %21939 = vmatprep.mubr.msk.f32.mxu1 %vm754_vm2, %v27863_v0  ;;  %22103 = vmatprep.mubr.msk.f32.mxu0 %vm754_vm2, %v9538_v49  ;;  %v9539_v0 = vld [vmem:[#allocation3 + $0x9] sm:$0xff] }
 0x6e2   : > { %22104 = vmatmul.mubr.msk.f32.vlgmr.msra.gmra.mrb[80].mxu0 %vm754_vm2, %v9539_v0 }
 0x6e4   : > { %21940 = vmatmul.mubr.msk.f32.gmra.mrb[8].mxu1 %vm754_vm2, %v31571_v9 }
 0x6e5   : > { %21942 = vmatprep.mubr.msk.f32.mxu1 %vm754_vm2, %v27871_v30  ;;  %v9537_v30 = vld [vmem:[#allocation13] sm:$0xf] }
 0x6e6   : > { %22151 = vmatprep.subr.msk.mxu0 %vm5113_vm5, %v9537_v30 }
 0x6e7   : > { %22152 = vmatpush3.msk.msra.mxu0 %vm5113_vm5, %v9537_v30  ;;  %v31594_v30 = vld [vmem:[#allocation119_spill] sm:$0xff] }
 0x6e8   : > { %21943 = vmatmul.mubr.msk.f32.gmra.mrb[10].mxu1 %vm754_vm2, %v31572_v29  ;;  %v31588_v29 = vld [vmem:[#allocation113_spill] sm:$0xff] }
 0x6e9   : > { %21945 = vmatprep.mubr.msk.f32.mxu1 %vm754_vm2, %v28117_v59 }
 0x6ec   : > { %21946 = vmatmul.mubr.msk.f32.gmra.mrb[12].mxu1 %vm754_vm2, %v28123_v7  ;;  %v8091_v7 = vld [vmem:[#allocation3 + $0x109] sm:$0xff] }
 0x6ed   : > { %21948 = vmatprep.mubr.msk.f32.mxu1 %vm754_vm2, %v7713_v13 }
 0x6f0   : > { %21949 = vmatmul.mubr.msk.f32.gmra.mrb[14].mxu1 %vm754_vm2, %v7714_v39 }
 0x6f1   : > { %21953 = vmatprep.mubr.msk.f32.mxu1 %vm754_vm2, %v27707_v48  ;;  %v8085_v48 = vld [vmem:[#allocation3 + $0xc1] sm:$0xff] }
 0x6f4   : > { %21954 = vmatmul.mubr.msk.f32.vlgmr.msra.gmra.mrb[16].mxu1 %vm754_vm2, %v27719_v58  ;;  %v8086_v58 = vld [vmem:[#allocation3 + $0xc9] sm:$0xff] }
 0x6f5   : > { %22002 = vmatpush3.msk.msra.mxu1 %vm5113_vm5, %v8496_v14  ;;  %21956 = vmatprep.mubr.msk.f32.mxu1 %vm754_vm2, %v27727_v62  ;;  %v8087_v62 = vld [vmem:[#allocation3 + $0xd9] sm:$0xff] }
 0x6f8   : > { %21957 = vmatmul.mubr.msk.f32.gmra.mrb[18].mxu1 %vm754_vm2, %v27735_v28  ;;  %v8088_v28 = vld [vmem:[#allocation3 + $0xe1] sm:$0xff] }
 0x6f9   : > { %21959 = vmatprep.mubr.msk.f32.mxu1 %vm754_vm2, %v27743_v33  ;;  %v8089_v33 = vld [vmem:[#allocation3 + $0xf1] sm:$0xff] }
 0x6fc   : > { %21960 = vmatmul.mubr.msk.f32.gmra.mrb[20].mxu1 %vm754_vm2, %v27751_v3  ;;  %v8090_v3 = vld [vmem:[#allocation3 + $0xf9] sm:$0xff] }
 0x6fd   : > { %21962 = vmatprep.mubr.msk.f32.mxu1 %vm754_vm2, %v27759_v19  ;;  %v8092_v19 = vld [vmem:[#allocation3 + $0x111] sm:$0xff] }
 0x700   : > { %21963 = vmatmul.mubr.msk.f32.gmra.mrb[22].mxu1 %vm754_vm2, %v27767_v12  ;;  %v8093_v12 = vld [vmem:[#allocation3 + $0x121] sm:$0xff] }
 0x701   : > { %21965 = vmatprep.mubr.msk.f32.mxu1 %vm754_vm2, %v27775_v16  ;;  %v8094_v16 = vld [vmem:[#allocation3 + $0x129] sm:$0xff] }
 0x704   : > { %21966 = vmatmul.mubr.msk.f32.gmra.mrb[24].mxu1 %vm754_vm2, %v27783_v53  ;;  %v8096_v53 = vld [vmem:[#allocation3 + $0x141] sm:$0xff] }
 0x705   : > { %21968 = vmatprep.mubr.msk.f32.mxu1 %vm754_vm2, %v27791_v21  ;;  %v8098_v21 = vld [vmem:[#allocation3 + $0x159] sm:$0xff] }
 0x708   : > { %21969 = vmatmul.mubr.msk.f32.gmra.mrb[26].mxu1 %vm754_vm2, %v27799_v47  ;;  %v8100_v47 = vld [vmem:[#allocation3 + $0x171] sm:$0xff] }
 0x709   : > { %21971 = vmatprep.mubr.msk.f32.mxu1 %vm754_vm2, %v8085_v48 }
 0x70c   : > { %21972 = vmatmul.mubr.msk.f32.gmra.mrb[28].mxu1 %vm754_vm2, %v8086_v58 }
 0x70d   : > { %21974 = vmatprep.mubr.msk.f32.mxu1 %vm754_vm2, %v8087_v62 }
 0x710   : > { %21975 = vmatmul.mubr.msk.f32.gmra.mrb[30].mxu1 %vm754_vm2, %v8088_v28  ;;  %v31589_v28 = vld [vmem:[#allocation114_spill] sm:$0xff] }
 0x711   : > { %21977 = vmatprep.mubr.msk.f32.mxu1 %vm754_vm2, %v8089_v33 }
 0x714   : > { %21978 = vmatmul.mubr.msk.f32.gmra.mrb[0].mxu1 %vm754_vm2, %v8090_v3 }
 0x715   : > { %21980 = vmatprep.mubr.msk.f32.mxu1 %vm754_vm2, %v8091_v7 }
 0x718   : > { %21981 = vmatmul.mubr.msk.f32.gmra.mrb[2].mxu1 %vm754_vm2, %v8092_v19  ;;  %v31590_v19 = vld [vmem:[#allocation115_spill] sm:$0xff] }
 0x719   : > { %21983 = vmatprep.mubr.msk.f32.mxu1 %vm754_vm2, %v8093_v12 }
 0x71c   : > { %21984 = vmatmul.mubr.msk.f32.gmra.mrb[4].mxu1 %vm754_vm2, %v8094_v16 }
 0x71d   : > { %21986 = vmatprep.mubr.msk.f32.mxu1 %vm754_vm2, %v8095_v24 }
 0x720   : > { %21987 = vmatmul.mubr.msk.f32.gmra.mrb[6].mxu1 %vm754_vm2, %v8096_v53 }
 0x721   : > { %21989 = vmatprep.mubr.msk.f32.mxu1 %vm754_vm2, %v8097_v27 }
 0x724   : > { %21990 = vmatmul.mubr.msk.f32.gmra.mrb[8].mxu1 %vm754_vm2, %v8098_v21 }
 0x725   : > { %21992 = vmatprep.mubr.msk.f32.mxu1 %vm754_vm2, %v8099_v36  ;;  %v31591_v36 = vld [vmem:[#allocation116_spill] sm:$0xff] }
 0x728   : > { %21993 = vmatmul.mubr.msk.f32.gmra.mrb[10].mxu1 %vm754_vm2, %v8100_v47 }
 0x729   : > { %21995 = vmatprep.mubr.msk.f32.mxu1 %vm754_vm2, %v28243_v40 }
 0x72c   : > { %21996 = vmatmul.mubr.msk.f32.gmra.mrb[12].mxu1 %vm754_vm2, %v28247_v41  ;;  %v31586_v41 = vld [vmem:[#allocation111_spill] sm:$0xff] }
 0x72d   : > { %21998 = vmatprep.mubr.msk.f32.mxu1 %vm754_vm2, %v8103_v37 }
 0x730   : > { %21999 = vmatmul.mubr.msk.f32.gmra.mrb[14].mxu1 %vm754_vm2, %v8104_v23 }
 0x731   : > { %22003 = vmatprep.mubr.msk.f32.mxu1 %vm754_vm2, %v31543_v4 }
 0x734   : > { %22004 = vmatmul.mubr.msk.f32.vlgmr.msra.gmra.mrb[16].mxu1 %vm754_vm2, %v31544_v2 }
 0x735   : > { %22006 = vmatprep.mubr.msk.f32.mxu1 %vm754_vm2, %v31545_v42 }
 0x738   : > { %22007 = vmatmul.mubr.msk.f32.gmra.mrb[18].mxu1 %vm754_vm2, %v31546_v26 }
 0x739   : > { %22009 = vmatprep.mubr.msk.f32.mxu1 %vm754_vm2, %v31547_v44  ;;  %v31587_v44 = vld [vmem:[#allocation112_spill] sm:$0xff] }
 0x73c   : > { %22010 = vmatmul.mubr.msk.f32.gmra.mrb[20].mxu1 %vm754_vm2, %v31548_v6 }
 0x73d   : > { %22012 = vmatprep.mubr.msk.f32.mxu1 %vm754_vm2, %v31549_v54 }
 0x740   : > { %22013 = vmatmul.mubr.msk.f32.gmra.mrb[22].mxu1 %vm754_vm2, %v31550_v55 }
 0x741   : > { %22015 = vmatprep.mubr.msk.f32.mxu1 %vm754_vm2, %v31551_v46 }
 0x744   : > { %22016 = vmatmul.mubr.msk.f32.gmra.mrb[24].mxu1 %vm754_vm2, %v31552_v34  ;;  %v31585_v34 = vld [vmem:[#allocation110_spill] sm:$0xff] }
 0x745   : > { %22018 = vmatprep.mubr.msk.f32.mxu1 %vm754_vm2, %v31553_v11 }
 0x748   : > { %22019 = vmatmul.mubr.msk.f32.gmra.mrb[26].mxu1 %vm754_vm2, %v31573_v25 }
 0x749   : > { %22021 = vmatprep.mubr.msk.f32.mxu1 %vm754_vm2, %v31574_v38 }
 0x74c   : > { %22022 = vmatmul.mubr.msk.f32.gmra.mrb[28].mxu1 %vm754_vm2, %v31575_v31  ;;  %v31592_v31 = vld [vmem:[#allocation117_spill] sm:$0xff] }
 0x74d   : > { %22024 = vmatprep.mubr.msk.f32.mxu1 %vm754_vm2, %v31576_v45 }
 0x750   : > { %22025 = vmatmul.mubr.msk.f32.gmra.mrb[30].mxu1 %vm754_vm2, %v31577_v51 }
 0x751   : > { %22027 = vmatprep.mubr.msk.f32.mxu1 %vm754_vm2, %v31559_v18 }
 0x754   : > { %22028 = vmatmul.mubr.msk.f32.gmra.mrb[0].mxu1 %vm754_vm2, %v31560_v56  ;;  %v31584_v56 = vld [vmem:[#allocation109_spill] sm:$0xff] }
 0x755   : > { %22030 = vmatprep.mubr.msk.f32.mxu1 %vm754_vm2, %v31561_v5  ;;  %v28503_v5 = vld [vmem:[#allocation13 + $0x8] sm:$0xf] }
 0x756   : > { %22201 = vmatprep.subr.msk.mxu0 %vm5113_vm5, %v28503_v5 }
 0x758   : > { %22031 = vmatmul.mubr.msk.f32.gmra.mrb[2].mxu1 %vm754_vm2, %v31562_v15  ;;  %v31581_v15 = vld [vmem:[#allocation49_spill] sm:$0xff] }
 0x759   : > { %22033 = vmatprep.mubr.msk.f32.mxu1 %vm754_vm2, %v31578_v8 }
 0x75c   : > { %22034 = vmatmul.mubr.msk.f32.gmra.mrb[4].mxu1 %vm754_vm2, %v31564_v22 }
 0x75d   : > { %22036 = vmatprep.mubr.msk.f32.mxu1 %vm754_vm2, %v31579_v32 }
 0x760   : > { %22037 = vmatmul.mubr.msk.f32.gmra.mrb[6].mxu1 %vm754_vm2, %v31566_v10 }
 0x761   : > { %22039 = vmatprep.mubr.msk.f32.mxu1 %vm754_vm2, %v27991_v60  ;;  %v9116_v60 = vld [vmem:[#allocation22] sm:$0xf] }
 0x762   : > { %22051 = vmatprep.subr.msk.mxu1 %vm5113_vm5, %v9116_v60 }
 0x763   : > { %22052 = vmatpush3.msk.msra.mxu1 %vm5113_vm5, %v9116_v60 }
 0x764   : > { %22040 = vmatmul.mubr.msk.f32.gmra.mrb[8].mxu1 %vm754_vm2, %v31580_v43 }
 0x765   : > { %22042 = vmatprep.mubr.msk.f32.mxu1 %vm754_vm2, %v27999_v17  ;;  %v28507_v17 = vld [vmem:[#allocation12] ss:$0 sm:$0xff] }
 0x768   : > { %22043 = vmatmul.mubr.msk.f32.gmra.mrb[10].mxu1 %vm754_vm2, %v28003_v50  ;;  %v31583_v50 = vld [vmem:[#allocation108_spill] sm:$0xff] }
 0x769   : > { %22045 = vmatprep.mubr.msk.f32.mxu1 %vm754_vm2, %v31581_v15 }
 0x76c   : > { %22046 = vmatmul.mubr.msk.f32.gmra.mrb[12].mxu1 %vm754_vm2, %v31582_v35  ;;  %v31593_v35 = vld [vmem:[#allocation118_spill] sm:$0xff] }
 0x76d   : > { %22048 = vmatprep.mubr.msk.f32.mxu1 %vm754_vm2, %v8493_v52 }
 0x770   : > { %22049 = vmatmul.mubr.msk.f32.gmra.mrb[14].mxu1 %vm754_vm2, %v8494_v57 }
 0x807   : > { %v22005_v14 = vpop.f32.mrb[16].mxu1 }
 0x808   : > { %v23171_v59 = vadd.f32 %v22005_v14, %v31583_v50  ;;  %v8662_v1 = vpop.f32.mrb[17].mxu1 }
 0x809   : > { %v23172_v10 = vadd.f32 %v8662_v1, %v31584_v56 }
 0x80a   : > { %v28512_v22 = vadd.f32 %v23171_v59, %v28507_v17 }
 0x80b   : > { %v28515_v18 = vadd.f32 %v23172_v10, %v28507_v17  ;;  %v22008_v63 = vpop.f32.mrb[18].mxu1 }
 0x80c   : > { %v18866_v11 = vmul.f32 -1.442695, %v28512_v22  ;;  %v23173_v46 = vadd.f32 %v22008_v63, %v31585_v34  ;;  %v8672_v55 = vpop.f32.mrb[19].mxu1 }
 0x80d   : > { %v18865_v40 = vmul.f32 -1.442695, %v28515_v18  ;;  %v23174_v20 = vadd.f32 %v8672_v55, %v31586_v41 }
 0x80e   : > { %24614 = vpow2.f32 %v18866_v11  ;;  %v28522_v4 = vadd.f32 %v23173_v46, %v28507_v17  ;;  %v31595_v11 = vld [vmem:[#allocation120_spill] sm:$0xff] }
 0x80f   : > { %24616 = vpow2.f32 %v18865_v40  ;;  %v28525_v2 = vadd.f32 %v23174_v20, %v28507_v17  ;;  %v22011_v42 = vpop.f32.mrb[20].mxu1  ;;  %v31596_v20 = vld [vmem:[#allocation121_spill] sm:$0xff] }
 0x810   : > { %v18868_v26 = vmul.f32 -1.442695, %v28522_v4  ;;  %v23175_v6 = vadd.f32 %v22011_v42, %v31587_v44  ;;  %v8682_v54 = vpop.f32.mrb[21].mxu1 }
 0x811   : > { %v18867_v9 = vmul.f32 -1.442695, %v28525_v2  ;;  %v23176_v13 = vadd.f32 %v8682_v54, %v31588_v29 }
 0x812   : > { %24618 = vpow2.f32 %v18868_v26  ;;  %v28532_v39 = vadd.f32 %v23175_v6, %v28507_v17 }
 0x813   : > { %24620 = vpow2.f32 %v18867_v9  ;;  %v28535_v48 = vadd.f32 %v23176_v13, %v28507_v17  ;;  %v22014_v58 = vpop.f32.mrb[22].mxu1  ;;  %v31597_v13 = vld [vmem:[#allocation122_spill] sm:$0xff] }
 0x814   : > { %v18870_v62 = vmul.f32 -1.442695, %v28532_v39  ;;  %v23177_v33 = vadd.f32 %v22014_v58, %v31589_v28  ;;  %v8692_v3 = vpop.f32.mrb[23].mxu1 }
 0x815   : > { %v18869_v7 = vmul.f32 -1.442695, %v28535_v48  ;;  %v23178_v12 = vadd.f32 %v8692_v3, %v31590_v19 }
 0x816   : > { %24622 = vpow2.f32 %v18870_v62  ;;  %v28542_v16 = vadd.f32 %v23177_v33, %v28507_v17 }
 0x817   : > { %24624 = vpow2.f32 %v18869_v7  ;;  %v28545_v24 = vadd.f32 %v23178_v12, %v28507_v17  ;;  %v22017_v53 = vpop.f32.mrb[24].mxu1  ;;  %v31598_v7 = vld [vmem:[#allocation123_spill] sm:$0xff] }
 0x818   : > { %v24615_v27 = vpop.eup %24614  ;;  %v18872_v21 = vmul.f32 -1.442695, %v28542_v16  ;;  %v23179_v47 = vadd.f32 %v22017_v53, %v31591_v36  ;;  %v8702_v37 = vpop.f32.mrb[25].mxu1 }
 0x819   : > { %v24617_v23 = vpop.eup %24616  ;;  %v8989_v25 = vadd.f32 1.0, %v24615_v27  ;;  %v18871_v38 = vmul.f32 -1.442695, %v28545_v24  ;;  %v23180_v45 = vadd.f32 %v8702_v37, %v31592_v31 }
 0x81a   : > { %v8988_v51 = vadd.f32 1.0, %v24617_v23  ;;  %24626 = vpow2.f32 %v18872_v21  ;;  %v28552_v8 = vadd.f32 %v23179_v47, %v28507_v17 }
 0x81b   : > { %24628 = vrcp.f32 %v8989_v25  ;;  %v28555_v32 = vadd.f32 %v23180_v45, %v28507_v17  ;;  %v22020_v43 = vpop.f32.mrb[26].mxu1 }
 0x81c   : > { %v24619_v15 = vpop.eup %24618  ;;  %24630 = vrcp.f32 %v8988_v51  ;;  %v18874_v52 = vmul.f32 -1.442695, %v28552_v8  ;;  %v23181_v57 = vadd.f32 %v22020_v43, %v31593_v35  ;;  %v8712_v60 = vpop.f32.mrb[27].mxu1 }
 0x81d   : > { %v24621_v61 = vpop.eup %24620  ;;  %v8991_v49 = vadd.f32 1.0, %v24619_v15  ;;  %24632 = vpow2.f32 %v18871_v38  ;;  %v18873_v0 = vmul.f32 -1.442695, %v28555_v32  ;;  %v23182_v14 = vadd.f32 %v8712_v60, %v31594_v30 }
 0x81e   : > { %v8990_v50 = vadd.f32 1.0, %v24621_v61  ;;  %24634 = vpow2.f32 %v18874_v52  ;;  %v28562_v59 = vadd.f32 %v23181_v57, %v28507_v17 }
 0x81f   : > { %24636 = vrcp.f32 %v8991_v49  ;;  %v28565_v1 = vadd.f32 %v23182_v14, %v28507_v17  ;;  %v22023_v56 = vpop.f32.mrb[28].mxu1 }
 0x820   : > { %v24623_v10 = vpop.eup %24622  ;;  %24638 = vrcp.f32 %v8990_v50  ;;  %v18876_v63 = vmul.f32 -1.442695, %v28562_v59  ;;  %v23183_v34 = vadd.f32 %v22023_v56, %v31595_v11  ;;  %v8722_v46 = vpop.f32.mrb[29].mxu1 }
 0x821   : > { %v24625_v55 = vpop.eup %24624  ;;  %v8993_v40 = vadd.f32 1.0, %v24623_v10  ;;  %24640 = vpow2.f32 %v18873_v0  ;;  %v18875_v41 = vmul.f32 -1.442695, %v28565_v1  ;;  %v23184_v42 = vadd.f32 %v8722_v46, %v31596_v20 }
 0x822   : > { %v8992_v26 = vadd.f32 1.0, %v24625_v55  ;;  %24642 = vpow2.f32 %v18876_v63  ;;  %v28572_v44 = vadd.f32 %v23183_v34, %v28507_v17 }
 0x823   : > { %24644 = vrcp.f32 %v8993_v40  ;;  %v28575_v6 = vadd.f32 %v23184_v42, %v28507_v17  ;;  %v22026_v54 = vpop.f32.mrb[30].mxu1 }
 0x824   : > { %v24627_v9 = vpop.eup %24626  ;;  %24646 = vrcp.f32 %v8992_v26  ;;  %v18878_v29 = vmul.f32 -1.442695, %v28572_v44  ;;  %v23185_v58 = vadd.f32 %v22026_v54, %v31597_v13  ;;  %v8732_v62 = vpop.f32.mrb[31].mxu1 }
 0x825   : > { %v24629_v28 = vpop.eup %24628  ;;  %v8995_v33 = vadd.f32 1.0, %v24627_v9  ;;  %24648 = vpow2.f32 %v18875_v41  ;;  %v18877_v3 = vmul.f32 -1.442695, %v28575_v6  ;;  %v23186_v19 = vadd.f32 %v8732_v62, %v31598_v7 }
 0x826   : > { %v24631_v12 = vpop.eup %24630  ;;  %v9085_v53 = vmul.f32 %v24629_v28, %v28512_v22  ;;  %24650 = vpow2.f32 %v18878_v29  ;;  %v28583_v27 = vadd.f32 %v23185_v58, %v28507_v17 }
 0x827   : > { %v24633_v21 = vpop.eup %24632  ;;  %v9084_v36 = vmul.f32 %v24631_v12, %v28515_v18  ;;  %24652 = vrcp.f32 %v8995_v33  ;;  %v28587_v47 = vadd.f32 %v23186_v19, %v28507_v17  ;;  %v22029_v37 = vpop.f32.mrb[0].mxu1 }
 0x828   : > { %v24635_v23 = vpop.eup %24634  ;;  %9474 = vst.msk [vmem:[#allocation3 + $0x21] sm:$0xff] %vm754_vm2, %v9085_v53  ;;  %v8994_v25 = vadd.f32 1.0, %v24633_v21  ;;  %24654 = vpow2.f32 %v18877_v3  ;;  %v18880_v38 = vmul.f32 -1.442695, %v28583_v27  ;;  %v28592_v22 = vadd.f32 %v22029_v37, %v28507_v17  ;;  %v8742_v31 = vpop.f32.mrb[1].mxu1 }
 0x829   : > { %v24637_v45 = vpop.eup %24636  ;;  %9473 = vst.msk [vmem:[#allocation3 + $0x19] sm:$0xff] %vm754_vm2, %v9084_v36  ;;  %v8997_v18 = vadd.f32 1.0, %v24635_v23  ;;  %v18879_v51 = vmul.f32 -1.442695, %v28587_v47  ;;  %v28597_v43 = vadd.f32 %v28507_v17, %v8742_v31  ;;  %22053 = vmatprep.mubr.msk.f32.mxu1 %vm754_vm2, %v9084_v36 }
 0x82a   : > { %v24639_v15 = vpop.eup %24638  ;;  %v9087_v52 = vmul.f32 %v24637_v45, %v28522_v4  ;;  %24656 = vrcp.f32 %v8994_v25  ;;  %22054 = vmatmul.mubr.msk.f32.vlgmr.msra.gmra.mrb[32].mxu1 %vm754_vm2, %v9085_v53  ;;  %v18882_v0 = vmul.f32 -1.442695, %v28592_v22 }
 0x82b   : > { %v24641_v35 = vpop.eup %24640  ;;  %v9086_v57 = vmul.f32 %v24639_v15, %v28525_v2  ;;  %24658 = vrcp.f32 %v8997_v18  ;;  %v22032_v60 = vpop.f32.mrb[2].mxu1  ;;  %v18881_v2 = vmul.f32 -1.442695, %v28597_v43 }
 0x82c   : > { %v24643_v61 = vpop.eup %24642  ;;  %9476 = vst.msk [vmem:[#allocation3 + $0x39] sm:$0xff] %vm754_vm2, %v9087_v52  ;;  %v8996_v49 = vadd.f32 1.0, %v24641_v35  ;;  %24660 = vpow2.f32 %v18880_v38  ;;  %v28606_v30 = vadd.f32 %v22032_v60, %v28507_v17  ;;  %v8752_v14 = vpop.f32.mrb[3].mxu1 }
 0x82d   : > { %v24645_v4 = vpop.eup %24644  ;;  %9475 = vst.msk [vmem:[#allocation3 + $0x31] sm:$0xff] %vm754_vm2, %v9086_v57  ;;  %v8999_v50 = vadd.f32 1.0, %v24643_v61  ;;  %24662 = vpow2.f32 %v18879_v51  ;;  %22056 = vmatprep.mubr.msk.f32.mxu1 %vm754_vm2, %v9086_v57  ;;  %v28613_v63 = vadd.f32 %v28507_v17, %v8752_v14 }
 0x82e   : > { %v24647_v56 = vpop.eup %24646  ;;  %v9089_v10 = vmul.f32 %v24645_v4, %v28532_v39  ;;  %24664 = vrcp.f32 %v8996_v49  ;;  %22057 = vmatmul.mubr.msk.f32.gmra.mrb[34].mxu1 %vm754_vm2, %v9087_v52  ;;  %v18884_v41 = vmul.f32 -1.442695, %v28606_v30 }
 0x82f   : > { %v24649_v11 = vpop.eup %24648  ;;  %v9088_v34 = vmul.f32 %v24647_v56, %v28535_v48  ;;  %24666 = vrcp.f32 %v8999_v50  ;;  %v22035_v46 = vpop.f32.mrb[4].mxu1  ;;  %v28631_v9 = vld [vmem:[#allocation3 + $0x21] sm:$0xff]  ;;  %v18883_v58 = vmul.f32 -1.442695, %v28613_v63 }
 0x830   : > { %v24651_v55 = vpop.eup %24650  ;;  %9478 = vst.msk [vmem:[#allocation3 + $0x51] sm:$0xff] %vm754_vm2, %v9089_v10  ;;  %v8998_v40 = vadd.f32 1.0, %v24649_v11  ;;  %24668 = vpow2.f32 %v18882_v0  ;;  %v28620_v39 = vadd.f32 %v22035_v46, %v28507_v17  ;;  %v8762_v20 = vpop.f32.mrb[5].mxu1  ;;  %v28622_v42 = vld [vmem:[#allocation3 + $0x19] sm:$0xff] }
 0x831   : > { %v24653_v26 = vpop.eup %24652  ;;  %9477 = vst.msk [vmem:[#allocation3 + $0x49] sm:$0xff] %vm754_vm2, %v9088_v34  ;;  %v9001_v54 = vadd.f32 1.0, %v24651_v55  ;;  %24670 = vpow2.f32 %v18881_v2  ;;  %v28626_v48 = vadd.f32 %v28507_v17, %v8762_v20  ;;  %22059 = vmatprep.mubr.msk.f32.mxu1 %vm754_vm2, %v9088_v34  ;;  %22106 = vmatprep.mubr.msk.f32.mxu0 %vm754_vm2, %v28622_v42 }
 0x832   : > { %v24655_v29 = vpop.eup %24654  ;;  %v9091_v13 = vmul.f32 %v24653_v26, %v28542_v16  ;;  %24672 = vrcp.f32 %v8998_v40  ;;  %22060 = vmatmul.mubr.msk.f32.gmra.mrb[36].mxu1 %vm754_vm2, %v9089_v10  ;;  %22107 = vmatmul.mubr.msk.f32.gmra.mrb[82].mxu0 %vm754_vm2, %v28631_v9  ;;  %v18886_v28 = vmul.f32 -1.442695, %v28620_v39 }
 0x833   : > { %24674 = vrcp.f32 %v9001_v54  ;;  %v9000_v62 = vadd.f32 1.0, %v24655_v29  ;;  %v22038_v33 = vpop.f32.mrb[6].mxu1  ;;  %v18885_v7 = vmul.f32 -1.442695, %v28626_v48  ;;  %v28652_v37 = vld [vmem:[#allocation3 + $0x39] sm:$0xff] }
 0x834   : > { %v24657_v3 = vpop.eup %24656  ;;  %9480 = vst.msk [vmem:[#allocation3 + $0x69] sm:$0xff] %vm754_vm2, %v9091_v13  ;;  %24676 = vpow2.f32 %v18884_v41  ;;  %v28642_v16 = vadd.f32 %v22038_v33, %v28507_v17  ;;  %v8772_v19 = vpop.f32.mrb[7].mxu1  ;;  %v28644_v12 = vld [vmem:[#allocation3 + $0x31] sm:$0xff] }
 0x835   : > { %v24659_v53 = vpop.eup %24658  ;;  %v9090_v21 = vmul.f32 %v24657_v3, %v28545_v24  ;;  %24678 = vrcp.f32 %v9000_v62  ;;  %v28648_v36 = vadd.f32 %v28507_v17, %v8772_v19  ;;  %22109 = vmatprep.mubr.msk.f32.mxu0 %vm754_vm2, %v28644_v12 }
 0x836   : > { %v24661_v23 = vpop.eup %24660  ;;  %v9093_v25 = vmul.f32 %v24659_v53, %v28552_v8  ;;  %24680 = vpow2.f32 %v18883_v58  ;;  %22110 = vmatmul.mubr.msk.f32.gmra.mrb[84].mxu0 %vm754_vm2, %v28652_v37  ;;  %v18888_v31 = vmul.f32 -1.442695, %v28642_v16 }
 0x837   : > { %v24663_v38 = vpop.eup %24662  ;;  %9479 = vst.msk [vmem:[#allocation3 + $0x61] sm:$0xff] %vm754_vm2, %v9090_v21  ;;  %v9003_v24 = vadd.f32 1.0, %v24661_v23  ;;  %24682 = vpow2.f32 %v18886_v28  ;;  %22062 = vmatprep.mubr.msk.f32.mxu1 %vm754_vm2, %v9090_v21  ;;  %v22041_v45 = vpop.f32.mrb[8].mxu1  ;;  %v18887_v8 = vmul.f32 -1.442695, %v28648_v36  ;;  %v28674_v49 = vld [vmem:[#allocation3 + $0x51] sm:$0xff] }
 0x838   : > { %v24665_v18 = vpop.eup %24664  ;;  %9482 = vst.msk [vmem:[#allocation3 + $0x81] sm:$0xff] %vm754_vm2, %v9093_v25  ;;  %v9002_v51 = vadd.f32 1.0, %v24663_v38  ;;  %24684 = vpow2.f32 %v18885_v7  ;;  %22063 = vmatmul.mubr.msk.f32.gmra.mrb[38].mxu1 %vm754_vm2, %v9091_v13  ;;  %v28664_v15 = vadd.f32 %v22041_v45, %v28507_v17  ;;  %v8782_v52 = vpop.f32.mrb[9].mxu1  ;;  %v28666_v35 = vld [vmem:[#allocation3 + $0x49] sm:$0xff] }
 0x839   : > { %v24667_v57 = vpop.eup %24666  ;;  %v9092_v60 = vmul.f32 %v24665_v18, %v28555_v32  ;;  %24686 = vrcp.f32 %v9003_v24  ;;  %v28670_v61 = vadd.f32 %v28507_v17, %v8782_v52  ;;  %22112 = vmatprep.mubr.msk.f32.mxu0 %vm754_vm2, %v28666_v35 }
 0x83a   : > { %v24669_v0 = vpop.eup %24668  ;;  %v9095_v14 = vmul.f32 %v24667_v57, %v28562_v59  ;;  %24688 = vrcp.f32 %v9002_v51  ;;  %22113 = vmatmul.mubr.msk.f32.gmra.mrb[86].mxu0 %vm754_vm2, %v28674_v49  ;;  %v18890_v50 = vmul.f32 -1.442695, %v28664_v15 }
 0x83b   : > { %v24671_v4 = vpop.eup %24670  ;;  %9481 = vst.msk [vmem:[#allocation3 + $0x79] sm:$0xff] %vm754_vm2, %v9092_v60  ;;  %v9005_v32 = vadd.f32 1.0, %v24669_v0  ;;  %24690 = vpow2.f32 %v18888_v31  ;;  %22065 = vmatprep.mubr.msk.f32.mxu1 %vm754_vm2, %v9092_v60  ;;  %v22044_v2 = vpop.f32.mrb[10].mxu1  ;;  %v18889_v59 = vmul.f32 -1.442695, %v28670_v61 }
 0x83c   : > { %v24673_v56 = vpop.eup %24672  ;;  %9484 = vst.msk [vmem:[#allocation3 + $0x99] sm:$0xff] %vm754_vm2, %v9095_v14  ;;  %v9004_v10 = vadd.f32 1.0, %v24671_v4  ;;  %24692 = vpow2.f32 %v18887_v8  ;;  %22066 = vmatmul.mubr.msk.f32.gmra.mrb[40].mxu1 %vm754_vm2, %v9093_v25  ;;  %v28686_v11 = vadd.f32 %v22044_v2, %v28507_v17  ;;  %v8792_v34 = vpop.f32.mrb[11].mxu1 }
 0x83d   : > { %v24675_v46 = vpop.eup %24674  ;;  %v9094_v55 = vmul.f32 %v24673_v56, %v28565_v1  ;;  %24694 = vrcp.f32 %v9005_v32  ;;  %v28692_v26 = vadd.f32 %v28507_v17, %v8792_v34  ;;  %v28700_v1 = vld [vmem:[#allocation3 + $0x69] sm:$0xff] }
 0x83e   : > { %v24677_v40 = vpop.eup %24676  ;;  %v9097_v41 = vmul.f32 %v24675_v46, %v28572_v44  ;;  %24696 = vrcp.f32 %v9004_v10  ;;  %v18892_v20 = vmul.f32 -1.442695, %v28686_v11  ;;  %v28694_v54 = vld [vmem:[#allocation3 + $0x61] sm:$0xff] }
 0x83f   : > { %v24679_v29 = vpop.eup %24678  ;;  %9483 = vst.msk [vmem:[#allocation3 + $0x91] sm:$0xff] %vm754_vm2, %v9094_v55  ;;  %v9007_v13 = vadd.f32 1.0, %v24677_v40  ;;  %24698 = vpow2.f32 %v18890_v50  ;;  %22068 = vmatprep.mubr.msk.f32.mxu1 %vm754_vm2, %v9094_v55  ;;  %22115 = vmatprep.mubr.msk.f32.mxu0 %vm754_vm2, %v28694_v54  ;;  %v22047_v44 = vpop.f32.mrb[12].mxu1  ;;  %v28721_v31 = vld [vmem:[#allocation3 + $0x81] sm:$0xff] }
 0x840   : > { %v24681_v58 = vpop.eup %24680  ;;  %9486 = vst.msk [vmem:[#allocation3 + $0xb1] sm:$0xff] %vm754_vm2, %v9097_v41  ;;  %v9096_v62 = vmul.f32 %v24679_v29, %v28575_v6  ;;  %24700 = vpow2.f32 %v18889_v59  ;;  %22069 = vmatmul.mubr.msk.f32.gmra.mrb[42].mxu1 %vm754_vm2, %v9095_v14  ;;  %22116 = vmatmul.mubr.msk.f32.gmra.mrb[88].mxu0 %vm754_vm2, %v28700_v1  ;;  %v28708_v28 = vadd.f32 %v22047_v44, %v28507_v17  ;;  %v8802_v33 = vpop.f32.mrb[13].mxu1  ;;  %v18891_v6 = vmul.f32 -1.442695, %v28692_v26 }
 0x841   : > { %v24683_v3 = vpop.eup %24682  ;;  %24702 = vrcp.f32 %v9007_v13  ;;  %v9006_v7 = vadd.f32 1.0, %v24681_v58  ;;  %v28713_v21 = vadd.f32 %v28507_v17, %v8802_v33 }
 0x842   : > { %v24685_v19 = vpop.eup %24684  ;;  %9485 = vst.msk [vmem:[#allocation3 + $0xa9] sm:$0xff] %vm754_vm2, %v9096_v62  ;;  %v9009_v53 = vadd.f32 1.0, %v24683_v3  ;;  %24704 = vpow2.f32 %v18892_v20  ;;  %22071 = vmatprep.mubr.msk.f32.mxu1 %vm754_vm2, %v9096_v62  ;;  %v28716_v23 = vld [vmem:[#allocation3 + $0x79] sm:$0xff]  ;;  %v18894_v24 = vmul.f32 -1.442695, %v28708_v28 }
 0x843   : > { %v24687_v25 = vpop.eup %24686  ;;  %24706 = vrcp.f32 %v9006_v7  ;;  %v9008_v38 = vadd.f32 1.0, %v24685_v19  ;;  %22118 = vmatprep.mubr.msk.f32.mxu0 %vm754_vm2, %v28716_v23  ;;  %v22050_v45 = vpop.f32.mrb[14].mxu1  ;;  %v18893_v4 = vmul.f32 -1.442695, %v28713_v21 }
 0x844   : > { %v24689_v18 = vpop.eup %24688  ;;  %v9099_v51 = vmul.f32 %v24687_v25, %v28583_v27  ;;  %24708 = vrcp.f32 %v9009_v53  ;;  %22072 = vmatmul.mubr.msk.f32.gmra.mrb[44].mxu1 %vm754_vm2, %v9097_v41  ;;  %22119 = vmatmul.mubr.msk.f32.gmra.mrb[90].mxu0 %vm754_vm2, %v28721_v31  ;;  %v28728_v8 = vadd.f32 %v22050_v45, %v28507_v17  ;;  %v8812_v52 = vpop.f32.mrb[15].mxu1 }
 0x845   : > { %v24691_v57 = vpop.eup %24690  ;;  %v9098_v60 = vmul.f32 %v24689_v18, %v28587_v47  ;;  %24710 = vrcp.f32 %v9008_v38  ;;  %v28732_v0 = vadd.f32 %v28507_v17, %v8812_v52  ;;  %v28743_v17 = vld [vmem:[#allocation3 + $0x99] sm:$0xff] }
 0x846   : > { %v24693_v14 = vpop.eup %24692  ;;  %9488 = vst.msk [vmem:[#allocation3 + $0xc9] sm:$0xff] %vm754_vm2, %v9099_v51  ;;  %v9011_v27 = vadd.f32 1.0, %v24691_v57  ;;  %24712 = vpow2.f32 %v18891_v6  ;;  %v28736_v32 = vld [vmem:[#allocation3 + $0x91] sm:$0xff]  ;;  %v18896_v47 = vmul.f32 -1.442695, %v28728_v8 }
 0x847   : > { %v24695_v50 = vpop.eup %24694  ;;  %9487 = vst.msk [vmem:[#allocation3 + $0xc1] sm:$0xff] %vm754_vm2, %v9098_v60  ;;  %v9010_v2 = vadd.f32 1.0, %v24693_v14  ;;  %24714 = vpow2.f32 %v18894_v24  ;;  %22074 = vmatprep.mubr.msk.f32.mxu1 %vm754_vm2, %v9098_v60  ;;  %22121 = vmatprep.mubr.msk.f32.mxu0 %vm754_vm2, %v28736_v32  ;;  %v18895_v41 = vmul.f32 -1.442695, %v28732_v0 }
 0x848   : > { %v24697_v56 = vpop.eup %24696  ;;  %v9101_v10 = vmul.f32 %v24695_v50, %v28592_v22  ;;  %24716 = vrcp.f32 %v9011_v27  ;;  %22075 = vmatmul.mubr.msk.f32.gmra.mrb[46].mxu1 %vm754_vm2, %v9099_v51  ;;  %22122 = vmatmul.mubr.msk.f32.gmra.mrb[92].mxu0 %vm754_vm2, %v28743_v17 }
 0x849   : > { %v24699_v59 = vpop.eup %24698  ;;  %v9100_v34 = vmul.f32 %v24697_v56, %v28597_v43  ;;  %24718 = vrcp.f32 %v9010_v2  ;;  %v28750_v46 = vld [vmem:[#allocation3 + $0xa9] sm:$0xff]  ;;  %v28758_v43 = vld [vmem:[#allocation3 + $0xb1] sm:$0xff] }
 0x84a   : > { %v24701_v55 = vpop.eup %24700  ;;  %9490 = vst.msk [vmem:[#allocation3 + $0xe1] sm:$0xff] %vm754_vm2, %v9101_v10  ;;  %v9013_v40 = vadd.f32 1.0, %v24699_v59  ;;  %24720 = vpow2.f32 %v18893_v4  ;;  %22124 = vmatprep.mubr.msk.f32.mxu0 %vm754_vm2, %v28750_v46 }
 0x84b   : > { %v24703_v22 = vpop.eup %24702  ;;  %9489 = vst.msk [vmem:[#allocation3 + $0xd9] sm:$0xff] %vm754_vm2, %v9100_v34  ;;  %v9012_v20 = vadd.f32 1.0, %v24701_v55  ;;  %24722 = vpow2.f32 %v18896_v47  ;;  %22077 = vmatprep.mubr.msk.f32.mxu1 %vm754_vm2, %v9100_v34 }
 0x84c   : > { %v24705_v29 = vpop.eup %24704  ;;  %v9103_v13 = vmul.f32 %v24703_v22, %v28606_v30  ;;  %24724 = vrcp.f32 %v9013_v40  ;;  %22078 = vmatmul.mubr.msk.f32.gmra.mrb[48].mxu1 %vm754_vm2, %v9101_v10  ;;  %22125 = vmatmul.mubr.msk.f32.gmra.mrb[94].mxu0 %vm754_vm2, %v28758_v43 }
 0x84d   : > { %v24707_v44 = vpop.eup %24706  ;;  %24726 = vrcp.f32 %v9012_v20  ;;  %v9015_v58 = vadd.f32 1.0, %v24705_v29  ;;  %v28771_v19 = vld [vmem:[#allocation3 + $0xc9] sm:$0xff] }
 0x84e   : > { %v24709_v62 = vpop.eup %24708  ;;  %9492 = vst.msk [vmem:[#allocation3 + $0xf9] sm:$0xff] %vm754_vm2, %v9103_v13  ;;  %v9102_v33 = vmul.f32 %v24707_v44, %v28613_v63  ;;  %24728 = vpow2.f32 %v18895_v41  ;;  %v28766_v3 = vld [vmem:[#allocation3 + $0xc1] sm:$0xff] }
 0x84f   : > { %v24711_v7 = vpop.eup %24710  ;;  %v9105_v30 = vmul.f32 %v24709_v62, %v28620_v39  ;;  %24730 = vrcp.f32 %v9015_v58  ;;  %22127 = vmatprep.mubr.msk.f32.mxu0 %vm754_vm2, %v28766_v3 }
 0x850   : > { %v24713_v53 = vpop.eup %24712  ;;  %9491 = vst.msk [vmem:[#allocation3 + $0xf1] sm:$0xff] %vm754_vm2, %v9102_v33  ;;  %v9104_v6 = vmul.f32 %v24711_v7, %v28626_v48  ;;  %22080 = vmatprep.mubr.msk.f32.mxu1 %vm754_vm2, %v9102_v33  ;;  %22128 = vmatmul.mubr.msk.f32.gmra.mrb[96].mxu0 %vm754_vm2, %v28771_v19  ;;  %v9505_v7 = vld [vmem:[#allocation3] sm:$0xff] }
 0x851   : > { %v24715_v63 = vpop.eup %24714  ;;  %9494 = vst.msk [vmem:[#allocation3 + $0x111] sm:$0xff] %vm754_vm2, %v9105_v30  ;;  %v9014_v39 = vadd.f32 1.0, %v24713_v53  ;;  %22081 = vmatmul.mubr.msk.f32.gmra.mrb[50].mxu1 %vm754_vm2, %v9103_v13  ;;  %v28787_v18 = vld [vmem:[#allocation3 + $0xe1] sm:$0xff]  ;;  %v28870_v53 = vld [vmem:[#allocation13 + $0xc] sm:$0xf] }
 0x852   : > { %v24717_v25 = vpop.eup %24716  ;;  %9493 = vst.msk [vmem:[#allocation3 + $0x109] sm:$0xff] %vm754_vm2, %v9104_v6  ;;  %v9017_v38 = vadd.f32 1.0, %v24715_v63  ;;  %22083 = vmatprep.mubr.msk.f32.mxu1 %vm754_vm2, %v9104_v6  ;;  %v28782_v24 = vld [vmem:[#allocation3 + $0xd9] sm:$0xff] }
 0x853   : > { %v24719_v48 = vpop.eup %24718  ;;  %v9107_v45 = vmul.f32 %v24717_v25, %v28642_v16  ;;  %24732 = vrcp.f32 %v9014_v39  ;;  %22130 = vmatprep.mubr.msk.f32.mxu0 %vm754_vm2, %v28782_v24  ;;  %v28873_v6 = vld [vmem:[#allocation3 + $0x18] sm:$0xff]  ;;  %v28881_v63 = vld [vmem:[#allocation3 + $0x20] sm:$0xff]  ;;  %v28885_v39 = vld [vmem:[#allocation3 + $0x30] sm:$0xff] }
 0x854   : > { %v24721_v51 = vpop.eup %24720  ;;  %v9106_v52 = vmul.f32 %v24719_v48, %v28648_v36  ;;  %24734 = vrcp.f32 %v9017_v38  ;;  %22131 = vmatmul.mubr.msk.f32.gmra.mrb[98].mxu0 %vm754_vm2, %v28787_v18  ;;  %v28889_v25 = vld [vmem:[#allocation3 + $0x38] sm:$0xff]  ;;  %v28897_v38 = vld [vmem:[#allocation3 + $0x50] sm:$0xff]  ;;  %v28901_v48 = vld [vmem:[#allocation3 + $0x60] sm:$0xff] }
 0x855   : > { %v24723_v57 = vpop.eup %24722  ;;  %9496 = vst.msk [vmem:[#allocation3 + $0x129] sm:$0xff] %vm754_vm2, %v9107_v45  ;;  %v9016_v60 = vadd.f32 1.0, %v24721_v51  ;;  %22084 = vmatmul.mubr.msk.f32.gmra.mrb[52].mxu1 %vm754_vm2, %v9105_v30  ;;  %v28802_v47 = vld [vmem:[#allocation3 + $0xf9] sm:$0xff]  ;;  %v9506_v30 = vld [vmem:[#allocation3 + $0x8] sm:$0xff] }
 0x856   : > { %v24725_v16 = vpop.eup %24724  ;;  %9495 = vst.msk [vmem:[#allocation3 + $0x121] sm:$0xff] %vm754_vm2, %v9106_v52  ;;  %v9019_v14 = vadd.f32 1.0, %v24723_v57  ;;  %22086 = vmatprep.mubr.msk.f32.mxu1 %vm754_vm2, %v9106_v52  ;;  %v28909_v51 = vld [vmem:[#allocation3 + $0x78] sm:$0xff]  ;;  %v28913_v52 = vld [vmem:[#allocation3 + $0x80] sm:$0xff]  ;;  %v28917_v57 = vld [vmem:[#allocation3 + $0x90] sm:$0xff] }
 0x857   : > { %v24727_v27 = vpop.eup %24726  ;;  %v9109_v4 = vmul.f32 %v24725_v16, %v28664_v15  ;;  %24736 = vrcp.f32 %v9016_v60  ;;  %v28797_v36 = vld [vmem:[#allocation3 + $0xf1] sm:$0xff]  ;;  %v28925_v16 = vld [vmem:[#allocation3 + $0xa8] sm:$0xff] }
 0x858   : > { %v24729_v50 = vpop.eup %24728  ;;  %v9108_v2 = vmul.f32 %v24727_v27, %v28670_v61  ;;  %24738 = vrcp.f32 %v9019_v14  ;;  %22133 = vmatprep.mubr.msk.f32.mxu0 %vm754_vm2, %v28797_v36  ;;  %v28816_v59 = vld [vmem:[#allocation3 + $0x111] sm:$0xff]  ;;  %v28933_v27 = vld [vmem:[#allocation3 + $0xc0] sm:$0xff] }
 0x859   : > { %v24731_v56 = vpop.eup %24730  ;;  %9498 = vst.msk [vmem:[#allocation3 + $0x141] sm:$0xff] %vm754_vm2, %v9109_v4  ;;  %v9018_v10 = vadd.f32 1.0, %v24729_v50  ;;  %22087 = vmatmul.mubr.msk.f32.gmra.mrb[54].mxu1 %vm754_vm2, %v9107_v45  ;;  %22134 = vmatmul.mubr.msk.f32.gmra.mrb[100].mxu0 %vm754_vm2, %v28802_v47  ;;  %v28808_v15 = vld [vmem:[#allocation3 + $0x109] sm:$0xff]  ;;  %v28921_v60 = vld [vmem:[#allocation3 + $0x98] sm:$0xff] }
 0x85a   : > { %9497 = vst.msk [vmem:[#allocation3 + $0x139] sm:$0xff] %vm754_vm2, %v9108_v2  ;;  %v9111_v61 = vmul.f32 %v24731_v56, %v28686_v11  ;;  %22089 = vmatprep.mubr.msk.f32.mxu1 %vm754_vm2, %v9108_v2  ;;  %22136 = vmatprep.mubr.msk.f32.mxu0 %vm754_vm2, %v28808_v15  ;;  %v28905_v45 = vld [vmem:[#allocation3 + $0x68] sm:$0xff]  ;;  %v28929_v14 = vld [vmem:[#allocation3 + $0xb0] sm:$0xff]  ;;  %v28941_v50 = vld [vmem:[#allocation3 + $0xd8] sm:$0xff] }
 0x85b   : > { %24740 = vrcp.f32 %v9018_v10  ;;  %v28945_v2 = vld [vmem:[#allocation3 + $0xe0] sm:$0xff]  ;;  %v28949_v56 = vld [vmem:[#allocation3 + $0xf0] sm:$0xff]  ;;  %v28953_v10 = vld [vmem:[#allocation3 + $0xf8] sm:$0xff] }
 0x85c   : > { %9500 = vst.msk [vmem:[#allocation3 + $0x159] sm:$0xff] %vm754_vm2, %v9111_v61  ;;  %v28829_v22 = vld [vmem:[#allocation3 + $0x129] sm:$0xff] }
 0x85d   : > { %v24733_v34 = vpop.eup %24732  ;;  %22090 = vmatmul.mubr.msk.f32.gmra.mrb[56].mxu1 %vm754_vm2, %v9109_v4  ;;  %22137 = vmatmul.mubr.msk.f32.gmra.mrb[102].mxu0 %vm754_vm2, %v28816_v59  ;;  %v28821_v55 = vld [vmem:[#allocation3 + $0x121] sm:$0xff] }
 0x85e   : > { %v24735_v40 = vpop.eup %24734  ;;  %v9110_v11 = vmul.f32 %v24733_v34, %v28692_v26  ;;  %22139 = vmatprep.mubr.msk.f32.mxu0 %vm754_vm2, %v28821_v55  ;;  %v28937_v4 = vld [vmem:[#allocation3 + $0xc8] sm:$0xff]  ;;  %v28961_v34 = vld [vmem:[#allocation3 + $0x110] sm:$0xff] }
 0x85f   : > { %v9113_v41 = vmul.f32 %v24735_v40, %v28708_v28  ;;  %v28965_v40 = vld [vmem:[#allocation3 + $0x120] sm:$0xff] }
 0x860   : > { %9499 = vst.msk [vmem:[#allocation3 + $0x151] sm:$0xff] %vm754_vm2, %v9110_v11  ;;  %22092 = vmatprep.mubr.msk.f32.mxu1 %vm754_vm2, %v9110_v11  ;;  %v28843_v44 = vld [vmem:[#allocation3 + $0x141] sm:$0xff] }
 0x861   : > { %v24737_v20 = vpop.eup %24736  ;;  %9502 = vst.msk [vmem:[#allocation3 + $0x171] sm:$0xff] %vm754_vm2, %v9113_v41  ;;  %22093 = vmatmul.mubr.msk.f32.gmra.mrb[58].mxu1 %vm754_vm2, %v9111_v61  ;;  %22140 = vmatmul.mubr.msk.f32.gmra.mrb[104].mxu0 %vm754_vm2, %v28829_v22  ;;  %v28835_v26 = vld [vmem:[#allocation3 + $0x139] sm:$0xff]  ;;  %v28957_v61 = vld [vmem:[#allocation3 + $0x108] sm:$0xff] }
 0x862   : > { %v24739_v29 = vpop.eup %24738  ;;  %v9112_v13 = vmul.f32 %v24737_v20, %v28713_v21  ;;  %22142 = vmatprep.mubr.msk.f32.mxu0 %vm754_vm2, %v28835_v26  ;;  %v28969_v11 = vld [vmem:[#allocation3 + $0x128] sm:$0xff]  ;;  %v28977_v20 = vld [vmem:[#allocation3 + $0x140] sm:$0xff] }
 0x863   : > { %v9115_v28 = vmul.f32 %v24739_v29, %v28728_v8  ;;  %v28856_v8 = vld [vmem:[#allocation3 + $0x159] sm:$0xff] }
 0x864   : > { %9501 = vst.msk [vmem:[#allocation3 + $0x169] sm:$0xff] %vm754_vm2, %v9112_v13  ;;  %22095 = vmatprep.mubr.msk.f32.mxu1 %vm754_vm2, %v9112_v13 }
 0x865   : > { %v24741_v58 = vpop.eup %24740  ;;  %9504 = vst.msk [vmem:[#allocation3 + $0x189] sm:$0xff] %vm754_vm2, %v9115_v28  ;;  %22096 = vmatmul.mubr.msk.f32.gmra.mrb[60].mxu1 %vm754_vm2, %v9113_v41  ;;  %22143 = vmatmul.mubr.msk.f32.gmra.mrb[106].mxu0 %vm754_vm2, %v28843_v44  ;;  %v28973_v41 = vld [vmem:[#allocation3 + $0x138] sm:$0xff] }
 0x866   : > { %v9114_v21 = vmul.f32 %v24741_v58, %v28732_v0  ;;  %v10220_v58 = vld [vmem:[#allocation3 + $0x2] sm:$0xff] }
 0x867   : > { %v28850_v62 = vld [vmem:[#allocation3 + $0x151] sm:$0xff] }
 0x868   : > { %9503 = vst.msk [vmem:[#allocation3 + $0x181] sm:$0xff] %vm754_vm2, %v9114_v21  ;;  %22098 = vmatprep.mubr.msk.f32.mxu1 %vm754_vm2, %v9114_v21  ;;  %22145 = vmatprep.mubr.msk.f32.mxu0 %vm754_vm2, %v28850_v62  ;;  %v28865_v0 = vld [vmem:[#allocation3 + $0x171] sm:$0xff] }
 0x869   : > { %22099 = vmatmul.mubr.msk.f32.gmra.mrb[62].mxu1 %vm754_vm2, %v9115_v28  ;;  %22146 = vmatmul.mubr.msk.f32.gmra.mrb[108].mxu0 %vm754_vm2, %v28856_v8  ;;  %31600 = vst [vmem:[#allocation74_spill] sm:$0xff] %v28865_v0  ;;  %v28981_v29 = vld [vmem:[#allocation3 + $0x150] sm:$0xff]  ;;  %v28985_v13 = vld [vmem:[#allocation3 + $0x158] sm:$0xff] }
 0x86b   : > { %v28861_v33 = vld [vmem:[#allocation3 + $0x169] sm:$0xff] }
 0x86c   : > { %31599 = vst [vmem:[#allocation72_spill] sm:$0xff] %v28861_v33  ;;  %22148 = vmatprep.mubr.msk.f32.mxu0 %vm754_vm2, %v28861_v33  ;;  %v28989_v28 = vld [vmem:[#allocation3 + $0x168] sm:$0xff]  ;;  %v28993_v21 = vld [vmem:[#allocation3 + $0x170] sm:$0xff] }
 0x86d   : > { %22149 = vmatmul.mubr.msk.f32.gmra.mrb[110].mxu0 %vm754_vm2, %v28865_v0  ;;  %v29001_v0 = vld [vmem:[#allocation3 + $0x1a] sm:$0xff]  ;;  %v29009_v33 = vld [vmem:[#allocation3 + $0x22] sm:$0xff] }
 0x86e   : > { %22153 = vmatprep.mubr.msk.f32.mxu0 %vm754_vm2, %v9505_v7  ;;  %v10221_v7 = vld [vmem:[#allocation3 + $0xa] sm:$0xff]  ;;  %31601 = vst [vmem:[#allocation43_spill] sm:$0xff] %v29001_v0  ;;  %31602 = vst [vmem:[#allocation44_spill] sm:$0xff] %v29009_v33 }
 0x871   : > { %22154 = vmatmul.mubr.msk.f32.vlgmr.msra.gmra.mrb[80].mxu0 %vm754_vm2, %v9506_v30  ;;  %v28998_v30 = vld [vmem:[#allocation13 + $0x10] sm:$0xf] }
 0x872   : > { %22202 = vmatpush3.msk.msra.mxu0 %vm5113_vm5, %v28503_v5  ;;  %22156 = vmatprep.mubr.msk.f32.mxu0 %vm754_vm2, %v28873_v6  ;;  %v28893_v5 = vld [vmem:[#allocation3 + $0x48] sm:$0xff] }
 0x873   : > { %22251 = vmatprep.subr.msk.mxu0 %vm5113_vm5, %v28870_v53 }
 0x875   : > { %22157 = vmatmul.mubr.msk.f32.gmra.mrb[82].mxu0 %vm754_vm2, %v28881_v63 }
 0x876   : > { %22159 = vmatprep.mubr.msk.f32.mxu0 %vm754_vm2, %v28885_v39 }
 0x879   : > { %22160 = vmatmul.mubr.msk.f32.gmra.mrb[84].mxu0 %vm754_vm2, %v28889_v25 }
 0x87a   : > { %22162 = vmatprep.mubr.msk.f32.mxu0 %vm754_vm2, %v28893_v5 }
 0x87d   : > { %22163 = vmatmul.mubr.msk.f32.gmra.mrb[86].mxu0 %vm754_vm2, %v28897_v38 }
 0x87e   : > { %22165 = vmatprep.mubr.msk.f32.mxu0 %vm754_vm2, %v28901_v48 }
 0x881   : > { %22166 = vmatmul.mubr.msk.f32.gmra.mrb[88].mxu0 %vm754_vm2, %v28905_v45 }
 0x882   : > { %22168 = vmatprep.mubr.msk.f32.mxu0 %vm754_vm2, %v28909_v51 }
 0x885   : > { %22169 = vmatmul.mubr.msk.f32.gmra.mrb[90].mxu0 %vm754_vm2, %v28913_v52 }
 0x886   : > { %22171 = vmatprep.mubr.msk.f32.mxu0 %vm754_vm2, %v28917_v57 }
 0x889   : > { %22172 = vmatmul.mubr.msk.f32.gmra.mrb[92].mxu0 %vm754_vm2, %v28921_v60 }
 0x88a   : > { %22174 = vmatprep.mubr.msk.f32.mxu0 %vm754_vm2, %v28925_v16 }
 0x88d   : > { %22175 = vmatmul.mubr.msk.f32.gmra.mrb[94].mxu0 %vm754_vm2, %v28929_v14 }
 0x88e   : > { %22177 = vmatprep.mubr.msk.f32.mxu0 %vm754_vm2, %v28933_v27 }
 0x891   : > { %22178 = vmatmul.mubr.msk.f32.gmra.mrb[96].mxu0 %vm754_vm2, %v28937_v4 }
 0x892   : > { %22180 = vmatprep.mubr.msk.f32.mxu0 %vm754_vm2, %v28941_v50 }
 0x895   : > { %22181 = vmatmul.mubr.msk.f32.gmra.mrb[98].mxu0 %vm754_vm2, %v28945_v2 }
 0x896   : > { %22183 = vmatprep.mubr.msk.f32.mxu0 %vm754_vm2, %v28949_v56 }
 0x899   : > { %22184 = vmatmul.mubr.msk.f32.gmra.mrb[100].mxu0 %vm754_vm2, %v28953_v10 }
 0x89a   : > { %22186 = vmatprep.mubr.msk.f32.mxu0 %vm754_vm2, %v28957_v61 }
 0x89d   : > { %22187 = vmatmul.mubr.msk.f32.gmra.mrb[102].mxu0 %vm754_vm2, %v28961_v34 }
 0x89e   : > { %22189 = vmatprep.mubr.msk.f32.mxu0 %vm754_vm2, %v28965_v40 }
 0x8a1   : > { %22190 = vmatmul.mubr.msk.f32.gmra.mrb[104].mxu0 %vm754_vm2, %v28969_v11 }
 0x8a2   : > { %22192 = vmatprep.mubr.msk.f32.mxu0 %vm754_vm2, %v28973_v41 }
 0x8a5   : > { %22193 = vmatmul.mubr.msk.f32.gmra.mrb[106].mxu0 %vm754_vm2, %v28977_v20 }
 0x8a6   : > { %22195 = vmatprep.mubr.msk.f32.mxu0 %vm754_vm2, %v28981_v29 }
 0x8a9   : > { %22196 = vmatmul.mubr.msk.f32.gmra.mrb[108].mxu0 %vm754_vm2, %v28985_v13 }
 0x8aa   : > { %22198 = vmatprep.mubr.msk.f32.mxu0 %vm754_vm2, %v28989_v28 }
 0x8ad   : > { %22199 = vmatmul.mubr.msk.f32.gmra.mrb[110].mxu0 %vm754_vm2, %v28993_v21 }
 0x8ae   : > { %22203 = vmatprep.mubr.msk.f32.mxu0 %vm754_vm2, %v10220_v58  ;;  %v29013_v58 = vld [vmem:[#allocation3 + $0x32] sm:$0xff] }
 0x8af   : > { %31603 = vst [vmem:[#allocation45_spill] sm:$0xff] %v29013_v58 }
 0x8b1   : > { %22204 = vmatmul.mubr.msk.f32.vlgmr.msra.gmra.mrb[80].mxu0 %vm754_vm2, %v10221_v7  ;;  %v29017_v7 = vld [vmem:[#allocation3 + $0x3a] sm:$0xff] }
 0x8b2   : > { %22252 = vmatpush3.msk.msra.mxu0 %vm5113_vm5, %v28870_v53  ;;  %22206 = vmatprep.mubr.msk.f32.mxu0 %vm754_vm2, %v29001_v0  ;;  %31604 = vst [vmem:[#allocation46_spill] sm:$0xff] %v29017_v7  ;;  %v29021_v53 = vld [vmem:[#allocation3 + $0x4a] sm:$0xff]  ;;  %v29025_v0 = vld [vmem:[#allocation3 + $0x52] sm:$0xff] }
 0x8b3   : > { %22301 = vmatprep.subr.msk.mxu0 %vm5113_vm5, %v28998_v30  ;;  %31605 = vst [vmem:[#allocation47_spill] sm:$0xff] %v29021_v53  ;;  %31606 = vst [vmem:[#allocation48_spill] sm:$0xff] %v29025_v0 }
 0x8b5   : > { %22207 = vmatmul.mubr.msk.f32.gmra.mrb[82].mxu0 %vm754_vm2, %v29009_v33  ;;  %v29029_v33 = vld [vmem:[#allocation3 + $0x62] sm:$0xff] }
 0x8b6   : > { %22209 = vmatprep.mubr.msk.f32.mxu0 %vm754_vm2, %v29013_v58  ;;  %31607 = vst [vmem:[#allocation76_spill] sm:$0xff] %v29029_v33  ;;  %v29033_v58 = vld [vmem:[#allocation3 + $0x6a] sm:$0xff] }
 0x8b7   : > { %31608 = vst [vmem:[#allocation77_spill] sm:$0xff] %v29033_v58 }
 0x8b9   : > { %22210 = vmatmul.mubr.msk.f32.gmra.mrb[84].mxu0 %vm754_vm2, %v29017_v7  ;;  %v29037_v7 = vld [vmem:[#allocation3 + $0x7a] sm:$0xff] }
 0x8ba   : > { %22212 = vmatprep.mubr.msk.f32.mxu0 %vm754_vm2, %v29021_v53  ;;  %31609 = vst [vmem:[#allocation51_spill] sm:$0xff] %v29037_v7  ;;  %v29041_v53 = vld [vmem:[#allocation3 + $0x82] sm:$0xff] }
 0x8bb   : > { %31610 = vst [vmem:[#allocation52_spill] sm:$0xff] %v29041_v53 }
 0x8bd   : > { %22213 = vmatmul.mubr.msk.f32.gmra.mrb[86].mxu0 %vm754_vm2, %v29025_v0  ;;  %v29045_v0 = vld [vmem:[#allocation3 + $0x92] sm:$0xff] }
 0x8be   : > { %22215 = vmatprep.mubr.msk.f32.mxu0 %vm754_vm2, %v29029_v33  ;;  %31611 = vst [vmem:[#allocation53_spill] sm:$0xff] %v29045_v0  ;;  %v29049_v33 = vld [vmem:[#allocation3 + $0x9a] sm:$0xff] }
 0x8bf   : > { %31612 = vst [vmem:[#allocation59_spill] sm:$0xff] %v29049_v33 }
 0x8c1   : > { %22216 = vmatmul.mubr.msk.f32.gmra.mrb[88].mxu0 %vm754_vm2, %v29033_v58  ;;  %v29053_v58 = vld [vmem:[#allocation3 + $0xaa] sm:$0xff] }
 0x8c2   : > { %22218 = vmatprep.mubr.msk.f32.mxu0 %vm754_vm2, %v29037_v7  ;;  %31613 = vst [vmem:[#allocation60_spill] sm:$0xff] %v29053_v58  ;;  %v29057_v7 = vld [vmem:[#allocation3 + $0xb2] sm:$0xff] }
 0x8c3   : > { %31614 = vst [vmem:[#allocation61_spill] sm:$0xff] %v29057_v7 }
 0x8c5   : > { %22219 = vmatmul.mubr.msk.f32.gmra.mrb[90].mxu0 %vm754_vm2, %v29041_v53  ;;  %v29061_v53 = vld [vmem:[#allocation3 + $0xc2] sm:$0xff] }
 0x8c6   : > { %22221 = vmatprep.mubr.msk.f32.mxu0 %vm754_vm2, %v29045_v0  ;;  %31615 = vst [vmem:[#allocation62_spill] sm:$0xff] %v29061_v53  ;;  %v29065_v0 = vld [vmem:[#allocation3 + $0xca] sm:$0xff] }
 0x8c7   : > { %31616 = vst [vmem:[#allocation64_spill] sm:$0xff] %v29065_v0 }
 0x8c9   : > { %22222 = vmatmul.mubr.msk.f32.gmra.mrb[92].mxu0 %vm754_vm2, %v29049_v33  ;;  %v29069_v33 = vld [vmem:[#allocation3 + $0xda] sm:$0xff] }
 0x8ca   : > { %22224 = vmatprep.mubr.msk.f32.mxu0 %vm754_vm2, %v29053_v58  ;;  %31617 = vst [vmem:[#allocation66_spill] sm:$0xff] %v29069_v33  ;;  %v29073_v58 = vld [vmem:[#allocation3 + $0xe2] sm:$0xff] }
 0x8cb   : > { %31618 = vst [vmem:[#allocation67_spill] sm:$0xff] %v29073_v58 }
 0x8cd   : > { %22225 = vmatmul.mubr.msk.f32.gmra.mrb[94].mxu0 %vm754_vm2, %v29057_v7  ;;  %v29077_v7 = vld [vmem:[#allocation3 + $0xf2] sm:$0xff] }
 0x8ce   : > { %22227 = vmatprep.mubr.msk.f32.mxu0 %vm754_vm2, %v29061_v53  ;;  %31619 = vst [vmem:[#allocation68_spill] sm:$0xff] %v29077_v7  ;;  %v29081_v53 = vld [vmem:[#allocation3 + $0xfa] sm:$0xff] }
 0x8cf   : > { %31620 = vst [vmem:[#allocation69_spill] sm:$0xff] %v29081_v53 }
 0x8d1   : > { %22228 = vmatmul.mubr.msk.f32.gmra.mrb[96].mxu0 %vm754_vm2, %v29065_v0  ;;  %v29085_v0 = vld [vmem:[#allocation3 + $0x10a] sm:$0xff] }
 0x8d2   : > { %22230 = vmatprep.mubr.msk.f32.mxu0 %vm754_vm2, %v29069_v33  ;;  %31621 = vst [vmem:[#allocation70_spill] sm:$0xff] %v29085_v0  ;;  %v29089_v33 = vld [vmem:[#allocation3 + $0x112] sm:$0xff] }
 0x8d3   : > { %31622 = vst [vmem:[#allocation54_spill] sm:$0xff] %v29089_v33 }
 0x8d5   : > { %22231 = vmatmul.mubr.msk.f32.gmra.mrb[98].mxu0 %vm754_vm2, %v29073_v58  ;;  %v29093_v58 = vld [vmem:[#allocation3 + $0x122] sm:$0xff] }
 0x8d6   : > { %22233 = vmatprep.mubr.msk.f32.mxu0 %vm754_vm2, %v29077_v7  ;;  %31623 = vst [vmem:[#allocation55_spill] sm:$0xff] %v29093_v58  ;;  %v29097_v7 = vld [vmem:[#allocation3 + $0x12a] sm:$0xff] }
 0x8d7   : > { %31624 = vst [vmem:[#allocation56_spill] sm:$0xff] %v29097_v7 }
 0x8d9   : > { %22234 = vmatmul.mubr.msk.f32.gmra.mrb[100].mxu0 %vm754_vm2, %v29081_v53  ;;  %v29101_v53 = vld [vmem:[#allocation3 + $0x13a] sm:$0xff] }
 0x8da   : > { %22236 = vmatprep.mubr.msk.f32.mxu0 %vm754_vm2, %v29085_v0  ;;  %31625 = vst [vmem:[#allocation57_spill] sm:$0xff] %v29101_v53  ;;  %v29105_v0 = vld [vmem:[#allocation3 + $0x142] sm:$0xff] }
 0x8db   : > { %31626 = vst [vmem:[#allocation58_spill] sm:$0xff] %v29105_v0 }
 0x8dd   : > { %22237 = vmatmul.mubr.msk.f32.gmra.mrb[102].mxu0 %vm754_vm2, %v29089_v33  ;;  %v29109_v33 = vld [vmem:[#allocation3 + $0x152] sm:$0xff] }
 0x8de   : > { %22239 = vmatprep.mubr.msk.f32.mxu0 %vm754_vm2, %v29093_v58  ;;  %v29113_v58 = vld [vmem:[#allocation3 + $0x15a] sm:$0xff] }
 0x8df   : > { %31627 = vst [vmem:[#allocation63_spill] sm:$0xff] %v29113_v58 }
 0x8e1   : > { %22240 = vmatmul.mubr.msk.f32.gmra.mrb[104].mxu0 %vm754_vm2, %v29097_v7  ;;  %v29117_v7 = vld [vmem:[#allocation3 + $0x16a] sm:$0xff] }
 0x8e2   : > { %22242 = vmatprep.mubr.msk.f32.mxu0 %vm754_vm2, %v29101_v53  ;;  %v29121_v53 = vld [vmem:[#allocation3 + $0x172] sm:$0xff] }
 0x8e5   : > { %22243 = vmatmul.mubr.msk.f32.gmra.mrb[106].mxu0 %vm754_vm2, %v29105_v0  ;;  %v11423_v0 = vld [vmem:[#allocation13 + $0x14] sm:$0xf] }
 0x8e6   : > { %22245 = vmatprep.mubr.msk.f32.mxu0 %vm754_vm2, %v29109_v33 }
 0x8e9   : > { %22246 = vmatmul.mubr.msk.f32.gmra.mrb[108].mxu0 %vm754_vm2, %v29113_v58 }
 0x8ea   : > { %22248 = vmatprep.mubr.msk.f32.mxu0 %vm754_vm2, %v29117_v7 }
 0x8ed   : > { %22249 = vmatmul.mubr.msk.f32.gmra.mrb[110].mxu0 %vm754_vm2, %v29121_v53 }
 0x8ee   : > { %22253 = vmatprep.mubr.msk.f32.mxu0 %vm754_vm2, %v28873_v6  ;;  %v29188_v6 = vld [vmem:[#allocation3 + $0x180] sm:$0xff] }
 0x8f1   : > { %22254 = vmatmul.mubr.msk.f32.vlgmr.msra.gmra.mrb[80].mxu0 %vm754_vm2, %v28881_v63  ;;  %v29192_v63 = vld [vmem:[#allocation3 + $0x188] sm:$0xff] }
 0x8f2   : > { %22302 = vmatpush3.msk.msra.mxu0 %vm5113_vm5, %v28998_v30  ;;  %22256 = vmatprep.mubr.msk.f32.mxu0 %vm754_vm2, %v28885_v39  ;;  %v11813_v30 = vld [vmem:[#allocation13 + $0x18] sm:$0xf] }
 0x8f3   : > { %22351 = vmatprep.subr.msk.mxu0 %vm5113_vm5, %v11423_v0 }
 0x8f5   : > { %22257 = vmatmul.mubr.msk.f32.gmra.mrb[82].mxu0 %vm754_vm2, %v28889_v25 }
 0x8f6   : > { %22259 = vmatprep.mubr.msk.f32.mxu0 %vm754_vm2, %v28893_v5 }
 0x8f9   : > { %22260 = vmatmul.mubr.msk.f32.gmra.mrb[84].mxu0 %vm754_vm2, %v28897_v38 }
 0x8fa   : > { %22262 = vmatprep.mubr.msk.f32.mxu0 %vm754_vm2, %v28901_v48 }
 0x8fd   : > { %22263 = vmatmul.mubr.msk.f32.gmra.mrb[86].mxu0 %vm754_vm2, %v28905_v45 }
 0x8fe   : > { %22265 = vmatprep.mubr.msk.f32.mxu0 %vm754_vm2, %v28909_v51 }
 0x901   : > { %22266 = vmatmul.mubr.msk.f32.gmra.mrb[88].mxu0 %vm754_vm2, %v28913_v52 }
 0x902   : > { %22268 = vmatprep.mubr.msk.f32.mxu0 %vm754_vm2, %v28917_v57 }
 0x905   : > { %22269 = vmatmul.mubr.msk.f32.gmra.mrb[90].mxu0 %vm754_vm2, %v28921_v60 }
 0x906   : > { %22271 = vmatprep.mubr.msk.f32.mxu0 %vm754_vm2, %v28925_v16 }
 0x909   : > { %22272 = vmatmul.mubr.msk.f32.gmra.mrb[92].mxu0 %vm754_vm2, %v28929_v14 }
 0x90a   : > { %22274 = vmatprep.mubr.msk.f32.mxu0 %vm754_vm2, %v28933_v27 }
 0x90d   : > { %22275 = vmatmul.mubr.msk.f32.gmra.mrb[94].mxu0 %vm754_vm2, %v28937_v4 }
 0x90e   : > { %22277 = vmatprep.mubr.msk.f32.mxu0 %vm754_vm2, %v28941_v50 }
 0x911   : > { %22278 = vmatmul.mubr.msk.f32.gmra.mrb[96].mxu0 %vm754_vm2, %v28945_v2 }
 0x912   : > { %22280 = vmatprep.mubr.msk.f32.mxu0 %vm754_vm2, %v28949_v56 }
 0x915   : > { %22281 = vmatmul.mubr.msk.f32.gmra.mrb[98].mxu0 %vm754_vm2, %v28953_v10 }
 0x916   : > { %22283 = vmatprep.mubr.msk.f32.mxu0 %vm754_vm2, %v28957_v61 }
 0x919   : > { %22284 = vmatmul.mubr.msk.f32.gmra.mrb[100].mxu0 %vm754_vm2, %v28961_v34 }
 0x91a   : > { %22286 = vmatprep.mubr.msk.f32.mxu0 %vm754_vm2, %v28965_v40 }
 0x91d   : > { %22287 = vmatmul.mubr.msk.f32.gmra.mrb[102].mxu0 %vm754_vm2, %v28969_v11 }
 0x91e   : > { %22289 = vmatprep.mubr.msk.f32.mxu0 %vm754_vm2, %v28973_v41 }
 0x921   : > { %22290 = vmatmul.mubr.msk.f32.gmra.mrb[104].mxu0 %vm754_vm2, %v28977_v20 }
 0x922   : > { %22292 = vmatprep.mubr.msk.f32.mxu0 %vm754_vm2, %v28981_v29 }
 0x925   : > { %22293 = vmatmul.mubr.msk.f32.gmra.mrb[106].mxu0 %vm754_vm2, %v28985_v13 }
 0x926   : > { %22295 = vmatprep.mubr.msk.f32.mxu0 %vm754_vm2, %v28989_v28 }
 0x929   : > { %22296 = vmatmul.mubr.msk.f32.gmra.mrb[108].mxu0 %vm754_vm2, %v28993_v21 }
 0x92a   : > { %22298 = vmatprep.mubr.msk.f32.mxu0 %vm754_vm2, %v29188_v6 }
 0x92d   : > { %22299 = vmatmul.mubr.msk.f32.gmra.mrb[110].mxu0 %vm754_vm2, %v29192_v63 }
 0x92e   : > { %22303 = vmatprep.mubr.msk.f32.mxu0 %vm754_vm2, %v28622_v42  ;;  %v31628_v42 = vld [vmem:[#allocation72_spill] sm:$0xff] }
 0x931   : > { %22304 = vmatmul.mubr.msk.f32.vlgmr.msra.gmra.mrb[80].mxu0 %vm754_vm2, %v28631_v9  ;;  %v31629_v9 = vld [vmem:[#allocation74_spill] sm:$0xff] }
 0x932   : > { %22352 = vmatpush3.msk.msra.mxu0 %vm5113_vm5, %v11423_v0  ;;  %22306 = vmatprep.mubr.msk.f32.mxu0 %vm754_vm2, %v28644_v12  ;;  %v29258_v12 = vld [vmem:[#allocation3 + $0x181] sm:$0xff] }
 0x933   : > { %22401 = vmatprep.subr.msk.mxu0 %vm5113_vm5, %v11813_v30  ;;  %31630 = vst [vmem:[#allocation65_spill] sm:$0xff] %v29258_v12  ;;  %v31635_v0 = vld [vmem:[#allocation46_spill] sm:$0xff] }
 0x935   : > { %22307 = vmatmul.mubr.msk.f32.gmra.mrb[82].mxu0 %vm754_vm2, %v28652_v37  ;;  %v29262_v37 = vld [vmem:[#allocation3 + $0x189] sm:$0xff] }
 0x936   : > { %22309 = vmatprep.mubr.msk.f32.mxu0 %vm754_vm2, %v28666_v35  ;;  %31631 = vst [vmem:[#allocation71_spill] sm:$0xff] %v29262_v37  ;;  %v31632_v35 = vld [vmem:[#allocation43_spill] sm:$0xff] }
 0x939   : > { %22310 = vmatmul.mubr.msk.f32.gmra.mrb[84].mxu0 %vm754_vm2, %v28674_v49  ;;  %v12203_v49 = vld [vmem:[#allocation13 + $0x1c] sm:$0xf] }
 0x93a   : > { %22312 = vmatprep.mubr.msk.f32.mxu0 %vm754_vm2, %v28694_v54  ;;  %v31633_v54 = vld [vmem:[#allocation44_spill] sm:$0xff] }
 0x93d   : > { %22313 = vmatmul.mubr.msk.f32.gmra.mrb[86].mxu0 %vm754_vm2, %v28700_v1  ;;  %v31634_v1 = vld [vmem:[#allocation45_spill] sm:$0xff] }
 0x93e   : > { %22315 = vmatprep.mubr.msk.f32.mxu0 %vm754_vm2, %v28716_v23 }
 0x941   : > { %22316 = vmatmul.mubr.msk.f32.gmra.mrb[88].mxu0 %vm754_vm2, %v28721_v31 }
 0x942   : > { %22318 = vmatprep.mubr.msk.f32.mxu0 %vm754_vm2, %v28736_v32 }
 0x945   : > { %22319 = vmatmul.mubr.msk.f32.gmra.mrb[90].mxu0 %vm754_vm2, %v28743_v17 }
 0x946   : > { %22321 = vmatprep.mubr.msk.f32.mxu0 %vm754_vm2, %v28750_v46 }
 0x949   : > { %22322 = vmatmul.mubr.msk.f32.gmra.mrb[92].mxu0 %vm754_vm2, %v28758_v43 }
 0x94a   : > { %22324 = vmatprep.mubr.msk.f32.mxu0 %vm754_vm2, %v28766_v3 }
 0x94d   : > { %22325 = vmatmul.mubr.msk.f32.gmra.mrb[94].mxu0 %vm754_vm2, %v28771_v19 }
 0x94e   : > { %22327 = vmatprep.mubr.msk.f32.mxu0 %vm754_vm2, %v28782_v24 }
 0x951   : > { %22328 = vmatmul.mubr.msk.f32.gmra.mrb[96].mxu0 %vm754_vm2, %v28787_v18 }
 0x952   : > { %22330 = vmatprep.mubr.msk.f32.mxu0 %vm754_vm2, %v28797_v36 }
 0x955   : > { %22331 = vmatmul.mubr.msk.f32.gmra.mrb[98].mxu0 %vm754_vm2, %v28802_v47 }
 0x956   : > { %22333 = vmatprep.mubr.msk.f32.mxu0 %vm754_vm2, %v28808_v15 }
 0x959   : > { %22334 = vmatmul.mubr.msk.f32.gmra.mrb[100].mxu0 %vm754_vm2, %v28816_v59 }
 0x95a   : > { %22336 = vmatprep.mubr.msk.f32.mxu0 %vm754_vm2, %v28821_v55 }
 0x95d   : > { %22337 = vmatmul.mubr.msk.f32.gmra.mrb[102].mxu0 %vm754_vm2, %v28829_v22 }
 0x95e   : > { %22339 = vmatprep.mubr.msk.f32.mxu0 %vm754_vm2, %v28835_v26 }
 0x961   : > { %22340 = vmatmul.mubr.msk.f32.gmra.mrb[104].mxu0 %vm754_vm2, %v28843_v44 }
 0x962   : > { %22342 = vmatprep.mubr.msk.f32.mxu0 %vm754_vm2, %v28850_v62 }
 0x965   : > { %22343 = vmatmul.mubr.msk.f32.gmra.mrb[106].mxu0 %vm754_vm2, %v28856_v8 }
 0x966   : > { %22345 = vmatprep.mubr.msk.f32.mxu0 %vm754_vm2, %v31628_v42 }
 0x969   : > { %22346 = vmatmul.mubr.msk.f32.gmra.mrb[108].mxu0 %vm754_vm2, %v31629_v9  ;;  %v31642_v9 = vld [vmem:[#allocation53_spill] sm:$0xff] }
 0x96a   : > { %22348 = vmatprep.mubr.msk.f32.mxu0 %vm754_vm2, %v29258_v12  ;;  %v31636_v12 = vld [vmem:[#allocation47_spill] sm:$0xff] }
 0x96d   : > { %22349 = vmatmul.mubr.msk.f32.gmra.mrb[110].mxu0 %vm754_vm2, %v29262_v37  ;;  %v31637_v37 = vld [vmem:[#allocation48_spill] sm:$0xff] }
 0x96e   : > { %22353 = vmatprep.mubr.msk.f32.mxu0 %vm754_vm2, %v31632_v35  ;;  %v31638_v35 = vld [vmem:[#allocation76_spill] sm:$0xff] }
 0x971   : > { %22354 = vmatmul.mubr.msk.f32.vlgmr.msra.gmra.mrb[80].mxu0 %vm754_vm2, %v31633_v54  ;;  %v31639_v54 = vld [vmem:[#allocation77_spill] sm:$0xff] }
 0x972   : > { %22402 = vmatpush3.msk.msra.mxu0 %vm5113_vm5, %v11813_v30  ;;  %22356 = vmatprep.mubr.msk.f32.mxu0 %vm754_vm2, %v31634_v1  ;;  %v31640_v30 = vld [vmem:[#allocation51_spill] sm:$0xff]  ;;  %v31641_v1 = vld [vmem:[#allocation52_spill] sm:$0xff] }
 0x973   : > { %22451 = vmatprep.subr.msk.mxu0 %vm5113_vm5, %v12203_v49 }
 0x975   : > { %22357 = vmatmul.mubr.msk.f32.gmra.mrb[82].mxu0 %vm754_vm2, %v31635_v0  ;;  %v31643_v0 = vld [vmem:[#allocation59_spill] sm:$0xff] }
 0x976   : > { %22359 = vmatprep.mubr.msk.f32.mxu0 %vm754_vm2, %v31636_v12  ;;  %v31644_v12 = vld [vmem:[#allocation60_spill] sm:$0xff] }
 0x979   : > { %22360 = vmatmul.mubr.msk.f32.gmra.mrb[84].mxu0 %vm754_vm2, %v31637_v37  ;;  %v31645_v37 = vld [vmem:[#allocation61_spill] sm:$0xff] }
 0x97a   : > { %22362 = vmatprep.mubr.msk.f32.mxu0 %vm754_vm2, %v31638_v35  ;;  %v31646_v35 = vld [vmem:[#allocation62_spill] sm:$0xff] }
 0x97d   : > { %22363 = vmatmul.mubr.msk.f32.gmra.mrb[86].mxu0 %vm754_vm2, %v31639_v54  ;;  %v31647_v54 = vld [vmem:[#allocation64_spill] sm:$0xff] }
 0x97e   : > { %22365 = vmatprep.mubr.msk.f32.mxu0 %vm754_vm2, %v31640_v30  ;;  %v31648_v30 = vld [vmem:[#allocation66_spill] sm:$0xff] }
 0x981   : > { %22366 = vmatmul.mubr.msk.f32.gmra.mrb[88].mxu0 %vm754_vm2, %v31641_v1  ;;  %v31649_v1 = vld [vmem:[#allocation67_spill] sm:$0xff] }
 0x982   : > { %22368 = vmatprep.mubr.msk.f32.mxu0 %vm754_vm2, %v31642_v9  ;;  %v31650_v9 = vld [vmem:[#allocation68_spill] sm:$0xff] }
 0x985   : > { %22369 = vmatmul.mubr.msk.f32.gmra.mrb[90].mxu0 %vm754_vm2, %v31643_v0  ;;  %v31651_v0 = vld [vmem:[#allocation69_spill] sm:$0xff] }
 0x986   : > { %22371 = vmatprep.mubr.msk.f32.mxu0 %vm754_vm2, %v31644_v12  ;;  %v31652_v12 = vld [vmem:[#allocation70_spill] sm:$0xff] }
 0x989   : > { %22372 = vmatmul.mubr.msk.f32.gmra.mrb[92].mxu0 %vm754_vm2, %v31645_v37  ;;  %v31653_v37 = vld [vmem:[#allocation54_spill] sm:$0xff] }
 0x98a   : > { %22374 = vmatprep.mubr.msk.f32.mxu0 %vm754_vm2, %v31646_v35  ;;  %v31654_v35 = vld [vmem:[#allocation55_spill] sm:$0xff] }
 0x98d   : > { %22375 = vmatmul.mubr.msk.f32.gmra.mrb[94].mxu0 %vm754_vm2, %v31647_v54  ;;  %v31655_v54 = vld [vmem:[#allocation56_spill] sm:$0xff] }
 0x98e   : > { %22377 = vmatprep.mubr.msk.f32.mxu0 %vm754_vm2, %v31648_v30  ;;  %v31656_v30 = vld [vmem:[#allocation57_spill] sm:$0xff] }
 0x991   : > { %22378 = vmatmul.mubr.msk.f32.gmra.mrb[96].mxu0 %vm754_vm2, %v31649_v1  ;;  %v31657_v1 = vld [vmem:[#allocation58_spill] sm:$0xff] }
 0x992   : > { %22380 = vmatprep.mubr.msk.f32.mxu0 %vm754_vm2, %v31650_v9 }
 0x995   : > { %22381 = vmatmul.mubr.msk.f32.gmra.mrb[98].mxu0 %vm754_vm2, %v31651_v0 }
 0x996   : > { %22383 = vmatprep.mubr.msk.f32.mxu0 %vm754_vm2, %v31652_v12 }
 0x999   : > { %22384 = vmatmul.mubr.msk.f32.gmra.mrb[100].mxu0 %vm754_vm2, %v31653_v37 }
 0x99a   : > { %22386 = vmatprep.mubr.msk.f32.mxu0 %vm754_vm2, %v31654_v35  ;;  %v29328_v35 = vld [vmem:[#allocation3 + $0x182] sm:$0xff] }
 0x99d   : > { %22387 = vmatmul.mubr.msk.f32.gmra.mrb[102].mxu0 %vm754_vm2, %v31655_v54 }
 0x99e   : > { %22389 = vmatprep.mubr.msk.f32.mxu0 %vm754_vm2, %v31656_v30  ;;  %v29332_v30 = vld [vmem:[#allocation3 + $0x18a] sm:$0xff] }
 0x9a1   : > { %22390 = vmatmul.mubr.msk.f32.gmra.mrb[104].mxu0 %vm754_vm2, %v31657_v1 }
 0x9a2   : > { %22392 = vmatprep.mubr.msk.f32.mxu0 %vm754_vm2, %v29109_v33 }
 0x9a5   : > { %22393 = vmatmul.mubr.msk.f32.gmra.mrb[106].mxu0 %vm754_vm2, %v29113_v58  ;;  %v12593_v58 = vld [vmem:[#allocation13 + $0x20] sm:$0xf] }
 0x9a6   : > { %22395 = vmatprep.mubr.msk.f32.mxu0 %vm754_vm2, %v29117_v7 }
 0x9a9   : > { %22396 = vmatmul.mubr.msk.f32.gmra.mrb[108].mxu0 %vm754_vm2, %v29121_v53 }
 0x9aa   : > { %22398 = vmatprep.mubr.msk.f32.mxu0 %vm754_vm2, %v29328_v35 }
 0x9ad   : > { %22399 = vmatmul.mubr.msk.f32.gmra.mrb[110].mxu0 %vm754_vm2, %v29332_v30 }
 0x9ae   : > { %22403 = vmatprep.mubr.msk.f32.mxu0 %vm754_vm2, %v28885_v39  ;;  %v11810_v39 = vld [vmem:[#allocation3 + $0x198] sm:$0xff] }
 0x9b1   : > { %22404 = vmatmul.mubr.msk.f32.vlgmr.msra.gmra.mrb[80].mxu0 %vm754_vm2, %v28889_v25  ;;  %v11811_v25 = vld [vmem:[#allocation3 + $0x1a0] sm:$0xff] }
 0x9b2   : > { %22452 = vmatpush3.msk.msra.mxu0 %vm5113_vm5, %v12203_v49  ;;  %22406 = vmatprep.mubr.msk.f32.mxu0 %vm754_vm2, %v28893_v5  ;;  %v12170_v5 = vld [vmem:[#allocation3 + $0x31] sm:$0xff] }
 0x9b3   : > { %22501 = vmatprep.subr.msk.mxu0 %vm5113_vm5, %v12593_v58 }
 0x9b5   : > { %22407 = vmatmul.mubr.msk.f32.gmra.mrb[82].mxu0 %vm754_vm2, %v28897_v38  ;;  %v13213_v38 = vld [vmem:[#allocation24] sm:$0xf] }
 0x9b6   : > { %22409 = vmatprep.mubr.msk.f32.mxu0 %vm754_vm2, %v28901_v48  ;;  %22551 = vmatprep.subr.msk.mxu1 %vm5113_vm5, %v13213_v38  ;;  %v12171_v48 = vld [vmem:[#allocation3 + $0x39] sm:$0xff] }
 0x9b7   : > { %22552 = vmatpush3.msk.msra.mxu1 %vm5113_vm5, %v13213_v38 }
 0x9b9   : > { %22410 = vmatmul.mubr.msk.f32.gmra.mrb[84].mxu0 %vm754_vm2, %v28905_v45  ;;  %v12172_v45 = vld [vmem:[#allocation3 + $0x49] sm:$0xff] }
 0x9ba   : > { %22412 = vmatprep.mubr.msk.f32.mxu0 %vm754_vm2, %v28909_v51  ;;  %v12173_v51 = vld [vmem:[#allocation3 + $0x51] sm:$0xff] }
 0x9bd   : > { %22413 = vmatmul.mubr.msk.f32.gmra.mrb[86].mxu0 %vm754_vm2, %v28913_v52  ;;  %v12174_v52 = vld [vmem:[#allocation3 + $0x61] sm:$0xff] }
 0x9be   : > { %22415 = vmatprep.mubr.msk.f32.mxu0 %vm754_vm2, %v28917_v57  ;;  %v12175_v57 = vld [vmem:[#allocation3 + $0x69] sm:$0xff] }
 0x9c1   : > { %22416 = vmatmul.mubr.msk.f32.gmra.mrb[88].mxu0 %vm754_vm2, %v28921_v60  ;;  %v31676_v60 = vld [vmem:[#allocation67_spill] sm:$0xff] }
 0x9c2   : > { %22418 = vmatprep.mubr.msk.f32.mxu0 %vm754_vm2, %v28925_v16  ;;  %v31677_v16 = vld [vmem:[#allocation55_spill] sm:$0xff] }
 0x9c5   : > { %22419 = vmatmul.mubr.msk.f32.gmra.mrb[90].mxu0 %vm754_vm2, %v28929_v14  ;;  %v31678_v14 = vld [vmem:[#allocation57_spill] sm:$0xff] }
 0x9c6   : > { %22421 = vmatprep.mubr.msk.f32.mxu0 %vm754_vm2, %v28933_v27  ;;  %v31679_v27 = vld [vmem:[#allocation63_spill] sm:$0xff] }
 0x9c9   : > { %22422 = vmatmul.mubr.msk.f32.gmra.mrb[92].mxu0 %vm754_vm2, %v28937_v4  ;;  %v12590_v4 = vld [vmem:[#allocation3 + $0x19a] sm:$0xff] }
 0x9ca   : > { %22424 = vmatprep.mubr.msk.f32.mxu0 %vm754_vm2, %v28941_v50  ;;  %v12591_v50 = vld [vmem:[#allocation3 + $0x1a2] sm:$0xff] }
 0x9cd   : > { %22425 = vmatmul.mubr.msk.f32.gmra.mrb[94].mxu0 %vm754_vm2, %v28945_v2  ;;  %v29525_v2 = vld [vmem:[#allocation15] ss:$0 sm:$0xff] }
 0x9ce   : > { %22427 = vmatprep.mubr.msk.f32.mxu0 %vm754_vm2, %v28949_v56 }
 0x9d1   : > { %22428 = vmatmul.mubr.msk.f32.gmra.mrb[96].mxu0 %vm754_vm2, %v28953_v10 }
 0x9d2   : > { %22430 = vmatprep.mubr.msk.f32.mxu0 %vm754_vm2, %v28957_v61 }
 0x9d5   : > { %22431 = vmatmul.mubr.msk.f32.gmra.mrb[98].mxu0 %vm754_vm2, %v28961_v34 }
 0x9d6   : > { %22433 = vmatprep.mubr.msk.f32.mxu0 %vm754_vm2, %v28965_v40 }
 0x9d9   : > { %22434 = vmatmul.mubr.msk.f32.gmra.mrb[100].mxu0 %vm754_vm2, %v28969_v11 }
 0x9da   : > { %22436 = vmatprep.mubr.msk.f32.mxu0 %vm754_vm2, %v28973_v41 }
 0x9dd   : > { %22437 = vmatmul.mubr.msk.f32.gmra.mrb[102].mxu0 %vm754_vm2, %v28977_v20 }
 0x9de   : > { %22439 = vmatprep.mubr.msk.f32.mxu0 %vm754_vm2, %v28981_v29 }
 0x9e1   : > { %22440 = vmatmul.mubr.msk.f32.gmra.mrb[104].mxu0 %vm754_vm2, %v28985_v13 }
 0x9e2   : > { %22442 = vmatprep.mubr.msk.f32.mxu0 %vm754_vm2, %v28989_v28 }
 0x9e5   : > { %22443 = vmatmul.mubr.msk.f32.gmra.mrb[106].mxu0 %vm754_vm2, %v28993_v21 }
 0x9e6   : > { %22445 = vmatprep.mubr.msk.f32.mxu0 %vm754_vm2, %v29188_v6 }
 0x9e9   : > { %22446 = vmatmul.mubr.msk.f32.gmra.mrb[108].mxu0 %vm754_vm2, %v29192_v63 }
 0x9ea   : > { %22448 = vmatprep.mubr.msk.f32.mxu0 %vm754_vm2, %v11810_v39 }
 0x9ed   : > { %22449 = vmatmul.mubr.msk.f32.gmra.mrb[110].mxu0 %vm754_vm2, %v11811_v25 }
 0x9ee   : > { %22453 = vmatprep.mubr.msk.f32.mxu0 %vm754_vm2, %v12170_v5 }
 0x9f1   : > { %22454 = vmatmul.mubr.msk.f32.vlgmr.msra.gmra.mrb[80].mxu0 %vm754_vm2, %v12171_v48 }
 0x9f2   : > { %22502 = vmatpush3.msk.msra.mxu0 %vm5113_vm5, %v12593_v58  ;;  %22456 = vmatprep.mubr.msk.f32.mxu0 %vm754_vm2, %v12172_v45 }
 0x9f5   : > { %22457 = vmatmul.mubr.msk.f32.gmra.mrb[82].mxu0 %vm754_vm2, %v12173_v51 }
 0x9f6   : > { %22459 = vmatprep.mubr.msk.f32.mxu0 %vm754_vm2, %v12174_v52 }
 0x9f9   : > { %22460 = vmatmul.mubr.msk.f32.gmra.mrb[84].mxu0 %vm754_vm2, %v12175_v57 }
 0x9fa   : > { %22462 = vmatprep.mubr.msk.f32.mxu0 %vm754_vm2, %v28716_v23  ;;  %v31658_v23 = vld [vmem:[#allocation74_spill] sm:$0xff] }
 0x9fd   : > { %22463 = vmatmul.mubr.msk.f32.gmra.mrb[86].mxu0 %vm754_vm2, %v28721_v31  ;;  %v31659_v31 = vld [vmem:[#allocation65_spill] sm:$0xff] }
 0x9fe   : > { %22465 = vmatprep.mubr.msk.f32.mxu0 %vm754_vm2, %v28736_v32  ;;  %v12200_v32 = vld [vmem:[#allocation3 + $0x199] sm:$0xff] }
 0xa01   : > { %22466 = vmatmul.mubr.msk.f32.gmra.mrb[88].mxu0 %vm754_vm2, %v28743_v17  ;;  %v31660_v17 = vld [vmem:[#allocation71_spill] sm:$0xff] }
 0xa02   : > { %22468 = vmatprep.mubr.msk.f32.mxu0 %vm754_vm2, %v28750_v46  ;;  %v12201_v46 = vld [vmem:[#allocation3 + $0x1a1] sm:$0xff] }
 0xa05   : > { %22469 = vmatmul.mubr.msk.f32.gmra.mrb[90].mxu0 %vm754_vm2, %v28758_v43  ;;  %v31661_v43 = vld [vmem:[#allocation45_spill] sm:$0xff] }
 0xa06   : > { %22471 = vmatprep.mubr.msk.f32.mxu0 %vm754_vm2, %v28766_v3  ;;  %v31662_v3 = vld [vmem:[#allocation46_spill] sm:$0xff] }
 0xa09   : > { %22472 = vmatmul.mubr.msk.f32.gmra.mrb[92].mxu0 %vm754_vm2, %v28771_v19  ;;  %v31663_v19 = vld [vmem:[#allocation47_spill] sm:$0xff] }
 0xa0a   : > { %22474 = vmatprep.mubr.msk.f32.mxu0 %vm754_vm2, %v28782_v24  ;;  %v31664_v24 = vld [vmem:[#allocation48_spill] sm:$0xff] }
 0xa0d   : > { %22475 = vmatmul.mubr.msk.f32.gmra.mrb[94].mxu0 %vm754_vm2, %v28787_v18  ;;  %v31665_v18 = vld [vmem:[#allocation76_spill] sm:$0xff] }
 0xa0e   : > { %22477 = vmatprep.mubr.msk.f32.mxu0 %vm754_vm2, %v28797_v36  ;;  %v31666_v36 = vld [vmem:[#allocation77_spill] sm:$0xff] }
 0xa11   : > { %22478 = vmatmul.mubr.msk.f32.gmra.mrb[96].mxu0 %vm754_vm2, %v28802_v47  ;;  %v31667_v47 = vld [vmem:[#allocation51_spill] sm:$0xff] }
 0xa12   : > { %22480 = vmatprep.mubr.msk.f32.mxu0 %vm754_vm2, %v28808_v15  ;;  %v31668_v15 = vld [vmem:[#allocation52_spill] sm:$0xff] }
 0xa15   : > { %22481 = vmatmul.mubr.msk.f32.gmra.mrb[98].mxu0 %vm754_vm2, %v28816_v59  ;;  %v31669_v59 = vld [vmem:[#allocation53_spill] sm:$0xff] }
 0xa16   : > { %22483 = vmatprep.mubr.msk.f32.mxu0 %vm754_vm2, %v28821_v55  ;;  %v31670_v55 = vld [vmem:[#allocation59_spill] sm:$0xff] }
 0xa19   : > { %22484 = vmatmul.mubr.msk.f32.gmra.mrb[100].mxu0 %vm754_vm2, %v28829_v22  ;;  %v31671_v22 = vld [vmem:[#allocation60_spill] sm:$0xff] }
 0xa1a   : > { %22486 = vmatprep.mubr.msk.f32.mxu0 %vm754_vm2, %v28835_v26  ;;  %v31672_v26 = vld [vmem:[#allocation61_spill] sm:$0xff] }
 0xa1d   : > { %22487 = vmatmul.mubr.msk.f32.gmra.mrb[102].mxu0 %vm754_vm2, %v28843_v44  ;;  %v31673_v44 = vld [vmem:[#allocation62_spill] sm:$0xff] }
 0xa1e   : > { %22489 = vmatprep.mubr.msk.f32.mxu0 %vm754_vm2, %v28850_v62  ;;  %v31674_v62 = vld [vmem:[#allocation64_spill] sm:$0xff] }
 0xa21   : > { %22490 = vmatmul.mubr.msk.f32.gmra.mrb[104].mxu0 %vm754_vm2, %v28856_v8  ;;  %v31675_v8 = vld [vmem:[#allocation66_spill] sm:$0xff] }
 0xa22   : > { %22492 = vmatprep.mubr.msk.f32.mxu0 %vm754_vm2, %v31628_v42 }
 0xa25   : > { %22493 = vmatmul.mubr.msk.f32.gmra.mrb[106].mxu0 %vm754_vm2, %v31658_v23 }
 0xa26   : > { %22495 = vmatprep.mubr.msk.f32.mxu0 %vm754_vm2, %v31659_v31 }
 0xa29   : > { %22496 = vmatmul.mubr.msk.f32.gmra.mrb[108].mxu0 %vm754_vm2, %v31660_v17 }
 0xa2a   : > { %22498 = vmatprep.mubr.msk.f32.mxu0 %vm754_vm2, %v12200_v32 }
 0xa2d   : > { %22499 = vmatmul.mubr.msk.f32.gmra.mrb[110].mxu0 %vm754_vm2, %v12201_v46 }
 0xa2e   : > { %22503 = vmatprep.mubr.msk.f32.mxu0 %vm754_vm2, %v31661_v43 }
 0xa31   : > { %22504 = vmatmul.mubr.msk.f32.vlgmr.msra.gmra.mrb[80].mxu0 %vm754_vm2, %v31662_v3 }
 0xa32   : > { %22506 = vmatprep.mubr.msk.f32.mxu0 %vm754_vm2, %v31663_v19 }
 0xa35   : > { %22507 = vmatmul.mubr.msk.f32.gmra.mrb[82].mxu0 %vm754_vm2, %v31664_v24 }
 0xa36   : > { %22509 = vmatprep.mubr.msk.f32.mxu0 %vm754_vm2, %v31665_v18 }
 0xa39   : > { %22510 = vmatmul.mubr.msk.f32.gmra.mrb[84].mxu0 %vm754_vm2, %v31666_v36 }
 0xa3a   : > { %22512 = vmatprep.mubr.msk.f32.mxu0 %vm754_vm2, %v31667_v47 }
 0xa3d   : > { %22513 = vmatmul.mubr.msk.f32.gmra.mrb[86].mxu0 %vm754_vm2, %v31668_v15 }
 0xa3e   : > { %22515 = vmatprep.mubr.msk.f32.mxu0 %vm754_vm2, %v31669_v59 }
 0xa41   : > { %22516 = vmatmul.mubr.msk.f32.gmra.mrb[88].mxu0 %vm754_vm2, %v31670_v55 }
 0xa42   : > { %22518 = vmatprep.mubr.msk.f32.mxu0 %vm754_vm2, %v31671_v22 }
 0xa45   : > { %22519 = vmatmul.mubr.msk.f32.gmra.mrb[90].mxu0 %vm754_vm2, %v31672_v26 }
 0xa46   : > { %22521 = vmatprep.mubr.msk.f32.mxu0 %vm754_vm2, %v31673_v44 }
 0xa49   : > { %22522 = vmatmul.mubr.msk.f32.gmra.mrb[92].mxu0 %vm754_vm2, %v31674_v62 }
 0xa4a   : > { %22524 = vmatprep.mubr.msk.f32.mxu0 %vm754_vm2, %v31675_v8 }
 0xa4d   : > { %22525 = vmatmul.mubr.msk.f32.gmra.mrb[94].mxu0 %vm754_vm2, %v31676_v60 }
 0xa4e   : > { %22527 = vmatprep.mubr.msk.f32.mxu0 %vm754_vm2, %v31650_v9 }
 0xa51   : > { %22528 = vmatmul.mubr.msk.f32.gmra.mrb[96].mxu0 %vm754_vm2, %v31651_v0 }
 0xa52   : > { %22530 = vmatprep.mubr.msk.f32.mxu0 %vm754_vm2, %v31652_v12 }
 0xa55   : > { %22531 = vmatmul.mubr.msk.f32.gmra.mrb[98].mxu0 %vm754_vm2, %v31653_v37 }
 0xa56   : > { %22533 = vmatprep.mubr.msk.f32.mxu0 %vm754_vm2, %v31677_v16 }
 0xa59   : > { %22534 = vmatmul.mubr.msk.f32.gmra.mrb[100].mxu0 %vm754_vm2, %v31655_v54 }
 0xa5a   : > { %22536 = vmatprep.mubr.msk.f32.mxu0 %vm754_vm2, %v31678_v14 }
 0xa5d   : > { %22537 = vmatmul.mubr.msk.f32.gmra.mrb[102].mxu0 %vm754_vm2, %v31657_v1 }
 0xa5e   : > { %22539 = vmatprep.mubr.msk.f32.mxu0 %vm754_vm2, %v29109_v33  ;;  %v29521_v33 = vld [vmem:[#allocation16 + $0x4] sm:$0xf] }
 0xa5f   : > { %22601 = vmatprep.subr.msk.mxu1 %vm5113_vm5, %v29521_v33 }
 0xa61   : > { %22540 = vmatmul.mubr.msk.f32.gmra.mrb[104].mxu0 %vm754_vm2, %v31679_v27 }
 0xa62   : > { %22542 = vmatprep.mubr.msk.f32.mxu0 %vm754_vm2, %v29117_v7 }
 0xa65   : > { %22543 = vmatmul.mubr.msk.f32.gmra.mrb[106].mxu0 %vm754_vm2, %v29121_v53 }
 0xa66   : > { %22545 = vmatprep.mubr.msk.f32.mxu0 %vm754_vm2, %v29328_v35 }
 0xa69   : > { %22546 = vmatmul.mubr.msk.f32.gmra.mrb[108].mxu0 %vm754_vm2, %v29332_v30 }
 0xa6a   : > { %22548 = vmatprep.mubr.msk.f32.mxu0 %vm754_vm2, %v12590_v4 }
 0xa6d   : > { %22549 = vmatmul.mubr.msk.f32.gmra.mrb[110].mxu0 %vm754_vm2, %v12591_v50 }
 0xb04   : > { %v22505_v56 = vpop.f32.mrb[80].mxu0 }
 0xb05   : > { %v29528_v10 = vadd.f32 %v22505_v56, %v29525_v2  ;;  %v12759_v61 = vpop.f32.mrb[81].mxu0 }
 0xb06   : > { %v29531_v34 = vadd.f32 %v29525_v2, %v12759_v61 }
 0xb07   : > { %v19229_v40 = vmul.f32 -1.442695, %v29528_v10 }
 0xb08   : > { %v19228_v11 = vmul.f32 -1.442695, %v29531_v34  ;;  %v22508_v41 = vpop.f32.mrb[82].mxu0 }
 0xb09   : > { %24742 = vpow2.f32 %v19229_v40  ;;  %v29536_v20 = vadd.f32 %v22508_v41, %v29525_v2  ;;  %v12769_v29 = vpop.f32.mrb[83].mxu0 }
 0xb0a   : > { %24744 = vpow2.f32 %v19228_v11  ;;  %v29539_v13 = vadd.f32 %v29525_v2, %v12769_v29 }
 0xb0b   : > { %v19231_v28 = vmul.f32 -1.442695, %v29536_v20 }
 0xb0c   : > { %v19230_v21 = vmul.f32 -1.442695, %v29539_v13  ;;  %v22511_v58 = vpop.f32.mrb[84].mxu0 }
 0xb0d   : > { %24746 = vpow2.f32 %v19231_v28  ;;  %v29544_v7 = vadd.f32 %v22511_v58, %v29525_v2  ;;  %v12779_v53 = vpop.f32.mrb[85].mxu0 }
 0xb0e   : > { %24748 = vpow2.f32 %v19230_v21  ;;  %v29547_v6 = vadd.f32 %v29525_v2, %v12779_v53 }
 0xb0f   : > { %v19233_v63 = vmul.f32 -1.442695, %v29544_v7 }
 0xb10   : > { %v19232_v42 = vmul.f32 -1.442695, %v29547_v6  ;;  %v22514_v9 = vpop.f32.mrb[86].mxu0 }
 0xb11   : > { %24750 = vpow2.f32 %v19233_v63  ;;  %v29552_v12 = vadd.f32 %v22514_v9, %v29525_v2  ;;  %v12789_v37 = vpop.f32.mrb[87].mxu0 }
 0xb12   : > { %24752 = vpow2.f32 %v19232_v42  ;;  %v29555_v49 = vadd.f32 %v29525_v2, %v12789_v37 }
 0xb13   : > { %v24743_v1 = vpop.eup %24742  ;;  %v19235_v0 = vmul.f32 -1.442695, %v29552_v12 }
 0xb14   : > { %v24745_v35 = vpop.eup %24744  ;;  %v13086_v54 = vadd.f32 1.0, %v24743_v1  ;;  %v19234_v30 = vmul.f32 -1.442695, %v29555_v49  ;;  %v22517_v39 = vpop.f32.mrb[88].mxu0 }
 0xb15   : > { %v13085_v25 = vadd.f32 1.0, %v24745_v35  ;;  %24754 = vpow2.f32 %v19235_v0  ;;  %v29560_v5 = vadd.f32 %v22517_v39, %v29525_v2  ;;  %v12799_v38 = vpop.f32.mrb[89].mxu0 }
 0xb16   : > { %24756 = vrcp.f32 %v13086_v54  ;;  %v29563_v48 = vadd.f32 %v29525_v2, %v12799_v38 }
 0xb17   : > { %v24747_v45 = vpop.eup %24746  ;;  %24758 = vrcp.f32 %v13085_v25  ;;  %v19237_v51 = vmul.f32 -1.442695, %v29560_v5 }
 0xb18   : > { %v24749_v52 = vpop.eup %24748  ;;  %v13088_v57 = vadd.f32 1.0, %v24747_v45  ;;  %24760 = vpow2.f32 %v19234_v30  ;;  %v19236_v23 = vmul.f32 -1.442695, %v29563_v48  ;;  %v22520_v31 = vpop.f32.mrb[90].mxu0 }
 0xb19   : > { %v13087_v32 = vadd.f32 1.0, %v24749_v52  ;;  %24762 = vpow2.f32 %v19237_v51  ;;  %v29568_v17 = vadd.f32 %v22520_v31, %v29525_v2  ;;  %v12809_v46 = vpop.f32.mrb[91].mxu0 }
 0xb1a   : > { %24764 = vrcp.f32 %v13088_v57  ;;  %v29571_v43 = vadd.f32 %v29525_v2, %v12809_v46 }
 0xb1b   : > { %v24751_v3 = vpop.eup %24750  ;;  %24766 = vrcp.f32 %v13087_v32  ;;  %v19239_v19 = vmul.f32 -1.442695, %v29568_v17 }
 0xb1c   : > { %v24753_v24 = vpop.eup %24752  ;;  %v13090_v18 = vadd.f32 1.0, %v24751_v3  ;;  %24768 = vpow2.f32 %v19236_v23  ;;  %v19238_v36 = vmul.f32 -1.442695, %v29571_v43  ;;  %v22523_v47 = vpop.f32.mrb[92].mxu0 }
 0xb1d   : > { %v13089_v15 = vadd.f32 1.0, %v24753_v24  ;;  %24770 = vpow2.f32 %v19239_v19  ;;  %v29576_v59 = vadd.f32 %v22523_v47, %v29525_v2  ;;  %v12819_v55 = vpop.f32.mrb[93].mxu0 }
 0xb1e   : > { %24772 = vrcp.f32 %v13090_v18  ;;  %v29579_v22 = vadd.f32 %v29525_v2, %v12819_v55 }
 0xb1f   : > { %v24755_v26 = vpop.eup %24754  ;;  %24774 = vrcp.f32 %v13089_v15  ;;  %v19241_v44 = vmul.f32 -1.442695, %v29576_v59 }
 0xb20   : > { %v24757_v62 = vpop.eup %24756  ;;  %v13092_v8 = vadd.f32 1.0, %v24755_v26  ;;  %24776 = vpow2.f32 %v19238_v36  ;;  %v19240_v60 = vmul.f32 -1.442695, %v29579_v22  ;;  %v22526_v16 = vpop.f32.mrb[94].mxu0 }
 0xb21   : > { %v24759_v14 = vpop.eup %24758  ;;  %v13182_v27 = vmul.f32 %v24757_v62, %v29528_v10  ;;  %24778 = vpow2.f32 %v19241_v44  ;;  %v29585_v4 = vadd.f32 %v22526_v16, %v29525_v2  ;;  %v12829_v50 = vpop.f32.mrb[95].mxu0 }
 0xb22   : > { %v24761_v56 = vpop.eup %24760  ;;  %v13181_v61 = vmul.f32 %v24759_v14, %v29531_v34  ;;  %24780 = vrcp.f32 %v13092_v8  ;;  %v29589_v40 = vadd.f32 %v29525_v2, %v12829_v50  ;;  %v29596_v34 = vld [vmem:[#allocation16] sm:$0xf] }
 0xb23   : > { %v24763_v11 = vpop.eup %24762  ;;  %13571 = vst.msk [vmem:[#allocation3 + $0x21] sm:$0xff] %vm754_vm2, %v13182_v27  ;;  %v13091_v41 = vadd.f32 1.0, %v24761_v56  ;;  %24782 = vpow2.f32 %v19240_v60  ;;  %v19243_v29 = vmul.f32 -1.442695, %v29585_v4 }
 0xb24   : > { %v24765_v10 = vpop.eup %24764  ;;  %13570 = vst.msk [vmem:[#allocation3 + $0x19] sm:$0xff] %vm754_vm2, %v13181_v61  ;;  %v13094_v28 = vadd.f32 1.0, %v24763_v11  ;;  %v19242_v21 = vmul.f32 -1.442695, %v29589_v40  ;;  %v22529_v58 = vpop.f32.mrb[96].mxu0  ;;  %22553 = vmatprep.mubr.msk.f32.mxu1 %vm754_vm2, %v13181_v61 }
 0xb25   : > { %v24767_v53 = vpop.eup %24766  ;;  %v13184_v63 = vmul.f32 %v24765_v10, %v29536_v20  ;;  %24784 = vrcp.f32 %v13091_v41  ;;  %v29600_v42 = vadd.f32 %v22529_v58, %v29525_v2  ;;  %v12839_v9 = vpop.f32.mrb[97].mxu0  ;;  %22554 = vmatmul.mubr.msk.f32.vlgmr.msra.gmra.mrb[32].mxu1 %vm754_vm2, %v13182_v27 }
 0xb26   : > { %v24769_v37 = vpop.eup %24768  ;;  %v13183_v1 = vmul.f32 %v24767_v53, %v29539_v13  ;;  %24786 = vrcp.f32 %v13094_v28  ;;  %v29605_v0 = vadd.f32 %v29525_v2, %v12839_v9  ;;  %22602 = vmatpush3.msk.msra.mxu1 %vm5113_vm5, %v29521_v33 }
 0xb27   : > { %v24771_v35 = vpop.eup %24770  ;;  %13573 = vst.msk [vmem:[#allocation3 + $0x39] sm:$0xff] %vm754_vm2, %v13184_v63  ;;  %v13093_v20 = vadd.f32 1.0, %v24769_v37  ;;  %24788 = vpow2.f32 %v19243_v29  ;;  %v19245_v54 = vmul.f32 -1.442695, %v29600_v42  ;;  %22651 = vmatprep.subr.msk.mxu1 %vm5113_vm5, %v29596_v34 }
 0xb28   : > { %v24773_v30 = vpop.eup %24772  ;;  %13572 = vst.msk [vmem:[#allocation3 + $0x31] sm:$0xff] %vm754_vm2, %v13183_v1  ;;  %v13096_v13 = vadd.f32 1.0, %v24771_v35  ;;  %24790 = vpow2.f32 %v19242_v21  ;;  %v19244_v39 = vmul.f32 -1.442695, %v29605_v0  ;;  %v22532_v25 = vpop.f32.mrb[98].mxu0  ;;  %22556 = vmatprep.mubr.msk.f32.mxu1 %vm754_vm2, %v13183_v1 }
 0xb29   : > { %v24775_v33 = vpop.eup %24774  ;;  %v13186_v38 = vmul.f32 %v24773_v30, %v29544_v7  ;;  %24792 = vrcp.f32 %v13093_v20  ;;  %v29618_v45 = vadd.f32 %v22532_v25, %v29525_v2  ;;  %v12849_v51 = vpop.f32.mrb[99].mxu0  ;;  %22557 = vmatmul.mubr.msk.f32.gmra.mrb[34].mxu1 %vm754_vm2, %v13184_v63 }
 0xb2a   : > { %v24777_v52 = vpop.eup %24776  ;;  %v13185_v57 = vmul.f32 %v24775_v33, %v29547_v6  ;;  %24794 = vrcp.f32 %v13096_v13  ;;  %v29623_v23 = vadd.f32 %v29525_v2, %v12849_v51 }
 0xb2b   : > { %v24779_v31 = vpop.eup %24778  ;;  %13575 = vst.msk [vmem:[#allocation3 + $0x51] sm:$0xff] %vm754_vm2, %v13186_v38  ;;  %v13095_v32 = vadd.f32 1.0, %v24777_v52  ;;  %24796 = vpow2.f32 %v19245_v54  ;;  %v19247_v7 = vmul.f32 -1.442695, %v29618_v45 }
 0xb2c   : > { %v24781_v46 = vpop.eup %24780  ;;  %13574 = vst.msk [vmem:[#allocation3 + $0x49] sm:$0xff] %vm754_vm2, %v13185_v57  ;;  %v13098_v3 = vadd.f32 1.0, %v24779_v31  ;;  %24798 = vpow2.f32 %v19244_v39  ;;  %v22535_v19 = vpop.f32.mrb[100].mxu0  ;;  %22559 = vmatprep.mubr.msk.f32.mxu1 %vm754_vm2, %v13185_v57  ;;  %v19246_v18 = vmul.f32 -1.442695, %v29623_v23 }
 0xb2d   : > { %v24783_v6 = vpop.eup %24782  ;;  %v13188_v24 = vmul.f32 %v24781_v46, %v29552_v12  ;;  %24800 = vrcp.f32 %v13095_v32  ;;  %v29632_v36 = vadd.f32 %v22535_v19, %v29525_v2  ;;  %v12859_v47 = vpop.f32.mrb[101].mxu0  ;;  %22560 = vmatmul.mubr.msk.f32.gmra.mrb[36].mxu1 %vm754_vm2, %v13186_v38 }
 0xb2e   : > { %24802 = vrcp.f32 %v13098_v3  ;;  %v13097_v15 = vadd.f32 1.0, %v24783_v6  ;;  %v29636_v55 = vadd.f32 %v29525_v2, %v12859_v47 }
 0xb2f   : > { %v24785_v26 = vpop.eup %24784  ;;  %13577 = vst.msk [vmem:[#allocation3 + $0x69] sm:$0xff] %vm754_vm2, %v13188_v24  ;;  %24804 = vpow2.f32 %v19247_v7  ;;  %v19249_v12 = vmul.f32 -1.442695, %v29632_v36 }
 0xb30   : > { %v24787_v44 = vpop.eup %24786  ;;  %v13187_v62 = vmul.f32 %v24785_v26, %v29555_v49  ;;  %24806 = vrcp.f32 %v13097_v15  ;;  %v19248_v8 = vmul.f32 -1.442695, %v29636_v55  ;;  %v22538_v60 = vpop.f32.mrb[102].mxu0 }
 0xb31   : > { %v24789_v16 = vpop.eup %24788  ;;  %v13190_v14 = vmul.f32 %v24787_v44, %v29560_v5  ;;  %24808 = vpow2.f32 %v19246_v18  ;;  %v29644_v27 = vadd.f32 %v22538_v60, %v29525_v2  ;;  %v12869_v50 = vpop.f32.mrb[103].mxu0 }
 0xb32   : > { %v24791_v56 = vpop.eup %24790  ;;  %13576 = vst.msk [vmem:[#allocation3 + $0x61] sm:$0xff] %vm754_vm2, %v13187_v62  ;;  %v13100_v61 = vadd.f32 1.0, %v24789_v16  ;;  %24810 = vpow2.f32 %v19249_v12  ;;  %22562 = vmatprep.mubr.msk.f32.mxu1 %vm754_vm2, %v13187_v62  ;;  %v29649_v49 = vadd.f32 %v29525_v2, %v12869_v50 }
 0xb33   : > { %v24793_v11 = vpop.eup %24792  ;;  %13579 = vst.msk [vmem:[#allocation3 + $0x81] sm:$0xff] %vm754_vm2, %v13190_v14  ;;  %v13099_v41 = vadd.f32 1.0, %v24791_v56  ;;  %24812 = vpow2.f32 %v19248_v8  ;;  %v19251_v5 = vmul.f32 -1.442695, %v29644_v27  ;;  %22563 = vmatmul.mubr.msk.f32.gmra.mrb[38].mxu1 %vm754_vm2, %v13188_v24 }
 0xb34   : > { %v24795_v29 = vpop.eup %24794  ;;  %v13189_v10 = vmul.f32 %v24793_v11, %v29563_v48  ;;  %24814 = vrcp.f32 %v13100_v61  ;;  %v19250_v28 = vmul.f32 -1.442695, %v29649_v49  ;;  %v22541_v21 = vpop.f32.mrb[104].mxu0 }
 0xb35   : > { %v24797_v58 = vpop.eup %24796  ;;  %v13192_v53 = vmul.f32 %v24795_v29, %v29568_v17  ;;  %24816 = vrcp.f32 %v13099_v41  ;;  %v29658_v63 = vadd.f32 %v22541_v21, %v29525_v2  ;;  %v12879_v9 = vpop.f32.mrb[105].mxu0 }
 0xb36   : > { %v24799_v37 = vpop.eup %24798  ;;  %13578 = vst.msk [vmem:[#allocation3 + $0x79] sm:$0xff] %vm754_vm2, %v13189_v10  ;;  %v13102_v1 = vadd.f32 1.0, %v24797_v58  ;;  %24818 = vpow2.f32 %v19251_v5  ;;  %22565 = vmatprep.mubr.msk.f32.mxu1 %vm754_vm2, %v13189_v10  ;;  %v29663_v48 = vadd.f32 %v29525_v2, %v12879_v9 }
 0xb37   : > { %v24801_v35 = vpop.eup %24800  ;;  %13581 = vst.msk [vmem:[#allocation3 + $0x99] sm:$0xff] %vm754_vm2, %v13192_v53  ;;  %v13101_v20 = vadd.f32 1.0, %v24799_v37  ;;  %24820 = vpow2.f32 %v19250_v28  ;;  %v19253_v17 = vmul.f32 -1.442695, %v29658_v63  ;;  %22566 = vmatmul.mubr.msk.f32.gmra.mrb[40].mxu1 %vm754_vm2, %v13190_v14 }
 0xb38   : > { %v24803_v54 = vpop.eup %24802  ;;  %v13191_v30 = vmul.f32 %v24801_v35, %v29571_v43  ;;  %24822 = vrcp.f32 %v13102_v1  ;;  %v19252_v13 = vmul.f32 -1.442695, %v29663_v48  ;;  %v22544_v39 = vpop.f32.mrb[106].mxu0 }
 0xb39   : > { %v24805_v25 = vpop.eup %24804  ;;  %v13194_v33 = vmul.f32 %v24803_v54, %v29576_v59  ;;  %24824 = vrcp.f32 %v13101_v20  ;;  %v29672_v38 = vadd.f32 %v22544_v39, %v29525_v2  ;;  %v12889_v51 = vpop.f32.mrb[107].mxu0 }
 0xb3a   : > { %v24807_v52 = vpop.eup %24806  ;;  %13580 = vst.msk [vmem:[#allocation3 + $0x91] sm:$0xff] %vm754_vm2, %v13191_v30  ;;  %v13104_v57 = vadd.f32 1.0, %v24805_v25  ;;  %24826 = vpow2.f32 %v19253_v17  ;;  %22568 = vmatprep.mubr.msk.f32.mxu1 %vm754_vm2, %v13191_v30  ;;  %v29677_v43 = vadd.f32 %v29525_v2, %v12889_v51 }
 0xb3b   : > { %v24809_v31 = vpop.eup %24808  ;;  %13583 = vst.msk [vmem:[#allocation3 + $0xb1] sm:$0xff] %vm754_vm2, %v13194_v33  ;;  %v13193_v59 = vmul.f32 %v24807_v52, %v29579_v22  ;;  %24828 = vpow2.f32 %v19252_v13  ;;  %v19255_v32 = vmul.f32 -1.442695, %v29672_v38  ;;  %22569 = vmatmul.mubr.msk.f32.gmra.mrb[42].mxu1 %vm754_vm2, %v13192_v53 }
 0xb3c   : > { %v24811_v7 = vpop.eup %24810  ;;  %24830 = vrcp.f32 %v13104_v57  ;;  %v13103_v46 = vadd.f32 1.0, %v24809_v31  ;;  %v22547_v3 = vpop.f32.mrb[108].mxu0  ;;  %v19254_v24 = vmul.f32 -1.442695, %v29677_v43 }
 0xb3d   : > { %v24813_v19 = vpop.eup %24812  ;;  %13582 = vst.msk [vmem:[#allocation3 + $0xa9] sm:$0xff] %vm754_vm2, %v13193_v59  ;;  %v13106_v6 = vadd.f32 1.0, %v24811_v7  ;;  %24832 = vpow2.f32 %v19255_v32  ;;  %v29686_v18 = vadd.f32 %v22547_v3, %v29525_v2  ;;  %22571 = vmatprep.mubr.msk.f32.mxu1 %vm754_vm2, %v13193_v59  ;;  %v12899_v22 = vpop.f32.mrb[109].mxu0 }
 0xb3e   : > { %v24815_v47 = vpop.eup %24814  ;;  %24834 = vrcp.f32 %v13103_v46  ;;  %v13105_v15 = vadd.f32 1.0, %v24813_v19  ;;  %v29690_v26 = vadd.f32 %v29525_v2, %v12899_v22 }
 0xb3f   : > { %v24817_v12 = vpop.eup %24816  ;;  %v13196_v44 = vmul.f32 %v24815_v47, %v29585_v4  ;;  %24836 = vrcp.f32 %v13106_v6  ;;  %v19257_v62 = vmul.f32 -1.442695, %v29686_v18  ;;  %22572 = vmatmul.mubr.msk.f32.gmra.mrb[44].mxu1 %vm754_vm2, %v13194_v33 }
 0xb40   : > { %v24819_v8 = vpop.eup %24818  ;;  %v13195_v60 = vmul.f32 %v24817_v12, %v29589_v40  ;;  %24838 = vrcp.f32 %v13105_v15  ;;  %v22550_v16 = vpop.f32.mrb[110].mxu0  ;;  %v19256_v56 = vmul.f32 -1.442695, %v29690_v26 }
 0xb41   : > { %v24821_v14 = vpop.eup %24820  ;;  %13585 = vst.msk [vmem:[#allocation3 + $0xc9] sm:$0xff] %vm754_vm2, %v13196_v44  ;;  %v13108_v50 = vadd.f32 1.0, %v24819_v8  ;;  %24840 = vpow2.f32 %v19254_v24  ;;  %v29699_v61 = vadd.f32 %v22550_v16, %v29525_v2  ;;  %v12909_v4 = vpop.f32.mrb[111].mxu0  ;;  %v29761_v8 = vld [vmem:[#allocation3 + $0x19] sm:$0xff]  ;;  %v29773_v16 = vld [vmem:[#allocation3 + $0x31] sm:$0xff] }
 0xb42   : > { %v24823_v11 = vpop.eup %24822  ;;  %13584 = vst.msk [vmem:[#allocation3 + $0xc1] sm:$0xff] %vm754_vm2, %v13195_v60  ;;  %v13107_v41 = vadd.f32 1.0, %v24821_v14  ;;  %24842 = vpow2.f32 %v19257_v62  ;;  %22574 = vmatprep.mubr.msk.f32.mxu1 %vm754_vm2, %v13195_v60  ;;  %v29704_v40 = vadd.f32 %v29525_v2, %v12909_v4  ;;  %v29758_v62 = vld [vmem:[#allocation16 + $0x8] sm:$0xf]  ;;  %v29769_v60 = vld [vmem:[#allocation3 + $0x21] sm:$0xff]  ;;  %v29777_v14 = vld [vmem:[#allocation3 + $0x39] sm:$0xff] }
 0xb43   : > { %v24825_v5 = vpop.eup %24824  ;;  %v13198_v29 = vmul.f32 %v24823_v11, %v29600_v42  ;;  %24844 = vrcp.f32 %v13108_v50  ;;  %v19259_v10 = vmul.f32 -1.442695, %v29699_v61  ;;  %22575 = vmatmul.mubr.msk.f32.gmra.mrb[46].mxu1 %vm754_vm2, %v13196_v44  ;;  %v13635_v44 = vld [vmem:[#allocation3 + $0x1] sm:$0xff]  ;;  %v29785_v50 = vld [vmem:[#allocation3 + $0x51] sm:$0xff]  ;;  %v29797_v4 = vld [vmem:[#allocation3 + $0x79] sm:$0xff] }
 0xb44   : > { %v24827_v28 = vpop.eup %24826  ;;  %v13197_v21 = vmul.f32 %v24825_v5, %v29605_v0  ;;  %24846 = vrcp.f32 %v13107_v41  ;;  %v19258_v2 = vmul.f32 -1.442695, %v29704_v40  ;;  %v29801_v11 = vld [vmem:[#allocation3 + $0x81] sm:$0xff]  ;;  %v29805_v41 = vld [vmem:[#allocation3 + $0x91] sm:$0xff]  ;;  %v29813_v5 = vld [vmem:[#allocation3 + $0xa9] sm:$0xff] }
 0xb45   : > { %v24829_v58 = vpop.eup %24828  ;;  %13587 = vst.msk [vmem:[#allocation3 + $0xe1] sm:$0xff] %vm754_vm2, %v13198_v29  ;;  %v13110_v53 = vadd.f32 1.0, %v24827_v28  ;;  %24848 = vpow2.f32 %v19256_v56  ;;  %v29789_v56 = vld [vmem:[#allocation3 + $0x61] sm:$0xff] }
 0xb46   : > { %v24831_v9 = vpop.eup %24830  ;;  %13586 = vst.msk [vmem:[#allocation3 + $0xd9] sm:$0xff] %vm754_vm2, %v13197_v21  ;;  %v13109_v42 = vadd.f32 1.0, %v24829_v58  ;;  %24850 = vpow2.f32 %v19259_v10  ;;  %22577 = vmatprep.mubr.msk.f32.mxu1 %vm754_vm2, %v13197_v21 }
 0xb47   : > { %v24833_v37 = vpop.eup %24832  ;;  %v13200_v1 = vmul.f32 %v24831_v9, %v29618_v45  ;;  %24852 = vrcp.f32 %v13110_v53  ;;  %22578 = vmatmul.mubr.msk.f32.gmra.mrb[48].mxu1 %vm754_vm2, %v13198_v29  ;;  %v29817_v29 = vld [vmem:[#allocation3 + $0xb1] sm:$0xff] }
 0xb48   : > { %v24835_v0 = vpop.eup %24834  ;;  %24854 = vrcp.f32 %v13109_v42  ;;  %v13112_v35 = vadd.f32 1.0, %v24833_v37  ;;  %v29825_v28 = vld [vmem:[#allocation3 + $0xc9] sm:$0xff] }
 0xb49   : > { %v24837_v20 = vpop.eup %24836  ;;  %13589 = vst.msk [vmem:[#allocation3 + $0xf9] sm:$0xff] %vm754_vm2, %v13200_v1  ;;  %v13199_v17 = vmul.f32 %v24835_v0, %v29623_v23  ;;  %24856 = vpow2.f32 %v19258_v2  ;;  %v29821_v10 = vld [vmem:[#allocation3 + $0xc1] sm:$0xff] }
 0xb4a   : > { %v24839_v54 = vpop.eup %24838  ;;  %v13202_v30 = vmul.f32 %v24837_v20, %v29632_v36  ;;  %24858 = vrcp.f32 %v13112_v35 }
 0xb4b   : > { %v24841_v13 = vpop.eup %24840  ;;  %13588 = vst.msk [vmem:[#allocation3 + $0xf1] sm:$0xff] %vm754_vm2, %v13199_v17  ;;  %v13201_v45 = vmul.f32 %v24839_v54, %v29636_v55  ;;  %22580 = vmatprep.mubr.msk.f32.mxu1 %vm754_vm2, %v13199_v17 }
 0xb4c   : > { %v24843_v39 = vpop.eup %24842  ;;  %13591 = vst.msk [vmem:[#allocation3 + $0x111] sm:$0xff] %vm754_vm2, %v13202_v30  ;;  %v13111_v25 = vadd.f32 1.0, %v24841_v13  ;;  %22581 = vmatmul.mubr.msk.f32.gmra.mrb[50].mxu1 %vm754_vm2, %v13200_v1  ;;  %v29833_v58 = vld [vmem:[#allocation3 + $0xe1] sm:$0xff] }
 0xb4d   : > { %v24845_v33 = vpop.eup %24844  ;;  %13590 = vst.msk [vmem:[#allocation3 + $0x109] sm:$0xff] %vm754_vm2, %v13201_v45  ;;  %v13114_v23 = vadd.f32 1.0, %v24843_v39  ;;  %22583 = vmatprep.mubr.msk.f32.mxu1 %vm754_vm2, %v13201_v45  ;;  %v29829_v21 = vld [vmem:[#allocation3 + $0xd9] sm:$0xff]  ;;  %v13603_v45 = vld [vmem:[#allocation3 + $0x8] sm:$0xff]  ;;  %v29886_v39 = vld [vmem:[#allocation16 + $0xc] sm:$0xf] }
 0xb4e   : > { %v24847_v36 = vpop.eup %24846  ;;  %v13204_v51 = vmul.f32 %v24845_v33, %v29644_v27  ;;  %24860 = vrcp.f32 %v13111_v25  ;;  %v29889_v25 = vld [vmem:[#allocation3 + $0x18] sm:$0xff]  ;;  %v29897_v33 = vld [vmem:[#allocation3 + $0x20] sm:$0xff] }
 0xb4f   : > { %v24849_v52 = vpop.eup %24848  ;;  %v13203_v55 = vmul.f32 %v24847_v36, %v29649_v49  ;;  %24862 = vrcp.f32 %v13114_v23  ;;  %v29901_v23 = vld [vmem:[#allocation3 + $0x30] sm:$0xff]  ;;  %v29905_v36 = vld [vmem:[#allocation3 + $0x38] sm:$0xff] }
 0xb50   : > { %v24851_v57 = vpop.eup %24850  ;;  %13593 = vst.msk [vmem:[#allocation3 + $0x129] sm:$0xff] %vm754_vm2, %v13204_v51  ;;  %v13113_v31 = vadd.f32 1.0, %v24849_v52  ;;  %22584 = vmatmul.mubr.msk.f32.gmra.mrb[52].mxu1 %vm754_vm2, %v13202_v30  ;;  %v29841_v2 = vld [vmem:[#allocation3 + $0xf9] sm:$0xff]  ;;  %v29913_v52 = vld [vmem:[#allocation3 + $0x50] sm:$0xff] }
 0xb51   : > { %v24853_v59 = vpop.eup %24852  ;;  %13592 = vst.msk [vmem:[#allocation3 + $0x121] sm:$0xff] %vm754_vm2, %v13203_v55  ;;  %v13116_v32 = vadd.f32 1.0, %v24851_v57  ;;  %22586 = vmatprep.mubr.msk.f32.mxu1 %vm754_vm2, %v13203_v55  ;;  %v13602_v30 = vld [vmem:[#allocation3] sm:$0xff]  ;;  %v29921_v57 = vld [vmem:[#allocation3 + $0x68] sm:$0xff] }
 0xb52   : > { %v24855_v7 = vpop.eup %24854  ;;  %v13206_v27 = vmul.f32 %v24853_v59, %v29658_v63  ;;  %24864 = vrcp.f32 %v13113_v31  ;;  %v29837_v53 = vld [vmem:[#allocation3 + $0xf1] sm:$0xff]  ;;  %v29917_v55 = vld [vmem:[#allocation3 + $0x60] sm:$0xff] }
 0xb53   : > { %v24857_v46 = vpop.eup %24856  ;;  %v13205_v49 = vmul.f32 %v24855_v7, %v29663_v48  ;;  %24866 = vrcp.f32 %v13116_v32  ;;  %v29849_v42 = vld [vmem:[#allocation3 + $0x111] sm:$0xff]  ;;  %v29929_v59 = vld [vmem:[#allocation3 + $0x80] sm:$0xff] }
 0xb54   : > { %v24859_v3 = vpop.eup %24858  ;;  %13595 = vst.msk [vmem:[#allocation3 + $0x141] sm:$0xff] %vm754_vm2, %v13206_v27  ;;  %v13115_v19 = vadd.f32 1.0, %v24857_v46  ;;  %22587 = vmatmul.mubr.msk.f32.gmra.mrb[54].mxu1 %vm754_vm2, %v13204_v51  ;;  %v29845_v9 = vld [vmem:[#allocation3 + $0x109] sm:$0xff]  ;;  %v29925_v31 = vld [vmem:[#allocation3 + $0x78] sm:$0xff] }
 0xb55   : > { %13594 = vst.msk [vmem:[#allocation3 + $0x139] sm:$0xff] %vm754_vm2, %v13205_v49  ;;  %v13208_v6 = vmul.f32 %v24859_v3, %v29672_v38  ;;  %22589 = vmatprep.mubr.msk.f32.mxu1 %vm754_vm2, %v13205_v49  ;;  %v29909_v51 = vld [vmem:[#allocation3 + $0x48] sm:$0xff]  ;;  %v29933_v32 = vld [vmem:[#allocation3 + $0x90] sm:$0xff]  ;;  %v29937_v7 = vld [vmem:[#allocation3 + $0x98] sm:$0xff] }
 0xb56   : > { %24868 = vrcp.f32 %v13115_v19  ;;  %v29945_v46 = vld [vmem:[#allocation3 + $0xb0] sm:$0xff]  ;;  %v29949_v49 = vld [vmem:[#allocation3 + $0xc0] sm:$0xff]  ;;  %v29953_v3 = vld [vmem:[#allocation3 + $0xc8] sm:$0xff] }
 0xb57   : > { %13597 = vst.msk [vmem:[#allocation3 + $0x159] sm:$0xff] %vm754_vm2, %v13208_v6  ;;  %v29857_v1 = vld [vmem:[#allocation3 + $0x129] sm:$0xff]  ;;  %v29957_v19 = vld [vmem:[#allocation3 + $0xd8] sm:$0xff] }
 0xb58   : > { %v24861_v63 = vpop.eup %24860  ;;  %22590 = vmatmul.mubr.msk.f32.gmra.mrb[56].mxu1 %vm754_vm2, %v13206_v27  ;;  %v29853_v37 = vld [vmem:[#allocation3 + $0x121] sm:$0xff]  ;;  %31680 = vst [vmem:[#allocation49_spill] sm:$0xff] %v29857_v1 }
 0xb59   : > { %v24863_v48 = vpop.eup %24862  ;;  %v13207_v24 = vmul.f32 %v24861_v63, %v29677_v43  ;;  %v29941_v27 = vld [vmem:[#allocation3 + $0xa8] sm:$0xff]  ;;  %v29965_v63 = vld [vmem:[#allocation3 + $0xf0] sm:$0xff] }
 0xb5a   : > { %v13210_v22 = vmul.f32 %v24863_v48, %v29686_v18  ;;  %v29969_v48 = vld [vmem:[#allocation3 + $0xf8] sm:$0xff] }
 0xb5b   : > { %13596 = vst.msk [vmem:[#allocation3 + $0x151] sm:$0xff] %vm754_vm2, %v13207_v24  ;;  %22592 = vmatprep.mubr.msk.f32.mxu1 %vm754_vm2, %v13207_v24  ;;  %v29865_v35 = vld [vmem:[#allocation3 + $0x141] sm:$0xff] }
 0xb5c   : > { %v24865_v47 = vpop.eup %24864  ;;  %13599 = vst.msk [vmem:[#allocation3 + $0x171] sm:$0xff] %vm754_vm2, %v13210_v22  ;;  %22593 = vmatmul.mubr.msk.f32.gmra.mrb[58].mxu1 %vm754_vm2, %v13208_v6  ;;  %v29861_v0 = vld [vmem:[#allocation3 + $0x139] sm:$0xff]  ;;  %31682 = vst [vmem:[#allocation108_spill] sm:$0xff] %v29865_v35  ;;  %v29973_v24 = vld [vmem:[#allocation3 + $0x108] sm:$0xff] }
 0xb5d   : > { %v24867_v38 = vpop.eup %24866  ;;  %v13209_v15 = vmul.f32 %v24865_v47, %v29690_v26  ;;  %v13636_v26 = vld [vmem:[#allocation3 + $0x9] sm:$0xff]  ;;  %31681 = vst [vmem:[#allocation50_spill] sm:$0xff] %v29861_v0  ;;  %v29961_v6 = vld [vmem:[#allocation3 + $0xe0] sm:$0xff] }
 0xb5e   : > { %v13212_v12 = vmul.f32 %v24867_v38, %v29699_v61  ;;  %v29793_v61 = vld [vmem:[#allocation3 + $0x69] sm:$0xff]  ;;  %v29873_v17 = vld [vmem:[#allocation3 + $0x159] sm:$0xff] }
 0xb5f   : > { %13598 = vst.msk [vmem:[#allocation3 + $0x169] sm:$0xff] %vm754_vm2, %v13209_v15  ;;  %22595 = vmatprep.mubr.msk.f32.mxu1 %vm754_vm2, %v13209_v15  ;;  %31684 = vst [vmem:[#allocation110_spill] sm:$0xff] %v29873_v17  ;;  %v29981_v47 = vld [vmem:[#allocation3 + $0x120] sm:$0xff]  ;;  %v29985_v38 = vld [vmem:[#allocation3 + $0x128] sm:$0xff] }
 0xb60   : > { %v24869_v43 = vpop.eup %24868  ;;  %13601 = vst.msk [vmem:[#allocation3 + $0x189] sm:$0xff] %vm754_vm2, %v13212_v12  ;;  %22596 = vmatmul.mubr.msk.f32.gmra.mrb[60].mxu1 %vm754_vm2, %v13210_v22  ;;  %v29977_v22 = vld [vmem:[#allocation3 + $0x110] sm:$0xff]  ;;  %v29989_v15 = vld [vmem:[#allocation3 + $0x138] sm:$0xff] }
 0xb61   : > { %v13211_v18 = vmul.f32 %v24869_v43, %v29704_v40  ;;  %v29809_v40 = vld [vmem:[#allocation3 + $0x99] sm:$0xff] }
 0xb62   : > { %v29869_v20 = vld [vmem:[#allocation3 + $0x151] sm:$0xff] }
 0xb63   : > { %13600 = vst.msk [vmem:[#allocation3 + $0x181] sm:$0xff] %vm754_vm2, %v13211_v18  ;;  %22598 = vmatprep.mubr.msk.f32.mxu1 %vm754_vm2, %v13211_v18  ;;  %31683 = vst [vmem:[#allocation109_spill] sm:$0xff] %v29869_v20  ;;  %v29881_v13 = vld [vmem:[#allocation3 + $0x171] sm:$0xff] }
 0xb64   : > { %22599 = vmatmul.mubr.msk.f32.gmra.mrb[62].mxu1 %vm754_vm2, %v13212_v12  ;;  %31686 = vst [vmem:[#allocation112_spill] sm:$0xff] %v29881_v13  ;;  %v29993_v12 = vld [vmem:[#allocation3 + $0x140] sm:$0xff]  ;;  %v29997_v43 = vld [vmem:[#allocation3 + $0x150] sm:$0xff]  ;;  %v30001_v18 = vld [vmem:[#allocation3 + $0x158] sm:$0xff] }
 0xb65   : > { %22603 = vmatprep.mubr.msk.f32.mxu1 %vm754_vm2, %v13635_v44 }
 0xb66   : > { %v29877_v54 = vld [vmem:[#allocation3 + $0x169] sm:$0xff] }
 0xb67   : > { %31685 = vst [vmem:[#allocation111_spill] sm:$0xff] %v29877_v54  ;;  %v30005_v44 = vld [vmem:[#allocation3 + $0x168] sm:$0xff] }
 0xb68   : > { %22604 = vmatmul.mubr.msk.f32.vlgmr.msra.gmra.mrb[64].mxu1 %vm754_vm2, %v13636_v26  ;;  %v14317_v26 = vld [vmem:[#allocation3 + $0x2] sm:$0xff] }
 0xb69   : > { %22652 = vmatpush3.msk.msra.mxu1 %vm5113_vm5, %v29596_v34  ;;  %22606 = vmatprep.mubr.msk.f32.mxu1 %vm754_vm2, %v29761_v8  ;;  %v29781_v34 = vld [vmem:[#allocation3 + $0x49] sm:$0xff] }
 0xb6a   : > { %22701 = vmatprep.subr.msk.mxu1 %vm5113_vm5, %v29758_v62 }
 0xb6c   : > { %22607 = vmatmul.mubr.msk.f32.gmra.mrb[66].mxu1 %vm754_vm2, %v29769_v60 }
 0xb6d   : > { %22609 = vmatprep.mubr.msk.f32.mxu1 %vm754_vm2, %v29773_v16 }
 0xb70   : > { %22610 = vmatmul.mubr.msk.f32.gmra.mrb[68].mxu1 %vm754_vm2, %v29777_v14 }
 0xb71   : > { %22612 = vmatprep.mubr.msk.f32.mxu1 %vm754_vm2, %v29781_v34 }
 0xb74   : > { %22613 = vmatmul.mubr.msk.f32.gmra.mrb[70].mxu1 %vm754_vm2, %v29785_v50 }
 0xb75   : > { %22615 = vmatprep.mubr.msk.f32.mxu1 %vm754_vm2, %v29789_v56 }
 0xb78   : > { %22616 = vmatmul.mubr.msk.f32.gmra.mrb[72].mxu1 %vm754_vm2, %v29793_v61 }
 0xb79   : > { %22618 = vmatprep.mubr.msk.f32.mxu1 %vm754_vm2, %v29797_v4 }
 0xb7c   : > { %22619 = vmatmul.mubr.msk.f32.gmra.mrb[74].mxu1 %vm754_vm2, %v29801_v11 }
 0xb7d   : > { %22621 = vmatprep.mubr.msk.f32.mxu1 %vm754_vm2, %v29805_v41 }
 0xb80   : > { %22622 = vmatmul.mubr.msk.f32.gmra.mrb[76].mxu1 %vm754_vm2, %v29809_v40 }
 0xb81   : > { %22624 = vmatprep.mubr.msk.f32.mxu1 %vm754_vm2, %v29813_v5 }
 0xb84   : > { %22625 = vmatmul.mubr.msk.f32.gmra.mrb[78].mxu1 %vm754_vm2, %v29817_v29 }
 0xb85   : > { %22627 = vmatprep.mubr.msk.f32.mxu1 %vm754_vm2, %v29821_v10 }
 0xb88   : > { %22628 = vmatmul.mubr.msk.f32.gmra.mrb[80].mxu1 %vm754_vm2, %v29825_v28 }
 0xb89   : > { %22630 = vmatprep.mubr.msk.f32.mxu1 %vm754_vm2, %v29829_v21 }
 0xb8c   : > { %22631 = vmatmul.mubr.msk.f32.gmra.mrb[82].mxu1 %vm754_vm2, %v29833_v58 }
 0xb8d   : > { %22633 = vmatprep.mubr.msk.f32.mxu1 %vm754_vm2, %v29837_v53 }
 0xb90   : > { %22634 = vmatmul.mubr.msk.f32.gmra.mrb[84].mxu1 %vm754_vm2, %v29841_v2 }
 0xb91   : > { %22636 = vmatprep.mubr.msk.f32.mxu1 %vm754_vm2, %v29845_v9 }
 0xb94   : > { %22637 = vmatmul.mubr.msk.f32.gmra.mrb[86].mxu1 %vm754_vm2, %v29849_v42 }
 0xb95   : > { %22639 = vmatprep.mubr.msk.f32.mxu1 %vm754_vm2, %v29853_v37 }
 0xb98   : > { %22640 = vmatmul.mubr.msk.f32.gmra.mrb[88].mxu1 %vm754_vm2, %v29857_v1 }
 0xb99   : > { %22642 = vmatprep.mubr.msk.f32.mxu1 %vm754_vm2, %v29861_v0 }
 0xb9c   : > { %22643 = vmatmul.mubr.msk.f32.gmra.mrb[90].mxu1 %vm754_vm2, %v29865_v35 }
 0xb9d   : > { %22645 = vmatprep.mubr.msk.f32.mxu1 %vm754_vm2, %v29869_v20 }
 0xba0   : > { %22646 = vmatmul.mubr.msk.f32.gmra.mrb[92].mxu1 %vm754_vm2, %v29873_v17 }
 0xba1   : > { %22648 = vmatprep.mubr.msk.f32.mxu1 %vm754_vm2, %v29877_v54  ;;  %v30025_v54 = vld [vmem:[#allocation3 + $0x22] sm:$0xff] }
 0xba2   : > { %31688 = vst [vmem:[#allocation114_spill] sm:$0xff] %v30025_v54 }
 0xba4   : > { %22649 = vmatmul.mubr.msk.f32.gmra.mrb[94].mxu1 %vm754_vm2, %v29881_v13  ;;  %v30017_v13 = vld [vmem:[#allocation3 + $0x1a] sm:$0xff] }
 0xba5   : > { %22653 = vmatprep.mubr.msk.f32.mxu1 %vm754_vm2, %v13602_v30  ;;  %v14318_v30 = vld [vmem:[#allocation3 + $0xa] sm:$0xff]  ;;  %31687 = vst [vmem:[#allocation113_spill] sm:$0xff] %v30017_v13 }
 0xba8   : > { %22654 = vmatmul.mubr.msk.f32.vlgmr.msra.gmra.mrb[64].mxu1 %vm754_vm2, %v13603_v45  ;;  %v30014_v45 = vld [vmem:[#allocation16 + $0x10] sm:$0xf] }
 0xba9   : > { %22702 = vmatpush3.msk.msra.mxu1 %vm5113_vm5, %v29758_v62  ;;  %22656 = vmatprep.mubr.msk.f32.mxu1 %vm754_vm2, %v29889_v25  ;;  %v30009_v62 = vld [vmem:[#allocation3 + $0x170] sm:$0xff] }
 0xbaa   : > { %22751 = vmatprep.subr.msk.mxu1 %vm5113_vm5, %v29886_v39 }
 0xbac   : > { %22657 = vmatmul.mubr.msk.f32.gmra.mrb[66].mxu1 %vm754_vm2, %v29897_v33 }
 0xbad   : > { %22659 = vmatprep.mubr.msk.f32.mxu1 %vm754_vm2, %v29901_v23 }
 0xbb0   : > { %22660 = vmatmul.mubr.msk.f32.gmra.mrb[68].mxu1 %vm754_vm2, %v29905_v36 }
 0xbb1   : > { %22662 = vmatprep.mubr.msk.f32.mxu1 %vm754_vm2, %v29909_v51 }
 0xbb4   : > { %22663 = vmatmul.mubr.msk.f32.gmra.mrb[70].mxu1 %vm754_vm2, %v29913_v52 }
 0xbb5   : > { %22665 = vmatprep.mubr.msk.f32.mxu1 %vm754_vm2, %v29917_v55 }
 0xbb8   : > { %22666 = vmatmul.mubr.msk.f32.gmra.mrb[72].mxu1 %vm754_vm2, %v29921_v57 }
 0xbb9   : > { %22668 = vmatprep.mubr.msk.f32.mxu1 %vm754_vm2, %v29925_v31 }
 0xbbc   : > { %22669 = vmatmul.mubr.msk.f32.gmra.mrb[74].mxu1 %vm754_vm2, %v29929_v59 }
 0xbbd   : > { %22671 = vmatprep.mubr.msk.f32.mxu1 %vm754_vm2, %v29933_v32 }
 0xbc0   : > { %22672 = vmatmul.mubr.msk.f32.gmra.mrb[76].mxu1 %vm754_vm2, %v29937_v7 }
 0xbc1   : > { %22674 = vmatprep.mubr.msk.f32.mxu1 %vm754_vm2, %v29941_v27 }
 0xbc4   : > { %22675 = vmatmul.mubr.msk.f32.gmra.mrb[78].mxu1 %vm754_vm2, %v29945_v46 }
 0xbc5   : > { %22677 = vmatprep.mubr.msk.f32.mxu1 %vm754_vm2, %v29949_v49 }
 0xbc8   : > { %22678 = vmatmul.mubr.msk.f32.gmra.mrb[80].mxu1 %vm754_vm2, %v29953_v3 }
 0xbc9   : > { %22680 = vmatprep.mubr.msk.f32.mxu1 %vm754_vm2, %v29957_v19 }
 0xbcc   : > { %22681 = vmatmul.mubr.msk.f32.gmra.mrb[82].mxu1 %vm754_vm2, %v29961_v6 }
 0xbcd   : > { %22683 = vmatprep.mubr.msk.f32.mxu1 %vm754_vm2, %v29965_v63 }
 0xbd0   : > { %22684 = vmatmul.mubr.msk.f32.gmra.mrb[84].mxu1 %vm754_vm2, %v29969_v48 }
 0xbd1   : > { %22686 = vmatprep.mubr.msk.f32.mxu1 %vm754_vm2, %v29973_v24 }
 0xbd4   : > { %22687 = vmatmul.mubr.msk.f32.gmra.mrb[86].mxu1 %vm754_vm2, %v29977_v22 }
 0xbd5   : > { %22689 = vmatprep.mubr.msk.f32.mxu1 %vm754_vm2, %v29981_v47 }
 0xbd8   : > { %22690 = vmatmul.mubr.msk.f32.gmra.mrb[88].mxu1 %vm754_vm2, %v29985_v38 }
 0xbd9   : > { %22692 = vmatprep.mubr.msk.f32.mxu1 %vm754_vm2, %v29989_v15 }
 0xbdc   : > { %22693 = vmatmul.mubr.msk.f32.gmra.mrb[90].mxu1 %vm754_vm2, %v29993_v12 }
 0xbdd   : > { %22695 = vmatprep.mubr.msk.f32.mxu1 %vm754_vm2, %v29997_v43 }
 0xbe0   : > { %22696 = vmatmul.mubr.msk.f32.gmra.mrb[92].mxu1 %vm754_vm2, %v30001_v18 }
 0xbe1   : > { %22698 = vmatprep.mubr.msk.f32.mxu1 %vm754_vm2, %v30005_v44 }
 0xbe4   : > { %22699 = vmatmul.mubr.msk.f32.gmra.mrb[94].mxu1 %vm754_vm2, %v30009_v62 }
 0xbe5   : > { %22703 = vmatprep.mubr.msk.f32.mxu1 %vm754_vm2, %v14317_v26  ;;  %v30029_v26 = vld [vmem:[#allocation3 + $0x32] sm:$0xff] }
 0xbe6   : > { %31689 = vst [vmem:[#allocation115_spill] sm:$0xff] %v30029_v26 }
 0xbe8   : > { %22704 = vmatmul.mubr.msk.f32.vlgmr.msra.gmra.mrb[64].mxu1 %vm754_vm2, %v14318_v30  ;;  %v30033_v30 = vld [vmem:[#allocation3 + $0x3a] sm:$0xff] }
 0xbe9   : > { %22752 = vmatpush3.msk.msra.mxu1 %vm5113_vm5, %v29886_v39  ;;  %22706 = vmatprep.mubr.msk.f32.mxu1 %vm754_vm2, %v30017_v13  ;;  %31690 = vst [vmem:[#allocation116_spill] sm:$0xff] %v30033_v30  ;;  %v30037_v39 = vld [vmem:[#allocation3 + $0x4a] sm:$0xff]  ;;  %v30041_v13 = vld [vmem:[#allocation3 + $0x52] sm:$0xff] }
 0xbea   : > { %22801 = vmatprep.subr.msk.mxu1 %vm5113_vm5, %v30014_v45  ;;  %31691 = vst [vmem:[#allocation117_spill] sm:$0xff] %v30037_v39  ;;  %31692 = vst [vmem:[#allocation118_spill] sm:$0xff] %v30041_v13 }
 0xbec   : > { %22707 = vmatmul.mubr.msk.f32.gmra.mrb[66].mxu1 %vm754_vm2, %v30025_v54  ;;  %v30045_v54 = vld [vmem:[#allocation3 + $0x62] sm:$0xff] }
 0xbed   : > { %22709 = vmatprep.mubr.msk.f32.mxu1 %vm754_vm2, %v30029_v26  ;;  %31693 = vst [vmem:[#allocation119_spill] sm:$0xff] %v30045_v54  ;;  %v30049_v26 = vld [vmem:[#allocation3 + $0x6a] sm:$0xff] }
 0xbee   : > { %31694 = vst [vmem:[#allocation120_spill] sm:$0xff] %v30049_v26 }
 0xbf0   : > { %22710 = vmatmul.mubr.msk.f32.gmra.mrb[68].mxu1 %vm754_vm2, %v30033_v30  ;;  %v30053_v30 = vld [vmem:[#allocation3 + $0x7a] sm:$0xff] }
 0xbf1   : > { %22712 = vmatprep.mubr.msk.f32.mxu1 %vm754_vm2, %v30037_v39  ;;  %31695 = vst [vmem:[#allocation121_spill] sm:$0xff] %v30053_v30  ;;  %v30057_v39 = vld [vmem:[#allocation3 + $0x82] sm:$0xff] }
 0xbf2   : > { %31696 = vst [vmem:[#allocation122_spill] sm:$0xff] %v30057_v39 }
 0xbf4   : > { %22713 = vmatmul.mubr.msk.f32.gmra.mrb[70].mxu1 %vm754_vm2, %v30041_v13  ;;  %v30061_v13 = vld [vmem:[#allocation3 + $0x92] sm:$0xff] }
 0xbf5   : > { %22715 = vmatprep.mubr.msk.f32.mxu1 %vm754_vm2, %v30045_v54  ;;  %31697 = vst [vmem:[#allocation123_spill] sm:$0xff] %v30061_v13  ;;  %v30065_v54 = vld [vmem:[#allocation3 + $0x9a] sm:$0xff] }
 0xbf6   : > { %31698 = vst [vmem:[#allocation72_spill] sm:$0xff] %v30065_v54 }
 0xbf8   : > { %22716 = vmatmul.mubr.msk.f32.gmra.mrb[72].mxu1 %vm754_vm2, %v30049_v26  ;;  %v30069_v26 = vld [vmem:[#allocation3 + $0xaa] sm:$0xff] }
 0xbf9   : > { %22718 = vmatprep.mubr.msk.f32.mxu1 %vm754_vm2, %v30053_v30  ;;  %31699 = vst [vmem:[#allocation43_spill] sm:$0xff] %v30069_v26  ;;  %v30073_v30 = vld [vmem:[#allocation3 + $0xb2] sm:$0xff] }
 0xbfa   : > { %31700 = vst [vmem:[#allocation44_spill] sm:$0xff] %v30073_v30 }
 0xbfc   : > { %22719 = vmatmul.mubr.msk.f32.gmra.mrb[74].mxu1 %vm754_vm2, %v30057_v39  ;;  %v30077_v39 = vld [vmem:[#allocation3 + $0xc2] sm:$0xff] }
 0xbfd   : > { %22721 = vmatprep.mubr.msk.f32.mxu1 %vm754_vm2, %v30061_v13  ;;  %31701 = vst [vmem:[#allocation68_spill] sm:$0xff] %v30077_v39  ;;  %v30081_v13 = vld [vmem:[#allocation3 + $0xca] sm:$0xff] }
 0xbfe   : > { %31702 = vst [vmem:[#allocation69_spill] sm:$0xff] %v30081_v13 }
 0xc00   : > { %22722 = vmatmul.mubr.msk.f32.gmra.mrb[76].mxu1 %vm754_vm2, %v30065_v54  ;;  %v30085_v54 = vld [vmem:[#allocation3 + $0xda] sm:$0xff] }
 0xc01   : > { %22724 = vmatprep.mubr.msk.f32.mxu1 %vm754_vm2, %v30069_v26  ;;  %31703 = vst [vmem:[#allocation70_spill] sm:$0xff] %v30085_v54  ;;  %v30089_v26 = vld [vmem:[#allocation3 + $0xe2] sm:$0xff] }
 0xc02   : > { %31704 = vst [vmem:[#allocation54_spill] sm:$0xff] %v30089_v26 }
 0xc04   : > { %22725 = vmatmul.mubr.msk.f32.gmra.mrb[78].mxu1 %vm754_vm2, %v30073_v30  ;;  %v30093_v30 = vld [vmem:[#allocation3 + $0xf2] sm:$0xff] }
 0xc05   : > { %22727 = vmatprep.mubr.msk.f32.mxu1 %vm754_vm2, %v30077_v39  ;;  %31705 = vst [vmem:[#allocation56_spill] sm:$0xff] %v30093_v30  ;;  %v30097_v39 = vld [vmem:[#allocation3 + $0xfa] sm:$0xff] }
 0xc06   : > { %31706 = vst [vmem:[#allocation58_spill] sm:$0xff] %v30097_v39 }
 0xc08   : > { %22728 = vmatmul.mubr.msk.f32.gmra.mrb[80].mxu1 %vm754_vm2, %v30081_v13  ;;  %v30101_v13 = vld [vmem:[#allocation3 + $0x10a] sm:$0xff] }
 0xc09   : > { %22730 = vmatprep.mubr.msk.f32.mxu1 %vm754_vm2, %v30085_v54  ;;  %31707 = vst [vmem:[#allocation74_spill] sm:$0xff] %v30101_v13  ;;  %v30105_v54 = vld [vmem:[#allocation3 + $0x112] sm:$0xff] }
 0xc0a   : > { %31708 = vst [vmem:[#allocation65_spill] sm:$0xff] %v30105_v54 }
 0xc0c   : > { %22731 = vmatmul.mubr.msk.f32.gmra.mrb[82].mxu1 %vm754_vm2, %v30089_v26  ;;  %v30109_v26 = vld [vmem:[#allocation3 + $0x122] sm:$0xff] }
 0xc0d   : > { %22733 = vmatprep.mubr.msk.f32.mxu1 %vm754_vm2, %v30093_v30  ;;  %31709 = vst [vmem:[#allocation71_spill] sm:$0xff] %v30109_v26  ;;  %v30113_v30 = vld [vmem:[#allocation3 + $0x12a] sm:$0xff] }
 0xc0e   : > { %31710 = vst [vmem:[#allocation45_spill] sm:$0xff] %v30113_v30 }
 0xc10   : > { %22734 = vmatmul.mubr.msk.f32.gmra.mrb[84].mxu1 %vm754_vm2, %v30097_v39  ;;  %v30117_v39 = vld [vmem:[#allocation3 + $0x13a] sm:$0xff] }
 0xc11   : > { %22736 = vmatprep.mubr.msk.f32.mxu1 %vm754_vm2, %v30101_v13  ;;  %31711 = vst [vmem:[#allocation46_spill] sm:$0xff] %v30117_v39  ;;  %v30121_v13 = vld [vmem:[#allocation3 + $0x142] sm:$0xff] }
 0xc12   : > { %31712 = vst [vmem:[#allocation47_spill] sm:$0xff] %v30121_v13 }
 0xc14   : > { %22737 = vmatmul.mubr.msk.f32.gmra.mrb[86].mxu1 %vm754_vm2, %v30105_v54  ;;  %v30125_v54 = vld [vmem:[#allocation3 + $0x152] sm:$0xff] }
 0xc15   : > { %22739 = vmatprep.mubr.msk.f32.mxu1 %vm754_vm2, %v30109_v26  ;;  %v30129_v26 = vld [vmem:[#allocation3 + $0x15a] sm:$0xff] }
 0xc16   : > { %31713 = vst [vmem:[#allocation48_spill] sm:$0xff] %v30129_v26 }
 0xc18   : > { %22740 = vmatmul.mubr.msk.f32.gmra.mrb[88].mxu1 %vm754_vm2, %v30113_v30  ;;  %v30133_v30 = vld [vmem:[#allocation3 + $0x16a] sm:$0xff] }
 0xc19   : > { %22742 = vmatprep.mubr.msk.f32.mxu1 %vm754_vm2, %v30117_v39  ;;  %v30137_v39 = vld [vmem:[#allocation3 + $0x172] sm:$0xff] }
 0xc1c   : > { %22743 = vmatmul.mubr.msk.f32.gmra.mrb[90].mxu1 %vm754_vm2, %v30121_v13  ;;  %v15520_v13 = vld [vmem:[#allocation16 + $0x14] sm:$0xf] }
 0xc1d   : > { %22745 = vmatprep.mubr.msk.f32.mxu1 %vm754_vm2, %v30125_v54 }
 0xc20   : > { %22746 = vmatmul.mubr.msk.f32.gmra.mrb[92].mxu1 %vm754_vm2, %v30129_v26 }
 0xc21   : > { %22748 = vmatprep.mubr.msk.f32.mxu1 %vm754_vm2, %v30133_v30 }
 0xc24   : > { %22749 = vmatmul.mubr.msk.f32.gmra.mrb[94].mxu1 %vm754_vm2, %v30137_v39 }
 0xc25   : > { %22753 = vmatprep.mubr.msk.f32.mxu1 %vm754_vm2, %v29889_v25  ;;  %v30204_v25 = vld [vmem:[#allocation3 + $0x180] sm:$0xff] }
 0xc28   : > { %22754 = vmatmul.mubr.msk.f32.vlgmr.msra.gmra.mrb[64].mxu1 %vm754_vm2, %v29897_v33  ;;  %v30208_v33 = vld [vmem:[#allocation3 + $0x188] sm:$0xff] }
 0xc29   : > { %22802 = vmatpush3.msk.msra.mxu1 %vm5113_vm5, %v30014_v45  ;;  %22756 = vmatprep.mubr.msk.f32.mxu1 %vm754_vm2, %v29901_v23  ;;  %v15910_v45 = vld [vmem:[#allocation16 + $0x18] sm:$0xf] }
 0xc2a   : > { %22851 = vmatprep.subr.msk.mxu1 %vm5113_vm5, %v15520_v13 }
 0xc2c   : > { %22757 = vmatmul.mubr.msk.f32.gmra.mrb[66].mxu1 %vm754_vm2, %v29905_v36 }
 0xc2d   : > { %22759 = vmatprep.mubr.msk.f32.mxu1 %vm754_vm2, %v29909_v51 }
 0xc30   : > { %22760 = vmatmul.mubr.msk.f32.gmra.mrb[68].mxu1 %vm754_vm2, %v29913_v52 }
 0xc31   : > { %22762 = vmatprep.mubr.msk.f32.mxu1 %vm754_vm2, %v29917_v55 }
 0xc34   : > { %22763 = vmatmul.mubr.msk.f32.gmra.mrb[70].mxu1 %vm754_vm2, %v29921_v57 }
 0xc35   : > { %22765 = vmatprep.mubr.msk.f32.mxu1 %vm754_vm2, %v29925_v31 }
 0xc38   : > { %22766 = vmatmul.mubr.msk.f32.gmra.mrb[72].mxu1 %vm754_vm2, %v29929_v59 }
 0xc39   : > { %22768 = vmatprep.mubr.msk.f32.mxu1 %vm754_vm2, %v29933_v32 }
 0xc3c   : > { %22769 = vmatmul.mubr.msk.f32.gmra.mrb[74].mxu1 %vm754_vm2, %v29937_v7 }
 0xc3d   : > { %22771 = vmatprep.mubr.msk.f32.mxu1 %vm754_vm2, %v29941_v27 }
 0xc40   : > { %22772 = vmatmul.mubr.msk.f32.gmra.mrb[76].mxu1 %vm754_vm2, %v29945_v46 }
 0xc41   : > { %22774 = vmatprep.mubr.msk.f32.mxu1 %vm754_vm2, %v29949_v49 }
 0xc44   : > { %22775 = vmatmul.mubr.msk.f32.gmra.mrb[78].mxu1 %vm754_vm2, %v29953_v3 }
 0xc45   : > { %22777 = vmatprep.mubr.msk.f32.mxu1 %vm754_vm2, %v29957_v19 }
 0xc48   : > { %22778 = vmatmul.mubr.msk.f32.gmra.mrb[80].mxu1 %vm754_vm2, %v29961_v6 }
 0xc49   : > { %22780 = vmatprep.mubr.msk.f32.mxu1 %vm754_vm2, %v29965_v63 }
 0xc4c   : > { %22781 = vmatmul.mubr.msk.f32.gmra.mrb[82].mxu1 %vm754_vm2, %v29969_v48 }
 0xc4d   : > { %22783 = vmatprep.mubr.msk.f32.mxu1 %vm754_vm2, %v29973_v24 }
 0xc50   : > { %22784 = vmatmul.mubr.msk.f32.gmra.mrb[84].mxu1 %vm754_vm2, %v29977_v22 }
 0xc51   : > { %22786 = vmatprep.mubr.msk.f32.mxu1 %vm754_vm2, %v29981_v47 }
 0xc54   : > { %22787 = vmatmul.mubr.msk.f32.gmra.mrb[86].mxu1 %vm754_vm2, %v29985_v38 }
 0xc55   : > { %22789 = vmatprep.mubr.msk.f32.mxu1 %vm754_vm2, %v29989_v15 }
 0xc58   : > { %22790 = vmatmul.mubr.msk.f32.gmra.mrb[88].mxu1 %vm754_vm2, %v29993_v12 }
 0xc59   : > { %22792 = vmatprep.mubr.msk.f32.mxu1 %vm754_vm2, %v29997_v43 }
 0xc5c   : > { %22793 = vmatmul.mubr.msk.f32.gmra.mrb[90].mxu1 %vm754_vm2, %v30001_v18 }
 0xc5d   : > { %22795 = vmatprep.mubr.msk.f32.mxu1 %vm754_vm2, %v30005_v44 }
 0xc60   : > { %22796 = vmatmul.mubr.msk.f32.gmra.mrb[92].mxu1 %vm754_vm2, %v30009_v62 }
 0xc61   : > { %22798 = vmatprep.mubr.msk.f32.mxu1 %vm754_vm2, %v30204_v25 }
 0xc64   : > { %22799 = vmatmul.mubr.msk.f32.gmra.mrb[94].mxu1 %vm754_vm2, %v30208_v33 }
 0xc65   : > { %22803 = vmatprep.mubr.msk.f32.mxu1 %vm754_vm2, %v29761_v8  ;;  %v31714_v8 = vld [vmem:[#allocation111_spill] sm:$0xff] }
 0xc68   : > { %22804 = vmatmul.mubr.msk.f32.vlgmr.msra.gmra.mrb[64].mxu1 %vm754_vm2, %v29769_v60  ;;  %v31715_v60 = vld [vmem:[#allocation112_spill] sm:$0xff] }
 0xc69   : > { %22852 = vmatpush3.msk.msra.mxu1 %vm5113_vm5, %v15520_v13  ;;  %22806 = vmatprep.mubr.msk.f32.mxu1 %vm754_vm2, %v29773_v16  ;;  %v30274_v13 = vld [vmem:[#allocation3 + $0x181] sm:$0xff] }
 0xc6a   : > { %22901 = vmatprep.subr.msk.mxu1 %vm5113_vm5, %v15910_v45  ;;  %31716 = vst [vmem:[#allocation76_spill] sm:$0xff] %v30274_v13 }
 0xc6c   : > { %22807 = vmatmul.mubr.msk.f32.gmra.mrb[66].mxu1 %vm754_vm2, %v29777_v14 }
 0xc6d   : > { %22809 = vmatprep.mubr.msk.f32.mxu1 %vm754_vm2, %v29781_v34 }
 0xc70   : > { %22810 = vmatmul.mubr.msk.f32.gmra.mrb[68].mxu1 %vm754_vm2, %v29785_v50 }
 0xc71   : > { %22812 = vmatprep.mubr.msk.f32.mxu1 %vm754_vm2, %v29789_v56 }
 0xc74   : > { %22813 = vmatmul.mubr.msk.f32.gmra.mrb[70].mxu1 %vm754_vm2, %v29793_v61 }
 0xc75   : > { %22815 = vmatprep.mubr.msk.f32.mxu1 %vm754_vm2, %v29797_v4 }
 0xc78   : > { %22816 = vmatmul.mubr.msk.f32.gmra.mrb[72].mxu1 %vm754_vm2, %v29801_v11 }
 0xc79   : > { %22818 = vmatprep.mubr.msk.f32.mxu1 %vm754_vm2, %v29805_v41 }
 0xc7c   : > { %22819 = vmatmul.mubr.msk.f32.gmra.mrb[74].mxu1 %vm754_vm2, %v29809_v40 }
 0xc7d   : > { %22821 = vmatprep.mubr.msk.f32.mxu1 %vm754_vm2, %v29813_v5 }
 0xc80   : > { %22822 = vmatmul.mubr.msk.f32.gmra.mrb[76].mxu1 %vm754_vm2, %v29817_v29 }
 0xc81   : > { %22824 = vmatprep.mubr.msk.f32.mxu1 %vm754_vm2, %v29821_v10 }
 0xc84   : > { %22825 = vmatmul.mubr.msk.f32.gmra.mrb[78].mxu1 %vm754_vm2, %v29825_v28 }
 0xc85   : > { %22827 = vmatprep.mubr.msk.f32.mxu1 %vm754_vm2, %v29829_v21 }
 0xc88   : > { %22828 = vmatmul.mubr.msk.f32.gmra.mrb[80].mxu1 %vm754_vm2, %v29833_v58 }
 0xc89   : > { %22830 = vmatprep.mubr.msk.f32.mxu1 %vm754_vm2, %v29837_v53 }
 0xc8c   : > { %22831 = vmatmul.mubr.msk.f32.gmra.mrb[82].mxu1 %vm754_vm2, %v29841_v2 }
 0xc8d   : > { %22833 = vmatprep.mubr.msk.f32.mxu1 %vm754_vm2, %v29845_v9 }
 0xc90   : > { %22834 = vmatmul.mubr.msk.f32.gmra.mrb[84].mxu1 %vm754_vm2, %v29849_v42 }
 0xc91   : > { %22836 = vmatprep.mubr.msk.f32.mxu1 %vm754_vm2, %v29853_v37 }
 0xc94   : > { %22837 = vmatmul.mubr.msk.f32.gmra.mrb[86].mxu1 %vm754_vm2, %v29857_v1  ;;  %v31728_v1 = vld [vmem:[#allocation123_spill] sm:$0xff] }
 0xc95   : > { %22839 = vmatprep.mubr.msk.f32.mxu1 %vm754_vm2, %v29861_v0  ;;  %v30278_v0 = vld [vmem:[#allocation3 + $0x189] sm:$0xff] }
 0xc96   : > { %31717 = vst [vmem:[#allocation77_spill] sm:$0xff] %v30278_v0 }
 0xc98   : > { %22840 = vmatmul.mubr.msk.f32.gmra.mrb[88].mxu1 %vm754_vm2, %v29865_v35  ;;  %v31719_v35 = vld [vmem:[#allocation114_spill] sm:$0xff] }
 0xc99   : > { %22842 = vmatprep.mubr.msk.f32.mxu1 %vm754_vm2, %v29869_v20  ;;  %v31718_v20 = vld [vmem:[#allocation113_spill] sm:$0xff] }
 0xc9c   : > { %22843 = vmatmul.mubr.msk.f32.gmra.mrb[90].mxu1 %vm754_vm2, %v29873_v17  ;;  %v16300_v17 = vld [vmem:[#allocation16 + $0x1c] sm:$0xf] }
 0xc9d   : > { %22845 = vmatprep.mubr.msk.f32.mxu1 %vm754_vm2, %v31714_v8  ;;  %v31722_v8 = vld [vmem:[#allocation117_spill] sm:$0xff] }
 0xca0   : > { %22846 = vmatmul.mubr.msk.f32.gmra.mrb[92].mxu1 %vm754_vm2, %v31715_v60  ;;  %v31720_v60 = vld [vmem:[#allocation115_spill] sm:$0xff] }
 0xca1   : > { %22848 = vmatprep.mubr.msk.f32.mxu1 %vm754_vm2, %v30274_v13  ;;  %v31721_v13 = vld [vmem:[#allocation116_spill] sm:$0xff] }
 0xca4   : > { %22849 = vmatmul.mubr.msk.f32.gmra.mrb[94].mxu1 %vm754_vm2, %v30278_v0  ;;  %v31723_v0 = vld [vmem:[#allocation118_spill] sm:$0xff] }
 0xca5   : > { %22853 = vmatprep.mubr.msk.f32.mxu1 %vm754_vm2, %v31718_v20  ;;  %v31724_v20 = vld [vmem:[#allocation119_spill] sm:$0xff] }
 0xca8   : > { %22854 = vmatmul.mubr.msk.f32.vlgmr.msra.gmra.mrb[64].mxu1 %vm754_vm2, %v31719_v35  ;;  %v31725_v35 = vld [vmem:[#allocation120_spill] sm:$0xff] }
 0xca9   : > { %22902 = vmatpush3.msk.msra.mxu1 %vm5113_vm5, %v15910_v45  ;;  %22856 = vmatprep.mubr.msk.f32.mxu1 %vm754_vm2, %v31720_v60  ;;  %v31726_v45 = vld [vmem:[#allocation121_spill] sm:$0xff]  ;;  %v31727_v60 = vld [vmem:[#allocation122_spill] sm:$0xff] }
 0xcaa   : > { %22951 = vmatprep.subr.msk.mxu1 %vm5113_vm5, %v16300_v17 }
 0xcac   : > { %22857 = vmatmul.mubr.msk.f32.gmra.mrb[66].mxu1 %vm754_vm2, %v31721_v13  ;;  %v31729_v13 = vld [vmem:[#allocation72_spill] sm:$0xff] }
 0xcad   : > { %22859 = vmatprep.mubr.msk.f32.mxu1 %vm754_vm2, %v31722_v8  ;;  %v31730_v8 = vld [vmem:[#allocation43_spill] sm:$0xff] }
 0xcb0   : > { %22860 = vmatmul.mubr.msk.f32.gmra.mrb[68].mxu1 %vm754_vm2, %v31723_v0  ;;  %v31731_v0 = vld [vmem:[#allocation44_spill] sm:$0xff] }
 0xcb1   : > { %22862 = vmatprep.mubr.msk.f32.mxu1 %vm754_vm2, %v31724_v20  ;;  %v31732_v20 = vld [vmem:[#allocation68_spill] sm:$0xff] }
 0xcb4   : > { %22863 = vmatmul.mubr.msk.f32.gmra.mrb[70].mxu1 %vm754_vm2, %v31725_v35  ;;  %v31733_v35 = vld [vmem:[#allocation69_spill] sm:$0xff] }
 0xcb5   : > { %22865 = vmatprep.mubr.msk.f32.mxu1 %vm754_vm2, %v31726_v45  ;;  %v31734_v45 = vld [vmem:[#allocation70_spill] sm:$0xff] }
 0xcb8   : > { %22866 = vmatmul.mubr.msk.f32.gmra.mrb[72].mxu1 %vm754_vm2, %v31727_v60  ;;  %v31735_v60 = vld [vmem:[#allocation54_spill] sm:$0xff] }
 0xcb9   : > { %22868 = vmatprep.mubr.msk.f32.mxu1 %vm754_vm2, %v31728_v1  ;;  %v31736_v1 = vld [vmem:[#allocation56_spill] sm:$0xff] }
 0xcbc   : > { %22869 = vmatmul.mubr.msk.f32.gmra.mrb[74].mxu1 %vm754_vm2, %v31729_v13  ;;  %v31737_v13 = vld [vmem:[#allocation58_spill] sm:$0xff] }
 0xcbd   : > { %22871 = vmatprep.mubr.msk.f32.mxu1 %vm754_vm2, %v31730_v8  ;;  %v31738_v8 = vld [vmem:[#allocation74_spill] sm:$0xff] }
 0xcc0   : > { %22872 = vmatmul.mubr.msk.f32.gmra.mrb[76].mxu1 %vm754_vm2, %v31731_v0  ;;  %v31739_v0 = vld [vmem:[#allocation65_spill] sm:$0xff] }
 0xcc1   : > { %22874 = vmatprep.mubr.msk.f32.mxu1 %vm754_vm2, %v31732_v20  ;;  %v31740_v20 = vld [vmem:[#allocation71_spill] sm:$0xff] }
 0xcc4   : > { %22875 = vmatmul.mubr.msk.f32.gmra.mrb[78].mxu1 %vm754_vm2, %v31733_v35  ;;  %v31741_v35 = vld [vmem:[#allocation45_spill] sm:$0xff] }
 0xcc5   : > { %22877 = vmatprep.mubr.msk.f32.mxu1 %vm754_vm2, %v31734_v45  ;;  %v31742_v45 = vld [vmem:[#allocation46_spill] sm:$0xff] }
 0xcc8   : > { %22878 = vmatmul.mubr.msk.f32.gmra.mrb[80].mxu1 %vm754_vm2, %v31735_v60  ;;  %v31743_v60 = vld [vmem:[#allocation47_spill] sm:$0xff] }
 0xcc9   : > { %22880 = vmatprep.mubr.msk.f32.mxu1 %vm754_vm2, %v31736_v1 }
 0xccc   : > { %22881 = vmatmul.mubr.msk.f32.gmra.mrb[82].mxu1 %vm754_vm2, %v31737_v13 }
 0xccd   : > { %22883 = vmatprep.mubr.msk.f32.mxu1 %vm754_vm2, %v31738_v8 }
 0xcd0   : > { %22884 = vmatmul.mubr.msk.f32.gmra.mrb[84].mxu1 %vm754_vm2, %v31739_v0 }
 0xcd1   : > { %22886 = vmatprep.mubr.msk.f32.mxu1 %vm754_vm2, %v31740_v20  ;;  %v30344_v20 = vld [vmem:[#allocation3 + $0x182] sm:$0xff] }
 0xcd4   : > { %22887 = vmatmul.mubr.msk.f32.gmra.mrb[86].mxu1 %vm754_vm2, %v31741_v35 }
 0xcd5   : > { %22889 = vmatprep.mubr.msk.f32.mxu1 %vm754_vm2, %v31742_v45  ;;  %v30348_v45 = vld [vmem:[#allocation3 + $0x18a] sm:$0xff] }
 0xcd8   : > { %22890 = vmatmul.mubr.msk.f32.gmra.mrb[88].mxu1 %vm754_vm2, %v31743_v60 }
 0xcd9   : > { %22892 = vmatprep.mubr.msk.f32.mxu1 %vm754_vm2, %v30125_v54 }
 0xcdc   : > { %22893 = vmatmul.mubr.msk.f32.gmra.mrb[90].mxu1 %vm754_vm2, %v30129_v26  ;;  %v16690_v26 = vld [vmem:[#allocation16 + $0x20] sm:$0xf] }
 0xcdd   : > { %22895 = vmatprep.mubr.msk.f32.mxu1 %vm754_vm2, %v30133_v30 }
 0xce0   : > { %22896 = vmatmul.mubr.msk.f32.gmra.mrb[92].mxu1 %vm754_vm2, %v30137_v39 }
 0xce1   : > { %22898 = vmatprep.mubr.msk.f32.mxu1 %vm754_vm2, %v30344_v20 }
 0xce4   : > { %22899 = vmatmul.mubr.msk.f32.gmra.mrb[94].mxu1 %vm754_vm2, %v30348_v45 }
 0xce5   : > { %22903 = vmatprep.mubr.msk.f32.mxu1 %vm754_vm2, %v29901_v23  ;;  %v15908_v23 = vld [vmem:[#allocation3 + $0x1a0] sm:$0xff] }
 0xce8   : > { %22904 = vmatmul.mubr.msk.f32.vlgmr.msra.gmra.mrb[64].mxu1 %vm754_vm2, %v29905_v36  ;;  %v17310_v36 = vld [vmem:[#allocation25] sm:$0xf] }
 0xce9   : > { %22952 = vmatpush3.msk.msra.mxu1 %vm5113_vm5, %v16300_v17  ;;  %22906 = vmatprep.mubr.msk.f32.mxu1 %vm754_vm2, %v29909_v51  ;;  %v15907_v17 = vld [vmem:[#allocation3 + $0x198] sm:$0xff]  ;;  %v31763_v51 = vld [vmem:[#allocation43_spill] sm:$0xff] }
 0xcea   : > { %23001 = vmatprep.subr.msk.mxu1 %vm5113_vm5, %v16690_v26 }
 0xcec   : > { %22907 = vmatmul.mubr.msk.f32.gmra.mrb[66].mxu1 %vm754_vm2, %v29913_v52  ;;  %v31764_v52 = vld [vmem:[#allocation44_spill] sm:$0xff] }
 0xced   : > { %22909 = vmatprep.mubr.msk.f32.mxu1 %vm754_vm2, %v29917_v55  ;;  %v31765_v55 = vld [vmem:[#allocation68_spill] sm:$0xff] }
 0xcf0   : > { %22910 = vmatmul.mubr.msk.f32.gmra.mrb[68].mxu1 %vm754_vm2, %v29921_v57  ;;  %v31766_v57 = vld [vmem:[#allocation69_spill] sm:$0xff] }
 0xcf1   : > { %22912 = vmatprep.mubr.msk.f32.mxu1 %vm754_vm2, %v29925_v31  ;;  %v31767_v31 = vld [vmem:[#allocation70_spill] sm:$0xff] }
 0xcf4   : > { %22913 = vmatmul.mubr.msk.f32.gmra.mrb[70].mxu1 %vm754_vm2, %v29929_v59  ;;  %v31768_v59 = vld [vmem:[#allocation54_spill] sm:$0xff] }
 0xcf5   : > { %22915 = vmatprep.mubr.msk.f32.mxu1 %vm754_vm2, %v29933_v32  ;;  %v31769_v32 = vld [vmem:[#allocation71_spill] sm:$0xff] }
 0xcf8   : > { %22916 = vmatmul.mubr.msk.f32.gmra.mrb[72].mxu1 %vm754_vm2, %v29937_v7  ;;  %v31770_v7 = vld [vmem:[#allocation46_spill] sm:$0xff] }
 0xcf9   : > { %22918 = vmatprep.mubr.msk.f32.mxu1 %vm754_vm2, %v29941_v27  ;;  %v16688_v27 = vld [vmem:[#allocation3 + $0x1a2] sm:$0xff] }
 0xcfc   : > { %22919 = vmatmul.mubr.msk.f32.gmra.mrb[74].mxu1 %vm754_vm2, %v29945_v46 }
 0xcfd   : > { %22921 = vmatprep.mubr.msk.f32.mxu1 %vm754_vm2, %v29949_v49 }
 0xd00   : > { %22922 = vmatmul.mubr.msk.f32.gmra.mrb[76].mxu1 %vm754_vm2, %v29953_v3 }
 0xd01   : > { %22924 = vmatprep.mubr.msk.f32.mxu1 %vm754_vm2, %v29957_v19 }
 0xd04   : > { %22925 = vmatmul.mubr.msk.f32.gmra.mrb[78].mxu1 %vm754_vm2, %v29961_v6 }
 0xd05   : > { %22927 = vmatprep.mubr.msk.f32.mxu1 %vm754_vm2, %v29965_v63 }
 0xd08   : > { %22928 = vmatmul.mubr.msk.f32.gmra.mrb[80].mxu1 %vm754_vm2, %v29969_v48 }
 0xd09   : > { %22930 = vmatprep.mubr.msk.f32.mxu1 %vm754_vm2, %v29973_v24 }
 0xd0c   : > { %22931 = vmatmul.mubr.msk.f32.gmra.mrb[82].mxu1 %vm754_vm2, %v29977_v22 }
 0xd0d   : > { %22933 = vmatprep.mubr.msk.f32.mxu1 %vm754_vm2, %v29981_v47 }
 0xd10   : > { %22934 = vmatmul.mubr.msk.f32.gmra.mrb[84].mxu1 %vm754_vm2, %v29985_v38 }
 0xd11   : > { %22936 = vmatprep.mubr.msk.f32.mxu1 %vm754_vm2, %v29989_v15 }
 0xd14   : > { %22937 = vmatmul.mubr.msk.f32.gmra.mrb[86].mxu1 %vm754_vm2, %v29993_v12 }
 0xd15   : > { %22939 = vmatprep.mubr.msk.f32.mxu1 %vm754_vm2, %v29997_v43 }
 0xd18   : > { %22940 = vmatmul.mubr.msk.f32.gmra.mrb[88].mxu1 %vm754_vm2, %v30001_v18 }
 0xd19   : > { %22942 = vmatprep.mubr.msk.f32.mxu1 %vm754_vm2, %v30005_v44 }
 0xd1c   : > { %22943 = vmatmul.mubr.msk.f32.gmra.mrb[90].mxu1 %vm754_vm2, %v30009_v62 }
 0xd1d   : > { %22945 = vmatprep.mubr.msk.f32.mxu1 %vm754_vm2, %v30204_v25 }
 0xd20   : > { %22946 = vmatmul.mubr.msk.f32.gmra.mrb[92].mxu1 %vm754_vm2, %v30208_v33 }
 0xd21   : > { %22948 = vmatprep.mubr.msk.f32.mxu1 %vm754_vm2, %v15907_v17 }
 0xd24   : > { %22949 = vmatmul.mubr.msk.f32.gmra.mrb[94].mxu1 %vm754_vm2, %v15908_v23 }
 0xd25   : > { %22953 = vmatprep.mubr.msk.f32.mxu1 %vm754_vm2, %v29773_v16  ;;  %v31744_v16 = vld [vmem:[#allocation49_spill] sm:$0xff] }
 0xd28   : > { %22954 = vmatmul.mubr.msk.f32.vlgmr.msra.gmra.mrb[64].mxu1 %vm754_vm2, %v29777_v14  ;;  %v31745_v14 = vld [vmem:[#allocation50_spill] sm:$0xff] }
 0xd29   : > { %23002 = vmatpush3.msk.msra.mxu1 %vm5113_vm5, %v16690_v26  ;;  %22956 = vmatprep.mubr.msk.f32.mxu1 %vm754_vm2, %v29781_v34  ;;  %v31746_v34 = vld [vmem:[#allocation108_spill] sm:$0xff] }
 0xd2a   : > { %23051 = vmatprep.subr.msk.mxu1 %vm5113_vm5, %v17310_v36 }
 0xd2c   : > { %22957 = vmatmul.mubr.msk.f32.gmra.mrb[66].mxu1 %vm754_vm2, %v29785_v50  ;;  %v31747_v50 = vld [vmem:[#allocation109_spill] sm:$0xff] }
 0xd2d   : > { %22959 = vmatprep.mubr.msk.f32.mxu1 %vm754_vm2, %v29789_v56  ;;  %v31748_v56 = vld [vmem:[#allocation110_spill] sm:$0xff] }
 0xd30   : > { %22960 = vmatmul.mubr.msk.f32.gmra.mrb[68].mxu1 %vm754_vm2, %v29793_v61  ;;  %v31749_v61 = vld [vmem:[#allocation111_spill] sm:$0xff] }
 0xd31   : > { %22962 = vmatprep.mubr.msk.f32.mxu1 %vm754_vm2, %v29797_v4  ;;  %v31750_v4 = vld [vmem:[#allocation112_spill] sm:$0xff] }
 0xd34   : > { %22963 = vmatmul.mubr.msk.f32.gmra.mrb[70].mxu1 %vm754_vm2, %v29801_v11  ;;  %v31751_v11 = vld [vmem:[#allocation76_spill] sm:$0xff] }
 0xd35   : > { %22965 = vmatprep.mubr.msk.f32.mxu1 %vm754_vm2, %v29805_v41  ;;  %v16297_v41 = vld [vmem:[#allocation3 + $0x199] sm:$0xff] }
 0xd38   : > { %22966 = vmatmul.mubr.msk.f32.gmra.mrb[72].mxu1 %vm754_vm2, %v29809_v40  ;;  %v31752_v40 = vld [vmem:[#allocation77_spill] sm:$0xff] }
 0xd39   : > { %22968 = vmatprep.mubr.msk.f32.mxu1 %vm754_vm2, %v29813_v5  ;;  %v16298_v5 = vld [vmem:[#allocation3 + $0x1a1] sm:$0xff] }
 0xd3c   : > { %22969 = vmatmul.mubr.msk.f32.gmra.mrb[74].mxu1 %vm754_vm2, %v29817_v29  ;;  %v31753_v29 = vld [vmem:[#allocation115_spill] sm:$0xff] }
 0xd3d   : > { %22971 = vmatprep.mubr.msk.f32.mxu1 %vm754_vm2, %v29821_v10  ;;  %v31754_v10 = vld [vmem:[#allocation116_spill] sm:$0xff] }
 0xd40   : > { %22972 = vmatmul.mubr.msk.f32.gmra.mrb[76].mxu1 %vm754_vm2, %v29825_v28  ;;  %v31755_v28 = vld [vmem:[#allocation117_spill] sm:$0xff] }
 0xd41   : > { %22974 = vmatprep.mubr.msk.f32.mxu1 %vm754_vm2, %v29829_v21  ;;  %v31756_v21 = vld [vmem:[#allocation118_spill] sm:$0xff] }
 0xd44   : > { %22975 = vmatmul.mubr.msk.f32.gmra.mrb[78].mxu1 %vm754_vm2, %v29833_v58  ;;  %v31757_v58 = vld [vmem:[#allocation119_spill] sm:$0xff] }
 0xd45   : > { %22977 = vmatprep.mubr.msk.f32.mxu1 %vm754_vm2, %v29837_v53  ;;  %v31758_v53 = vld [vmem:[#allocation120_spill] sm:$0xff] }
 0xd48   : > { %22978 = vmatmul.mubr.msk.f32.gmra.mrb[80].mxu1 %vm754_vm2, %v29841_v2  ;;  %v31759_v2 = vld [vmem:[#allocation121_spill] sm:$0xff] }
 0xd49   : > { %22980 = vmatprep.mubr.msk.f32.mxu1 %vm754_vm2, %v29845_v9  ;;  %v31760_v9 = vld [vmem:[#allocation122_spill] sm:$0xff] }
 0xd4c   : > { %22981 = vmatmul.mubr.msk.f32.gmra.mrb[82].mxu1 %vm754_vm2, %v29849_v42  ;;  %v31761_v42 = vld [vmem:[#allocation123_spill] sm:$0xff] }
 0xd4d   : > { %22983 = vmatprep.mubr.msk.f32.mxu1 %vm754_vm2, %v29853_v37  ;;  %v31762_v37 = vld [vmem:[#allocation72_spill] sm:$0xff] }
 0xd50   : > { %22984 = vmatmul.mubr.msk.f32.gmra.mrb[84].mxu1 %vm754_vm2, %v31744_v16 }
 0xd51   : > { %22986 = vmatprep.mubr.msk.f32.mxu1 %vm754_vm2, %v31745_v14 }
 0xd54   : > { %22987 = vmatmul.mubr.msk.f32.gmra.mrb[86].mxu1 %vm754_vm2, %v31746_v34 }
 0xd55   : > { %22989 = vmatprep.mubr.msk.f32.mxu1 %vm754_vm2, %v31747_v50 }
 0xd58   : > { %22990 = vmatmul.mubr.msk.f32.gmra.mrb[88].mxu1 %vm754_vm2, %v31748_v56 }
 0xd59   : > { %22992 = vmatprep.mubr.msk.f32.mxu1 %vm754_vm2, %v31749_v61 }
 0xd5c   : > { %22993 = vmatmul.mubr.msk.f32.gmra.mrb[90].mxu1 %vm754_vm2, %v31750_v4 }
 0xd5d   : > { %22995 = vmatprep.mubr.msk.f32.mxu1 %vm754_vm2, %v31751_v11 }
 0xd60   : > { %22996 = vmatmul.mubr.msk.f32.gmra.mrb[92].mxu1 %vm754_vm2, %v31752_v40 }
 0xd61   : > { %22998 = vmatprep.mubr.msk.f32.mxu1 %vm754_vm2, %v16297_v41 }
 0xd64   : > { %22999 = vmatmul.mubr.msk.f32.gmra.mrb[94].mxu1 %vm754_vm2, %v16298_v5 }
 0xd65   : > { %23003 = vmatprep.mubr.msk.f32.mxu1 %vm754_vm2, %v31753_v29 }
 0xd68   : > { %23004 = vmatmul.mubr.msk.f32.vlgmr.msra.gmra.mrb[64].mxu1 %vm754_vm2, %v31754_v10 }
 0xd69   : > { %23006 = vmatprep.mubr.msk.f32.mxu1 %vm754_vm2, %v31755_v28  ;;  %23052 = vmatpush3.msk.msra.mxu1 %vm5113_vm5, %v17310_v36 }
 0xd6c   : > { %23007 = vmatmul.mubr.msk.f32.gmra.mrb[66].mxu1 %vm754_vm2, %v31756_v21 }
 0xd6d   : > { %23009 = vmatprep.mubr.msk.f32.mxu1 %vm754_vm2, %v31757_v58 }
 0xd70   : > { %23010 = vmatmul.mubr.msk.f32.gmra.mrb[68].mxu1 %vm754_vm2, %v31758_v53 }
 0xd71   : > { %23012 = vmatprep.mubr.msk.f32.mxu1 %vm754_vm2, %v31759_v2 }
 0xd74   : > { %23013 = vmatmul.mubr.msk.f32.gmra.mrb[70].mxu1 %vm754_vm2, %v31760_v9 }
 0xd75   : > { %23015 = vmatprep.mubr.msk.f32.mxu1 %vm754_vm2, %v31761_v42 }
 0xd78   : > { %23016 = vmatmul.mubr.msk.f32.gmra.mrb[72].mxu1 %vm754_vm2, %v31762_v37 }
 0xd79   : > { %23018 = vmatprep.mubr.msk.f32.mxu1 %vm754_vm2, %v31763_v51 }
 0xd7c   : > { %23019 = vmatmul.mubr.msk.f32.gmra.mrb[74].mxu1 %vm754_vm2, %v31764_v52 }
 0xd7d   : > { %23021 = vmatprep.mubr.msk.f32.mxu1 %vm754_vm2, %v31765_v55 }
 0xd80   : > { %23022 = vmatmul.mubr.msk.f32.gmra.mrb[76].mxu1 %vm754_vm2, %v31766_v57 }
 0xd81   : > { %23024 = vmatprep.mubr.msk.f32.mxu1 %vm754_vm2, %v31767_v31 }
 0xd84   : > { %23025 = vmatmul.mubr.msk.f32.gmra.mrb[78].mxu1 %vm754_vm2, %v31768_v59 }
 0xd85   : > { %23027 = vmatprep.mubr.msk.f32.mxu1 %vm754_vm2, %v31736_v1  ;;  %v31771_v1 = vld [vmem:[#allocation48_spill] sm:$0xff] }
 0xd88   : > { %23028 = vmatmul.mubr.msk.f32.gmra.mrb[80].mxu1 %vm754_vm2, %v31737_v13 }
 0xd89   : > { %23030 = vmatprep.mubr.msk.f32.mxu1 %vm754_vm2, %v31738_v8 }
 0xd8c   : > { %23031 = vmatmul.mubr.msk.f32.gmra.mrb[82].mxu1 %vm754_vm2, %v31739_v0  ;;  %v16687_v0 = vld [vmem:[#allocation3 + $0x19a] sm:$0xff] }
 0xd8d   : > { %23033 = vmatprep.mubr.msk.f32.mxu1 %vm754_vm2, %v31769_v32 }
 0xd90   : > { %23034 = vmatmul.mubr.msk.f32.gmra.mrb[84].mxu1 %vm754_vm2, %v31741_v35 }
 0xd91   : > { %23036 = vmatprep.mubr.msk.f32.mxu1 %vm754_vm2, %v31770_v7 }
 0xd94   : > { %23037 = vmatmul.mubr.msk.f32.gmra.mrb[86].mxu1 %vm754_vm2, %v31743_v60 }
 0xd95   : > { %23039 = vmatprep.mubr.msk.f32.mxu1 %vm754_vm2, %v30125_v54  ;;  %v30543_v54 = vld [vmem:[#allocation18] ss:$0 sm:$0xff] }
 0xd98   : > { %23040 = vmatmul.mubr.msk.f32.gmra.mrb[88].mxu1 %vm754_vm2, %v31771_v1 }
 0xd99   : > { %23042 = vmatprep.mubr.msk.f32.mxu1 %vm754_vm2, %v30133_v30 }
 0xd9c   : > { %23043 = vmatmul.mubr.msk.f32.gmra.mrb[90].mxu1 %vm754_vm2, %v30137_v39 }
 0xd9d   : > { %23045 = vmatprep.mubr.msk.f32.mxu1 %vm754_vm2, %v30344_v20 }
 0xda0   : > { %23046 = vmatmul.mubr.msk.f32.gmra.mrb[92].mxu1 %vm754_vm2, %v30348_v45 }
 0xda1   : > { %23048 = vmatprep.mubr.msk.f32.mxu1 %vm754_vm2, %v16687_v0 }
 0xda4   : > { %23049 = vmatmul.mubr.msk.f32.gmra.mrb[94].mxu1 %vm754_vm2, %v16688_v27 }
 0xe3b   : > { %v23005_v46 = vpop.f32.mrb[64].mxu1 }
 0xe3c   : > { %v30546_v49 = vadd.f32 %v23005_v46, %v30543_v54  ;;  %v16856_v3 = vpop.f32.mrb[65].mxu1 }
 0xe3d   : > { %v30549_v19 = vadd.f32 %v30543_v54, %v16856_v3 }
 0xe3e   : > { %v19592_v6 = vmul.f32 -1.442695, %v30546_v49 }
 0xe3f   : > { %v19591_v63 = vmul.f32 -1.442695, %v30549_v19  ;;  %v23008_v48 = vpop.f32.mrb[66].mxu1 }
 0xe40   : > { %24870 = vpow2.f32 %v19592_v6  ;;  %v30554_v24 = vadd.f32 %v23008_v48, %v30543_v54  ;;  %v16866_v22 = vpop.f32.mrb[67].mxu1 }
 0xe41   : > { %24872 = vpow2.f32 %v19591_v63  ;;  %v30557_v47 = vadd.f32 %v30543_v54, %v16866_v22 }
 0xe42   : > { %v19594_v38 = vmul.f32 -1.442695, %v30554_v24 }
 0xe43   : > { %v19593_v15 = vmul.f32 -1.442695, %v30557_v47  ;;  %v23011_v12 = vpop.f32.mrb[68].mxu1 }
 0xe44   : > { %24874 = vpow2.f32 %v19594_v38  ;;  %v30562_v43 = vadd.f32 %v23011_v12, %v30543_v54  ;;  %v16876_v18 = vpop.f32.mrb[69].mxu1 }
 0xe45   : > { %24876 = vpow2.f32 %v19593_v15  ;;  %v30565_v44 = vadd.f32 %v30543_v54, %v16876_v18 }
 0xe46   : > { %v19596_v62 = vmul.f32 -1.442695, %v30562_v43 }
 0xe47   : > { %v19595_v26 = vmul.f32 -1.442695, %v30565_v44  ;;  %v23014_v30 = vpop.f32.mrb[70].mxu1 }
 0xe48   : > { %24878 = vpow2.f32 %v19596_v62  ;;  %v30570_v39 = vadd.f32 %v23014_v30, %v30543_v54  ;;  %v16886_v25 = vpop.f32.mrb[71].mxu1 }
 0xe49   : > { %24880 = vpow2.f32 %v19595_v26  ;;  %v30573_v33 = vadd.f32 %v30543_v54, %v16886_v25 }
 0xe4a   : > { %v24871_v8 = vpop.eup %24870  ;;  %v19598_v60 = vmul.f32 -1.442695, %v30570_v39 }
 0xe4b   : > { %v24873_v13 = vpop.eup %24872  ;;  %v17183_v20 = vadd.f32 1.0, %v24871_v8  ;;  %v19597_v35 = vmul.f32 -1.442695, %v30573_v33  ;;  %v23017_v45 = vpop.f32.mrb[72].mxu1 }
 0xe4c   : > { %v17182_v17 = vadd.f32 1.0, %v24873_v13  ;;  %24882 = vpow2.f32 %v19598_v60  ;;  %v30578_v23 = vadd.f32 %v23017_v45, %v30543_v54  ;;  %v16896_v36 = vpop.f32.mrb[73].mxu1 }
 0xe4d   : > { %24884 = vrcp.f32 %v17183_v20  ;;  %v30581_v16 = vadd.f32 %v30543_v54, %v16896_v36 }
 0xe4e   : > { %v24875_v14 = vpop.eup %24874  ;;  %24886 = vrcp.f32 %v17182_v17  ;;  %v19600_v34 = vmul.f32 -1.442695, %v30578_v23 }
 0xe4f   : > { %v24877_v50 = vpop.eup %24876  ;;  %v17185_v56 = vadd.f32 1.0, %v24875_v14  ;;  %24888 = vpow2.f32 %v19597_v35  ;;  %v19599_v61 = vmul.f32 -1.442695, %v30581_v16  ;;  %v23020_v4 = vpop.f32.mrb[74].mxu1 }
 0xe50   : > { %v17184_v11 = vadd.f32 1.0, %v24877_v50  ;;  %24890 = vpow2.f32 %v19600_v34  ;;  %v30586_v41 = vadd.f32 %v23020_v4, %v30543_v54  ;;  %v16906_v40 = vpop.f32.mrb[75].mxu1 }
 0xe51   : > { %24892 = vrcp.f32 %v17185_v56  ;;  %v30589_v5 = vadd.f32 %v30543_v54, %v16906_v40 }
 0xe52   : > { %v24879_v29 = vpop.eup %24878  ;;  %24894 = vrcp.f32 %v17184_v11  ;;  %v19602_v10 = vmul.f32 -1.442695, %v30586_v41 }
 0xe53   : > { %v24881_v28 = vpop.eup %24880  ;;  %v17187_v21 = vadd.f32 1.0, %v24879_v29  ;;  %24896 = vpow2.f32 %v19599_v61  ;;  %v19601_v58 = vmul.f32 -1.442695, %v30589_v5  ;;  %v23023_v53 = vpop.f32.mrb[76].mxu1 }
 0xe54   : > { %v17186_v2 = vadd.f32 1.0, %v24881_v28  ;;  %24898 = vpow2.f32 %v19602_v10  ;;  %v30594_v9 = vadd.f32 %v23023_v53, %v30543_v54  ;;  %v16916_v42 = vpop.f32.mrb[77].mxu1 }
 0xe55   : > { %24900 = vrcp.f32 %v17187_v21  ;;  %v30597_v37 = vadd.f32 %v30543_v54, %v16916_v42 }
 0xe56   : > { %v24883_v51 = vpop.eup %24882  ;;  %24902 = vrcp.f32 %v17186_v2  ;;  %v19604_v52 = vmul.f32 -1.442695, %v30594_v9 }
 0xe57   : > { %v24885_v55 = vpop.eup %24884  ;;  %v17189_v57 = vadd.f32 1.0, %v24883_v51  ;;  %24904 = vpow2.f32 %v19601_v58  ;;  %v19603_v31 = vmul.f32 -1.442695, %v30597_v37  ;;  %v23026_v59 = vpop.f32.mrb[78].mxu1 }
 0xe58   : > { %v24887_v32 = vpop.eup %24886  ;;  %24906 = vpow2.f32 %v19604_v52  ;;  %v30602_v7 = vadd.f32 %v23026_v59, %v30543_v54  ;;  %v16926_v1 = vpop.f32.mrb[79].mxu1  ;;  %v17279_v6 = vmul.f32 %v24885_v55, %v30546_v49 }
 0xe59   : > { %v24889_v0 = vpop.eup %24888  ;;  %v17278_v27 = vmul.f32 %v24887_v32, %v30549_v19  ;;  %v30606_v46 = vadd.f32 %v30543_v54, %v16926_v1  ;;  %24908 = vpow2.f32 %v19603_v31 }
 0xe5a   : > { %v24891_v3 = vpop.eup %24890  ;;  %v17188_v63 = vadd.f32 1.0, %v24889_v0  ;;  %v19606_v48 = vmul.f32 -1.442695, %v30602_v7  ;;  %24910 = vrcp.f32 %v17189_v57 }
 0xe5b   : > { %v24893_v22 = vpop.eup %24892  ;;  %v17191_v38 = vadd.f32 1.0, %v24891_v3  ;;  %v19605_v15 = vmul.f32 -1.442695, %v30606_v46  ;;  %v23029_v12 = vpop.f32.mrb[80].mxu1  ;;  %23053 = vmatprep.mubr.msk.f32.mxu1 %vm754_vm2, %v17278_v27 }
 0xe5c   : > { %v24895_v18 = vpop.eup %24894  ;;  %24912 = vrcp.f32 %v17188_v63  ;;  %v30613_v19 = vadd.f32 %v23029_v12, %v30543_v54  ;;  %v16936_v62 = vpop.f32.mrb[81].mxu1  ;;  %23054 = vmatmul.mubr.msk.f32.vlgmr.msra.gmra.mrb[32].mxu1 %vm754_vm2, %v17279_v6  ;;  %v17281_v8 = vmul.f32 %v24893_v22, %v30554_v24 }
 0xe5d   : > { %v24897_v49 = vpop.eup %24896  ;;  %v17280_v26 = vmul.f32 %v24895_v18, %v30557_v47  ;;  %24914 = vrcp.f32 %v17191_v38  ;;  %v30618_v30 = vadd.f32 %v30543_v54, %v16936_v62 }
 0xe5e   : > { %v24899_v25 = vpop.eup %24898  ;;  %v17190_v60 = vadd.f32 1.0, %v24897_v49  ;;  %24916 = vpow2.f32 %v19606_v48  ;;  %v19608_v13 = vmul.f32 -1.442695, %v30613_v19 }
 0xe5f   : > { %v24901_v20 = vpop.eup %24900  ;;  %v17193_v35 = vadd.f32 1.0, %v24899_v25  ;;  %24918 = vpow2.f32 %v19605_v15  ;;  %v19607_v45 = vmul.f32 -1.442695, %v30618_v30  ;;  %v23032_v17 = vpop.f32.mrb[82].mxu1  ;;  %23056 = vmatprep.mubr.msk.f32.mxu1 %vm754_vm2, %v17280_v26 }
 0xe60   : > { %v24903_v47 = vpop.eup %24902  ;;  %24920 = vrcp.f32 %v17190_v60  ;;  %v30625_v36 = vadd.f32 %v23032_v17, %v30543_v54  ;;  %v16946_v14 = vpop.f32.mrb[83].mxu1  ;;  %23057 = vmatmul.mubr.msk.f32.gmra.mrb[34].mxu1 %vm754_vm2, %v17281_v8  ;;  %v17283_v61 = vmul.f32 %v24901_v20, %v30562_v43 }
 0xe61   : > { %v24905_v24 = vpop.eup %24904  ;;  %v17282_v34 = vmul.f32 %v24903_v47, %v30565_v44  ;;  %24922 = vrcp.f32 %v17193_v35  ;;  %v30630_v50 = vadd.f32 %v30543_v54, %v16946_v14 }
 0xe62   : > { %v24907_v56 = vpop.eup %24906  ;;  %v17192_v4 = vadd.f32 1.0, %v24905_v24  ;;  %24924 = vpow2.f32 %v19608_v13  ;;  %v19610_v11 = vmul.f32 -1.442695, %v30625_v36 }
 0xe63   : > { %v17195_v40 = vadd.f32 1.0, %v24907_v56  ;;  %24926 = vpow2.f32 %v19607_v45  ;;  %v23035_v29 = vpop.f32.mrb[84].mxu1  ;;  %23059 = vmatprep.mubr.msk.f32.mxu1 %vm754_vm2, %v17282_v34  ;;  %v24909_v10 = vpop.eup %24908  ;;  %v19609_v44 = vmul.f32 -1.442695, %v30630_v50 }
 0xe64   : > { %24928 = vrcp.f32 %v17192_v4  ;;  %v30637_v28 = vadd.f32 %v23035_v29, %v30543_v54  ;;  %v16956_v21 = vpop.f32.mrb[85].mxu1  ;;  %23060 = vmatmul.mubr.msk.f32.gmra.mrb[36].mxu1 %vm754_vm2, %v17283_v61  ;;  %v24911_v43 = vpop.eup %24910  ;;  %v17194_v58 = vadd.f32 1.0, %v24909_v10 }
 0xe65   : > { %24930 = vrcp.f32 %v17195_v40  ;;  %v30641_v53 = vadd.f32 %v30543_v54, %v16956_v21  ;;  %v17285_v59 = vmul.f32 %v24911_v43, %v30570_v39 }
 0xe66   : > { %v24913_v2 = vpop.eup %24912  ;;  %24932 = vpow2.f32 %v19610_v11  ;;  %v19612_v42 = vmul.f32 -1.442695, %v30637_v28 }
 0xe67   : > { %v24915_v51 = vpop.eup %24914  ;;  %v17284_v52 = vmul.f32 %v24913_v2, %v30573_v33  ;;  %24934 = vrcp.f32 %v17194_v58  ;;  %v19611_v55 = vmul.f32 -1.442695, %v30641_v53  ;;  %v23038_v57 = vpop.f32.mrb[86].mxu1 }
 0xe68   : > { %v24917_v31 = vpop.eup %24916  ;;  %24936 = vpow2.f32 %v19609_v44  ;;  %v30648_v32 = vadd.f32 %v23038_v57, %v30543_v54  ;;  %v16966_v1 = vpop.f32.mrb[87].mxu1  ;;  %v17287_v12 = vmul.f32 %v24915_v51, %v30578_v23 }
 0xe69   : > { %v24919_v0 = vpop.eup %24918  ;;  %v17197_v27 = vadd.f32 1.0, %v24917_v31  ;;  %24938 = vpow2.f32 %v19612_v42  ;;  %23062 = vmatprep.mubr.msk.f32.mxu1 %vm754_vm2, %v17284_v52  ;;  %v30652_v3 = vadd.f32 %v30543_v54, %v16966_v1 }
 0xe6a   : > { %v24921_v33 = vpop.eup %24920  ;;  %v17196_v6 = vadd.f32 1.0, %v24919_v0  ;;  %24940 = vpow2.f32 %v19611_v55  ;;  %v19614_v63 = vmul.f32 -1.442695, %v30648_v32  ;;  %23063 = vmatmul.mubr.msk.f32.gmra.mrb[38].mxu1 %vm754_vm2, %v17285_v59 }
 0xe6b   : > { %v24923_v39 = vpop.eup %24922  ;;  %v17286_v48 = vmul.f32 %v24921_v33, %v30581_v16  ;;  %24942 = vrcp.f32 %v17197_v27  ;;  %v19613_v22 = vmul.f32 -1.442695, %v30652_v3  ;;  %v23041_v38 = vpop.f32.mrb[88].mxu1 }
 0xe6c   : > { %v24925_v15 = vpop.eup %24924  ;;  %24944 = vrcp.f32 %v17196_v6  ;;  %v30660_v18 = vadd.f32 %v23041_v38, %v30543_v54  ;;  %v16976_v62 = vpop.f32.mrb[89].mxu1  ;;  %v17289_v17 = vmul.f32 %v24923_v39, %v30586_v41 }
 0xe6d   : > { %v24927_v49 = vpop.eup %24926  ;;  %v17199_v26 = vadd.f32 1.0, %v24925_v15  ;;  %24946 = vpow2.f32 %v19614_v63  ;;  %23065 = vmatprep.mubr.msk.f32.mxu1 %vm754_vm2, %v17286_v48  ;;  %v30664_v25 = vadd.f32 %v30543_v54, %v16976_v62 }
 0xe6e   : > { %v24929_v16 = vpop.eup %24928  ;;  %v17198_v8 = vadd.f32 1.0, %v24927_v49  ;;  %24948 = vpow2.f32 %v19613_v22  ;;  %v19616_v60 = vmul.f32 -1.442695, %v30660_v18  ;;  %23066 = vmatmul.mubr.msk.f32.gmra.mrb[40].mxu1 %vm754_vm2, %v17287_v12 }
 0xe6f   : > { %v24931_v23 = vpop.eup %24930  ;;  %v17288_v13 = vmul.f32 %v24929_v16, %v30589_v5  ;;  %24950 = vrcp.f32 %v17199_v26  ;;  %v19615_v20 = vmul.f32 -1.442695, %v30664_v25  ;;  %v23044_v35 = vpop.f32.mrb[90].mxu1 }
 0xe70   : > { %v24933_v45 = vpop.eup %24932  ;;  %24952 = vrcp.f32 %v17198_v8  ;;  %v30672_v47 = vadd.f32 %v23044_v35, %v30543_v54  ;;  %v16986_v14 = vpop.f32.mrb[91].mxu1  ;;  %v17291_v11 = vmul.f32 %v24931_v23, %v30594_v9 }
 0xe71   : > { %v24935_v24 = vpop.eup %24934  ;;  %v17201_v34 = vadd.f32 1.0, %v24933_v45  ;;  %24954 = vpow2.f32 %v19616_v60  ;;  %23068 = vmatprep.mubr.msk.f32.mxu1 %vm754_vm2, %v17288_v13  ;;  %v30676_v56 = vadd.f32 %v30543_v54, %v16986_v14 }
 0xe72   : > { %v24937_v5 = vpop.eup %24936  ;;  %v17290_v61 = vmul.f32 %v24935_v24, %v30597_v37  ;;  %24956 = vpow2.f32 %v19615_v20  ;;  %v19618_v4 = vmul.f32 -1.442695, %v30672_v47  ;;  %23069 = vmatmul.mubr.msk.f32.gmra.mrb[42].mxu1 %vm754_vm2, %v17289_v17 }
 0xe73   : > { %v24939_v41 = vpop.eup %24938  ;;  %24958 = vrcp.f32 %v17201_v34  ;;  %v17200_v40 = vadd.f32 1.0, %v24937_v5  ;;  %v23047_v29 = vpop.f32.mrb[92].mxu1  ;;  %v19617_v21 = vmul.f32 -1.442695, %v30676_v56 }
 0xe74   : > { %v24941_v10 = vpop.eup %24940  ;;  %v17203_v44 = vadd.f32 1.0, %v24939_v41  ;;  %24960 = vpow2.f32 %v19618_v4  ;;  %v30684_v43 = vadd.f32 %v23047_v29, %v30543_v54  ;;  %23071 = vmatprep.mubr.msk.f32.mxu1 %vm754_vm2, %v17290_v61  ;;  %v16996_v37 = vpop.f32.mrb[93].mxu1 }
 0xe75   : > { %v24943_v58 = vpop.eup %24942  ;;  %24962 = vrcp.f32 %v17200_v40  ;;  %v17202_v2 = vadd.f32 1.0, %v24941_v10  ;;  %v30688_v42 = vadd.f32 %v30543_v54, %v16996_v37 }
 0xe76   : > { %v24945_v9 = vpop.eup %24944  ;;  %24964 = vrcp.f32 %v17203_v44  ;;  %v19620_v51 = vmul.f32 -1.442695, %v30684_v43  ;;  %23072 = vmatmul.mubr.msk.f32.gmra.mrb[44].mxu1 %vm754_vm2, %v17291_v11  ;;  %v17293_v55 = vmul.f32 %v24943_v58, %v30602_v7 }
 0xe77   : > { %v24947_v52 = vpop.eup %24946  ;;  %v17292_v57 = vmul.f32 %v24945_v9, %v30606_v46  ;;  %24966 = vrcp.f32 %v17202_v2  ;;  %v23050_v31 = vpop.f32.mrb[94].mxu1  ;;  %v19619_v0 = vmul.f32 -1.442695, %v30688_v42 }
 0xe78   : > { %v24949_v59 = vpop.eup %24948  ;;  %v17205_v1 = vadd.f32 1.0, %v24947_v52  ;;  %24968 = vpow2.f32 %v19617_v21  ;;  %v30696_v27 = vadd.f32 %v23050_v31, %v30543_v54  ;;  %v17006_v33 = vpop.f32.mrb[95].mxu1  ;;  %v31772_v52 = vld [vmem:[#allocation73_spill] sm:$0xff] }
 0xe79   : > { %v24951_v6 = vpop.eup %24950  ;;  %v17204_v63 = vadd.f32 1.0, %v24949_v59  ;;  %24970 = vpow2.f32 %v19620_v51  ;;  %23074 = vmatprep.mubr.msk.f32.mxu1 %vm754_vm2, %v17292_v57  ;;  %v30700_v7 = vadd.f32 %v30543_v54, %v17006_v33  ;;  %v30737_v51 = vld [vmem:[#allocation27] ss:$0 sm:$0xff] }
 0xe7a   : > { %v24953_v46 = vpop.eup %24952  ;;  %24972 = vrcp.f32 %v17205_v1  ;;  %v19622_v39 = vmul.f32 -1.442695, %v30696_v27  ;;  %23075 = vmatmul.mubr.msk.f32.gmra.mrb[46].mxu1 %vm754_vm2, %v17293_v55  ;;  %v17295_v15 = vmul.f32 %v24951_v6, %v30613_v19  ;;  %v31775_v6 = vld [vmem:[#allocation79_spill] sm:$0xff] }
 0xe7b   : > { %v24955_v48 = vpop.eup %24954  ;;  %v17294_v22 = vmul.f32 %v24953_v46, %v30618_v30  ;;  %24974 = vrcp.f32 %v17204_v63  ;;  %v19621_v62 = vmul.f32 -1.442695, %v30700_v7  ;;  %v23113_v63 = vadd.f32 %v30737_v51, %v31775_v6 }
 0xe7c   : > { %v24957_v38 = vpop.eup %24956  ;;  %v17207_v12 = vadd.f32 1.0, %v24955_v48  ;;  %24976 = vpow2.f32 %v19619_v0  ;;  %v31774_v0 = vld [vmem:[#allocation78_spill] sm:$0xff] }
 0xe7d   : > { %v24959_v49 = vpop.eup %24958  ;;  %v17206_v54 = vadd.f32 1.0, %v24957_v38  ;;  %24978 = vpow2.f32 %v19622_v39  ;;  %23077 = vmatprep.mubr.msk.f32.mxu1 %vm754_vm2, %v17294_v22  ;;  %v31776_v38 = vld [vmem:[#allocation80_spill] sm:$0xff] }
 0xe7e   : > { %v24961_v26 = vpop.eup %24960  ;;  %24980 = vrcp.f32 %v17207_v12  ;;  %23078 = vmatmul.mubr.msk.f32.gmra.mrb[48].mxu1 %vm754_vm2, %v17295_v15  ;;  %v17297_v23 = vmul.f32 %v24959_v49, %v30625_v36  ;;  %v23115_v15 = vadd.f32 %v30737_v51, %v31776_v38 }
 0xe7f   : > { %v24963_v16 = vpop.eup %24962  ;;  %24982 = vrcp.f32 %v17206_v54  ;;  %v17209_v60 = vadd.f32 1.0, %v24961_v26 }
 0xe80   : > { %v24965_v30 = vpop.eup %24964  ;;  %v17296_v8 = vmul.f32 %v24963_v16, %v30630_v50  ;;  %24984 = vpow2.f32 %v19621_v62  ;;  %v31777_v62 = vld [vmem:[#allocation81_spill] sm:$0xff] }
 0xe81   : > { %v24967_v19 = vpop.eup %24966  ;;  %24986 = vrcp.f32 %v17209_v60  ;;  %v17299_v24 = vmul.f32 %v24965_v30, %v30637_v28  ;;  %v23117_v49 = vadd.f32 %v30737_v51, %v31777_v62 }
 0xe82   : > { %v24969_v13 = vpop.eup %24968  ;;  %v17298_v20 = vmul.f32 %v24967_v19, %v30641_v53  ;;  %23080 = vmatprep.mubr.msk.f32.mxu1 %vm754_vm2, %v17296_v8 }
 0xe83   : > { %v24971_v35 = vpop.eup %24970  ;;  %v17208_v45 = vadd.f32 1.0, %v24969_v13  ;;  %23081 = vmatmul.mubr.msk.f32.gmra.mrb[50].mxu1 %vm754_vm2, %v17297_v23  ;;  %v31778_v23 = vld [vmem:[#allocation82_spill] sm:$0xff] }
 0xe84   : > { %v24973_v17 = vpop.eup %24972  ;;  %v17211_v14 = vadd.f32 1.0, %v24971_v35  ;;  %23083 = vmatprep.mubr.msk.f32.mxu1 %vm754_vm2, %v17298_v20  ;;  %v23119_v13 = vadd.f32 %v30737_v51, %v31778_v23  ;;  %v31779_v20 = vld [vmem:[#allocation83_spill] sm:$0xff] }
 0xe85   : > { %v24975_v50 = vpop.eup %24974  ;;  %24988 = vrcp.f32 %v17208_v45  ;;  %v17301_v11 = vmul.f32 %v24973_v17, %v30648_v32  ;;  %v23121_v35 = vadd.f32 %v30737_v51, %v31779_v20  ;;  %v31787_v23 = vld [vmem:[#allocation91_spill] sm:$0xff] }
 0xe86   : > { %v24977_v34 = vpop.eup %24976  ;;  %v17300_v36 = vmul.f32 %v24975_v50, %v30652_v3  ;;  %24990 = vrcp.f32 %v17211_v14 }
 0xe87   : > { %v24979_v5 = vpop.eup %24978  ;;  %v17210_v53 = vadd.f32 1.0, %v24977_v34  ;;  %23084 = vmatmul.mubr.msk.f32.gmra.mrb[52].mxu1 %vm754_vm2, %v17299_v24 }
 0xe88   : > { %v24981_v61 = vpop.eup %24980  ;;  %v17213_v4 = vadd.f32 1.0, %v24979_v5  ;;  %23086 = vmatprep.mubr.msk.f32.mxu1 %vm754_vm2, %v17300_v36  ;;  %v31780_v5 = vld [vmem:[#allocation84_spill] sm:$0xff] }
 0xe89   : > { %v24983_v41 = vpop.eup %24982  ;;  %24992 = vrcp.f32 %v17210_v53  ;;  %v17303_v3 = vmul.f32 %v24981_v61, %v30660_v18  ;;  %v23123_v53 = vadd.f32 %v30737_v51, %v31780_v5 }
 0xe8a   : > { %v24985_v40 = vpop.eup %24984  ;;  %v17302_v28 = vmul.f32 %v24983_v41, %v30664_v25  ;;  %24994 = vrcp.f32 %v17213_v4  ;;  %v31781_v41 = vld [vmem:[#allocation85_spill] sm:$0xff] }
 0xe8b   : > { %v17212_v29 = vadd.f32 1.0, %v24985_v40  ;;  %23087 = vmatmul.mubr.msk.f32.gmra.mrb[54].mxu1 %vm754_vm2, %v17301_v11  ;;  %v24987_v10 = vpop.eup %24986  ;;  %v23125_v11 = vadd.f32 %v30737_v51, %v31781_v41 }
 0xe8c   : > { %23089 = vmatprep.mubr.msk.f32.mxu1 %vm754_vm2, %v17302_v28  ;;  %v17305_v32 = vmul.f32 %v24987_v10, %v30672_v47 }
 0xe8d   : > { %24996 = vrcp.f32 %v17212_v29 }
 0xe8f   : > { %v24989_v44 = vpop.eup %24988  ;;  %23090 = vmatmul.mubr.msk.f32.gmra.mrb[56].mxu1 %vm754_vm2, %v17303_v3 }
 0xe90   : > { %v17304_v21 = vmul.f32 %v24989_v44, %v30676_v56  ;;  %v24991_v37 = vpop.eup %24990 }
 0xe91   : > { %v17307_v2 = vmul.f32 %v24991_v37, %v30684_v43  ;;  %v31773_v43 = vld [vmem:[#allocation75_spill] sm:$0xff]  ;;  %v31782_v37 = vld [vmem:[#allocation86_spill] sm:$0xff] }
 0xe92   : > { %23092 = vmatprep.mubr.msk.f32.mxu1 %vm754_vm2, %v17304_v21  ;;  %v23109_v55 = vadd.f32 %v30737_v51, %v31773_v43 }
 0xe93   : > { %v24993_v25 = vpop.eup %24992  ;;  %23093 = vmatmul.mubr.msk.f32.gmra.mrb[58].mxu1 %vm754_vm2, %v17305_v32 }
 0xe94   : > { %v17306_v58 = vmul.f32 %v24993_v25, %v30688_v42  ;;  %v24995_v18 = vpop.eup %24994  ;;  %v23107_v42 = vadd.f32 %v30737_v51, %v31772_v52  ;;  %v23127_v25 = vadd.f32 %v30737_v51, %v31782_v37 }
 0xe95   : > { %v17309_v47 = vmul.f32 %v24995_v18, %v30696_v27  ;;  %v23111_v27 = vadd.f32 %v30737_v51, %v31774_v0  ;;  %v31783_v18 = vld [vmem:[#allocation87_spill] sm:$0xff]  ;;  %v31784_v0 = vld [vmem:[#allocation88_spill] sm:$0xff] }
 0xe96   : > { %23095 = vmatprep.mubr.msk.f32.mxu1 %vm754_vm2, %v17306_v58 }
 0xe97   : > { %v24997_v9 = vpop.eup %24996  ;;  %23096 = vmatmul.mubr.msk.f32.gmra.mrb[60].mxu1 %vm754_vm2, %v17307_v2 }
 0xe98   : > { %v17308_v56 = vmul.f32 %v24997_v9, %v30700_v7  ;;  %v23129_v9 = vadd.f32 %v30737_v51, %v31783_v18 }
 0xe9a   : > { %23098 = vmatprep.mubr.msk.f32.mxu1 %vm754_vm2, %v17308_v56 }
 0xe9b   : > { %23099 = vmatmul.mubr.msk.f32.gmra.mrb[62].mxu1 %vm754_vm2, %v17309_v47 }
 0xf2f   : > { %v23055_v57 = vpop.f32.mrb[32].mxu1 }
 0xf30   : > { %v30743_v31 = vadd.f32 %v23107_v42, %v23055_v57  ;;  %v17476_v59 = vpop.f32.mrb[33].mxu1 }
 0xf31   : > { %v30745_v1 = vadd.f32 %v23109_v55, %v17476_v59 }
 0xf32   : > { %v19657_v33 = vmul.f32 -1.442695, %v30743_v31 }
 0xf33   : > { %v19656_v7 = vmul.f32 -1.442695, %v30745_v1  ;;  %v23058_v46 = vpop.f32.mrb[34].mxu1 }
 0xf34   : > { %24998 = vpow2.f32 %v19657_v33  ;;  %v30753_v39 = vadd.f32 %v23111_v27, %v23058_v46  ;;  %v17486_v48 = vpop.f32.mrb[35].mxu1  ;;  %v23131_v27 = vadd.f32 %v30737_v51, %v31784_v0 }
 0xf35   : > { %25000 = vpow2.f32 %v19656_v7  ;;  %v30755_v22 = vadd.f32 %v23113_v63, %v17486_v48  ;;  %v31785_v63 = vld [vmem:[#allocation89_spill] sm:$0xff] }
 0xf36   : > { %v19659_v12 = vmul.f32 -1.442695, %v30753_v39  ;;  %v23133_v7 = vadd.f32 %v30737_v51, %v31785_v63 }
 0xf37   : > { %v19658_v54 = vmul.f32 -1.442695, %v30755_v22  ;;  %v23061_v26 = vpop.f32.mrb[36].mxu1 }
 0xf38   : > { %25002 = vpow2.f32 %v19659_v12  ;;  %v30763_v16 = vadd.f32 %v23115_v15, %v23061_v26  ;;  %v17496_v30 = vpop.f32.mrb[37].mxu1 }
 0xf39   : > { %25004 = vpow2.f32 %v19658_v54  ;;  %v30765_v8 = vadd.f32 %v23117_v49, %v17496_v30  ;;  %v31786_v54 = vld [vmem:[#allocation90_spill] sm:$0xff] }
 0xf3a   : > { %v19661_v60 = vmul.f32 -1.442695, %v30763_v16  ;;  %v23135_v26 = vadd.f32 %v30737_v51, %v31786_v54 }
 0xf3b   : > { %v19660_v19 = vmul.f32 -1.442695, %v30765_v8 }
 0xf3c   : > { %25006 = vpow2.f32 %v19661_v60 }
 0xf3d   : > { %25008 = vpow2.f32 %v19660_v19  ;;  %v23064_v45 = vpop.f32.mrb[38].mxu1 }
 0xf3e   : > { %v24999_v17 = vpop.eup %24998  ;;  %v30773_v14 = vadd.f32 %v23119_v13, %v23064_v45  ;;  %v17506_v50 = vpop.f32.mrb[39].mxu1  ;;  %v23137_v13 = vadd.f32 %v30737_v51, %v31787_v23 }
 0xf3f   : > { %v25001_v24 = vpop.eup %25000  ;;  %v17764_v34 = vadd.f32 1.0, %v24999_v17  ;;  %v30775_v36 = vadd.f32 %v23121_v35, %v17506_v50 }
 0xf40   : > { %v17763_v61 = vadd.f32 1.0, %v25001_v24  ;;  %v19663_v4 = vmul.f32 -1.442695, %v30773_v14 }
 0xf41   : > { %25010 = vrcp.f32 %v17764_v34  ;;  %v19662_v40 = vmul.f32 -1.442695, %v30775_v36  ;;  %v23067_v28 = vpop.f32.mrb[40].mxu1 }
 0xf42   : > { %v25003_v29 = vpop.eup %25002  ;;  %25012 = vrcp.f32 %v17763_v61  ;;  %v30783_v3 = vadd.f32 %v23123_v53, %v23067_v28  ;;  %v17516_v10 = vpop.f32.mrb[41].mxu1  ;;  %v31788_v61 = vld [vmem:[#allocation92_spill] sm:$0xff]  ;;  %v31789_v28 = vld [vmem:[#allocation93_spill] sm:$0xff] }
 0xf43   : > { %v25005_v44 = vpop.eup %25004  ;;  %v17766_v21 = vadd.f32 1.0, %v25003_v29  ;;  %25014 = vpow2.f32 %v19663_v4  ;;  %v30785_v32 = vadd.f32 %v23125_v11, %v17516_v10  ;;  %v23139_v4 = vadd.f32 %v30737_v51, %v31788_v61 }
 0xf44   : > { %v17765_v58 = vadd.f32 1.0, %v25005_v44  ;;  %25016 = vpow2.f32 %v19662_v40  ;;  %v19665_v2 = vmul.f32 -1.442695, %v30783_v3  ;;  %v23141_v29 = vadd.f32 %v30737_v51, %v31789_v28  ;;  %v31795_v28 = vld [vmem:[#allocation99_spill] sm:$0xff] }
 0xf45   : > { %25018 = vrcp.f32 %v17766_v21  ;;  %v19664_v56 = vmul.f32 -1.442695, %v30785_v32  ;;  %v23070_v47 = vpop.f32.mrb[42].mxu1 }
 0xf46   : > { %v25007_v52 = vpop.eup %25006  ;;  %25020 = vrcp.f32 %v17765_v58  ;;  %v30793_v42 = vadd.f32 %v23127_v25, %v23070_v47  ;;  %v17526_v43 = vpop.f32.mrb[43].mxu1 }
 0xf47   : > { %v25009_v55 = vpop.eup %25008  ;;  %v17768_v57 = vadd.f32 1.0, %v25007_v52  ;;  %25022 = vpow2.f32 %v19665_v2  ;;  %v30795_v59 = vadd.f32 %v23129_v9, %v17526_v43  ;;  %v31790_v43 = vld [vmem:[#allocation94_spill] sm:$0xff] }
 0xf48   : > { %v17767_v33 = vadd.f32 1.0, %v25009_v55  ;;  %25024 = vpow2.f32 %v19664_v56  ;;  %v19667_v6 = vmul.f32 -1.442695, %v30793_v42  ;;  %v23143_v55 = vadd.f32 %v30737_v51, %v31790_v43 }
 0xf49   : > { %25026 = vrcp.f32 %v17768_v57  ;;  %v19666_v46 = vmul.f32 -1.442695, %v30795_v59  ;;  %v23073_v48 = vpop.f32.mrb[44].mxu1 }
 0xf4a   : > { %25028 = vrcp.f32 %v17767_v33  ;;  %v30803_v38 = vadd.f32 %v23131_v27, %v23073_v48  ;;  %v17536_v15 = vpop.f32.mrb[45].mxu1  ;;  %v31791_v33 = vld [vmem:[#allocation95_spill] sm:$0xff] }
 0xf4b   : > { %v25011_v12 = vpop.eup %25010  ;;  %25030 = vpow2.f32 %v19667_v6  ;;  %v30805_v62 = vadd.f32 %v23133_v7, %v17536_v15  ;;  %v23145_v6 = vadd.f32 %v30737_v51, %v31791_v33 }
 0xf4c   : > { %v25013_v49 = vpop.eup %25012  ;;  %v17860_v30 = vmul.f32 %v25011_v12, %v30743_v31  ;;  %25032 = vpow2.f32 %v19666_v46  ;;  %v19669_v60 = vmul.f32 -1.442695, %v30803_v38 }
 0xf4d   : > { %v25015_v19 = vpop.eup %25014  ;;  %v17859_v20 = vmul.f32 %v25013_v49, %v30745_v1  ;;  %v19668_v35 = vmul.f32 -1.442695, %v30805_v62  ;;  %v23076_v45 = vpop.f32.mrb[46].mxu1  ;;  %v31792_v49 = vld [vmem:[#allocation96_spill] sm:$0xff] }
 0xf4e   : > { %v25017_v17 = vpop.eup %25016  ;;  %17892 = vst.msk [vmem:[%s30817_s18 + $0x8] sm:$0xff] %vm4688_vm4, %v17860_v30  ;;  %v17770_v31 = vadd.f32 1.0, %v25015_v19  ;;  %25034 = vpow2.f32 %v19669_v60  ;;  %v30821_v50 = vadd.f32 %v23135_v26, %v23076_v45  ;;  %v17546_v24 = vpop.f32.mrb[47].mxu1  ;;  %v23147_v54 = vadd.f32 %v30737_v51, %v31792_v49  ;;  %v31793_v19 = vld [vmem:[#allocation97_spill] sm:$0xff]  ;;  %v31798_v49 = vld [vmem:[#allocation102_spill] sm:$0xff] }
 0xf4f   : > { %v25019_v34 = vpop.eup %25018  ;;  %17891 = vst.msk [vmem:[%s30817_s18] sm:$0xff] %vm4688_vm4, %v17859_v20  ;;  %v17769_v1 = vadd.f32 1.0, %v25017_v17  ;;  %25036 = vpow2.f32 %v19668_v35  ;;  %v30825_v5 = vadd.f32 %v23137_v13, %v17546_v24  ;;  %v23149_v23 = vadd.f32 %v30737_v51, %v31793_v19 }
 0xf50   : > { %v25021_v53 = vpop.eup %25020  ;;  %v17862_v41 = vmul.f32 %v25019_v34, %v30753_v39  ;;  %25038 = vrcp.f32 %v17770_v31  ;;  %v19671_v11 = vmul.f32 -1.442695, %v30821_v50 }
 0xf51   : > { %v25023_v40 = vpop.eup %25022  ;;  %v17861_v10 = vmul.f32 %v25021_v53, %v30755_v22  ;;  %25040 = vrcp.f32 %v17769_v1  ;;  %v19670_v44 = vmul.f32 -1.442695, %v30825_v5  ;;  %v23079_v21 = vpop.f32.mrb[48].mxu1 }
 0xf52   : > { %v25025_v37 = vpop.eup %25024  ;;  %17894 = vst.msk [vmem:[%s30817_s18 + $0x18] sm:$0xff] %vm4688_vm4, %v17862_v41  ;;  %v17772_v25 = vadd.f32 1.0, %v25023_v40  ;;  %25042 = vpow2.f32 %v19671_v11  ;;  %v30837_v39 = vadd.f32 %v23139_v4, %v23079_v21  ;;  %v17556_v58 = vpop.f32.mrb[49].mxu1  ;;  %v31794_v4 = vld [vmem:[#allocation98_spill] sm:$0xff] }
 0xf53   : > { %v25027_v2 = vpop.eup %25026  ;;  %17893 = vst.msk [vmem:[%s30817_s18 + $0x10] sm:$0xff] %vm4688_vm4, %v17861_v10  ;;  %v17771_v18 = vadd.f32 1.0, %v25025_v37  ;;  %25044 = vpow2.f32 %v19670_v44  ;;  %v30841_v9 = vadd.f32 %v23141_v29, %v17556_v58  ;;  %v23151_v41 = vadd.f32 %v30737_v51, %v31794_v4 }
 0xf54   : > { %v25029_v22 = vpop.eup %25028  ;;  %v17864_v56 = vmul.f32 %v25027_v2, %v30763_v16  ;;  %25046 = vrcp.f32 %v17772_v25  ;;  %v19673_v47 = vmul.f32 -1.442695, %v30837_v39  ;;  %v23153_v29 = vadd.f32 %v30737_v51, %v31795_v28 }
 0xf55   : > { %v25031_v52 = vpop.eup %25030  ;;  %v17863_v57 = vmul.f32 %v25029_v22, %v30765_v8  ;;  %25048 = vrcp.f32 %v17771_v18  ;;  %v19672_v0 = vmul.f32 -1.442695, %v30841_v9 }
 0xf56   : > { %v25033_v27 = vpop.eup %25032  ;;  %17896 = vst.msk [vmem:[%s30817_s18 + $0x28] sm:$0xff] %vm4688_vm4, %v17864_v56  ;;  %v17774_v63 = vadd.f32 1.0, %v25031_v52  ;;  %25050 = vpow2.f32 %v19673_v47  ;;  %v23082_v16 = vpop.f32.mrb[50].mxu1  ;;  %v31796_v47 = vld [vmem:[#allocation100_spill] sm:$0xff] }
 0xf57   : > { %17895 = vst.msk [vmem:[%s30817_s18 + $0x20] sm:$0xff] %vm4688_vm4, %v17863_v57  ;;  %v17773_v7 = vadd.f32 1.0, %v25033_v27  ;;  %25052 = vpow2.f32 %v19672_v0  ;;  %v30855_v46 = vadd.f32 %v23143_v55, %v23082_v16  ;;  %v17566_v48 = vpop.f32.mrb[51].mxu1  ;;  %v23155_v52 = vadd.f32 %v30737_v51, %v31796_v47  ;;  %v31797_v57 = vld [vmem:[#allocation101_spill] sm:$0xff] }
 0xf58   : > { %v25035_v8 = vpop.eup %25034  ;;  %25054 = vrcp.f32 %v17774_v63  ;;  %v30857_v15 = vadd.f32 %v23145_v6, %v17566_v48  ;;  %v23157_v0 = vadd.f32 %v30737_v51, %v31797_v57 }
 0xf59   : > { %v25037_v12 = vpop.eup %25036  ;;  %25056 = vrcp.f32 %v17773_v7  ;;  %v17776_v26 = vadd.f32 1.0, %v25035_v8  ;;  %v19675_v30 = vmul.f32 -1.442695, %v30855_v46 }
 0xf5a   : > { %v25039_v60 = vpop.eup %25038  ;;  %v17775_v13 = vadd.f32 1.0, %v25037_v12  ;;  %v19674_v20 = vmul.f32 -1.442695, %v30857_v15  ;;  %v23085_v35 = vpop.f32.mrb[52].mxu1 }
 0xf5b   : > { %v25041_v45 = vpop.eup %25040  ;;  %v17866_v17 = vmul.f32 %v25039_v60, %v30773_v14  ;;  %25058 = vrcp.f32 %v17776_v26  ;;  %v30866_v31 = vadd.f32 %v23147_v54, %v23085_v35  ;;  %v17576_v24 = vpop.f32.mrb[53].mxu1  ;;  %v23159_v54 = vadd.f32 %v30737_v51, %v31798_v49 }
 0xf5c   : > { %v25043_v34 = vpop.eup %25042  ;;  %v17865_v1 = vmul.f32 %v25041_v45, %v30775_v36  ;;  %25060 = vrcp.f32 %v17775_v13  ;;  %v30869_v53 = vadd.f32 %v23149_v23, %v17576_v24 }
 0xf5d   : > { %v25045_v61 = vpop.eup %25044  ;;  %17898 = vst.msk [vmem:[%s30817_s18 + $0x38] sm:$0xff] %vm4688_vm4, %v17866_v17  ;;  %v17778_v11 = vadd.f32 1.0, %v25043_v34  ;;  %25062 = vpow2.f32 %v19675_v30  ;;  %v19677_v14 = vmul.f32 -1.442695, %v30866_v31  ;;  %v31799_v30 = vld [vmem:[#allocation103_spill] sm:$0xff] }
 0xf5e   : > { %v25047_v40 = vpop.eup %25046  ;;  %17897 = vst.msk [vmem:[%s30817_s18 + $0x30] sm:$0xff] %vm4688_vm4, %v17865_v1  ;;  %v17777_v36 = vadd.f32 1.0, %v25045_v61  ;;  %25064 = vpow2.f32 %v19674_v20  ;;  %v19676_v10 = vmul.f32 -1.442695, %v30869_v53  ;;  %v23088_v44 = vpop.f32.mrb[54].mxu1  ;;  %v23161_v60 = vadd.f32 %v30737_v51, %v31799_v30  ;;  %v31800_v1 = vld [vmem:[#allocation104_spill] sm:$0xff] }
 0xf5f   : > { %v25049_v21 = vpop.eup %25048  ;;  %v17868_v37 = vmul.f32 %v25047_v40, %v30783_v3  ;;  %25066 = vrcp.f32 %v17778_v11  ;;  %v30882_v25 = vadd.f32 %v23151_v41, %v23088_v44  ;;  %v17586_v58 = vpop.f32.mrb[55].mxu1  ;;  %v23163_v61 = vadd.f32 %v30737_v51, %v31800_v1  ;;  %v31801_v11 = vld [vmem:[#allocation105_spill] sm:$0xff] }
 0xf60   : > { %v25051_v2 = vpop.eup %25050  ;;  %v17867_v18 = vmul.f32 %v25049_v21, %v30785_v32  ;;  %25068 = vrcp.f32 %v17777_v36  ;;  %v30885_v22 = vadd.f32 %v23153_v29, %v17586_v58 }
 0xf61   : > { %v25053_v56 = vpop.eup %25052  ;;  %17900 = vst.msk [vmem:[%s30817_s18 + $0x48] sm:$0xff] %vm4688_vm4, %v17868_v37  ;;  %v17780_v43 = vadd.f32 1.0, %v25051_v2  ;;  %25070 = vpow2.f32 %v19677_v14  ;;  %v19679_v3 = vmul.f32 -1.442695, %v30882_v25  ;;  %v23165_v14 = vadd.f32 %v30737_v51, %v31801_v11 }
 0xf62   : > { %v25055_v55 = vpop.eup %25054  ;;  %17899 = vst.msk [vmem:[%s30817_s18 + $0x40] sm:$0xff] %vm4688_vm4, %v17867_v18  ;;  %v17779_v32 = vadd.f32 1.0, %v25053_v56  ;;  %25072 = vpow2.f32 %v19676_v10  ;;  %v19678_v27 = vmul.f32 -1.442695, %v30885_v22  ;;  %v23091_v33 = vpop.f32.mrb[56].mxu1 }
 0xf63   : > { %v25057_v6 = vpop.eup %25056  ;;  %v17870_v63 = vmul.f32 %v25055_v55, %v30793_v42  ;;  %25074 = vrcp.f32 %v17780_v43  ;;  %v30898_v16 = vadd.f32 %v23155_v52, %v23091_v33  ;;  %v17596_v7 = vpop.f32.mrb[57].mxu1  ;;  %v31802_v55 = vld [vmem:[#allocation106_spill] sm:$0xff]  ;;  %v31803_v33 = vld [vmem:[#allocation107_spill] sm:$0xff] }
 0xf64   : > { %v17869_v48 = vmul.f32 %v25057_v6, %v30795_v59  ;;  %25076 = vrcp.f32 %v17779_v32  ;;  %v30901_v8 = vadd.f32 %v23157_v0, %v17596_v7 }
 0xf65   : > { %v25059_v12 = vpop.eup %25058  ;;  %17902 = vst.msk [vmem:[%s30817_s18 + $0x58] sm:$0xff] %vm4688_vm4, %v17870_v63  ;;  %25078 = vpow2.f32 %v19679_v3  ;;  %v19681_v26 = vmul.f32 -1.442695, %v30898_v16 }
 0xf66   : > { %v25061_v42 = vpop.eup %25060  ;;  %17901 = vst.msk [vmem:[%s30817_s18 + $0x50] sm:$0xff] %vm4688_vm4, %v17869_v48  ;;  %v17872_v59 = vmul.f32 %v25059_v12, %v30803_v38  ;;  %25080 = vpow2.f32 %v19678_v27  ;;  %v19680_v19 = vmul.f32 -1.442695, %v30901_v8  ;;  %v23094_v23 = vpop.f32.mrb[58].mxu1 }
 0xf67   : > { %v25063_v13 = vpop.eup %25062  ;;  %v17871_v20 = vmul.f32 %v25061_v42, %v30805_v62  ;;  %25082 = vpow2.f32 %v19681_v26  ;;  %v30915_v35 = vadd.f32 %v23159_v54, %v23094_v23  ;;  %v17606_v45 = vpop.f32.mrb[59].mxu1 }
 0xf68   : > { %v25065_v17 = vpop.eup %25064  ;;  %17904 = vst.msk [vmem:[%s30817_s18 + $0x68] sm:$0xff] %vm4688_vm4, %v17872_v59  ;;  %v17782_v24 = vadd.f32 1.0, %v25063_v13  ;;  %25084 = vpow2.f32 %v19680_v19  ;;  %v30919_v34 = vadd.f32 %v23161_v60, %v17606_v45 }
 0xf69   : > { %v25067_v38 = vpop.eup %25066  ;;  %17903 = vst.msk [vmem:[%s30817_s18 + $0x60] sm:$0xff] %vm4688_vm4, %v17871_v20  ;;  %v17781_v4 = vadd.f32 1.0, %v25065_v17  ;;  %v19683_v62 = vmul.f32 -1.442695, %v30915_v35 }
 0xf6a   : > { %v25069_v41 = vpop.eup %25068  ;;  %v17874_v40 = vmul.f32 %v25067_v38, %v30821_v50  ;;  %25086 = vrcp.f32 %v17782_v24  ;;  %v19682_v28 = vmul.f32 -1.442695, %v30919_v34  ;;  %v23097_v29 = vpop.f32.mrb[60].mxu1 }
 0xf6b   : > { %v25071_v36 = vpop.eup %25070  ;;  %v17873_v10 = vmul.f32 %v25069_v41, %v30825_v5  ;;  %25088 = vrcp.f32 %v17781_v4  ;;  %v30931_v44 = vadd.f32 %v23163_v61, %v23097_v29  ;;  %v17616_v21 = vpop.f32.mrb[61].mxu1 }
 0xf6c   : > { %v25073_v37 = vpop.eup %25072  ;;  %17906 = vst.msk [vmem:[%s30817_s18 + $0x78] sm:$0xff] %vm4688_vm4, %v17874_v40  ;;  %v17784_v58 = vadd.f32 1.0, %v25071_v36  ;;  %25090 = vpow2.f32 %v19683_v62  ;;  %v30935_v51 = vadd.f32 %v23165_v14, %v17616_v21 }
 0xf6d   : > { %v25075_v2 = vpop.eup %25074  ;;  %17905 = vst.msk [vmem:[%s30817_s18 + $0x70] sm:$0xff] %vm4688_vm4, %v17873_v10  ;;  %v17783_v50 = vadd.f32 1.0, %v25073_v37  ;;  %25092 = vpow2.f32 %v19682_v28  ;;  %v19685_v18 = vmul.f32 -1.442695, %v30931_v44 }
 0xf6e   : > { %v25077_v5 = vpop.eup %25076  ;;  %v17876_v56 = vmul.f32 %v25075_v2, %v30837_v39  ;;  %25094 = vrcp.f32 %v17784_v58  ;;  %v19684_v47 = vmul.f32 -1.442695, %v30935_v51  ;;  %v23100_v52 = vpop.f32.mrb[62].mxu1 }
 0xf6f   : > { %v25079_v43 = vpop.eup %25078  ;;  %v17875_v3 = vmul.f32 %v25077_v5, %v30841_v9  ;;  %25096 = vrcp.f32 %v17783_v50  ;;  %v30944_v57 = vadd.f32 %v31802_v55, %v23100_v52  ;;  %v17626_v0 = vpop.f32.mrb[63].mxu1 }
 0xf70   : > { %v25081_v32 = vpop.eup %25080  ;;  %17908 = vst.msk [vmem:[%s30817_s18 + $0x88] sm:$0xff] %vm4688_vm4, %v17876_v56  ;;  %v17786_v27 = vadd.f32 1.0, %v25079_v43  ;;  %25098 = vpow2.f32 %v19685_v18  ;;  %v30949_v6 = vadd.f32 %v31803_v33, %v17626_v0 }
 0xf71   : > { %v25083_v39 = vpop.eup %25082  ;;  %17907 = vst.msk [vmem:[%s30817_s18 + $0x80] sm:$0xff] %vm4688_vm4, %v17875_v3  ;;  %v17785_v63 = vadd.f32 1.0, %v25081_v32  ;;  %25100 = vpow2.f32 %v19684_v47  ;;  %v19687_v48 = vmul.f32 -1.442695, %v30944_v57 }
 0xf72   : > { %v25085_v7 = vpop.eup %25084  ;;  %25102 = vrcp.f32 %v17786_v27  ;;  %v17788_v9 = vadd.f32 1.0, %v25083_v39  ;;  %v19686_v49 = vmul.f32 -1.442695, %v30949_v6 }
 0xf73   : > { %25104 = vrcp.f32 %v17785_v63  ;;  %v17787_v12 = vadd.f32 1.0, %v25085_v7 }
 0xf74   : > { %v25087_v54 = vpop.eup %25086  ;;  %25106 = vrcp.f32 %v17788_v9 }
 0xf75   : > { %v25089_v26 = vpop.eup %25088  ;;  %v17878_v42 = vmul.f32 %v25087_v54, %v30855_v46  ;;  %25108 = vrcp.f32 %v17787_v12 }
 0xf76   : > { %v25091_v30 = vpop.eup %25090  ;;  %v17877_v60 = vmul.f32 %v25089_v26, %v30857_v15  ;;  %25110 = vpow2.f32 %v19687_v48 }
 0xf77   : > { %v25093_v59 = vpop.eup %25092  ;;  %17910 = vst.msk [vmem:[%s30817_s18 + $0x98] sm:$0xff] %vm4688_vm4, %v17878_v42  ;;  %v17790_v19 = vadd.f32 1.0, %v25091_v30  ;;  %25112 = vpow2.f32 %v19686_v49 }
 0xf78   : > { %v25095_v23 = vpop.eup %25094  ;;  %17909 = vst.msk [vmem:[%s30817_s18 + $0x90] sm:$0xff] %vm4688_vm4, %v17877_v60  ;;  %v17789_v13 = vadd.f32 1.0, %v25093_v59 }
 0xf79   : > { %v25097_v20 = vpop.eup %25096  ;;  %v17880_v45 = vmul.f32 %v25095_v23, %v30866_v31  ;;  %25114 = vrcp.f32 %v17790_v19 }
 0xf7a   : > { %v25099_v46 = vpop.eup %25098  ;;  %v17879_v15 = vmul.f32 %v25097_v20, %v30869_v53  ;;  %25116 = vrcp.f32 %v17789_v13 }
 0xf7b   : > { %v25101_v17 = vpop.eup %25100  ;;  %17912 = vst.msk [vmem:[%s30817_s18 + $0xa8] sm:$0xff] %vm4688_vm4, %v17880_v45  ;;  %v17792_v24 = vadd.f32 1.0, %v25099_v46 }
 0xf7c   : > { %v25103_v38 = vpop.eup %25102  ;;  %17911 = vst.msk [vmem:[%s30817_s18 + $0xa0] sm:$0xff] %vm4688_vm4, %v17879_v15  ;;  %v17791_v1 = vadd.f32 1.0, %v25101_v17 }
 0xf7d   : > { %v25105_v61 = vpop.eup %25104  ;;  %v17882_v31 = vmul.f32 %v25103_v38, %v30882_v25  ;;  %25118 = vrcp.f32 %v17792_v24 }
 0xf7e   : > { %v25107_v4 = vpop.eup %25106  ;;  %v17881_v62 = vmul.f32 %v25105_v61, %v30885_v22  ;;  %25120 = vrcp.f32 %v17791_v1 }
 0xf7f   : > { %v25109_v53 = vpop.eup %25108  ;;  %17914 = vst.msk [vmem:[%s30817_s18 + $0xb8] sm:$0xff] %vm4688_vm4, %v17882_v31  ;;  %v17884_v41 = vmul.f32 %v25107_v4, %v30898_v16 }
 0xf80   : > { %v25111_v11 = vpop.eup %25110  ;;  %17913 = vst.msk [vmem:[%s30817_s18 + $0xb0] sm:$0xff] %vm4688_vm4, %v17881_v62  ;;  %v17883_v14 = vmul.f32 %v25109_v53, %v30901_v8 }
 0xf81   : > { %v25113_v40 = vpop.eup %25112  ;;  %17916 = vst.msk [vmem:[%s30817_s18 + $0xc8] sm:$0xff] %vm4688_vm4, %v17884_v41  ;;  %v17794_v25 = vadd.f32 1.0, %v25111_v11 }
 0xf82   : > { %17915 = vst.msk [vmem:[%s30817_s18 + $0xc0] sm:$0xff] %vm4688_vm4, %v17883_v14  ;;  %v17793_v22 = vadd.f32 1.0, %v25113_v40 }
 0xf83   : > { %v25115_v28 = vpop.eup %25114  ;;  %25122 = vrcp.f32 %v17794_v25 }
 0xf84   : > { %v25117_v16 = vpop.eup %25116  ;;  %v17886_v29 = vmul.f32 %v25115_v28, %v30915_v35  ;;  %25124 = vrcp.f32 %v17793_v22 }
 0xf85   : > { %v17885_v36 = vmul.f32 %v25117_v16, %v30919_v34 }
 0xf86   : > { %17918 = vst.msk [vmem:[%s30817_s18 + $0xd8] sm:$0xff] %vm4688_vm4, %v17886_v29 }
 0xf87   : > { %v25119_v8 = vpop.eup %25118  ;;  %17917 = vst.msk [vmem:[%s30817_s18 + $0xd0] sm:$0xff] %vm4688_vm4, %v17885_v36 }
 0xf88   : > { %v25121_v10 = vpop.eup %25120  ;;  %v17888_v21 = vmul.f32 %v25119_v8, %v30931_v44 }
 0xf89   : > { %v17887_v37 = vmul.f32 %v25121_v10, %v30935_v51 }
 0xf8a   : > { %17920 = vst.msk [vmem:[%s30817_s18 + $0xe8] sm:$0xff] %vm4688_vm4, %v17888_v21 }
 0xf8b   : > { %17919 = vst.msk [vmem:[%s30817_s18 + $0xe0] sm:$0xff] %vm4688_vm4, %v17887_v37 }
 0xf8d   : > { %v25123_v35 = vpop.eup %25122 }
 0xf8e   : > { %v25125_v34 = vpop.eup %25124  ;;  %v17890_v58 = vmul.f32 %v25123_v35, %v30944_v57 }
 0xf8f   : > { %v17889_v44 = vmul.f32 %v25125_v34, %v30949_v6 }
 0xf90   : > { %17922 = vst.msk [vmem:[%s30817_s18 + $0xf8] sm:$0xff] %vm4688_vm4, %v17890_v58 }
 0xf91   : > { %17921 = vst.msk [vmem:[%s30817_s18 + $0xf0] sm:$0xff] %vm4688_vm4, %v17889_v44 }
 0xf92   : > { %25594 = shalt.err (!%p25591_p5)
}
 0xf93   : > { %s25595_s3 = scalar_lea.hbm %s30997_s26, 4096  ;;  %s25599_s0 = scalar_lea.hbm %s31804_s1, 8192 }
 0xf94   : > { %p25596_p10 = scmp.ne.s32.totalorder %s30997_s26, %s25595_s3  ;;  %p25600_p12 = scmp.lt.u32.totalorder %s30997_s26, %s31804_s1 }
 0xf95   : > { %p25601_p13 = scmp.lt.u32.totalorder %s25599_s0, %s25595_s3  ;;  %p25603_p7 = scmp.lt.u32.totalorder %s25595_s3, %s30997_s26 }
 0xf96   : > { %p25597_p1 = pnand %p25596_p10, %p31805_p9 }
 0xf97   : > { %p25602_p8 = por %p25601_p13, %p25600_p12 }
 0xf98   : > { %p25598_p11 = pneg %p25597_p1 }
 0xf99   : > { %p25604_p4 = por %p25603_p7, %p25602_p8 }
 0xf9b   : > { %p25605_p3 = pnand %p25604_p4, %p25598_p11 }
 0xf9d   : > { %25608 = shalt.err (!%p25605_p3)
}
 0xf9e   : > { %s25699_s16 = smov 128   ;;  %s25700_s24 = smov 8  }
 0xf9f   : > { %24349 = dma.vmem_to_hbm [thread:$0]  (%p31805_p9), %s30999_s15, 4096, %s30997_s26, %s17924_s29, %s25699_s16, %s25699_s16, %s25700_s24  }
 0xfa0 PF: > { %s31806_s2 = sld [smem:[#allocation38_spill]]  ;;  %p31807_p0 = scmp.ne.s32.totalorder %s31346_s20, 0 }
 0xfa1   : > { %p31808_p2 = scmp.ge.s32.totalorder %s25675_s21, 2 }
 0xfa3   : > { %p24399_p6 = pnand %p31808_p2, %p31807_p0 }
 0xfa6   : > { %s17952_s18 = sand.u32 1, %s31806_s2  }
 0xfa7   : > { %s17953_s3 = scalar_lea.sflag [#allocation6], %s17952_s18 }
 0xfa8   : > { %25658 = dma.done.wait (!%p24399_p6), %s17953_s3, 4096  }
 0xfa9   : > { %25660 = vsyncadd (!%p24399_p6), %s17953_s3, 4294963200  ;;  %s31809_s18 = sld [smem:[#allocation39_spill]]  ;;  %s31810_s19 = sld [smem:[#allocation40_spill]] }
 0xfaa   : > { %p35_p5 = scmp.ge.s32.totalorder %s26112_s28, 4   ;;  %s31811_s20 = smov %s26123_s17 }
 0xfab   : > { %s31812_s21 = smov %s26112_s28 }
 0xfac   :  { %37 = sbr.rel (!%p35_p5) target bundleno = 18 (0x12), region = 217 }
 0xfb3   :  { %17958 = vsyncpa [#allocation5], 1 }
 0xfb4   :  { %17960 = vsyncpa [#allocation5 + $0x1], 1 }
 0xfb5   :  { %17961 = vsyncpa [#allocation8], 1 }
 0xfb6   :  { %17962 = vsyncpa [#allocation11], 1 }
 0xfb7   :  { %17963 = vsyncpa [#allocation14], 1 }
 0xfb8   :  { %17964 = vsyncpa [#allocation17], 1 }
 0xfb9   :  { %17965 = vsyncpa [#allocation20], 1 }
 0xfba   :  { %17966 = vsyncpa [#allocation23], 1 }
 0xfbb   :  { %17967 = vsyncpa [#allocation26], 1 }
 0xfbc   :  { %17968 = vsyncpa [#allocation6], 1 }
 0xfbd   :  { %17970 = vsyncpa [#allocation6 + $0x1], 1 }

</bundles_post_ra>
